<compile_context>
chip_gen: v7x
topology: tpu7x:2x2x1
jax: 0.10.0
libtpu: 0.0.40
codegen_flags: <defaults>
</compile_context>

<pallas_src>
import functools

import jax
import jax.numpy as jnp
from jax.experimental import pallas as pl
from jax.experimental.pallas import tpu as pltpu

RRELU_NEG_SLOPE = (1.0 / 8.0 + 1.0 / 3.0) / 2.0   # F.rrelu eval-mode slope
NORM_EPS = 1e-12                                  # F.normalize default eps


def _round_up(x, m):
    return ((x + m - 1) // m) * m


def _pad2d(x, rows, cols):
    return jnp.pad(x, ((0, rows - x.shape[0]), (0, cols - x.shape[1])))


# ----------------------------- fused Pallas kernel --------------------------

def _fused_step_kernel(
        # grid-invariant (resident) inputs
        init_h_ref, emb_rel_ref, rel_gi0_ref, rel_w_x_ref, rel_w_hh_ref, rel_b_hh_ref,
        ent_w_ih_ref, ent_b_ih_ref, ent_w_hh_ref, ent_b_hh_ref, w_nb_ref,
        # per-timestep graph operators (time-varying, pipelined)
        m_ref, inv_cnt_ref, a_ent_ref, a_rel_ref, dnorm_ref,
        # outputs
        hist_ref, h0_out_ref,
        # VMEM scratch (persists across the whole grid)
        h_f32, h_bf, h0_f32, h0_bf, hW_bf, rW_bf,
        *, h_dim, tile_dst, layer_norm):
    H = h_dim
    t = pl.program_id(0)
    j = pl.program_id(1)

    def mm(a, b):
        # bf16 MXU operands, f32 accumulation
        return jnp.dot(a, b, preferred_element_type=jnp.float32)

    def maybe_norm(x):
        # F.normalize(x, p=2, dim=1) == x / max(||x||, eps); rsqrt form (EUP)
        if not layer_norm:
            return x
        ss = jnp.sum(x * x, axis=-1, keepdims=True)
        return x * jax.lax.rsqrt(jnp.maximum(ss, NORM_EPS * NORM_EPS))

    def gru_gates(gi, gh, h_prev):
        # torch.nn.GRUCell semantics, gate order [r | z | n]
        r = jax.nn.sigmoid(gi[:, 0:H] + gh[:, 0:H])
        z = jax.nn.sigmoid(gi[:, H:2 * H] + gh[:, H:2 * H])
        n = jnp.tanh(gi[:, 2 * H:3 * H] + r * gh[:, 2 * H:3 * H])
        return (1.0 - z) * n + z * h_prev

    # ---- t == 0: initialize recurrent state (h, h_0) in VMEM scratch ----------
    @pl.when(jnp.logical_and(t == 0, j == 0))
    def _():
        h_init = maybe_norm(init_h_ref[...])
        h_f32[...] = h_init
        h_bf[...] = h_init.astype(jnp.bfloat16)
        er = emb_rel_ref[...]
        h0_f32[...] = er
        h0_bf[...] = er.astype(jnp.bfloat16)

    # ---- once per timestep (dst tile 0): relation mean + relation GRU + h@W ----
    @pl.when(j == 0)
    def _():
        # per-relation mean over UNIQUE incident entities: (M_bin @ h) * (1/cnt)
        x_mean = mm(m_ref[0], h_bf[...]) * inv_cnt_ref[0]             # (R2p, H) f32
        # relation GRUCell on x = [emb_rel | x_mean], h = h0_prev.
        # emb_rel @ W_ih[:H] + b_ih is the precomputed constant rel_gi0.
        gi = rel_gi0_ref[...] + mm(x_mean.astype(jnp.bfloat16), rel_w_x_ref[...])
        gh = mm(h0_bf[...], rel_w_hh_ref[...]) + rel_b_hh_ref[...]
        h0_new = maybe_norm(gru_gates(gi, gh, h0_f32[...]))
        h0_f32[...] = h0_new
        h0_bf[...] = h0_new.astype(jnp.bfloat16)
        # neighbor projections, reused by every dst tile of this timestep
        hW_bf[...] = mm(h_bf[...], w_nb_ref[...]).astype(jnp.bfloat16)
        rW_bf[...] = mm(h0_bf[...], w_nb_ref[...]).astype(jnp.bfloat16)

    # ---- per dst tile: UnionRGCNLayer message passing ---------------------------
    #   agg[d] = (1/in_deg[d]) * sum_{e: dst(e)=d} (h[src_e] + h0[etype_e]) @ W
    #          = ((A_ent @ hW) + (A_rel @ rW)) * dnorm        (distributive trick)
    agg = mm(a_ent_ref[0], hW_bf[...]) + mm(a_rel_ref[0], rW_bf[...])   # (TILE, H)
    agg = agg * dnorm_ref[0]                                            # f32 1/deg
    cur = jnp.where(agg >= 0.0, agg, agg * RRELU_NEG_SLOPE)             # F.rrelu eval
    cur = maybe_norm(cur)

    # ---- entity GRU cell for this tile's rows -----------------------------------
    row0 = pl.multiple_of(j * tile_dst, tile_dst)
    h_prev = h_f32[pl.ds(row0, tile_dst), :]
    gi = mm(cur.astype(jnp.bfloat16), ent_w_ih_ref[...]) + ent_b_ih_ref[...]
    gh = mm(h_bf[pl.ds(row0, tile_dst), :], ent_w_hh_ref[...]) + ent_b_hh_ref[...]
    h_new = maybe_norm(gru_gates(gi, gh, h_prev))

    # ---- carry + outputs ---------------------------------------------------------
    h_f32[pl.ds(row0, tile_dst), :] = h_new
    h_bf[pl.ds(row0, tile_dst), :] = h_new.astype(jnp.bfloat16)
    hist_ref[0] = h_new.astype(hist_ref.dtype)
    h0_out_ref[...] = h0_f32[...]


# ------------------------------ wrapper glue --------------------------------

def build_graph_operators(g, n_pad, r2_pad, op_dtype=jnp.bfloat16):
    """Edge lists -> dense 0/1 operators (bf16, exact) + f32 normalization vectors.

    The in-degree / unique-entity-count normalizations are kept as separate f32
    column vectors so bf16 storage of the big operators does not quantize them.
    """
    src, dst, etype = g['src'], g['dst'], g['etype']

    # unique-entities-per-relation membership (RE-GCN r_to_e semantics)
    inc = jnp.zeros((r2_pad, n_pad), jnp.float32)
    inc = inc.at[etype, src].set(1.0).at[etype, dst].set(1.0)
    cnt = jnp.sum(inc, axis=1, keepdims=True)
    inv_cnt = 1.0 / jnp.maximum(cnt, 1.0)                      # (r2_pad, 1) f32

    in_deg = jnp.zeros((n_pad,), jnp.float32).at[dst].add(1.0)
    dnorm = (1.0 / jnp.maximum(in_deg, 1.0))[:, None]          # (n_pad, 1) f32

    a_ent = jnp.zeros((n_pad, n_pad), jnp.float32).at[dst, src].add(1.0)
    a_rel = jnp.zeros((n_pad, r2_pad), jnp.float32).at[dst, etype].add(1.0)
    return (inc.astype(op_dtype), inv_cnt,
            a_ent.astype(op_dtype), a_rel.astype(op_dtype), dnorm)


def _pick_tile(requested, n_pad):
    """Largest power-of-two multiple of 8 that divides n_pad and is <= requested."""
    requested = max(8, min(requested, n_pad))
    t = 8
    while t * 2 <= requested and n_pad % (t * 2) == 0:
        t *= 2
    return t


def recurrent_rgcn_forward(params, graphs, num_ents, num_rels, *, layer_norm=True,
                           tile_dst=None, hist_dtype=jnp.float32,
                           op_dtype=jnp.bfloat16,
                           vmem_limit_bytes=48 * 1024 * 1024):
    """Mirrors RecurrentRGCN.forward(g_list, static_graph, use_cuda) with
    use_static=False.  Returns (history_embs, static_emb, h_0, gate_list, degree_list).
    Set hist_dtype=jnp.bfloat16 to halve the history writeback traffic if the
    downstream decoder tolerates it."""
    T = len(graphs)
    H = params['dynamic_emb'].shape[1]
    R2 = 2 * num_rels
    N_pad = _round_up(num_ents, 128)
    R2_pad = _round_up(R2, 128)
    tile_dst = _pick_tile(512 if tile_dst is None else tile_dst, N_pad)
    J = N_pad // tile_dst

    f32, bf16 = jnp.float32, jnp.bfloat16
    init_h = _pad2d(params['dynamic_emb'].astype(f32), N_pad, H)
    emb_rel = _pad2d(params['emb_rel'].astype(f32), R2_pad, H)

    # relation GRUCell input is [emb_rel | x_mean] (2H wide): split the W_ih matmul
    # and precompute the constant emb_rel part (f32, once).
    rel_w_ih = params['rel_w_ih'].astype(f32)                       # (2H, 3H)
    rel_gi0 = emb_rel @ rel_w_ih[:H] + params['rel_b_ih'].astype(f32)   # (R2p, 3H)
    rel_w_x = rel_w_ih[H:2 * H].astype(bf16)                        # (H, 3H)
    rel_w_hh = params['rel_w_hh'].astype(bf16)
    rel_b_hh = params['rel_b_hh'].astype(f32)
    ent_w_ih = params['ent_w_ih'].astype(bf16)
    ent_b_ih = params['ent_b_ih'].astype(f32)
    ent_w_hh = params['ent_w_hh'].astype(bf16)
    ent_b_hh = params['ent_b_hh'].astype(f32)
    w_nb = params['w_neighbor'].astype(bf16)

    ops = [build_graph_operators(g, N_pad, R2_pad, op_dtype) for g in graphs]
    M_all = jnp.stack([o[0] for o in ops])         # (T, R2p, Np)  bf16 0/1
    cnt_all = jnp.stack([o[1] for o in ops])       # (T, R2p, 1)   f32
    Ae_all = jnp.stack([o[2] for o in ops])        # (T, Np, Np)   bf16 counts
    Ar_all = jnp.stack([o[3] for o in ops])        # (T, Np, R2p)  bf16 counts
    dn_all = jnp.stack([o[4] for o in ops])        # (T, Np, 1)    f32

    kernel = functools.partial(_fused_step_kernel, h_dim=H, tile_dst=tile_dst,
                               layer_norm=layer_norm)

    def run(single_buffer_resident):
        def res_spec(shape):
            kw = {}
            if single_buffer_resident:
                kw['pipeline_mode'] = pl.Buffered(1)   # grid-invariant -> 1 buffer
            return pl.BlockSpec(shape, lambda t, j: (0,) * len(shape), **kw)

        grid_spec = pltpu.PrefetchScalarGridSpec(
            num_scalar_prefetch=0,
            grid=(T, J),
            in_specs=[
                res_spec((N_pad, H)),                # dynamic_emb (padded)
                res_spec((R2_pad, H)),               # emb_rel (padded)
                res_spec((R2_pad, 3 * H)),           # rel_gi0 = emb_rel@W_ih[:H]+b_ih
                res_spec((H, 3 * H)),                # rel W_ih (x_mean part)
                res_spec((H, 3 * H)),                # rel W_hh
                res_spec((1, 3 * H)),                # rel b_hh
                res_spec((H, 3 * H)),                # ent W_ih
                res_spec((1, 3 * H)),                # ent b_ih
                res_spec((H, 3 * H)),                # ent W_hh
                res_spec((1, 3 * H)),                # ent b_hh
                res_spec((H, H)),                    # W_neighbor
                pl.BlockSpec((1, R2_pad, N_pad), lambda t, j: (t, 0, 0)),    # M_bin
                pl.BlockSpec((1, R2_pad, 1), lambda t, j: (t, 0, 0)),        # 1/cnt
                pl.BlockSpec((1, tile_dst, N_pad), lambda t, j: (t, j, 0)),  # A_ent
                pl.BlockSpec((1, tile_dst, R2_pad), lambda t, j: (t, j, 0)), # A_rel
                pl.BlockSpec((1, tile_dst, 1), lambda t, j: (t, j, 0)),      # 1/deg
            ],
            out_specs=(
                pl.BlockSpec((1, tile_dst, H), lambda t, j: (t, j, 0)),      # history
                pl.BlockSpec((R2_pad, H), lambda t, j: (0, 0)),              # final h_0
            ),
            scratch_shapes=[
                pltpu.VMEM((N_pad, H), f32),    # h (f32 carry)
                pltpu.VMEM((N_pad, H), bf16),   # h (bf16 matmul operand)
                pltpu.VMEM((R2_pad, H), f32),   # h_0 (f32 carry)
                pltpu.VMEM((R2_pad, H), bf16),  # h_0 (bf16 matmul operand)
                pltpu.VMEM((N_pad, H), bf16),   # h @ W_neighbor
                pltpu.VMEM((R2_pad, H), bf16),  # h_0 @ W_neighbor
            ],
        )
        return pl.pallas_call(
            kernel,
            out_shape=(jax.ShapeDtypeStruct((T, N_pad, H), hist_dtype),
                       jax.ShapeDtypeStruct((R2_pad, H), f32)),
            grid_spec=grid_spec,
            compiler_params=pltpu.CompilerParams(
                # time axis is recurrent, dst tiles share per-timestep scratch
                dimension_semantics=("arbitrary", "arbitrary"),
                vmem_limit_bytes=vmem_limit_bytes),
        )(init_h, emb_rel, rel_gi0, rel_w_x, rel_w_hh, rel_b_hh,
          ent_w_ih, ent_b_ih, ent_w_hh, ent_b_hh, w_nb,
          M_all, cnt_all, Ae_all, Ar_all, dn_all)

    try:
        hist, h0 = run(True)
    except Exception:
        # pl.Buffered(1) / pipeline_mode unsupported on this jax version:
        # fall back to default (double) buffering for resident operands.
        hist, h0 = run(False)

    history_embs = [hist[t, :num_ents, :] for t in range(T)]
    # TODO(synk): use_static=True branch (RGCNBlockLayer over the static graph)
    # not implemented -> static_emb is None, exactly as in the use_static=False path.
    return history_embs, None, h0[:R2, :], [], []


# --------------------------------- main --------------------------------------

if __name__ == "__main__":
    num_ents, num_rels, h_dim = 64, 8, 128
    seq_len, num_edges = 3, 48

    key = jax.random.PRNGKey(0)
    ks = jax.random.split(key, 12)

    def xavier(k, shape):
        std = (2.0 / (shape[0] + shape[1])) ** 0.5
        return std * jax.random.normal(k, shape, jnp.float32)

    params = {
        'dynamic_emb': jax.random.normal(ks[0], (num_ents, h_dim), jnp.float32),
        'emb_rel':     xavier(ks[1], (2 * num_rels, h_dim)),
        'w_neighbor':  xavier(ks[2], (h_dim, h_dim)),
        # relation_cell_1: GRUCell(2*h_dim -> h_dim), weights stored transposed
        'rel_w_ih': 0.1 * jax.random.normal(ks[3], (2 * h_dim, 3 * h_dim), jnp.float32),
        'rel_w_hh': 0.1 * jax.random.normal(ks[4], (h_dim, 3 * h_dim), jnp.float32),
        'rel_b_ih': 0.1 * jax.random.normal(ks[5], (1, 3 * h_dim), jnp.float32),
        'rel_b_hh': 0.1 * jax.random.normal(ks[6], (1, 3 * h_dim), jnp.float32),
        # entity_cell_1: GRUCell(h_dim -> h_dim)
        'ent_w_ih': 0.1 * jax.random.normal(ks[7], (h_dim, 3 * h_dim), jnp.float32),
        'ent_w_hh': 0.1 * jax.random.normal(ks[8], (h_dim, 3 * h_dim), jnp.float32),
        'ent_b_ih': 0.1 * jax.random.normal(ks[9], (1, 3 * h_dim), jnp.float32),
        'ent_b_hh': 0.1 * jax.random.normal(ks[10], (1, 3 * h_dim), jnp.float32),
    }

    # synthetic per-timestep graphs (stand-in for the DGL graphs in g_list)
    gkeys = jax.random.split(ks[11], seq_len * 3)
    graphs = []
    for t in range(seq_len):
        graphs.append({
            'src':   jax.random.randint(gkeys[3 * t + 0], (num_edges,), 0, num_ents),
            'dst':   jax.random.randint(gkeys[3 * t + 1], (num_edges,), 0, num_ents),
            'etype': jax.random.randint(gkeys[3 * t + 2], (num_edges,), 0, 2 * num_rels),
        })

    history_embs, static_emb, h0, gate_list, degree_list = recurrent_rgcn_forward(
        params, graphs, num_ents, num_rels, layer_norm=True, tile_dst=64)

    jax.block_until_ready(history_embs[-1])
    jax.block_until_ready(h0)
    assert history_embs[-1].shape == (num_ents, h_dim)
    assert h0.shape == (2 * num_rels, h_dim)
    assert bool(jnp.all(jnp.isfinite(history_embs[-1].astype(jnp.float32))))
    assert bool(jnp.all(jnp.isfinite(h0)))
    print("KERNEL_OK")
</pallas_src>

<mosaic_0001>
module attributes {stable_mosaic.version = 11 : i64} {
  func.func @_fused_step_kernel(%arg0: i32, %arg1: i32, %arg2: memref<128x128xf32, #tpu.memory_space<vmem>>, %arg3: memref<128x128xf32, #tpu.memory_space<vmem>>, %arg4: memref<128x384xf32, #tpu.memory_space<vmem>>, %arg5: memref<128x384xbf16, #tpu.memory_space<vmem>>, %arg6: memref<128x384xbf16, #tpu.memory_space<vmem>>, %arg7: memref<1x384xf32, #tpu.memory_space<vmem>>, %arg8: memref<128x384xbf16, #tpu.memory_space<vmem>>, %arg9: memref<1x384xf32, #tpu.memory_space<vmem>>, %arg10: memref<128x384xbf16, #tpu.memory_space<vmem>>, %arg11: memref<1x384xf32, #tpu.memory_space<vmem>>, %arg12: memref<128x128xbf16, #tpu.memory_space<vmem>>, %arg13: memref<1x128x128xbf16, #tpu.memory_space<vmem>>, %arg14: memref<1x128x1xf32, #tpu.memory_space<vmem>>, %arg15: memref<1x64x128xbf16, #tpu.memory_space<vmem>>, %arg16: memref<1x64x128xbf16, #tpu.memory_space<vmem>>, %arg17: memref<1x64x1xf32, #tpu.memory_space<vmem>>, %arg18: memref<1x64x128xf32, #tpu.memory_space<vmem>>, %arg19: memref<128x128xf32, #tpu.memory_space<vmem>>, %arg20: memref<128x128xf32, #tpu.memory_space<vmem>>, %arg21: memref<128x128xbf16, #tpu.memory_space<vmem>>, %arg22: memref<128x128xf32, #tpu.memory_space<vmem>>, %arg23: memref<128x128xbf16, #tpu.memory_space<vmem>>, %arg24: memref<128x128xbf16, #tpu.memory_space<vmem>>, %arg25: memref<128x128xbf16, #tpu.memory_space<vmem>>) attributes {dimension_semantics = [#tpu.dimension_semantics<arbitrary>, #tpu.dimension_semantics<arbitrary>], iteration_bounds = array<i64: 3, 2>, scalar_prefetch = 0 : i64, scratch_operands = 6 : i64, tpu.core_type = #tpu.core_type<tc>, window_params = [{pipeline_mode = #tpu.pipeline_mode<synchronous>, transform_indices = @transform_0, window_bounds = array<i64: 128, 128>}, {pipeline_mode = #tpu.pipeline_mode<synchronous>, transform_indices = @transform_1, window_bounds = array<i64: 128, 128>}, {pipeline_mode = #tpu.pipeline_mode<synchronous>, transform_indices = @transform_2, window_bounds = array<i64: 128, 384>}, {pipeline_mode = #tpu.pipeline_mode<synchronous>, transform_indices = @transform_3, window_bounds = array<i64: 128, 384>}, {pipeline_mode = #tpu.pipeline_mode<synchronous>, transform_indices = @transform_4, window_bounds = array<i64: 128, 384>}, {pipeline_mode = #tpu.pipeline_mode<synchronous>, transform_indices = @transform_5, window_bounds = array<i64: 1, 384>}, {pipeline_mode = #tpu.pipeline_mode<synchronous>, transform_indices = @transform_6, window_bounds = array<i64: 128, 384>}, {pipeline_mode = #tpu.pipeline_mode<synchronous>, transform_indices = @transform_7, window_bounds = array<i64: 1, 384>}, {pipeline_mode = #tpu.pipeline_mode<synchronous>, transform_indices = @transform_8, window_bounds = array<i64: 128, 384>}, {pipeline_mode = #tpu.pipeline_mode<synchronous>, transform_indices = @transform_9, window_bounds = array<i64: 1, 384>}, {pipeline_mode = #tpu.pipeline_mode<synchronous>, transform_indices = @transform_10, window_bounds = array<i64: 128, 128>}, {transform_indices = @transform_11, window_bounds = array<i64: 1, 128, 128>}, {transform_indices = @transform_12, window_bounds = array<i64: 1, 128, 1>}, {transform_indices = @transform_13, window_bounds = array<i64: 1, 64, 128>}, {transform_indices = @transform_14, window_bounds = array<i64: 1, 64, 128>}, {transform_indices = @transform_15, window_bounds = array<i64: 1, 64, 1>}, {transform_indices = @transform_16, window_bounds = array<i64: 1, 64, 128>}, {pipeline_mode = #tpu.pipeline_mode<synchronous>, transform_indices = @transform_17, window_bounds = array<i64: 128, 128>}]} {
    %c0_i32 = arith.constant 0 : i32
    %0 = arith.cmpi eq, %arg0, %c0_i32 : i32
    %c0_i32_0 = arith.constant 0 : i32
    %1 = arith.cmpi eq, %arg1, %c0_i32_0 : i32
    %2 = arith.andi %0, %1 : i1
    %3 = arith.extui %2 : i1 to i32
    %c0_i32_1 = arith.constant 0 : i32
    %4 = arith.cmpi ne, %3, %c0_i32_1 : i32
    scf.if %4 {
      %c0_47 = arith.constant 0 : index
      %c0_48 = arith.constant 0 : index
      %95 = vector.load %arg2[%c0_47, %c0_48] : memref<128x128xf32, #tpu.memory_space<vmem>>, vector<128x128xf32>
      %96 = arith.mulf %95, %95 : vector<128x128xf32>
      %cst_49 = arith.constant dense<0.000000e+00> : vector<128xf32>
      %97 = vector.multi_reduction <add>, %96, %cst_49 [1] : vector<128x128xf32> to vector<128xf32>
      %98 = vector.shape_cast %97 : vector<128xf32> to vector<128x1xf32>
      %cst_50 = arith.constant 1.000000e-24 : f32
      %99 = vector.broadcast %cst_50 : f32 to vector<128x1xf32>
      %100 = arith.maximumf %98, %99 : vector<128x1xf32>
      %101 = math.rsqrt %100 : vector<128x1xf32>
      %102 = vector.broadcast %101 : vector<128x1xf32> to vector<128x128xf32>
      %103 = arith.mulf %95, %102 : vector<128x128xf32>
      %c0_51 = arith.constant 0 : index
      %c0_52 = arith.constant 0 : index
      %104 = vector.load %arg20[%c0_51, %c0_52] : memref<128x128xf32, #tpu.memory_space<vmem>>, vector<128x128xf32>
      tpu.vector_store %arg20[%c0_51, %c0_52], %103 {strides = array<i32>} : memref<128x128xf32, #tpu.memory_space<vmem>>, vector<128x128xf32>,
      %105 = arith.truncf %103 : vector<128x128xf32> to vector<128x128xbf16>
      %c0_53 = arith.constant 0 : index
      %c0_54 = arith.constant 0 : index
      %106 = vector.load %arg21[%c0_53, %c0_54] : memref<128x128xbf16, #tpu.memory_space<vmem>>, vector<128x128xbf16>
      tpu.vector_store %arg21[%c0_53, %c0_54], %105 {strides = array<i32>} : memref<128x128xbf16, #tpu.memory_space<vmem>>, vector<128x128xbf16>,
      %c0_55 = arith.constant 0 : index
      %c0_56 = arith.constant 0 : index
      %107 = vector.load %arg3[%c0_55, %c0_56] : memref<128x128xf32, #tpu.memory_space<vmem>>, vector<128x128xf32>
      %c0_57 = arith.constant 0 : index
      %c0_58 = arith.constant 0 : index
      %108 = vector.load %arg22[%c0_57, %c0_58] : memref<128x128xf32, #tpu.memory_space<vmem>>, vector<128x128xf32>
      tpu.vector_store %arg22[%c0_57, %c0_58], %107 {strides = array<i32>} : memref<128x128xf32, #tpu.memory_space<vmem>>, vector<128x128xf32>,
      %109 = arith.truncf %107 : vector<128x128xf32> to vector<128x128xbf16>
      %c0_59 = arith.constant 0 : index
      %c0_60 = arith.constant 0 : index
      %110 = vector.load %arg23[%c0_59, %c0_60] : memref<128x128xbf16, #tpu.memory_space<vmem>>, vector<128x128xbf16>
      tpu.vector_store %arg23[%c0_59, %c0_60], %109 {strides = array<i32>} : memref<128x128xbf16, #tpu.memory_space<vmem>>, vector<128x128xbf16>,
    } else {
    }
    %c0_i32_2 = arith.constant 0 : i32
    %5 = arith.cmpi eq, %arg1, %c0_i32_2 : i32
    %6 = arith.extui %5 : i1 to i32
    %c0_i32_3 = arith.constant 0 : i32
    %7 = arith.cmpi ne, %6, %c0_i32_3 : i32
    scf.if %7 {
      %c0_47 = arith.constant 0 : index
      %c0_48 = arith.constant 0 : index
      %c0_49 = arith.constant 0 : index
      %95 = vector.load %arg13[%c0_47, %c0_48, %c0_49] : memref<1x128x128xbf16, #tpu.memory_space<vmem>>, vector<1x128x128xbf16>
      %96 = vector.shape_cast %95 : vector<1x128x128xbf16> to vector<128x128xbf16>
      %c0_50 = arith.constant 0 : index
      %c0_51 = arith.constant 0 : index
      %97 = vector.load %arg21[%c0_50, %c0_51] : memref<128x128xbf16, #tpu.memory_space<vmem>>, vector<128x128xbf16>
      %cst_52 = arith.constant dense<0.000000e+00> : vector<128x128xf32>
      %98 = tpu.matmul %96, %97, %cst_52 {dimension_numbers = #tpu.dot_dimension_numbers<[1], [0], [0], [1], [0, 0, 1, 1], [], []>} : vector<128x128xbf16>, vector<128x128xbf16>, vector<128x128xf32> -> vector<128x128xf32>
      %c0_53 = arith.constant 0 : index
      %c0_54 = arith.constant 0 : index
      %c0_55 = arith.constant 0 : index
      %99 = vector.load %arg14[%c0_53, %c0_54, %c0_55] : memref<1x128x1xf32, #tpu.memory_space<vmem>>, vector<1x128x1xf32>
      %100 = vector.shape_cast %99 : vector<1x128x1xf32> to vector<128x1xf32>
      %101 = vector.broadcast %100 : vector<128x1xf32> to vector<128x128xf32>
      %102 = arith.mulf %98, %101 : vector<128x128xf32>
      %c0_56 = arith.constant 0 : index
      %c0_57 = arith.constant 0 : index
      %103 = vector.load %arg4[%c0_56, %c0_57] : memref<128x384xf32, #tpu.memory_space<vmem>>, vector<128x384xf32>
      %104 = arith.truncf %102 : vector<128x128xf32> to vector<128x128xbf16>
      %c0_58 = arith.constant 0 : index
      %c0_59 = arith.constant 0 : index
      %105 = vector.load %arg5[%c0_58, %c0_59] : memref<128x384xbf16, #tpu.memory_space<vmem>>, vector<128x384xbf16>
      %cst_60 = arith.constant dense<0.000000e+00> : vector<128x384xf32>
      %106 = tpu.matmul %104, %105, %cst_60 {dimension_numbers = #tpu.dot_dimension_numbers<[1], [0], [0], [1], [0, 0, 1, 1], [], []>} : vector<128x128xbf16>, vector<128x384xbf16>, vector<128x384xf32> -> vector<128x384xf32>
      %107 = arith.addf %103, %106 : vector<128x384xf32>
      %c0_61 = arith.constant 0 : index
      %c0_62 = arith.constant 0 : index
      %108 = vector.load %arg23[%c0_61, %c0_62] : memref<128x128xbf16, #tpu.memory_space<vmem>>, vector<128x128xbf16>
      %c0_63 = arith.constant 0 : index
      %c0_64 = arith.constant 0 : index
      %109 = vector.load %arg6[%c0_63, %c0_64] : memref<128x384xbf16, #tpu.memory_space<vmem>>, vector<128x384xbf16>
      %cst_65 = arith.constant dense<0.000000e+00> : vector<128x384xf32>
      %110 = tpu.matmul %108, %109, %cst_65 {dimension_numbers = #tpu.dot_dimension_numbers<[1], [0], [0], [1], [0, 0, 1, 1], [], []>} : vector<128x128xbf16>, vector<128x384xbf16>, vector<128x384xf32> -> vector<128x384xf32>
      %c0_66 = arith.constant 0 : index
      %c0_67 = arith.constant 0 : index
      %111 = vector.load %arg7[%c0_66, %c0_67] : memref<1x384xf32, #tpu.memory_space<vmem>>, vector<1x384xf32>
      %112 = vector.broadcast %111 : vector<1x384xf32> to vector<128x384xf32>
      %113 = arith.addf %110, %112 : vector<128x384xf32>
      %c0_68 = arith.constant 0 : index
      %c0_69 = arith.constant 0 : index
      %114 = vector.load %arg22[%c0_68, %c0_69] : memref<128x128xf32, #tpu.memory_space<vmem>>, vector<128x128xf32>
      %115 = vector.extract_strided_slice %107 {offsets = [0, 0], sizes = [128, 128], strides = [1, 1]} : vector<128x384xf32> to vector<128x128xf32>
      %116 = vector.extract_strided_slice %113 {offsets = [0, 0], sizes = [128, 128], strides = [1, 1]} : vector<128x384xf32> to vector<128x128xf32>
      %117 = arith.addf %115, %116 : vector<128x128xf32>
      %118 = arith.negf %117 : vector<128x128xf32>
      %119 = math.exp %118 : vector<128x128xf32>
      %cst_70 = arith.constant 1.000000e+00 : f32
      %120 = vector.broadcast %cst_70 : f32 to vector<128x128xf32>
      %121 = arith.addf %120, %119 : vector<128x128xf32>
      %122 = arith.divf %120, %121 : vector<128x128xf32>
      %123 = vector.extract_strided_slice %107 {offsets = [0, 128], sizes = [128, 128], strides = [1, 1]} : vector<128x384xf32> to vector<128x128xf32>
      %124 = vector.extract_strided_slice %113 {offsets = [0, 128], sizes = [128, 128], strides = [1, 1]} : vector<128x384xf32> to vector<128x128xf32>
      %125 = arith.addf %123, %124 : vector<128x128xf32>
      %126 = arith.negf %125 : vector<128x128xf32>
      %127 = math.exp %126 : vector<128x128xf32>
      %cst_71 = arith.constant 1.000000e+00 : f32
      %128 = vector.broadcast %cst_71 : f32 to vector<128x128xf32>
      %129 = arith.addf %128, %127 : vector<128x128xf32>
      %130 = arith.divf %128, %129 : vector<128x128xf32>
      %131 = vector.extract_strided_slice %107 {offsets = [0, 256], sizes = [128, 128], strides = [1, 1]} : vector<128x384xf32> to vector<128x128xf32>
      %132 = vector.extract_strided_slice %113 {offsets = [0, 256], sizes = [128, 128], strides = [1, 1]} : vector<128x384xf32> to vector<128x128xf32>
      %133 = arith.mulf %122, %132 : vector<128x128xf32>
      %134 = arith.addf %131, %133 : vector<128x128xf32>
      %135 = math.tanh %134 : vector<128x128xf32>
      %cst_72 = arith.constant 1.000000e+00 : f32
      %136 = vector.broadcast %cst_72 : f32 to vector<128x128xf32>
      %137 = arith.subf %136, %130 : vector<128x128xf32>
      %138 = arith.mulf %137, %135 : vector<128x128xf32>
      %139 = arith.mulf %130, %114 : vector<128x128xf32>
      %140 = arith.addf %138, %139 : vector<128x128xf32>
      %141 = arith.mulf %140, %140 : vector<128x128xf32>
      %cst_73 = arith.constant dense<0.000000e+00> : vector<128xf32>
      %142 = vector.multi_reduction <add>, %141, %cst_73 [1] : vector<128x128xf32> to vector<128xf32>
      %143 = vector.shape_cast %142 : vector<128xf32> to vector<128x1xf32>
      %cst_74 = arith.constant 1.000000e-24 : f32
      %144 = vector.broadcast %cst_74 : f32 to vector<128x1xf32>
      %145 = arith.maximumf %143, %144 : vector<128x1xf32>
      %146 = math.rsqrt %145 : vector<128x1xf32>
      %147 = vector.broadcast %146 : vector<128x1xf32> to vector<128x128xf32>
      %148 = arith.mulf %140, %147 : vector<128x128xf32>
      %c0_75 = arith.constant 0 : index
      %c0_76 = arith.constant 0 : index
      %149 = vector.load %arg22[%c0_75, %c0_76] : memref<128x128xf32, #tpu.memory_space<vmem>>, vector<128x128xf32>
      tpu.vector_store %arg22[%c0_75, %c0_76], %148 {strides = array<i32>} : memref<128x128xf32, #tpu.memory_space<vmem>>, vector<128x128xf32>,
      %150 = arith.truncf %148 : vector<128x128xf32> to vector<128x128xbf16>
      %c0_77 = arith.constant 0 : index
      %c0_78 = arith.constant 0 : index
      %151 = vector.load %arg23[%c0_77, %c0_78] : memref<128x128xbf16, #tpu.memory_space<vmem>>, vector<128x128xbf16>
      tpu.vector_store %arg23[%c0_77, %c0_78], %150 {strides = array<i32>} : memref<128x128xbf16, #tpu.memory_space<vmem>>, vector<128x128xbf16>,
      %c0_79 = arith.constant 0 : index
      %c0_80 = arith.constant 0 : index
      %152 = vector.load %arg21[%c0_79, %c0_80] : memref<128x128xbf16, #tpu.memory_space<vmem>>, vector<128x128xbf16>
      %c0_81 = arith.constant 0 : index
      %c0_82 = arith.constant 0 : index
      %153 = vector.load %arg12[%c0_81, %c0_82] : memref<128x128xbf16, #tpu.memory_space<vmem>>, vector<128x128xbf16>
      %cst_83 = arith.constant dense<0.000000e+00> : vector<128x128xf32>
      %154 = tpu.matmul %152, %153, %cst_83 {dimension_numbers = #tpu.dot_dimension_numbers<[1], [0], [0], [1], [0, 0, 1, 1], [], []>} : vector<128x128xbf16>, vector<128x128xbf16>, vector<128x128xf32> -> vector<128x128xf32>
      %155 = arith.truncf %154 : vector<128x128xf32> to vector<128x128xbf16>
      %c0_84 = arith.constant 0 : index
      %c0_85 = arith.constant 0 : index
      %156 = vector.load %arg24[%c0_84, %c0_85] : memref<128x128xbf16, #tpu.memory_space<vmem>>, vector<128x128xbf16>
      tpu.vector_store %arg24[%c0_84, %c0_85], %155 {strides = array<i32>} : memref<128x128xbf16, #tpu.memory_space<vmem>>, vector<128x128xbf16>,
      %c0_86 = arith.constant 0 : index
      %c0_87 = arith.constant 0 : index
      %157 = vector.load %arg23[%c0_86, %c0_87] : memref<128x128xbf16, #tpu.memory_space<vmem>>, vector<128x128xbf16>
      %c0_88 = arith.constant 0 : index
      %c0_89 = arith.constant 0 : index
      %158 = vector.load %arg12[%c0_88, %c0_89] : memref<128x128xbf16, #tpu.memory_space<vmem>>, vector<128x128xbf16>
      %cst_90 = arith.constant dense<0.000000e+00> : vector<128x128xf32>
      %159 = tpu.matmul %157, %158, %cst_90 {dimension_numbers = #tpu.dot_dimension_numbers<[1], [0], [0], [1], [0, 0, 1, 1], [], []>} : vector<128x128xbf16>, vector<128x128xbf16>, vector<128x128xf32> -> vector<128x128xf32>
      %160 = arith.truncf %159 : vector<128x128xf32> to vector<128x128xbf16>
      %c0_91 = arith.constant 0 : index
      %c0_92 = arith.constant 0 : index
      %161 = vector.load %arg25[%c0_91, %c0_92] : memref<128x128xbf16, #tpu.memory_space<vmem>>, vector<128x128xbf16>
      tpu.vector_store %arg25[%c0_91, %c0_92], %160 {strides = array<i32>} : memref<128x128xbf16, #tpu.memory_space<vmem>>, vector<128x128xbf16>,
    } else {
    }
    %c0 = arith.constant 0 : index
    %c0_4 = arith.constant 0 : index
    %c0_5 = arith.constant 0 : index
    %8 = vector.load %arg15[%c0, %c0_4, %c0_5] : memref<1x64x128xbf16, #tpu.memory_space<vmem>>, vector<1x64x128xbf16>
    %9 = vector.shape_cast %8 : vector<1x64x128xbf16> to vector<64x128xbf16>
    %c0_6 = arith.constant 0 : index
    %c0_7 = arith.constant 0 : index
    %10 = vector.load %arg24[%c0_6, %c0_7] : memref<128x128xbf16, #tpu.memory_space<vmem>>, vector<128x128xbf16>
    %cst = arith.constant dense<0.000000e+00> : vector<64x128xf32>
    %11 = tpu.matmul %9, %10, %cst {dimension_numbers = #tpu.dot_dimension_numbers<[1], [0], [0], [1], [0, 0, 1, 1], [], []>} : vector<64x128xbf16>, vector<128x128xbf16>, vector<64x128xf32> -> vector<64x128xf32>
    %c0_8 = arith.constant 0 : index
    %c0_9 = arith.constant 0 : index
    %c0_10 = arith.constant 0 : index
    %12 = vector.load %arg16[%c0_8, %c0_9, %c0_10] : memref<1x64x128xbf16, #tpu.memory_space<vmem>>, vector<1x64x128xbf16>
    %13 = vector.shape_cast %12 : vector<1x64x128xbf16> to vector<64x128xbf16>
    %c0_11 = arith.constant 0 : index
    %c0_12 = arith.constant 0 : index
    %14 = vector.load %arg25[%c0_11, %c0_12] : memref<128x128xbf16, #tpu.memory_space<vmem>>, vector<128x128xbf16>
    %cst_13 = arith.constant dense<0.000000e+00> : vector<64x128xf32>
    %15 = tpu.matmul %13, %14, %cst_13 {dimension_numbers = #tpu.dot_dimension_numbers<[1], [0], [0], [1], [0, 0, 1, 1], [], []>} : vector<64x128xbf16>, vector<128x128xbf16>, vector<64x128xf32> -> vector<64x128xf32>
    %16 = arith.addf %11, %15 : vector<64x128xf32>
    %c0_14 = arith.constant 0 : index
    %c0_15 = arith.constant 0 : index
    %c0_16 = arith.constant 0 : index
    %17 = vector.load %arg17[%c0_14, %c0_15, %c0_16] : memref<1x64x1xf32, #tpu.memory_space<vmem>>, vector<1x64x1xf32>
    %18 = vector.shape_cast %17 : vector<1x64x1xf32> to vector<64x1xf32>
    %19 = vector.broadcast %18 : vector<64x1xf32> to vector<64x128xf32>
    %20 = arith.mulf %16, %19 : vector<64x128xf32>
    %cst_17 = arith.constant 0.000000e+00 : f32
    %21 = vector.broadcast %cst_17 : f32 to vector<64x128xf32>
    %22 = arith.cmpf oge, %20, %21 : vector<64x128xf32>
    %cst_18 = arith.constant 0.229166672 : f32
    %23 = vector.broadcast %cst_18 : f32 to vector<64x128xf32>
    %24 = arith.mulf %20, %23 : vector<64x128xf32>
    %25 = arith.select %22, %20, %24 : vector<64x128xi1>, vector<64x128xf32>
    %26 = arith.mulf %25, %25 : vector<64x128xf32>
    %cst_19 = arith.constant dense<0.000000e+00> : vector<64xf32>
    %27 = vector.multi_reduction <add>, %26, %cst_19 [1] : vector<64x128xf32> to vector<64xf32>
    %28 = vector.shape_cast %27 : vector<64xf32> to vector<64x1xf32>
    %cst_20 = arith.constant 1.000000e-24 : f32
    %29 = vector.broadcast %cst_20 : f32 to vector<64x1xf32>
    %30 = arith.maximumf %28, %29 : vector<64x1xf32>
    %31 = math.rsqrt %30 : vector<64x1xf32>
    %32 = vector.broadcast %31 : vector<64x1xf32> to vector<64x128xf32>
    %33 = arith.mulf %25, %32 : vector<64x128xf32>
    %c64_i32 = arith.constant 64 : i32
    %34 = arith.muli %arg1, %c64_i32 : i32
    %35 = tpu.assume_multiple %34, 64 : i32
    %36 = arith.index_cast %35 : i32 to index
    %c0_21 = arith.constant 0 : index
    %37 = vector.load %arg20[%36, %c0_21] : memref<128x128xf32, #tpu.memory_space<vmem>>, vector<64x128xf32>
    %38 = arith.truncf %33 : vector<64x128xf32> to vector<64x128xbf16>
    %c0_22 = arith.constant 0 : index
    %c0_23 = arith.constant 0 : index
    %39 = vector.load %arg8[%c0_22, %c0_23] : memref<128x384xbf16, #tpu.memory_space<vmem>>, vector<128x384xbf16>
    %cst_24 = arith.constant dense<0.000000e+00> : vector<64x384xf32>
    %40 = tpu.matmul %38, %39, %cst_24 {dimension_numbers = #tpu.dot_dimension_numbers<[1], [0], [0], [1], [0, 0, 1, 1], [], []>} : vector<64x128xbf16>, vector<128x384xbf16>, vector<64x384xf32> -> vector<64x384xf32>
    %c0_25 = arith.constant 0 : index
    %c0_26 = arith.constant 0 : index
    %41 = vector.load %arg9[%c0_25, %c0_26] : memref<1x384xf32, #tpu.memory_space<vmem>>, vector<1x384xf32>
    %42 = vector.broadcast %41 : vector<1x384xf32> to vector<64x384xf32>
    %43 = arith.addf %40, %42 : vector<64x384xf32>
    %44 = arith.index_cast %35 : i32 to index
    %c0_27 = arith.constant 0 : index
    %45 = vector.load %arg21[%44, %c0_27] : memref<128x128xbf16, #tpu.memory_space<vmem>>, vector<64x128xbf16>
    %c0_28 = arith.constant 0 : index
    %c0_29 = arith.constant 0 : index
    %46 = vector.load %arg10[%c0_28, %c0_29] : memref<128x384xbf16, #tpu.memory_space<vmem>>, vector<128x384xbf16>
    %cst_30 = arith.constant dense<0.000000e+00> : vector<64x384xf32>
    %47 = tpu.matmul %45, %46, %cst_30 {dimension_numbers = #tpu.dot_dimension_numbers<[1], [0], [0], [1], [0, 0, 1, 1], [], []>} : vector<64x128xbf16>, vector<128x384xbf16>, vector<64x384xf32> -> vector<64x384xf32>
    %c0_31 = arith.constant 0 : index
    %c0_32 = arith.constant 0 : index
    %48 = vector.load %arg11[%c0_31, %c0_32] : memref<1x384xf32, #tpu.memory_space<vmem>>, vector<1x384xf32>
    %49 = vector.broadcast %48 : vector<1x384xf32> to vector<64x384xf32>
    %50 = arith.addf %47, %49 : vector<64x384xf32>
    %51 = vector.extract_strided_slice %43 {offsets = [0, 0], sizes = [64, 128], strides = [1, 1]} : vector<64x384xf32> to vector<64x128xf32>
    %52 = vector.extract_strided_slice %50 {offsets = [0, 0], sizes = [64, 128], strides = [1, 1]} : vector<64x384xf32> to vector<64x128xf32>
    %53 = arith.addf %51, %52 : vector<64x128xf32>
    %54 = arith.negf %53 : vector<64x128xf32>
    %55 = math.exp %54 : vector<64x128xf32>
    %cst_33 = arith.constant 1.000000e+00 : f32
    %56 = vector.broadcast %cst_33 : f32 to vector<64x128xf32>
    %57 = arith.addf %56, %55 : vector<64x128xf32>
    %58 = arith.divf %56, %57 : vector<64x128xf32>
    %59 = vector.extract_strided_slice %43 {offsets = [0, 128], sizes = [64, 128], strides = [1, 1]} : vector<64x384xf32> to vector<64x128xf32>
    %60 = vector.extract_strided_slice %50 {offsets = [0, 128], sizes = [64, 128], strides = [1, 1]} : vector<64x384xf32> to vector<64x128xf32>
    %61 = arith.addf %59, %60 : vector<64x128xf32>
    %62 = arith.negf %61 : vector<64x128xf32>
    %63 = math.exp %62 : vector<64x128xf32>
    %cst_34 = arith.constant 1.000000e+00 : f32
    %64 = vector.broadcast %cst_34 : f32 to vector<64x128xf32>
    %65 = arith.addf %64, %63 : vector<64x128xf32>
    %66 = arith.divf %64, %65 : vector<64x128xf32>
    %67 = vector.extract_strided_slice %43 {offsets = [0, 256], sizes = [64, 128], strides = [1, 1]} : vector<64x384xf32> to vector<64x128xf32>
    %68 = vector.extract_strided_slice %50 {offsets = [0, 256], sizes = [64, 128], strides = [1, 1]} : vector<64x384xf32> to vector<64x128xf32>
    %69 = arith.mulf %58, %68 : vector<64x128xf32>
    %70 = arith.addf %67, %69 : vector<64x128xf32>
    %71 = math.tanh %70 : vector<64x128xf32>
    %cst_35 = arith.constant 1.000000e+00 : f32
    %72 = vector.broadcast %cst_35 : f32 to vector<64x128xf32>
    %73 = arith.subf %72, %66 : vector<64x128xf32>
    %74 = arith.mulf %73, %71 : vector<64x128xf32>
    %75 = arith.mulf %66, %37 : vector<64x128xf32>
    %76 = arith.addf %74, %75 : vector<64x128xf32>
    %77 = arith.mulf %76, %76 : vector<64x128xf32>
    %cst_36 = arith.constant dense<0.000000e+00> : vector<64xf32>
    %78 = vector.multi_reduction <add>, %77, %cst_36 [1] : vector<64x128xf32> to vector<64xf32>
    %79 = vector.shape_cast %78 : vector<64xf32> to vector<64x1xf32>
    %cst_37 = arith.constant 1.000000e-24 : f32
    %80 = vector.broadcast %cst_37 : f32 to vector<64x1xf32>
    %81 = arith.maximumf %79, %80 : vector<64x1xf32>
    %82 = math.rsqrt %81 : vector<64x1xf32>
    %83 = vector.broadcast %82 : vector<64x1xf32> to vector<64x128xf32>
    %84 = arith.mulf %76, %83 : vector<64x128xf32>
    %85 = arith.index_cast %35 : i32 to index
    %c0_38 = arith.constant 0 : index
    %86 = vector.load %arg20[%85, %c0_38] : memref<128x128xf32, #tpu.memory_space<vmem>>, vector<64x128xf32>
    tpu.vector_store %arg20[%85, %c0_38], %84 {strides = array<i32>} : memref<128x128xf32, #tpu.memory_space<vmem>>, vector<64x128xf32>,
    %87 = arith.truncf %84 : vector<64x128xf32> to vector<64x128xbf16>
    %88 = arith.index_cast %35 : i32 to index
    %c0_39 = arith.constant 0 : index
    %89 = vector.load %arg21[%88, %c0_39] : memref<128x128xbf16, #tpu.memory_space<vmem>>, vector<64x128xbf16>
    tpu.vector_store %arg21[%88, %c0_39], %87 {strides = array<i32>} : memref<128x128xbf16, #tpu.memory_space<vmem>>, vector<64x128xbf16>,
    %c0_40 = arith.constant 0 : index
    %c0_41 = arith.constant 0 : index
    %c0_42 = arith.constant 0 : index
    %90 = vector.load %arg18[%c0_40, %c0_41, %c0_42] : memref<1x64x128xf32, #tpu.memory_space<vmem>>, vector<1x64x128xf32>
    %91 = vector.shape_cast %90 : vector<1x64x128xf32> to vector<64x128xf32>
    %92 = vector.shape_cast %84 : vector<64x128xf32> to vector<1x64x128xf32>
    tpu.vector_store %arg18[%c0_40, %c0_41, %c0_42], %92 {strides = array<i32>} : memref<1x64x128xf32, #tpu.memory_space<vmem>>, vector<1x64x128xf32>,
    %c0_43 = arith.constant 0 : index
    %c0_44 = arith.constant 0 : index
    %93 = vector.load %arg22[%c0_43, %c0_44] : memref<128x128xf32, #tpu.memory_space<vmem>>, vector<128x128xf32>
    %c0_45 = arith.constant 0 : index
    %c0_46 = arith.constant 0 : index
    %94 = vector.load %arg19[%c0_45, %c0_46] : memref<128x128xf32, #tpu.memory_space<vmem>>, vector<128x128xf32>
    tpu.vector_store %arg19[%c0_45, %c0_46], %93 {strides = array<i32>} : memref<128x128xf32, #tpu.memory_space<vmem>>, vector<128x128xf32>,
    return
  }
  func.func @transform_0(%arg0: i32, %arg1: i32) -> (i32, i32) {
    %c0_i32 = arith.constant 0 : i32
    %c0_i32_0 = arith.constant 0 : i32
    %c0_i32_1 = arith.constant 0 : i32
    return %c0_i32, %c0_i32_0 : i32, i32
  }
  func.func @transform_1(%arg0: i32, %arg1: i32) -> (i32, i32) {
    %c0_i32 = arith.constant 0 : i32
    %c0_i32_0 = arith.constant 0 : i32
    %c0_i32_1 = arith.constant 0 : i32
    return %c0_i32, %c0_i32_0 : i32, i32
  }
  func.func @transform_2(%arg0: i32, %arg1: i32) -> (i32, i32) {
    %c0_i32 = arith.constant 0 : i32
    %c0_i32_0 = arith.constant 0 : i32
    %c0_i32_1 = arith.constant 0 : i32
    return %c0_i32, %c0_i32_0 : i32, i32
  }
  func.func @transform_3(%arg0: i32, %arg1: i32) -> (i32, i32) {
    %c0_i32 = arith.constant 0 : i32
    %c0_i32_0 = arith.constant 0 : i32
    %c0_i32_1 = arith.constant 0 : i32
    return %c0_i32, %c0_i32_0 : i32, i32
  }
  func.func @transform_4(%arg0: i32, %arg1: i32) -> (i32, i32) {
    %c0_i32 = arith.constant 0 : i32
    %c0_i32_0 = arith.constant 0 : i32
    %c0_i32_1 = arith.constant 0 : i32
    return %c0_i32, %c0_i32_0 : i32, i32
  }
  func.func @transform_5(%arg0: i32, %arg1: i32) -> (i32, i32) {
    %c0_i32 = arith.constant 0 : i32
    %c0_i32_0 = arith.constant 0 : i32
    %c0_i32_1 = arith.constant 0 : i32
    return %c0_i32, %c0_i32_0 : i32, i32
  }
  func.func @transform_6(%arg0: i32, %arg1: i32) -> (i32, i32) {
    %c0_i32 = arith.constant 0 : i32
    %c0_i32_0 = arith.constant 0 : i32
    %c0_i32_1 = arith.constant 0 : i32
    return %c0_i32, %c0_i32_0 : i32, i32
  }
  func.func @transform_7(%arg0: i32, %arg1: i32) -> (i32, i32) {
    %c0_i32 = arith.constant 0 : i32
    %c0_i32_0 = arith.constant 0 : i32
    %c0_i32_1 = arith.constant 0 : i32
    return %c0_i32, %c0_i32_0 : i32, i32
  }
  func.func @transform_8(%arg0: i32, %arg1: i32) -> (i32, i32) {
    %c0_i32 = arith.constant 0 : i32
    %c0_i32_0 = arith.constant 0 : i32
    %c0_i32_1 = arith.constant 0 : i32
    return %c0_i32, %c0_i32_0 : i32, i32
  }
  func.func @transform_9(%arg0: i32, %arg1: i32) -> (i32, i32) {
    %c0_i32 = arith.constant 0 : i32
    %c0_i32_0 = arith.constant 0 : i32
    %c0_i32_1 = arith.constant 0 : i32
    return %c0_i32, %c0_i32_0 : i32, i32
  }
  func.func @transform_10(%arg0: i32, %arg1: i32) -> (i32, i32) {
    %c0_i32 = arith.constant 0 : i32
    %c0_i32_0 = arith.constant 0 : i32
    %c0_i32_1 = arith.constant 0 : i32
    return %c0_i32, %c0_i32_0 : i32, i32
  }
  func.func @transform_11(%arg0: i32, %arg1: i32) -> (i32, i32, i32) {
    %c0_i32 = arith.constant 0 : i32
    %c0_i32_0 = arith.constant 0 : i32
    %c0_i32_1 = arith.constant 0 : i32
    return %arg0, %c0_i32, %c0_i32_0 : i32, i32, i32
  }
  func.func @transform_12(%arg0: i32, %arg1: i32) -> (i32, i32, i32) {
    %c0_i32 = arith.constant 0 : i32
    %c0_i32_0 = arith.constant 0 : i32
    %c0_i32_1 = arith.constant 0 : i32
    return %arg0, %c0_i32, %c0_i32_0 : i32, i32, i32
  }
  func.func @transform_13(%arg0: i32, %arg1: i32) -> (i32, i32, i32) {
    %c0_i32 = arith.constant 0 : i32
    %c0_i32_0 = arith.constant 0 : i32
    return %arg0, %arg1, %c0_i32 : i32, i32, i32
  }
  func.func @transform_14(%arg0: i32, %arg1: i32) -> (i32, i32, i32) {
    %c0_i32 = arith.constant 0 : i32
    %c0_i32_0 = arith.constant 0 : i32
    return %arg0, %arg1, %c0_i32 : i32, i32, i32
  }
  func.func @transform_15(%arg0: i32, %arg1: i32) -> (i32, i32, i32) {
    %c0_i32 = arith.constant 0 : i32
    %c0_i32_0 = arith.constant 0 : i32
    return %arg0, %arg1, %c0_i32 : i32, i32, i32
  }
  func.func @transform_16(%arg0: i32, %arg1: i32) -> (i32, i32, i32) {
    %c0_i32 = arith.constant 0 : i32
    %c0_i32_0 = arith.constant 0 : i32
    return %arg0, %arg1, %c0_i32 : i32, i32, i32
  }
  func.func @transform_17(%arg0: i32, %arg1: i32) -> (i32, i32) {
    %c0_i32 = arith.constant 0 : i32
    %c0_i32_0 = arith.constant 0 : i32
    %c0_i32_1 = arith.constant 0 : i32
    return %c0_i32, %c0_i32_0 : i32, i32
  }
}

module attributes {stable_mosaic.version = 11 : i64} {
  func.func @_fused_step_kernel(%arg0: i32, %arg1: i32, %arg2: memref<128x128xf32, #tpu.memory_space<vmem>>, %arg3: memref<128x128xf32, #tpu.memory_space<vmem>>, %arg4: memref<128x384xf32, #tpu.memory_space<vmem>>, %arg5: memref<128x384xbf16, #tpu.memory_space<vmem>>, %arg6: memref<128x384xbf16, #tpu.memory_space<vmem>>, %arg7: memref<1x384xf32, #tpu.memory_space<vmem>>, %arg8: memref<128x384xbf16, #tpu.memory_space<vmem>>, %arg9: memref<1x384xf32, #tpu.memory_space<vmem>>, %arg10: memref<128x384xbf16, #tpu.memory_space<vmem>>, %arg11: memref<1x384xf32, #tpu.memory_space<vmem>>, %arg12: memref<128x128xbf16, #tpu.memory_space<vmem>>, %arg13: memref<1x128x128xbf16, #tpu.memory_space<vmem>>, %arg14: memref<1x128x1xf32, #tpu.memory_space<vmem>>, %arg15: memref<1x64x128xbf16, #tpu.memory_space<vmem>>, %arg16: memref<1x64x128xbf16, #tpu.memory_space<vmem>>, %arg17: memref<1x64x1xf32, #tpu.memory_space<vmem>>, %arg18: memref<1x64x128xf32, #tpu.memory_space<vmem>>, %arg19: memref<128x128xf32, #tpu.memory_space<vmem>>, %arg20: memref<128x128xf32, #tpu.memory_space<vmem>>, %arg21: memref<128x128xbf16, #tpu.memory_space<vmem>>, %arg22: memref<128x128xf32, #tpu.memory_space<vmem>>, %arg23: memref<128x128xbf16, #tpu.memory_space<vmem>>, %arg24: memref<128x128xbf16, #tpu.memory_space<vmem>>, %arg25: memref<128x128xbf16, #tpu.memory_space<vmem>>) attributes {dimension_semantics = [#tpu.dimension_semantics<arbitrary>, #tpu.dimension_semantics<arbitrary>], iteration_bounds = array<i64: 3, 2>, scalar_prefetch = 0 : i64, scratch_operands = 6 : i64, tpu.core_type = #tpu.core_type<tc>, window_params = [{pipeline_mode = #tpu.pipeline_mode<synchronous>, transform_indices = @transform_0, window_bounds = array<i64: 128, 128>}, {pipeline_mode = #tpu.pipeline_mode<synchronous>, transform_indices = @transform_1, window_bounds = array<i64: 128, 128>}, {pipeline_mode = #tpu.pipeline_mode<synchronous>, transform_indices = @transform_2, window_bounds = array<i64: 128, 384>}, {pipeline_mode = #tpu.pipeline_mode<synchronous>, transform_indices = @transform_3, window_bounds = array<i64: 128, 384>}, {pipeline_mode = #tpu.pipeline_mode<synchronous>, transform_indices = @transform_4, window_bounds = array<i64: 128, 384>}, {pipeline_mode = #tpu.pipeline_mode<synchronous>, transform_indices = @transform_5, window_bounds = array<i64: 1, 384>}, {pipeline_mode = #tpu.pipeline_mode<synchronous>, transform_indices = @transform_6, window_bounds = array<i64: 128, 384>}, {pipeline_mode = #tpu.pipeline_mode<synchronous>, transform_indices = @transform_7, window_bounds = array<i64: 1, 384>}, {pipeline_mode = #tpu.pipeline_mode<synchronous>, transform_indices = @transform_8, window_bounds = array<i64: 128, 384>}, {pipeline_mode = #tpu.pipeline_mode<synchronous>, transform_indices = @transform_9, window_bounds = array<i64: 1, 384>}, {pipeline_mode = #tpu.pipeline_mode<synchronous>, transform_indices = @transform_10, window_bounds = array<i64: 128, 128>}, {transform_indices = @transform_11, window_bounds = array<i64: 1, 128, 128>}, {transform_indices = @transform_12, window_bounds = array<i64: 1, 128, 1>}, {transform_indices = @transform_13, window_bounds = array<i64: 1, 64, 128>}, {transform_indices = @transform_14, window_bounds = array<i64: 1, 64, 128>}, {transform_indices = @transform_15, window_bounds = array<i64: 1, 64, 1>}, {transform_indices = @transform_16, window_bounds = array<i64: 1, 64, 128>}, {pipeline_mode = #tpu.pipeline_mode<synchronous>, transform_indices = @transform_17, window_bounds = array<i64: 128, 128>}]} {
    %c0_i32 = arith.constant 0 : i32
    %0 = arith.cmpi eq, %arg0, %c0_i32 : i32
    %c0_i32_0 = arith.constant 0 : i32
    %1 = arith.cmpi eq, %arg1, %c0_i32_0 : i32
    %2 = arith.andi %0, %1 : i1
    %3 = arith.extui %2 : i1 to i32
    %c0_i32_1 = arith.constant 0 : i32
    %4 = arith.cmpi ne, %3, %c0_i32_1 : i32
    scf.if %4 {
      %c0_47 = arith.constant 0 : index
      %c0_48 = arith.constant 0 : index
      %95 = vector.load %arg2[%c0_47, %c0_48] : memref<128x128xf32, #tpu.memory_space<vmem>>, vector<128x128xf32>
      %96 = arith.mulf %95, %95 : vector<128x128xf32>
      %cst_49 = arith.constant dense<0.000000e+00> : vector<128xf32>
      %97 = vector.multi_reduction <add>, %96, %cst_49 [1] : vector<128x128xf32> to vector<128xf32>
      %98 = vector.shape_cast %97 : vector<128xf32> to vector<128x1xf32>
      %cst_50 = arith.constant 1.000000e-24 : f32
      %99 = vector.broadcast %cst_50 : f32 to vector<128x1xf32>
      %100 = arith.maximumf %98, %99 : vector<128x1xf32>
      %101 = math.rsqrt %100 : vector<128x1xf32>
      %102 = vector.broadcast %101 : vector<128x1xf32> to vector<128x128xf32>
      %103 = arith.mulf %95, %102 : vector<128x128xf32>
      %c0_51 = arith.constant 0 : index
      %c0_52 = arith.constant 0 : index
      %104 = vector.load %arg20[%c0_51, %c0_52] : memref<128x128xf32, #tpu.memory_space<vmem>>, vector<128x128xf32>
      tpu.vector_store %arg20[%c0_51, %c0_52], %103 {strides = array<i32>} : memref<128x128xf32, #tpu.memory_space<vmem>>, vector<128x128xf32>,
      %105 = arith.truncf %103 : vector<128x128xf32> to vector<128x128xbf16>
      %c0_53 = arith.constant 0 : index
      %c0_54 = arith.constant 0 : index
      %106 = vector.load %arg21[%c0_53, %c0_54] : memref<128x128xbf16, #tpu.memory_space<vmem>>, vector<128x128xbf16>
      tpu.vector_store %arg21[%c0_53, %c0_54], %105 {strides = array<i32>} : memref<128x128xbf16, #tpu.memory_space<vmem>>, vector<128x128xbf16>,
      %c0_55 = arith.constant 0 : index
      %c0_56 = arith.constant 0 : index
      %107 = vector.load %arg3[%c0_55, %c0_56] : memref<128x128xf32, #tpu.memory_space<vmem>>, vector<128x128xf32>
      %c0_57 = arith.constant 0 : index
      %c0_58 = arith.constant 0 : index
      %108 = vector.load %arg22[%c0_57, %c0_58] : memref<128x128xf32, #tpu.memory_space<vmem>>, vector<128x128xf32>
      tpu.vector_store %arg22[%c0_57, %c0_58], %107 {strides = array<i32>} : memref<128x128xf32, #tpu.memory_space<vmem>>, vector<128x128xf32>,
      %109 = arith.truncf %107 : vector<128x128xf32> to vector<128x128xbf16>
      %c0_59 = arith.constant 0 : index
      %c0_60 = arith.constant 0 : index
      %110 = vector.load %arg23[%c0_59, %c0_60] : memref<128x128xbf16, #tpu.memory_space<vmem>>, vector<128x128xbf16>
      tpu.vector_store %arg23[%c0_59, %c0_60], %109 {strides = array<i32>} : memref<128x128xbf16, #tpu.memory_space<vmem>>, vector<128x128xbf16>,
    } else {
    }
    %c0_i32_2 = arith.constant 0 : i32
    %5 = arith.cmpi eq, %arg1, %c0_i32_2 : i32
    %6 = arith.extui %5 : i1 to i32
    %c0_i32_3 = arith.constant 0 : i32
    %7 = arith.cmpi ne, %6, %c0_i32_3 : i32
    scf.if %7 {
      %c0_47 = arith.constant 0 : index
      %c0_48 = arith.constant 0 : index
      %c0_49 = arith.constant 0 : index
      %95 = vector.load %arg13[%c0_47, %c0_48, %c0_49] : memref<1x128x128xbf16, #tpu.memory_space<vmem>>, vector<1x128x128xbf16>
      %96 = vector.shape_cast %95 : vector<1x128x128xbf16> to vector<128x128xbf16>
      %c0_50 = arith.constant 0 : index
      %c0_51 = arith.constant 0 : index
      %97 = vector.load %arg21[%c0_50, %c0_51] : memref<128x128xbf16, #tpu.memory_space<vmem>>, vector<128x128xbf16>
      %cst_52 = arith.constant dense<0.000000e+00> : vector<128x128xf32>
      %98 = tpu.matmul %96, %97, %cst_52 {dimension_numbers = #tpu.dot_dimension_numbers<[1], [0], [0], [1], [0, 0, 1, 1], [], []>} : vector<128x128xbf16>, vector<128x128xbf16>, vector<128x128xf32> -> vector<128x128xf32>
      %c0_53 = arith.constant 0 : index
      %c0_54 = arith.constant 0 : index
      %c0_55 = arith.constant 0 : index
      %99 = vector.load %arg14[%c0_53, %c0_54, %c0_55] : memref<1x128x1xf32, #tpu.memory_space<vmem>>, vector<1x128x1xf32>
      %100 = vector.shape_cast %99 : vector<1x128x1xf32> to vector<128x1xf32>
      %101 = vector.broadcast %100 : vector<128x1xf32> to vector<128x128xf32>
      %102 = arith.mulf %98, %101 : vector<128x128xf32>
      %c0_56 = arith.constant 0 : index
      %c0_57 = arith.constant 0 : index
      %103 = vector.load %arg4[%c0_56, %c0_57] : memref<128x384xf32, #tpu.memory_space<vmem>>, vector<128x384xf32>
      %104 = arith.truncf %102 : vector<128x128xf32> to vector<128x128xbf16>
      %c0_58 = arith.constant 0 : index
      %c0_59 = arith.constant 0 : index
      %105 = vector.load %arg5[%c0_58, %c0_59] : memref<128x384xbf16, #tpu.memory_space<vmem>>, vector<128x384xbf16>
      %cst_60 = arith.constant dense<0.000000e+00> : vector<128x384xf32>
      %106 = tpu.matmul %104, %105, %cst_60 {dimension_numbers = #tpu.dot_dimension_numbers<[1], [0], [0], [1], [0, 0, 1, 1], [], []>} : vector<128x128xbf16>, vector<128x384xbf16>, vector<128x384xf32> -> vector<128x384xf32>
      %107 = arith.addf %103, %106 : vector<128x384xf32>
      %c0_61 = arith.constant 0 : index
      %c0_62 = arith.constant 0 : index
      %108 = vector.load %arg23[%c0_61, %c0_62] : memref<128x128xbf16, #tpu.memory_space<vmem>>, vector<128x128xbf16>
      %c0_63 = arith.constant 0 : index
      %c0_64 = arith.constant 0 : index
      %109 = vector.load %arg6[%c0_63, %c0_64] : memref<128x384xbf16, #tpu.memory_space<vmem>>, vector<128x384xbf16>
      %cst_65 = arith.constant dense<0.000000e+00> : vector<128x384xf32>
      %110 = tpu.matmul %108, %109, %cst_65 {dimension_numbers = #tpu.dot_dimension_numbers<[1], [0], [0], [1], [0, 0, 1, 1], [], []>} : vector<128x128xbf16>, vector<128x384xbf16>, vector<128x384xf32> -> vector<128x384xf32>
      %c0_66 = arith.constant 0 : index
      %c0_67 = arith.constant 0 : index
      %111 = vector.load %arg7[%c0_66, %c0_67] : memref<1x384xf32, #tpu.memory_space<vmem>>, vector<1x384xf32>
      %112 = vector.broadcast %111 : vector<1x384xf32> to vector<128x384xf32>
      %113 = arith.addf %110, %112 : vector<128x384xf32>
      %c0_68 = arith.constant 0 : index
      %c0_69 = arith.constant 0 : index
      %114 = vector.load %arg22[%c0_68, %c0_69] : memref<128x128xf32, #tpu.memory_space<vmem>>, vector<128x128xf32>
      %115 = vector.extract_strided_slice %107 {offsets = [0, 0], sizes = [128, 128], strides = [1, 1]} : vector<128x384xf32> to vector<128x128xf32>
      %116 = vector.extract_strided_slice %113 {offsets = [0, 0], sizes = [128, 128], strides = [1, 1]} : vector<128x384xf32> to vector<128x128xf32>
      %117 = arith.addf %115, %116 : vector<128x128xf32>
      %118 = arith.negf %117 : vector<128x128xf32>
      %119 = math.exp %118 : vector<128x128xf32>
      %cst_70 = arith.constant 1.000000e+00 : f32
      %120 = vector.broadcast %cst_70 : f32 to vector<128x128xf32>
      %121 = arith.addf %120, %119 : vector<128x128xf32>
      %122 = arith.divf %120, %121 : vector<128x128xf32>
      %123 = vector.extract_strided_slice %107 {offsets = [0, 128], sizes = [128, 128], strides = [1, 1]} : vector<128x384xf32> to vector<128x128xf32>
      %124 = vector.extract_strided_slice %113 {offsets = [0, 128], sizes = [128, 128], strides = [1, 1]} : vector<128x384xf32> to vector<128x128xf32>
      %125 = arith.addf %123, %124 : vector<128x128xf32>
      %126 = arith.negf %125 : vector<128x128xf32>
      %127 = math.exp %126 : vector<128x128xf32>
      %cst_71 = arith.constant 1.000000e+00 : f32
      %128 = vector.broadcast %cst_71 : f32 to vector<128x128xf32>
      %129 = arith.addf %128, %127 : vector<128x128xf32>
      %130 = arith.divf %128, %129 : vector<128x128xf32>
      %131 = vector.extract_strided_slice %107 {offsets = [0, 256], sizes = [128, 128], strides = [1, 1]} : vector<128x384xf32> to vector<128x128xf32>
      %132 = vector.extract_strided_slice %113 {offsets = [0, 256], sizes = [128, 128], strides = [1, 1]} : vector<128x384xf32> to vector<128x128xf32>
      %133 = arith.mulf %122, %132 : vector<128x128xf32>
      %134 = arith.addf %131, %133 : vector<128x128xf32>
      %135 = math.tanh %134 : vector<128x128xf32>
      %cst_72 = arith.constant 1.000000e+00 : f32
      %136 = vector.broadcast %cst_72 : f32 to vector<128x128xf32>
      %137 = arith.subf %136, %130 : vector<128x128xf32>
      %138 = arith.mulf %137, %135 : vector<128x128xf32>
      %139 = arith.mulf %130, %114 : vector<128x128xf32>
      %140 = arith.addf %138, %139 : vector<128x128xf32>
      %141 = arith.mulf %140, %140 : vector<128x128xf32>
      %cst_73 = arith.constant dense<0.000000e+00> : vector<128xf32>
      %142 = vector.multi_reduction <add>, %141, %cst_73 [1] : vector<128x128xf32> to vector<128xf32>
      %143 = vector.shape_cast %142 : vector<128xf32> to vector<128x1xf32>
      %cst_74 = arith.constant 1.000000e-24 : f32
      %144 = vector.broadcast %cst_74 : f32 to vector<128x1xf32>
      %145 = arith.maximumf %143, %144 : vector<128x1xf32>
      %146 = math.rsqrt %145 : vector<128x1xf32>
      %147 = vector.broadcast %146 : vector<128x1xf32> to vector<128x128xf32>
      %148 = arith.mulf %140, %147 : vector<128x128xf32>
      %c0_75 = arith.constant 0 : index
      %c0_76 = arith.constant 0 : index
      %149 = vector.load %arg22[%c0_75, %c0_76] : memref<128x128xf32, #tpu.memory_space<vmem>>, vector<128x128xf32>
      tpu.vector_store %arg22[%c0_75, %c0_76], %148 {strides = array<i32>} : memref<128x128xf32, #tpu.memory_space<vmem>>, vector<128x128xf32>,
      %150 = arith.truncf %148 : vector<128x128xf32> to vector<128x128xbf16>
      %c0_77 = arith.constant 0 : index
      %c0_78 = arith.constant 0 : index
      %151 = vector.load %arg23[%c0_77, %c0_78] : memref<128x128xbf16, #tpu.memory_space<vmem>>, vector<128x128xbf16>
      tpu.vector_store %arg23[%c0_77, %c0_78], %150 {strides = array<i32>} : memref<128x128xbf16, #tpu.memory_space<vmem>>, vector<128x128xbf16>,
      %c0_79 = arith.constant 0 : index
      %c0_80 = arith.constant 0 : index
      %152 = vector.load %arg21[%c0_79, %c0_80] : memref<128x128xbf16, #tpu.memory_space<vmem>>, vector<128x128xbf16>
      %c0_81 = arith.constant 0 : index
      %c0_82 = arith.constant 0 : index
      %153 = vector.load %arg12[%c0_81, %c0_82] : memref<128x128xbf16, #tpu.memory_space<vmem>>, vector<128x128xbf16>
      %cst_83 = arith.constant dense<0.000000e+00> : vector<128x128xf32>
      %154 = tpu.matmul %152, %153, %cst_83 {dimension_numbers = #tpu.dot_dimension_numbers<[1], [0], [0], [1], [0, 0, 1, 1], [], []>} : vector<128x128xbf16>, vector<128x128xbf16>, vector<128x128xf32> -> vector<128x128xf32>
      %155 = arith.truncf %154 : vector<128x128xf32> to vector<128x128xbf16>
      %c0_84 = arith.constant 0 : index
      %c0_85 = arith.constant 0 : index
      %156 = vector.load %arg24[%c0_84, %c0_85] : memref<128x128xbf16, #tpu.memory_space<vmem>>, vector<128x128xbf16>
      tpu.vector_store %arg24[%c0_84, %c0_85], %155 {strides = array<i32>} : memref<128x128xbf16, #tpu.memory_space<vmem>>, vector<128x128xbf16>,
      %c0_86 = arith.constant 0 : index
      %c0_87 = arith.constant 0 : index
      %157 = vector.load %arg23[%c0_86, %c0_87] : memref<128x128xbf16, #tpu.memory_space<vmem>>, vector<128x128xbf16>
      %c0_88 = arith.constant 0 : index
      %c0_89 = arith.constant 0 : index
      %158 = vector.load %arg12[%c0_88, %c0_89] : memref<128x128xbf16, #tpu.memory_space<vmem>>, vector<128x128xbf16>
      %cst_90 = arith.constant dense<0.000000e+00> : vector<128x128xf32>
      %159 = tpu.matmul %157, %158, %cst_90 {dimension_numbers = #tpu.dot_dimension_numbers<[1], [0], [0], [1], [0, 0, 1, 1], [], []>} : vector<128x128xbf16>, vector<128x128xbf16>, vector<128x128xf32> -> vector<128x128xf32>
      %160 = arith.truncf %159 : vector<128x128xf32> to vector<128x128xbf16>
      %c0_91 = arith.constant 0 : index
      %c0_92 = arith.constant 0 : index
      %161 = vector.load %arg25[%c0_91, %c0_92] : memref<128x128xbf16, #tpu.memory_space<vmem>>, vector<128x128xbf16>
      tpu.vector_store %arg25[%c0_91, %c0_92], %160 {strides = array<i32>} : memref<128x128xbf16, #tpu.memory_space<vmem>>, vector<128x128xbf16>,
    } else {
    }
    %c0 = arith.constant 0 : index
    %c0_4 = arith.constant 0 : index
    %c0_5 = arith.constant 0 : index
    %8 = vector.load %arg15[%c0, %c0_4, %c0_5] : memref<1x64x128xbf16, #tpu.memory_space<vmem>>, vector<1x64x128xbf16>
    %9 = vector.shape_cast %8 : vector<1x64x128xbf16> to vector<64x128xbf16>
    %c0_6 = arith.constant 0 : index
    %c0_7 = arith.constant 0 : index
    %10 = vector.load %arg24[%c0_6, %c0_7] : memref<128x128xbf16, #tpu.memory_space<vmem>>, vector<128x128xbf16>
    %cst = arith.constant dense<0.000000e+00> : vector<64x128xf32>
    %11 = tpu.matmul %9, %10, %cst {dimension_numbers = #tpu.dot_dimension_numbers<[1], [0], [0], [1], [0, 0, 1, 1], [], []>} : vector<64x128xbf16>, vector<128x128xbf16>, vector<64x128xf32> -> vector<64x128xf32>
    %c0_8 = arith.constant 0 : index
    %c0_9 = arith.constant 0 : index
    %c0_10 = arith.constant 0 : index
    %12 = vector.load %arg16[%c0_8, %c0_9, %c0_10] : memref<1x64x128xbf16, #tpu.memory_space<vmem>>, vector<1x64x128xbf16>
    %13 = vector.shape_cast %12 : vector<1x64x128xbf16> to vector<64x128xbf16>
    %c0_11 = arith.constant 0 : index
    %c0_12 = arith.constant 0 : index
    %14 = vector.load %arg25[%c0_11, %c0_12] : memref<128x128xbf16, #tpu.memory_space<vmem>>, vector<128x128xbf16>
    %cst_13 = arith.constant dense<0.000000e+00> : vector<64x128xf32>
    %15 = tpu.matmul %13, %14, %cst_13 {dimension_numbers = #tpu.dot_dimension_numbers<[1], [0], [0], [1], [0, 0, 1, 1], [], []>} : vector<64x128xbf16>, vector<128x128xbf16>, vector<64x128xf32> -> vector<64x128xf32>
    %16 = arith.addf %11, %15 : vector<64x128xf32>
    %c0_14 = arith.constant 0 : index
    %c0_15 = arith.constant 0 : index
    %c0_16 = arith.constant 0 : index
    %17 = vector.load %arg17[%c0_14, %c0_15, %c0_16] : memref<1x64x1xf32, #tpu.memory_space<vmem>>, vector<1x64x1xf32>
    %18 = vector.shape_cast %17 : vector<1x64x1xf32> to vector<64x1xf32>
    %19 = vector.broadcast %18 : vector<64x1xf32> to vector<64x128xf32>
    %20 = arith.mulf %16, %19 : vector<64x128xf32>
    %cst_17 = arith.constant 0.000000e+00 : f32
    %21 = vector.broadcast %cst_17 : f32 to vector<64x128xf32>
    %22 = arith.cmpf oge, %20, %21 : vector<64x128xf32>
    %cst_18 = arith.constant 0.229166672 : f32
    %23 = vector.broadcast %cst_18 : f32 to vector<64x128xf32>
    %24 = arith.mulf %20, %23 : vector<64x128xf32>
    %25 = arith.select %22, %20, %24 : vector<64x128xi1>, vector<64x128xf32>
    %26 = arith.mulf %25, %25 : vector<64x128xf32>
    %cst_19 = arith.constant dense<0.000000e+00> : vector<64xf32>
    %27 = vector.multi_reduction <add>, %26, %cst_19 [1] : vector<64x128xf32> to vector<64xf32>
    %28 = vector.shape_cast %27 : vector<64xf32> to vector<64x1xf32>
    %cst_20 = arith.constant 1.000000e-24 : f32
    %29 = vector.broadcast %cst_20 : f32 to vector<64x1xf32>
    %30 = arith.maximumf %28, %29 : vector<64x1xf32>
    %31 = math.rsqrt %30 : vector<64x1xf32>
    %32 = vector.broadcast %31 : vector<64x1xf32> to vector<64x128xf32>
    %33 = arith.mulf %25, %32 : vector<64x128xf32>
    %c64_i32 = arith.constant 64 : i32
    %34 = arith.muli %arg1, %c64_i32 : i32
    %35 = tpu.assume_multiple %34, 64 : i32
    %36 = arith.index_cast %35 : i32 to index
    %c0_21 = arith.constant 0 : index
    %37 = vector.load %arg20[%36, %c0_21] : memref<128x128xf32, #tpu.memory_space<vmem>>, vector<64x128xf32>
    %38 = arith.truncf %33 : vector<64x128xf32> to vector<64x128xbf16>
    %c0_22 = arith.constant 0 : index
    %c0_23 = arith.constant 0 : index
    %39 = vector.load %arg8[%c0_22, %c0_23] : memref<128x384xbf16, #tpu.memory_space<vmem>>, vector<128x384xbf16>
    %cst_24 = arith.constant dense<0.000000e+00> : vector<64x384xf32>
    %40 = tpu.matmul %38, %39, %cst_24 {dimension_numbers = #tpu.dot_dimension_numbers<[1], [0], [0], [1], [0, 0, 1, 1], [], []>} : vector<64x128xbf16>, vector<128x384xbf16>, vector<64x384xf32> -> vector<64x384xf32>
    %c0_25 = arith.constant 0 : index
    %c0_26 = arith.constant 0 : index
    %41 = vector.load %arg9[%c0_25, %c0_26] : memref<1x384xf32, #tpu.memory_space<vmem>>, vector<1x384xf32>
    %42 = vector.broadcast %41 : vector<1x384xf32> to vector<64x384xf32>
    %43 = arith.addf %40, %42 : vector<64x384xf32>
    %44 = arith.index_cast %35 : i32 to index
    %c0_27 = arith.constant 0 : index
    %45 = vector.load %arg21[%44, %c0_27] : memref<128x128xbf16, #tpu.memory_space<vmem>>, vector<64x128xbf16>
    %c0_28 = arith.constant 0 : index
    %c0_29 = arith.constant 0 : index
    %46 = vector.load %arg10[%c0_28, %c0_29] : memref<128x384xbf16, #tpu.memory_space<vmem>>, vector<128x384xbf16>
    %cst_30 = arith.constant dense<0.000000e+00> : vector<64x384xf32>
    %47 = tpu.matmul %45, %46, %cst_30 {dimension_numbers = #tpu.dot_dimension_numbers<[1], [0], [0], [1], [0, 0, 1, 1], [], []>} : vector<64x128xbf16>, vector<128x384xbf16>, vector<64x384xf32> -> vector<64x384xf32>
    %c0_31 = arith.constant 0 : index
    %c0_32 = arith.constant 0 : index
    %48 = vector.load %arg11[%c0_31, %c0_32] : memref<1x384xf32, #tpu.memory_space<vmem>>, vector<1x384xf32>
    %49 = vector.broadcast %48 : vector<1x384xf32> to vector<64x384xf32>
    %50 = arith.addf %47, %49 : vector<64x384xf32>
    %51 = vector.extract_strided_slice %43 {offsets = [0, 0], sizes = [64, 128], strides = [1, 1]} : vector<64x384xf32> to vector<64x128xf32>
    %52 = vector.extract_strided_slice %50 {offsets = [0, 0], sizes = [64, 128], strides = [1, 1]} : vector<64x384xf32> to vector<64x128xf32>
    %53 = arith.addf %51, %52 : vector<64x128xf32>
    %54 = arith.negf %53 : vector<64x128xf32>
    %55 = math.exp %54 : vector<64x128xf32>
    %cst_33 = arith.constant 1.000000e+00 : f32
    %56 = vector.broadcast %cst_33 : f32 to vector<64x128xf32>
    %57 = arith.addf %56, %55 : vector<64x128xf32>
    %58 = arith.divf %56, %57 : vector<64x128xf32>
    %59 = vector.extract_strided_slice %43 {offsets = [0, 128], sizes = [64, 128], strides = [1, 1]} : vector<64x384xf32> to vector<64x128xf32>
    %60 = vector.extract_strided_slice %50 {offsets = [0, 128], sizes = [64, 128], strides = [1, 1]} : vector<64x384xf32> to vector<64x128xf32>
    %61 = arith.addf %59, %60 : vector<64x128xf32>
    %62 = arith.negf %61 : vector<64x128xf32>
    %63 = math.exp %62 : vector<64x128xf32>
    %cst_34 = arith.constant 1.000000e+00 : f32
    %64 = vector.broadcast %cst_34 : f32 to vector<64x128xf32>
    %65 = arith.addf %64, %63 : vector<64x128xf32>
    %66 = arith.divf %64, %65 : vector<64x128xf32>
    %67 = vector.extract_strided_slice %43 {offsets = [0, 256], sizes = [64, 128], strides = [1, 1]} : vector<64x384xf32> to vector<64x128xf32>
    %68 = vector.extract_strided_slice %50 {offsets = [0, 256], sizes = [64, 128], strides = [1, 1]} : vector<64x384xf32> to vector<64x128xf32>
    %69 = arith.mulf %58, %68 : vector<64x128xf32>
    %70 = arith.addf %67, %69 : vector<64x128xf32>
    %71 = math.tanh %70 : vector<64x128xf32>
    %cst_35 = arith.constant 1.000000e+00 : f32
    %72 = vector.broadcast %cst_35 : f32 to vector<64x128xf32>
    %73 = arith.subf %72, %66 : vector<64x128xf32>
    %74 = arith.mulf %73, %71 : vector<64x128xf32>
    %75 = arith.mulf %66, %37 : vector<64x128xf32>
    %76 = arith.addf %74, %75 : vector<64x128xf32>
    %77 = arith.mulf %76, %76 : vector<64x128xf32>
    %cst_36 = arith.constant dense<0.000000e+00> : vector<64xf32>
    %78 = vector.multi_reduction <add>, %77, %cst_36 [1] : vector<64x128xf32> to vector<64xf32>
    %79 = vector.shape_cast %78 : vector<64xf32> to vector<64x1xf32>
    %cst_37 = arith.constant 1.000000e-24 : f32
    %80 = vector.broadcast %cst_37 : f32 to vector<64x1xf32>
    %81 = arith.maximumf %79, %80 : vector<64x1xf32>
    %82 = math.rsqrt %81 : vector<64x1xf32>
    %83 = vector.broadcast %82 : vector<64x1xf32> to vector<64x128xf32>
    %84 = arith.mulf %76, %83 : vector<64x128xf32>
    %85 = arith.index_cast %35 : i32 to index
    %c0_38 = arith.constant 0 : index
    %86 = vector.load %arg20[%85, %c0_38] : memref<128x128xf32, #tpu.memory_space<vmem>>, vector<64x128xf32>
    tpu.vector_store %arg20[%85, %c0_38], %84 {strides = array<i32>} : memref<128x128xf32, #tpu.memory_space<vmem>>, vector<64x128xf32>,
    %87 = arith.truncf %84 : vector<64x128xf32> to vector<64x128xbf16>
    %88 = arith.index_cast %35 : i32 to index
    %c0_39 = arith.constant 0 : index
    %89 = vector.load %arg21[%88, %c0_39] : memref<128x128xbf16, #tpu.memory_space<vmem>>, vector<64x128xbf16>
    tpu.vector_store %arg21[%88, %c0_39], %87 {strides = array<i32>} : memref<128x128xbf16, #tpu.memory_space<vmem>>, vector<64x128xbf16>,
    %c0_40 = arith.constant 0 : index
    %c0_41 = arith.constant 0 : index
    %c0_42 = arith.constant 0 : index
    %90 = vector.load %arg18[%c0_40, %c0_41, %c0_42] : memref<1x64x128xf32, #tpu.memory_space<vmem>>, vector<1x64x128xf32>
    %91 = vector.shape_cast %90 : vector<1x64x128xf32> to vector<64x128xf32>
    %92 = vector.shape_cast %84 : vector<64x128xf32> to vector<1x64x128xf32>
    tpu.vector_store %arg18[%c0_40, %c0_41, %c0_42], %92 {strides = array<i32>} : memref<1x64x128xf32, #tpu.memory_space<vmem>>, vector<1x64x128xf32>,
    %c0_43 = arith.constant 0 : index
    %c0_44 = arith.constant 0 : index
    %93 = vector.load %arg22[%c0_43, %c0_44] : memref<128x128xf32, #tpu.memory_space<vmem>>, vector<128x128xf32>
    %c0_45 = arith.constant 0 : index
    %c0_46 = arith.constant 0 : index
    %94 = vector.load %arg19[%c0_45, %c0_46] : memref<128x128xf32, #tpu.memory_space<vmem>>, vector<128x128xf32>
    tpu.vector_store %arg19[%c0_45, %c0_46], %93 {strides = array<i32>} : memref<128x128xf32, #tpu.memory_space<vmem>>, vector<128x128xf32>,
    return
  }
  func.func @transform_0(%arg0: i32, %arg1: i32) -> (i32, i32) {
    %c0_i32 = arith.constant 0 : i32
    %c0_i32_0 = arith.constant 0 : i32
    %c0_i32_1 = arith.constant 0 : i32
    return %c0_i32, %c0_i32_0 : i32, i32
  }
  func.func @transform_1(%arg0: i32, %arg1: i32) -> (i32, i32) {
    %c0_i32 = arith.constant 0 : i32
    %c0_i32_0 = arith.constant 0 : i32
    %c0_i32_1 = arith.constant 0 : i32
    return %c0_i32, %c0_i32_0 : i32, i32
  }
  func.func @transform_2(%arg0: i32, %arg1: i32) -> (i32, i32) {
    %c0_i32 = arith.constant 0 : i32
    %c0_i32_0 = arith.constant 0 : i32
    %c0_i32_1 = arith.constant 0 : i32
    return %c0_i32, %c0_i32_0 : i32, i32
  }
  func.func @transform_3(%arg0: i32, %arg1: i32) -> (i32, i32) {
    %c0_i32 = arith.constant 0 : i32
    %c0_i32_0 = arith.constant 0 : i32
    %c0_i32_1 = arith.constant 0 : i32
    return %c0_i32, %c0_i32_0 : i32, i32
  }
  func.func @transform_4(%arg0: i32, %arg1: i32) -> (i32, i32) {
    %c0_i32 = arith.constant 0 : i32
    %c0_i32_0 = arith.constant 0 : i32
    %c0_i32_1 = arith.constant 0 : i32
    return %c0_i32, %c0_i32_0 : i32, i32
  }
  func.func @transform_5(%arg0: i32, %arg1: i32) -> (i32, i32) {
    %c0_i32 = arith.constant 0 : i32
    %c0_i32_0 = arith.constant 0 : i32
    %c0_i32_1 = arith.constant 0 : i32
    return %c0_i32, %c0_i32_0 : i32, i32
  }
  func.func @transform_6(%arg0: i32, %arg1: i32) -> (i32, i32) {
    %c0_i32 = arith.constant 0 : i32
    %c0_i32_0 = arith.constant 0 : i32
    %c0_i32_1 = arith.constant 0 : i32
    return %c0_i32, %c0_i32_0 : i32, i32
  }
  func.func @transform_7(%arg0: i32, %arg1: i32) -> (i32, i32) {
    %c0_i32 = arith.constant 0 : i32
    %c0_i32_0 = arith.constant 0 : i32
    %c0_i32_1 = arith.constant 0 : i32
    return %c0_i32, %c0_i32_0 : i32, i32
  }
  func.func @transform_8(%arg0: i32, %arg1: i32) -> (i32, i32) {
    %c0_i32 = arith.constant 0 : i32
    %c0_i32_0 = arith.constant 0 : i32
    %c0_i32_1 = arith.constant 0 : i32
    return %c0_i32, %c0_i32_0 : i32, i32
  }
  func.func @transform_9(%arg0: i32, %arg1: i32) -> (i32, i32) {
    %c0_i32 = arith.constant 0 : i32
    %c0_i32_0 = arith.constant 0 : i32
    %c0_i32_1 = arith.constant 0 : i32
    return %c0_i32, %c0_i32_0 : i32, i32
  }
  func.func @transform_10(%arg0: i32, %arg1: i32) -> (i32, i32) {
    %c0_i32 = arith.constant 0 : i32
    %c0_i32_0 = arith.constant 0 : i32
    %c0_i32_1 = arith.constant 0 : i32
    return %c0_i32, %c0_i32_0 : i32, i32
  }
  func.func @transform_11(%arg0: i32, %arg1: i32) -> (i32, i32, i32) {
    %c0_i32 = arith.constant 0 : i32
    %c0_i32_0 = arith.constant 0 : i32
    %c0_i32_1 = arith.constant 0 : i32
    return %arg0, %c0_i32, %c0_i32_0 : i32, i32, i32
  }
  func.func @transform_12(%arg0: i32, %arg1: i32) -> (i32, i32, i32) {
    %c0_i32 = arith.constant 0 : i32
    %c0_i32_0 = arith.constant 0 : i32
    %c0_i32_1 = arith.constant 0 : i32
    return %arg0, %c0_i32, %c0_i32_0 : i32, i32, i32
  }
  func.func @transform_13(%arg0: i32, %arg1: i32) -> (i32, i32, i32) {
    %c0_i32 = arith.constant 0 : i32
    %c0_i32_0 = arith.constant 0 : i32
    return %arg0, %arg1, %c0_i32 : i32, i32, i32
  }
  func.func @transform_14(%arg0: i32, %arg1: i32) -> (i32, i32, i32) {
    %c0_i32 = arith.constant 0 : i32
    %c0_i32_0 = arith.constant 0 : i32
    return %arg0, %arg1, %c0_i32 : i32, i32, i32
  }
  func.func @transform_15(%arg0: i32, %arg1: i32) -> (i32, i32, i32) {
    %c0_i32 = arith.constant 0 : i32
    %c0_i32_0 = arith.constant 0 : i32
    return %arg0, %arg1, %c0_i32 : i32, i32, i32
  }
  func.func @transform_16(%arg0: i32, %arg1: i32) -> (i32, i32, i32) {
    %c0_i32 = arith.constant 0 : i32
    %c0_i32_0 = arith.constant 0 : i32
    return %arg0, %arg1, %c0_i32 : i32, i32, i32
  }
  func.func @transform_17(%arg0: i32, %arg1: i32) -> (i32, i32) {
    %c0_i32 = arith.constant 0 : i32
    %c0_i32_0 = arith.constant 0 : i32
    %c0_i32_1 = arith.constant 0 : i32
    return %c0_i32, %c0_i32_0 : i32, i32
  }
}

</mosaic_0001>

<bundles_post_ra>
// kernel: tpu_custom_call.1
= control target key start
LH: loop header
LB: loop body
LE: loop exit
PB: predicated region body
PF: predicated region fallthrough
CT: control target
= control target key end

     0   :  { %s8069_s0 = inlined_call_operand.hbm [shape: f32[128,128], index: 0, kind: input, shape index: {}]   ;;  %s8070_s1 = inlined_call_operand.hbm [shape: f32[128,128], index: 1, kind: input, shape index: {}]   ;;  %s8071_s2 = inlined_call_operand.vmem [shape: f32[128,384], index: 2, kind: input, shape index: {}]   ;;  %s8072_s3 = inlined_call_operand.vmem [shape: bf16[128,384], index: 3, kind: input, shape index: {}]   ;;  %s8073_s4 = inlined_call_operand.vmem [shape: bf16[128,384], index: 4, kind: input, shape index: {}]   ;;  %s8074_s5 = inlined_call_operand.vmem [shape: f32[1,384], index: 5, kind: input, shape index: {}]   ;;  %s8075_s6 = inlined_call_operand.hbm [shape: bf16[128,384], index: 6, kind: input, shape index: {}]   ;;  %s8076_s7 = inlined_call_operand.vmem [shape: f32[1,384], index: 7, kind: input, shape index: {}]   ;;  %s8077_s8 = inlined_call_operand.hbm [shape: bf16[128,384], index: 8, kind: input, shape index: {}]   ;;  %s8078_s9 = inlined_call_operand.vmem [shape: f32[1,384], index: 9, kind: input, shape index: {}]   ;;  %s8079_s10 = inlined_call_operand.hbm [shape: bf16[128,128], index: 10, kind: input, shape index: {}]   ;;  %s8080_s11 = inlined_call_operand.hbm [shape: bf16[3,128,128], index: 11, kind: input, shape index: {}]   ;;  %s8081_s12 = inlined_call_operand.vmem [shape: f32[3,128,1], index: 12, kind: input, shape index: {}]   ;;  %s8082_s13 = inlined_call_operand.hbm [shape: bf16[3,128,128], index: 13, kind: input, shape index: {}]   ;;  %s8083_s14 = inlined_call_operand.hbm [shape: bf16[3,128,128], index: 14, kind: input, shape index: {}]   ;;  %s8084_s15 = inlined_call_operand.vmem [shape: f32[3,128,1], index: 15, kind: input, shape index: {}]   ;;  %s8085_s16 = inlined_call_operand.hbm [shape: f32[3,128,128], index: 16, kind: output, shape index: {0}]   ;;  %s8086_s17 = inlined_call_operand.hbm [shape: f32[128,128], index: 17, kind: output, shape index: {1}]  }
   0x1   :  { %8128 = sst [smem:[#allocation48_spill]] %s8069_s0 }
   0x2   :  { %8129 = sst [smem:[#allocation49_spill]] %s8070_s1 }
   0x3   :  { %8130 = sst [smem:[#allocation50_spill]] %s8071_s2 }
   0x4   :  { %8131 = sst [smem:[#allocation51_spill]] %s8072_s3 }
   0x5   :  { %8132 = sst [smem:[#allocation52_spill]] %s8073_s4 }
   0x6   :  { %8133 = sst [smem:[#allocation53_spill]] %s8074_s5 }
   0x7   :  { %8134 = sst [smem:[#allocation54_spill]] %s8075_s6 }
   0x8   :  { %8135 = sst [smem:[#allocation55_spill]] %s8076_s7 }
   0x9   :  { %8136 = sst [smem:[#allocation56_spill]] %s8077_s8 }
   0xa   :  { %8137 = sst [smem:[#allocation57_spill]] %s8078_s9 }
   0xb   :  { %8138 = sst [smem:[#allocation58_spill]] %s8079_s10 }
   0xc   :  { %8139 = sst [smem:[#allocation59_spill]] %s8080_s11 }
   0xd   :  { %8140 = sst [smem:[#allocation60_spill]] %s8081_s12 }
   0xe   :  { %8141 = sst [smem:[#allocation61_spill]] %s8082_s13 }
   0xf   :  { %8142 = sst [smem:[#allocation62_spill]] %s8083_s14 }
  0x10   :  { %8143 = sst [smem:[#allocation63_spill]] %s8084_s15 }
  0x11   :  { %8144 = sst [smem:[#allocation64_spill]] %s8085_s16 }
  0x12   :  { %8145 = sst [smem:[#allocation65_spill]] %s8086_s17 }
  0x13   :  { %23 = vsyncpa [#allocation9], 0 }
  0x14   :  { %24 = vsyncpa [#allocation12], 0 }
  0x15   :  { %25 = vsyncpa [#allocation15], 0 }
  0x16   :  { %26 = vsyncpa [#allocation18], 0 }
  0x17   :  { %28 = vsyncpa [#allocation18 + $0x1], 0 }
  0x18   :  { %29 = vsyncpa [#allocation21], 0 }
  0x19   :  { %31 = vsyncpa [#allocation21 + $0x1], 0 }
  0x1a   :  { %32 = vsyncpa [#allocation10], 0 }
  0x1b   :  { %34 = vsyncpa [#allocation10 + $0x1], 0 }
  0x1c   :  { %35 = vsyncpa [#allocation24], 0  ;;  %s6491_s24 = smov 0   ;;  %s6493_s25 = smov 0  }
  0x1d   :  { %s6495_s26 = smov 0   ;;  %s6497_s27 = smov 0  }
  0x1e   :  { %s6499_s28 = smov 0   ;;  %s6501_s29 = smov 0  }
  0x1f   :  { %s6503_s0 = smov 0   ;;  %s6505_s30 = smov 0  }
  0x20   :  { %s6507_s18 = smov 0   ;;  %s6509_s19 = smov 0  }
  0x21   :  { %s6511_s1 = smov 0  }
  0x22 LB: > { %8146 = sst [smem:[#allocation33_spill]] %s6355_s28  ;;  %s6547_s20 = sadd.s32 4294967295, %s6379_s1   ;;  %s6379_s1 = sphi %s6511_s1, %s41_s1   ;;  %s6375_s19 = sphi %s6509_s19, %s8236_s19   ;;  %s6371_s18 = sphi %s6507_s18, %s8235_s18   ;;  %s6367_s30 = sphi %s6505_s30, %s8234_s30   ;;  %s6363_s0 = sphi %s6503_s0, %s8233_s0   ;;  %s6359_s29 = sphi %s6501_s29, %s8232_s29   ;;  %s6355_s28 = sphi %s6499_s28, %s8231_s28   ;;  %s6351_s27 = sphi %s6497_s27, %s8230_s27   ;;  %s6347_s26 = sphi %s6495_s26, %s8239_s26   ;;  %s6343_s25 = sphi %s6493_s25, %s8238_s25   ;;  %s6339_s24 = sphi %s6491_s24, %s8237_s24  }
  0x23   : > { %8147 = sst [smem:[#allocation34_spill]] %s6359_s29  ;;  %p4523_p0 = scmp.ge.s32.totalorder %s6379_s1, 1 }
  0x24   : > { %8148 = sst [smem:[#allocation35_spill]] %s6363_s0  ;;  %p8094_p1 = scmp.eq.s32.totalorder %s6547_s20, 0 }
  0x25   : > { %8149 = sst [smem:[#allocation36_spill]] %s6367_s30  ;;  %p474_p2 = scmp.lt.s32.totalorder %s6379_s1, 7 }
  0x26   : > { %8150 = sst [smem:[#allocation37_spill]] %s6371_s18  ;;  %s6381_s22 = smov [#allocation11]  }
  0x27   : > { %8151 = sst [smem:[#allocation38_spill]] %s6375_s19  ;;  %p6552_p3 = pnand %p4523_p0, %p474_p2 }
  0x28   : > { %s499_s23 = sshll.u32 %s6381_s22, 4  ;;  %s6382_s17 = smov [#allocation14]   ;;  %s500_s23 = int_to_ptr.vmem [resolvable:$true] %s499_s23 }
  0x29   : > { %s8152_s21 = scalar_select %p6552_p3, 1, 0 }
  0x2a   : > { %p5329_p4 = pneg %p6552_p3  ;;  %s540_s7 = sshll.u32 %s6382_s17, 4  ;;  %s6564_s7 = int_to_ptr.vmem [resolvable:$true] %s540_s7 }
  0x2b   : > { %8153 = sst [smem:[#allocation39_spill]] %s8152_s21  ;;  %s8155_s5 = sld [smem:[#allocation49_spill]] }
  0x2c   : > { %p6560_p5 = pnand %p5329_p4, %p8094_p1 }
  0x2e   : > { %s8154_s16 = scalar_select %p6560_p5, 1, 0 }
  0x2f   : > { %p6574_p7 = pneg %p6560_p5 }
  0x31   : > { %s5977_s4 = scalar_lea.hbm %s8155_s5, 2048 }
  0x32   : > { %p5978_p6 = scmp.ne.s32.totalorder %s8155_s5, %s5977_s4  ;;  %p5984_p10 = scmp.lt.u32.totalorder %s5977_s4, %s8155_s5 }
  0x34   : > { %p5980_p8 = pnand %p6574_p7, %p5978_p6 }
  0x36   : > { %p5981_p9 = pneg %p5980_p8 }
  0x38   : > { %p5986_p11 = pnand %p5984_p10, %p5981_p9 }
  0x3a   : > { %5989 = shalt.err (!%p5986_p11)
}
  0x3b   : > { %s5990_s2 = scalar_lea.vmem %s500_s23, 2048  ;;  %p5998_p2 = scmp.lt.s32.totalorder %s500_s23, %s500_s23 }
  0x3c   : > { %p5991_p12 = scmp.ne.s32.totalorder %s500_s23, %s5990_s2  ;;  %p5999_p4 = scmp.lt.s32.totalorder %s5990_s2, %s5990_s2 }
  0x3e   : > { %p5993_p13 = pnand %p5991_p12, %p6574_p7  ;;  %p6000_p1 = por %p5999_p4, %p5998_p2 }
  0x40   : > { %p5994_p0 = pneg %p5993_p13 }
  0x42   : > { %p6001_p3 = pnand %p6000_p1, %p5994_p0 }
  0x44   : > { %6004 = shalt.err (!%p6001_p3)
}
  0x45   : > { %s8101_s3 = smov 128   ;;  %s8109_s9 = smov 8  }
  0x46   : > { %5335 = dma.hbm_to_vmem [thread:$0]  (!%p6560_p5), %s8155_s5, 2048, %s500_s23, [#allocation12], %s8101_s3, %s8101_s3, %s8109_s9  }
  0x47   : > { %s8157_s8 = sld [smem:[#allocation56_spill]] }
  0x4d   : > { %s6005_s0 = scalar_lea.hbm %s8157_s8, 3072 }
  0x4e   : > { %p6006_p1 = scmp.ne.s32.totalorder %s8157_s8, %s6005_s0  ;;  %p6012_p8 = scmp.lt.u32.totalorder %s6005_s0, %s8157_s8 }
  0x50   : > { %p6008_p3 = pnand %p6006_p1, %p6574_p7 }
  0x52   : > { %p6009_p6 = pneg %p6008_p3 }
  0x54   : > { %p6014_p9 = pnand %p6012_p8, %p6009_p6 }
  0x56   : > { %6017 = shalt.err (!%p6014_p9)
}
  0x57   : > { %s6018_s23 = scalar_lea.vmem %s6564_s7, 3072  ;;  %p6026_p13 = scmp.lt.s32.totalorder %s6564_s7, %s6564_s7 }
  0x58   : > { %p6019_p10 = scmp.ne.s32.totalorder %s6564_s7, %s6018_s23  ;;  %p6027_p0 = scmp.lt.s32.totalorder %s6018_s23, %s6018_s23 }
  0x5a   : > { %p6021_p11 = pnand %p6019_p10, %p6574_p7  ;;  %p6028_p2 = por %p6027_p0, %p6026_p13 }
  0x5c   : > { %p6022_p12 = pneg %p6021_p11 }
  0x5e   : > { %p6029_p4 = pnand %p6028_p2, %p6022_p12 }
  0x60   : > { %6032 = shalt.err (!%p6029_p4)
}
  0x61   : > { %s8102_s30 = smov 192   ;;  %s8108_s14 = smov 12  }
  0x62   : > { %5341 = dma.hbm_to_vmem [thread:$0]  (!%p6560_p5), %s8157_s8, 3072, %s6564_s7, [#allocation15], %s8102_s30, %s8102_s30, %s8108_s14  }
  0x63   : > { %p298_p1 = scmp.ne.s32.totalorder %s6359_s29, %s6355_s28  ;;  %p8104_p3 = scmp.eq.s32.totalorder %s6379_s1, 0 }
  0x64   : > { %p304_p6 = scmp.ne.s32.totalorder %s6355_s28, %s6351_s27  ;;  %p8158_p9 = scmp.eq.s32.totalorder %s6547_s20, 0 }
  0x65   : > { %p300_p8 = por %p8104_p3, %p298_p1  ;;  %p8103_p11 = scmp.lt.s32.totalorder %s6379_s1, 6 }
  0x66   : > { %p6630_p10 = por %p8158_p9, %p304_p6  ;;  %s570_s17 = sand.u32 1, %s6379_s1  }
  0x67   : > { %s572_s2 = sand.u32 1, %s6359_s29   ;;  %s4743_s3 = sshll.u32 %s6375_s19, 10 }
  0x68   : > { %s8159_s15 = scalar_select %p6630_p10, 1, 0 }
  0x69   : > { %s4530_s23 = sshll.u32 %s572_s2, 6  ;;  %s8161_s11 = sld [smem:[#allocation59_spill]] }
  0x6a   : > { %8160 = sst [smem:[#allocation40_spill]] %s8159_s15  ;;  %s574_s27 = scalar_lea.vmem [#allocation17], %s4530_s23 }
  0x6b   : > { %s581_s12 = sshll.u32 %s574_s27, 4  ;;  %p6647_p12 = pnand %p8103_p11, %p300_p8  ;;  %s6643_s12 = int_to_ptr.vmem [resolvable:$true] %s581_s12 }
  0x6c   : > { %s6651_s2 = scalar_lea.sflag [#allocation18], %s570_s17 }
  0x6d   : > { %p6035_p0 = pneg %p6647_p12 }
  0x6f   : > { %s6641_s21 = scalar_lea.hbm %s8161_s11, %s4743_s3  ;;  %s6038_s7 = scalar_lea.hbm %s8161_s11, 3072 }
  0x70   : > { %s6033_s0 = scalar_lea.hbm %s6641_s21, 1024  ;;  %p6039_p1 = scmp.lt.u32.totalorder %s6641_s21, %s8161_s11 }
  0x71   : > { %p6034_p13 = scmp.ne.s32.totalorder %s6641_s21, %s6033_s0  ;;  %p6040_p6 = scmp.lt.u32.totalorder %s6038_s7, %s6033_s0 }
  0x72   : > { %p6042_p9 = scmp.lt.u32.totalorder %s6033_s0, %s6641_s21 }
  0x73   : > { %p6036_p2 = pnand %p6035_p0, %p6034_p13  ;;  %p6041_p8 = por %p6040_p6, %p6039_p1 }
  0x75   : > { %p6037_p4 = pneg %p6036_p2  ;;  %p6043_p11 = por %p6042_p9, %p6041_p8 }
  0x77   : > { %p6044_p3 = pnand %p6043_p11, %p6037_p4 }
  0x79   : > { %6047 = shalt.err (!%p6044_p3)
}
  0x7a   : > { %s6048_s17 = scalar_lea.vmem %s6643_s12, 1024  ;;  %s6387_s3 = smov [#allocation17]  }
  0x7b   : > { %p6049_p13 = scmp.ne.s32.totalorder %s6643_s12, %s6048_s17  ;;  %s6053_s23 = sshll.u32 %s6387_s3, 4  ;;  %s6054_s23 = int_to_ptr.vmem [resolvable:$false] %s6053_s23 }
  0x7c   : > { %s6055_s30 = scalar_lea.vmem %s6054_s23, 2048  ;;  %p6056_p5 = scmp.lt.s32.totalorder %s6643_s12, %s6054_s23 }
  0x7d   : > { %p6051_p2 = pnand %p6049_p13, %p6035_p0  ;;  %p6057_p1 = scmp.lt.s32.totalorder %s6055_s30, %s6048_s17 }
  0x7f   : > { %p6052_p10 = pneg %p6051_p2  ;;  %p6058_p6 = por %p6057_p1, %p6056_p5 }
  0x81   : > { %p6059_p8 = pnand %p6058_p6, %p6052_p10 }
  0x83   : > { %6062 = shalt.err (!%p6059_p8)
}
  0x84   : > { %s8113_s0 = smov 64   ;;  %s8115_s7 = smov 4  }
  0x85   : > { %5348 = dma.hbm_to_vmem [thread:$0]  (!%p6647_p12), %s6641_s21, 1024, %s6643_s12, %s6651_s2, %s8113_s0, %s8113_s0, %s8115_s7  }
  0x86   : > { %s6390_s27 = smov [#allocation8]   ;;  %s6391_s23 = smov [#allocation13]  }
  0x87   : > { %s486_s3 = sshll.u32 %s6390_s27, 4  ;;  %s524_s17 = sshll.u32 %s6391_s23, 4  ;;  %s487_s3 = int_to_ptr.vmem [resolvable:$true] %s486_s3  ;;  %s525_s17 = int_to_ptr.vmem [resolvable:$true] %s524_s17 }
  0x88   : > { %s8163_s9 = sld [smem:[#allocation48_spill]] }
  0x8e   : > { %s6063_s5 = scalar_lea.hbm %s8163_s9, 2048 }
  0x8f   : > { %p6064_p5 = scmp.ne.s32.totalorder %s8163_s9, %s6063_s5  ;;  %p6070_p11 = scmp.lt.u32.totalorder %s6063_s5, %s8163_s9 }
  0x91   : > { %p6066_p3 = pnand %p6064_p5, %p6574_p7 }
  0x93   : > { %p6067_p10 = pneg %p6066_p3 }
  0x95   : > { %p6072_p12 = pnand %p6070_p11, %p6067_p10 }
  0x97   : > { %6075 = shalt.err (!%p6072_p12)
}
  0x98   : > { %s6076_s12 = scalar_lea.vmem %s487_s3, 2048  ;;  %p6084_p13 = scmp.lt.s32.totalorder %s487_s3, %s487_s3 }
  0x99   : > { %p6077_p0 = scmp.ne.s32.totalorder %s487_s3, %s6076_s12  ;;  %p6085_p2 = scmp.lt.s32.totalorder %s6076_s12, %s6076_s12 }
  0x9b   : > { %p6079_p4 = pnand %p6077_p0, %p6574_p7  ;;  %p6086_p1 = por %p6085_p2, %p6084_p13 }
  0x9d   : > { %p6080_p9 = pneg %p6079_p4 }
  0x9f   : > { %p6087_p6 = pnand %p6086_p1, %p6080_p9 }
  0xa1   : > { %6090 = shalt.err (!%p6087_p6)
}
  0xa2   : > { %p8164_p8 = scmp.ne.s32.totalorder %s8154_s16, 0  ;;  %s8165_s8 = smov 8  }
  0xa3   : > { %s8166_s11 = smov 128   ;;  %s8167_s6 = sld [smem:[#allocation54_spill]] }
  0xa4   : > { %5332 = dma.hbm_to_vmem [thread:$0]  (!%p8164_p8), %s8163_s9, 2048, %s487_s3, [#allocation9], %s8166_s11, %s8166_s11, %s8165_s8  }
  0xa9   : > { %s6091_s27 = scalar_lea.hbm %s8167_s6, 3072 }
  0xaa   : > { %p6092_p5 = scmp.ne.s32.totalorder %s8167_s6, %s6091_s27  ;;  %p6098_p11 = scmp.lt.u32.totalorder %s6091_s27, %s8167_s6 }
  0xac   : > { %p6094_p3 = pnand %p6092_p5, %p6574_p7 }
  0xae   : > { %p6095_p10 = pneg %p6094_p3 }
  0xb0   : > { %p6100_p12 = pnand %p6098_p11, %p6095_p10 }
  0xb2   : > { %6103 = shalt.err (!%p6100_p12)
}
  0xb3   : > { %s6104_s14 = scalar_lea.vmem %s525_s17, 3072  ;;  %p6112_p13 = scmp.lt.s32.totalorder %s525_s17, %s525_s17 }
  0xb4   : > { %p6105_p0 = scmp.ne.s32.totalorder %s525_s17, %s6104_s14  ;;  %p6113_p2 = scmp.lt.s32.totalorder %s6104_s14, %s6104_s14 }
  0xb6   : > { %p6107_p4 = pnand %p6105_p0, %p6574_p7  ;;  %p6114_p1 = por %p6113_p2, %p6112_p13 }
  0xb8   : > { %p6108_p9 = pneg %p6107_p4 }
  0xba   : > { %p6115_p6 = pnand %p6114_p1, %p6108_p9 }
  0xbc   : > { %6118 = shalt.err (!%p6115_p6)
}
  0xbd   : > { %s8168_s3 = smov 12   ;;  %s8169_s8 = smov 192  }
  0xbe   : > { %5338 = dma.hbm_to_vmem [thread:$0]  (!%p8164_p8), %s8167_s6, 3072, %s525_s17, [#allocation12], %s8169_s8, %s8169_s8, %s8168_s3  }
  0xbf   : > { %s6392_s15 = smov [#allocation16]   ;;  %s8170_s10 = sld [smem:[#allocation58_spill]] }
  0xc0   : > { %s556_s21 = sshll.u32 %s6392_s15, 4  ;;  %s557_s21 = int_to_ptr.vmem [resolvable:$true] %s556_s21 }
  0xc5   : > { %s6119_s30 = scalar_lea.hbm %s8170_s10, 1024 }
  0xc6   : > { %p6120_p5 = scmp.ne.s32.totalorder %s8170_s10, %s6119_s30  ;;  %p6126_p11 = scmp.lt.u32.totalorder %s6119_s30, %s8170_s10 }
  0xc8   : > { %p6122_p3 = pnand %p6120_p5, %p6574_p7 }
  0xca   : > { %p6123_p10 = pneg %p6122_p3 }
  0xcc   : > { %p6128_p12 = pnand %p6126_p11, %p6123_p10 }
  0xce   : > { %6131 = shalt.err (!%p6128_p12)
}
  0xcf   : > { %s6132_s17 = scalar_lea.vmem %s557_s21, 1024  ;;  %p6140_p13 = scmp.lt.s32.totalorder %s557_s21, %s557_s21 }
  0xd0   : > { %p6133_p0 = scmp.ne.s32.totalorder %s557_s21, %s6132_s17  ;;  %p6141_p2 = scmp.lt.s32.totalorder %s6132_s17, %s6132_s17 }
  0xd2   : > { %p6135_p4 = pnand %p6133_p0, %p6574_p7  ;;  %p6142_p1 = por %p6141_p2, %p6140_p13 }
  0xd4   : > { %p6136_p9 = pneg %p6135_p4 }
  0xd6   : > { %p6143_p6 = pnand %p6142_p1, %p6136_p9 }
  0xd8   : > { %6146 = shalt.err (!%p6143_p6)
}
  0xd9   : > { %s8171_s3 = smov 64   ;;  %s4522_s16 = sadd.s32 4294967294, %s6379_s1  }
  0xda   : > { %5344 = dma.hbm_to_vmem [thread:$0]  (!%p8164_p8), %s8170_s10, 1024, %s557_s21, [#allocation15], %s8171_s3, %s8171_s3, %s8115_s7  }
  0xdb   : > { %s50_s22 = sadd.s32 1, %s6371_s18  ;;  %s345_s11 = sadd.s32 1, %s6347_s26 }
  0xdc   : > { %p51_p7 = scmp.ge.s32.totalorder %s50_s22, 2  ;;  %p352_p5 = scmp.ne.s32.totalorder %s6347_s26, %s6343_s25 }
  0xdd   : > { %p358_p3 = scmp.ne.s32.totalorder %s6343_s25, %s6339_s24  ;;  %s8173_s5 = sadd.s32 1, %s6375_s19 }
  0xde   : > { %s8241_s22 = smov (%p51_p7, %s50_s22), 0  ;;  %s8243_s5 = smov (!%p51_p7, %s8173_s5), %s6375_s19 }
  0xdf   : > { %8172 = sst [smem:[#allocation41_spill]] %s8241_s22  ;;  %s341_s15 = ssub.s32 %s6371_s18, %s8241_s22 }
  0xe0   : > { %p8174_p10 = scmp.eq.s32.totalorder %s6379_s1, 0  ;;  %p55_p11 = scmp.ge.s32.totalorder %s8243_s5, 3 }
  0xe1   : > { %p8176_p12 = scmp.eq.s32.totalorder %s6547_s20, 0  ;;  %p8119_p4 = scmp.eq.s32.totalorder %s6547_s20, 5 }
  0xe2   : > { %p6761_p8 = por %p352_p5, %p8174_p10  ;;  %p446_p9 = scmp.eq.s32.totalorder %s4522_s16, 5 }
  0xe3   : > { %p6767_p0 = por %p358_p3, %p8176_p12  ;;  %s8245_s5 = smov (%p55_p11, %s8243_s5), 0 }
  0xe4   : > { %8178 = sst [smem:[#allocation42_spill]] %s8245_s5  ;;  %p6776_p13 = por %p8119_p4, %p352_p5 }
  0xe5   : > { %p6780_p2 = por %p446_p9, %p358_p3  ;;  %s288_s4 = ssub.s32 %s6375_s19, %s8245_s5 }
  0xe6   : > { %s8179_s23 = scalar_select %p6776_p13, 1, 0 }
  0xe7   : > { %s8180_s30 = scalar_select %p6780_p2, 1, 0 }
  0xe8   : > { %s8120_s12 = sand.u32 1, %s6347_s26   ;;  %p289_p1 = scmp.eq.s32.totalorder %s288_s4, 0 }
  0xe9   : > { %s342_s14 = sor.u32 %s341_s15, %s288_s4  ;;  %s6789_s17 = sshll.u32 %s8120_s12, 5 }
  0xea   : > { %p343_p6 = scmp.eq.s32.totalorder %s342_s14, 0  ;;  %s8181_s0 = sadd.s32 1, %s6359_s29 }
  0xeb   : > { %s6794_s8 = scalar_select %p289_p1, %s6359_s29, %s8181_s0  }
  0xec   : > { %s6797_s16 = scalar_select %p343_p6, %s6347_s26, %s345_s11  }
  0xed   : > { %8182 = sst [smem:[#allocation43_spill]] %s6794_s8  ;;  %s4534_s7 = sshll.u32 %s6371_s18, 3 }
  0xee   : > { %s4535_s6 = sshll.u32 %s6375_s19, 4  ;;  %s603_s9 = scalar_lea.vmem [#allocation19], %s6789_s17 }
  0xef   : > { %s612_s10 = sshll.u32 %s603_s9, 4  ;;  %s6802_s22 = sadd.s32 %s4535_s6, %s4534_s7  ;;  %s6804_s10 = int_to_ptr.vmem [resolvable:$true] %s612_s10 }
  0xf0   : > { %s4536_s15 = sshll.u32 %s6802_s22, 6  ;;  %p8183_p7 = scmp.lt.s32.totalorder %s6379_s1, 6 }
  0xf1   : > { %s8185_s13 = sld [smem:[#allocation61_spill]] }
  0xf2   : > { %p6811_p5 = pnand %p8183_p7, %p6761_p8 }
  0xf4   : > { %p6149_p10 = pneg %p6811_p5 }
  0xf7   : > { %s6820_s9 = scalar_lea.hbm %s8185_s13, %s4536_s15  ;;  %s6152_s0 = scalar_lea.hbm %s8185_s13, 3072 }
  0xf8   : > { %s6147_s6 = scalar_lea.hbm %s6820_s9, 512  ;;  %p6153_p12 = scmp.lt.u32.totalorder %s6820_s9, %s8185_s13 }
  0xf9   : > { %p6148_p3 = scmp.ne.s32.totalorder %s6820_s9, %s6147_s6  ;;  %p6154_p9 = scmp.lt.u32.totalorder %s6152_s0, %s6147_s6 }
  0xfa   : > { %p6156_p6 = scmp.lt.u32.totalorder %s6147_s6, %s6820_s9 }
  0xfb   : > { %p6150_p8 = pnand %p6149_p10, %p6148_p3  ;;  %p6155_p1 = por %p6154_p9, %p6153_p12 }
  0xfd   : > { %p6151_p11 = pneg %p6150_p8  ;;  %p6157_p7 = por %p6156_p6, %p6155_p1 }
  0xff   : > { %p6158_p4 = pnand %p6157_p7, %p6151_p11 }
 0x101   : > { %6161 = shalt.err (!%p6158_p4)
}
 0x102   : > { %s6162_s12 = scalar_lea.vmem %s6804_s10, 512  ;;  %s6393_s7 = smov [#allocation19]  }
 0x103   : > { %p6163_p3 = scmp.ne.s32.totalorder %s6804_s10, %s6162_s12  ;;  %s6167_s21 = sshll.u32 %s6393_s7, 4  ;;  %s6168_s21 = int_to_ptr.vmem [resolvable:$false] %s6167_s21 }
 0x104   : > { %s6169_s11 = scalar_lea.vmem %s6168_s21, 1024  ;;  %p6170_p13 = scmp.lt.s32.totalorder %s6804_s10, %s6168_s21 }
 0x105   : > { %p6165_p8 = pnand %p6163_p3, %p6149_p10  ;;  %p6171_p12 = scmp.lt.s32.totalorder %s6169_s11, %s6162_s12 }
 0x107   : > { %p6166_p2 = pneg %p6165_p8  ;;  %p6172_p9 = por %p6171_p12, %p6170_p13 }
 0x109   : > { %p6173_p1 = pnand %p6172_p9, %p6166_p2 }
 0x10b   : > { %6176 = shalt.err (!%p6173_p1)
}
 0x10c   : > { %s8186_s6 = smov 4   ;;  %s8187_s12 = sld [smem:[#allocation62_spill]] }
 0x10d   : > { %5351 = dma.hbm_to_vmem [thread:$0]  (!%p6811_p5), %s6820_s9, 512, %s6804_s10, %s6651_s2, %s8171_s3, %s8171_s3, %s8186_s6  }
 0x10e   : > { %s626_s21 = scalar_lea.vmem [#allocation20], %s6789_s17  ;;  %s8188_s13 = sand.u32 1, %s6347_s26  }
 0x10f   : > { %s635_s11 = sshll.u32 %s626_s21, 4  ;;  %s6863_s5 = scalar_lea.sflag [#allocation21], %s8188_s13  ;;  %s6859_s11 = int_to_ptr.vmem [resolvable:$true] %s635_s11 }
 0x112   : > { %s6856_s7 = scalar_lea.hbm %s8187_s12, %s4536_s15  ;;  %s6182_s22 = scalar_lea.hbm %s8187_s12, 3072 }
 0x113   : > { %s6177_s19 = scalar_lea.hbm %s6856_s7, 512  ;;  %p6183_p11 = scmp.lt.u32.totalorder %s6856_s7, %s8187_s12 }
 0x114   : > { %p6178_p4 = scmp.ne.s32.totalorder %s6856_s7, %s6177_s19  ;;  %p6184_p6 = scmp.lt.u32.totalorder %s6182_s22, %s6177_s19 }
 0x115   : > { %p6186_p3 = scmp.lt.u32.totalorder %s6177_s19, %s6856_s7 }
 0x116   : > { %p6180_p13 = pnand %p6178_p4, %p6149_p10  ;;  %p6185_p7 = por %p6184_p6, %p6183_p11 }
 0x118   : > { %p6181_p2 = pneg %p6180_p13  ;;  %p6187_p8 = por %p6186_p3, %p6185_p7 }
 0x11a   : > { %p6188_p12 = pnand %p6187_p8, %p6181_p2 }
 0x11c   : > { %6191 = shalt.err (!%p6188_p12)
}
 0x11d   : > { %s6192_s13 = scalar_lea.vmem %s6859_s11, 512  ;;  %s6394_s17 = smov [#allocation20]  }
 0x11e   : > { %p6193_p9 = scmp.ne.s32.totalorder %s6859_s11, %s6192_s13  ;;  %s6197_s0 = sshll.u32 %s6394_s17, 4  ;;  %s6198_s0 = int_to_ptr.vmem [resolvable:$false] %s6197_s0 }
 0x11f   : > { %s6199_s14 = scalar_lea.vmem %s6198_s0, 1024  ;;  %p6200_p13 = scmp.lt.s32.totalorder %s6859_s11, %s6198_s0 }
 0x120   : > { %p6195_p1 = pnand %p6193_p9, %p6149_p10  ;;  %p6201_p11 = scmp.lt.s32.totalorder %s6199_s14, %s6192_s13 }
 0x122   : > { %p6196_p4 = pneg %p6195_p1  ;;  %p6202_p6 = por %p6201_p11, %p6200_p13 }
 0x124   : > { %p6203_p7 = pnand %p6202_p6, %p6196_p4 }
 0x126   : > { %6206 = shalt.err (!%p6203_p7)
}
 0x127   : > { %5354 = dma.hbm_to_vmem [thread:$0]  (!%p6811_p5), %s6856_s7, 512, %s6859_s11, %s6863_s5, %s8171_s3, %s8171_s3, %s8186_s6  }
 0x128   : > { %s8189_s19 = sld [smem:[#allocation39_spill]] }
 0x12e   : > { %p8190_p10 = scmp.ne.s32.totalorder %s8189_s19, 0 }
 0x12f   : > { %p8191_p2 = scmp.eq.s32.totalorder (!%p8190_p10), %s6547_s20, 0 }
 0x130   : > { %660 = sbr.rel (%p8190_p10) target bundleno = 2550 (0x9f6), region = 84 }
 0x137   : > { %6306 = dma.done.wait (%p8191_p2), [#allocation9], 2048   ;;  %p8192_p3 = pmov %p8191_p2 }
 0x138   : > { %p8193_p8 = pmov %p8191_p2 }
 0x139   : > { %6308 = vsyncadd (%p8192_p3), [#allocation9], 4294965248 }
 0x13a   : > { %6310 = dma.done.wait (%p8193_p8), [#allocation12], 5120   ;;  %p8194_p12 = pmov %p8191_p2 }
 0x13b   : > { %p8195_p9 = pmov %p8191_p2 }
 0x13c   : > { %6312 = vsyncadd (%p8194_p12), [#allocation12], 4294962176 }
 0x13d   : > { %6314 = dma.done.wait (%p8195_p9), [#allocation15], 4096   ;;  %p8196_p5 = pmov %p8191_p2 }
 0x13e   : > { %s8197_s3 = sld [smem:[#allocation40_spill]]  ;;  %s682_s5 = sand.u32 1, %s6547_s20  }
 0x13f   : > { %6316 = vsyncadd (%p8196_p5), [#allocation15], 4294963200  ;;  %s684_s4 = sand.u32 1, %s6355_s28   ;;  %s683_s7 = scalar_lea.sflag [#allocation18], %s682_s5 }
 0x140   : > { %s4547_s6 = sshll.u32 %s684_s4, 6 }
 0x141   : > { %s6908_s21 = scalar_lea.vmem [#allocation17], %s4547_s6 }
 0x144   : > { %p8198_p1 = scmp.ne.s32.totalorder %s8197_s3, 0 }
 0x146   : > { %6318 = dma.done.wait (%p8198_p1), %s683_s7, 1024  }
 0x147   : > { %6320 = vsyncadd (%p8198_p1), %s683_s7, 4294966272  ;;  %s6915_s11 = sand.u32 1, %s6343_s25  }
 0x148   : > { %s4548_s10 = sshll.u32 %s6915_s11, 5 }
 0x149   : > { %s6918_s2 = scalar_lea.vmem [#allocation19], %s4548_s10 }
 0x14a   : > { %6322 = dma.done.wait (%p6767_p0), %s683_s7, 512  }
 0x14b   : > { %6324 = vsyncadd (%p6767_p0), %s683_s7, 4294966784  ;;  %s701_s22 = scalar_lea.sflag [#allocation21], %s6915_s11  ;;  %s6925_s15 = scalar_lea.vmem [#allocation20], %s4548_s10 }
 0x14c   : > { %6326 = dma.done.wait (%p6767_p0), %s701_s22, 512  }
 0x14d   : > { %6328 = vsyncadd (%p6767_p0), %s701_s22, 4294966784  ;;  %s8199_s9 = sld [smem:[#allocation36_spill]]  ;;  %s8200_s13 = sld [smem:[#allocation35_spill]] }
 0x14e   : > { %s4550_s17 = sshll.u32 %s6915_s11, 6  ;;  %s8201_s4 = sld [smem:[#allocation60_spill]] }
 0x14f   : > { %s8202_s8 = sld [smem:[#allocation63_spill]]  ;;  %s6951_s28 = scalar_lea.vmem [#allocation22], %s4550_s17 }
 0x153   : > { %p779_p4 = scmp.lt.s32.totalorder %s8199_s9, 2  ;;  %s6934_s0 = sshll.u32 %s8200_s13, 3 }
 0x154   : > { %p789_p13 = scmp.lt.s32.totalorder %s6934_s0, 15  ;;  %p798_p11 = scmp.eq.s32.totalorder %s8199_s9, 0 }
 0x155   : > { %s780_s14 = scalar_select %p779_p4, %s8199_s9, 2 }
 0x156   : > { %p799_p0 = scmp.eq.s32.totalorder %s8200_s13, 0 }
 0x157   : > { %s4744_s19 = sshll.u32 %s780_s14, 7  ;;  %s4554_s3 = sshll.u32 %s780_s14, 4 }
 0x158   : > { %s6942_s6 = scalar_lea.vmem %s8201_s4, %s4744_s19  ;;  %p800_p6 = pnand %p799_p0, %p798_p11 }
 0x159   : > { %s790_s7 = scalar_select %p789_p13, %s6934_s0, 15 }
 0x15a   : > { %803 = sbr.rel (%p800_p6) target bundleno = 538 (0x21a), region = 120  ;;  %v6953_v0 = vld [vmem:[#allocation8 + $0x10] sm:$0xff] (!%p800_p6)  ;;  %v6955_v1 = vld [vmem:[#allocation8] sm:$0xff] (!%p800_p6)  ;;  %v6957_v2 = vld [vmem:[#allocation8 + $0x18] sm:$0xff] (!%p800_p6) }
 0x15b   : > { %s792_s10 = sadd.s32 %s4554_s3, %s790_s7  ;;  %v822_v3 = vmul.f32 (!%p800_p6), %v6953_v0, %v6953_v0  ;;  %v820_v4 = vmul.f32 (!%p800_p6), %v6955_v1, %v6955_v1  ;;  %v6963_v5 = vld [vmem:[#allocation8 + $0x8] sm:$0xff] (!%p800_p6)  ;;  %v823_v6 = vmul.f32 (!%p800_p6), %v6957_v2, %v6957_v2  ;;  %v6971_v9 = vld [vmem:[#allocation8 + $0x20] sm:$0xff] (!%p800_p6)  ;;  %v6977_v12 = vld [vmem:[#allocation8 + $0x38] sm:$0xff] (!%p800_p6) }
 0x15c   : > { %s4555_s22 = sshll.u32 %s792_s10, 3  ;;  %v821_v7 = vmul.f32 (!%p800_p6), %v6963_v5, %v6963_v5  ;;  %v6969_v8 = vld [vmem:[#allocation8 + $0x28] sm:$0xff] (!%p800_p6)  ;;  %v824_v11 = vmul.f32 (!%p800_p6), %v6971_v9, %v6971_v9  ;;  %v6979_v13 = vld [vmem:[#allocation8 + $0x30] sm:$0xff] (!%p800_p6)  ;;  %v827_v14 = vmul.f32 (!%p800_p6), %v6977_v12, %v6977_v12  ;;  %v6987_v17 = vld [vmem:[#allocation8 + $0x40] sm:$0xff] (!%p800_p6) }
 0x15d   : > { %s6949_s29 = scalar_lea.vmem %s8202_s8, %s4555_s22  ;;  %840 = vadd.xlane.f32.xlu1 (!%p800_p6), %v822_v3  ;;  %836 = vadd.xlane.f32.xlu0 (!%p800_p6), %v820_v4  ;;  %v825_v10 = vmul.f32 (!%p800_p6), %v6969_v8, %v6969_v8  ;;  %v826_v15 = vmul.f32 (!%p800_p6), %v6979_v13, %v6979_v13  ;;  %v6985_v16 = vld [vmem:[#allocation8 + $0x48] sm:$0xff] (!%p800_p6)  ;;  %v828_v19 = vmul.f32 (!%p800_p6), %v6987_v17, %v6987_v17  ;;  %v6993_v20 = vld [vmem:[#allocation8 + $0x58] sm:$0xff] (!%p800_p6)  ;;  %v6995_v21 = vld [vmem:[#allocation8 + $0x50] sm:$0xff] (!%p800_p6) }
 0x15e   : > { %v829_v18 = vmul.f32 (!%p800_p6), %v6985_v16, %v6985_v16  ;;  %v831_v22 = vmul.f32 (!%p800_p6), %v6993_v20, %v6993_v20  ;;  %v830_v23 = vmul.f32 (!%p800_p6), %v6995_v21, %v6995_v21  ;;  %v7001_v24 = vld [vmem:[#allocation8 + $0x68] sm:$0xff] (!%p800_p6)  ;;  %v7003_v25 = vld [vmem:[#allocation8 + $0x60] sm:$0xff] (!%p800_p6)  ;;  %v7009_v28 = vld [vmem:[#allocation8 + $0x78] sm:$0xff] (!%p800_p6) }
 0x15f   : > { %v833_v26 = vmul.f32 (!%p800_p6), %v7001_v24, %v7001_v24  ;;  %v832_v27 = vmul.f32 (!%p800_p6), %v7003_v25, %v7003_v25  ;;  %v7011_v29 = vld [vmem:[#allocation8 + $0x70] sm:$0xff] (!%p800_p6)  ;;  %v835_v30 = vmul.f32 (!%p800_p6), %v7009_v28, %v7009_v28  ;;  %v948_v32 = vld [vmem:[#allocation11] sm:$0xff] (!%p800_p6)  ;;  %v949_v33 = vld [vmem:[#allocation11 + $0x8] sm:$0xff] (!%p800_p6) }
 0x160   : > { %v834_v31 = vmul.f32 (!%p800_p6), %v7011_v29, %v7011_v29  ;;  %v950_v34 = vld [vmem:[#allocation11 + $0x10] sm:$0xff] (!%p800_p6)  ;;  %v951_v35 = vld [vmem:[#allocation11 + $0x18] sm:$0xff] (!%p800_p6)  ;;  %v952_v36 = vld [vmem:[#allocation11 + $0x20] sm:$0xff] (!%p800_p6)  ;;  %964 = vst [vmem:[#allocation4] sm:$0xff] (!%p800_p6), %v948_v32  ;;  %v980_v38 = vpack.c.bf16 (!%p800_p6), %v949_v33, %v948_v32 }
 0x161   : > { %842 = vadd.xlane.f32.xlu1 %v823_v6  ;;  %838 = vadd.xlane.f32.xlu0 %v821_v7  ;;  %v953_v37 = vld [vmem:[#allocation11 + $0x28] sm:$0xff]  ;;  %965 = vst [vmem:[#allocation4 + $0x8] sm:$0xff] %v949_v33  ;;  %966 = vst [vmem:[#allocation4 + $0x10] sm:$0xff] %v950_v34  ;;  %v954_v39 = vld [vmem:[#allocation11 + $0x30] sm:$0xff]  ;;  %v981_v42 = vpack.c.bf16 %v951_v35, %v950_v34 }
 0x162   : > { %v955_v40 = vld [vmem:[#allocation11 + $0x38] sm:$0xff]  ;;  %v956_v41 = vld [vmem:[#allocation11 + $0x40] sm:$0xff]  ;;  %967 = vst [vmem:[#allocation4 + $0x18] sm:$0xff] %v951_v35  ;;  %968 = vst [vmem:[#allocation4 + $0x20] sm:$0xff] %v952_v36  ;;  %v982_v43 = vpack.c.bf16 %v953_v37, %v952_v36 }
 0x163   : > { %969 = vst [vmem:[#allocation4 + $0x28] sm:$0xff] %v953_v37  ;;  %v957_v44 = vld [vmem:[#allocation11 + $0x48] sm:$0xff]  ;;  %v958_v45 = vld [vmem:[#allocation11 + $0x50] sm:$0xff]  ;;  %v959_v46 = vld [vmem:[#allocation11 + $0x58] sm:$0xff]  ;;  %v983_v47 = vpack.c.bf16 %v955_v40, %v954_v39 }
 0x164   : > { %970 = vst [vmem:[#allocation4 + $0x30] sm:$0xff] %v954_v39  ;;  %971 = vst [vmem:[#allocation4 + $0x38] sm:$0xff] %v955_v40  ;;  %v960_v48 = vld [vmem:[#allocation11 + $0x60] sm:$0xff]  ;;  %v961_v49 = vld [vmem:[#allocation11 + $0x68] sm:$0xff]  ;;  %v984_v51 = vpack.c.bf16 %v957_v44, %v956_v41  ;;  %v985_v52 = vpack.c.bf16 %v959_v46, %v958_v45 }
 0x165   : > { %846 = vadd.xlane.f32.xlu1 %v825_v10  ;;  %844 = vadd.xlane.f32.xlu0 %v824_v11  ;;  %972 = vst [vmem:[#allocation4 + $0x40] sm:$0xff] %v956_v41  ;;  %988 = vst [vmem:[#allocation5] sm:$0xff] %v980_v38  ;;  %v962_v50 = vld [vmem:[#allocation11 + $0x70] sm:$0xff]  ;;  %v963_v53 = vld [vmem:[#allocation11 + $0x78] sm:$0xff]  ;;  %v986_v54 = vpack.c.bf16 %v961_v49, %v960_v48 }
 0x166   : > { %973 = vst [vmem:[#allocation4 + $0x48] sm:$0xff] %v957_v44  ;;  %974 = vst [vmem:[#allocation4 + $0x50] sm:$0xff] %v958_v45  ;;  %v987_v55 = vpack.c.bf16 %v963_v53, %v962_v50 }
 0x167   : > { %975 = vst [vmem:[#allocation4 + $0x58] sm:$0xff] %v959_v46  ;;  %989 = vst [vmem:[#allocation5 + $0x8] sm:$0xff] %v981_v42 }
 0x168   : > { %990 = vst [vmem:[#allocation5 + $0x10] sm:$0xff] %v982_v43  ;;  %976 = vst [vmem:[#allocation4 + $0x60] sm:$0xff] %v960_v48 }
 0x169   : > { %850 = vadd.xlane.f32.xlu1 %v827_v14  ;;  %848 = vadd.xlane.f32.xlu0 %v826_v15  ;;  %977 = vst [vmem:[#allocation4 + $0x68] sm:$0xff] %v961_v49  ;;  %978 = vst [vmem:[#allocation4 + $0x70] sm:$0xff] %v962_v50 }
 0x16a   : > { %991 = vst [vmem:[#allocation5 + $0x18] sm:$0xff] %v983_v47  ;;  %979 = vst [vmem:[#allocation4 + $0x78] sm:$0xff] %v963_v53 }
 0x16b   : > { %992 = vst [vmem:[#allocation5 + $0x20] sm:$0xff] %v984_v51  ;;  %993 = vst [vmem:[#allocation5 + $0x28] sm:$0xff] %v985_v52 }
 0x16c   : > { %994 = vst [vmem:[#allocation5 + $0x30] sm:$0xff] %v986_v54  ;;  %995 = vst [vmem:[#allocation5 + $0x38] sm:$0xff] %v987_v55 }
 0x16d   : > { %854 = vadd.xlane.f32.xlu1 %v829_v18  ;;  %852 = vadd.xlane.f32.xlu0 %v828_v19 }
 0x171   : > { %858 = vadd.xlane.f32.xlu1 %v831_v22  ;;  %856 = vadd.xlane.f32.xlu0 %v830_v23 }
 0x175   : > { %862 = vadd.xlane.f32.xlu1 %v833_v26  ;;  %860 = vadd.xlane.f32.xlu0 %v832_v27 }
 0x179   : > { %866 = vadd.xlane.f32.xlu1 %v835_v30  ;;  %864 = vadd.xlane.f32.xlu0 %v834_v31 }
 0x1ea   : > { %v841_v56 = vpop.xlane.xlu1 %840  ;;  %v837_v57 = vpop.xlane.xlu0 %836 }
 0x1eb   : > { %v870_v58 = vmax.f32 %v841_v56, 1e-24  ;;  %v868_v59 = vmax.f32 %v837_v57, 1e-24 }
 0x1ed   : > { %5477 = vrsqrt.f32 %v870_v58 }
 0x1ee   : > { %5479 = vrsqrt.f32 %v868_v59  ;;  %v843_v60 = vpop.xlane.xlu1 %842  ;;  %v839_v61 = vpop.xlane.xlu0 %838 }
 0x1ef   : > { %v871_v62 = vmax.f32 %v843_v60, 1e-24  ;;  %v869_v63 = vmax.f32 %v839_v61, 1e-24 }
 0x1f1   : > { %5481 = vrsqrt.f32 %v871_v62 }
 0x1f2   : > { %5483 = vrsqrt.f32 %v869_v63  ;;  %v847_v3 = vpop.xlane.xlu1 %846  ;;  %v845_v4 = vpop.xlane.xlu0 %844 }
 0x1f3   : > { %v873_v6 = vmax.f32 %v847_v3, 1e-24  ;;  %v872_v7 = vmax.f32 %v845_v4, 1e-24 }
 0x1f5   : > { %5485 = vrsqrt.f32 %v873_v6 }
 0x1f6   : > { %5487 = vrsqrt.f32 %v872_v7  ;;  %v851_v10 = vpop.xlane.xlu1 %850  ;;  %v849_v11 = vpop.xlane.xlu0 %848 }
 0x1f7   : > { %v5478_v14 = vpop.eup %5477  ;;  %v875_v15 = vmax.f32 %v851_v10, 1e-24  ;;  %v874_v18 = vmax.f32 %v849_v11, 1e-24 }
 0x1f8   : > { %v5480_v19 = vpop.eup %5479  ;;  %v902_v22 = vmul.f32 %v5478_v14, %v6953_v0 }
 0x1f9   : > { %v900_v23 = vmul.f32 %v5480_v19, %v6955_v1  ;;  %5489 = vrsqrt.f32 %v875_v15 }
 0x1fa   : > { %918 = vst [vmem:[#allocation2 + $0x10] sm:$0xff] %v902_v22  ;;  %5491 = vrsqrt.f32 %v874_v18  ;;  %v855_v26 = vpop.xlane.xlu1 %854  ;;  %v853_v27 = vpop.xlane.xlu0 %852 }
 0x1fb   : > { %v5482_v30 = vpop.eup %5481  ;;  %916 = vst [vmem:[#allocation2] sm:$0xff] %v900_v23  ;;  %v877_v31 = vmax.f32 %v855_v26, 1e-24  ;;  %v876_v32 = vmax.f32 %v853_v27, 1e-24 }
 0x1fc   : > { %v5484_v33 = vpop.eup %5483  ;;  %v903_v34 = vmul.f32 %v5482_v30, %v6957_v2 }
 0x1fd   : > { %v901_v35 = vmul.f32 %v5484_v33, %v6963_v5  ;;  %5493 = vrsqrt.f32 %v877_v31 }
 0x1fe   : > { %919 = vst [vmem:[#allocation2 + $0x18] sm:$0xff] %v903_v34  ;;  %v933_v36 = vpack.c.bf16 %v903_v34, %v902_v22  ;;  %5495 = vrsqrt.f32 %v876_v32  ;;  %v859_v0 = vpop.xlane.xlu1 %858  ;;  %v857_v1 = vpop.xlane.xlu0 %856 }
 0x1ff   : > { %v5486_v37 = vpop.eup %5485  ;;  %917 = vst [vmem:[#allocation2 + $0x8] sm:$0xff] %v901_v35  ;;  %v932_v38 = vpack.c.bf16 %v901_v35, %v900_v23  ;;  %v879_v39 = vmax.f32 %v859_v0, 1e-24  ;;  %v878_v40 = vmax.f32 %v857_v1, 1e-24 }
 0x200   : > { %v5488_v41 = vpop.eup %5487  ;;  %941 = vst [vmem:[#allocation3 + $0x8] sm:$0xff] %v933_v36  ;;  %v905_v42 = vmul.f32 %v5486_v37, %v6969_v8 }
 0x201   : > { %940 = vst [vmem:[#allocation3] sm:$0xff] %v932_v38  ;;  %v904_v2 = vmul.f32 %v5488_v41, %v6971_v9  ;;  %5497 = vrsqrt.f32 %v879_v39 }
 0x202   : > { %921 = vst [vmem:[#allocation2 + $0x28] sm:$0xff] %v905_v42  ;;  %5499 = vrsqrt.f32 %v878_v40  ;;  %v863_v5 = vpop.xlane.xlu1 %862  ;;  %v861_v43 = vpop.xlane.xlu0 %860 }
 0x203   : > { %v5490_v44 = vpop.eup %5489  ;;  %920 = vst [vmem:[#allocation2 + $0x20] sm:$0xff] %v904_v2  ;;  %v934_v45 = vpack.c.bf16 %v905_v42, %v904_v2  ;;  %v881_v46 = vmax.f32 %v863_v5, 1e-24  ;;  %v880_v47 = vmax.f32 %v861_v43, 1e-24 }
 0x204   : > { %v5492_v48 = vpop.eup %5491  ;;  %v907_v49 = vmul.f32 %v5490_v44, %v6977_v12 }
 0x205   : > { %942 = vst [vmem:[#allocation3 + $0x10] sm:$0xff] %v934_v45  ;;  %v906_v50 = vmul.f32 %v5492_v48, %v6979_v13  ;;  %5501 = vrsqrt.f32 %v881_v46 }
 0x206   : > { %923 = vst [vmem:[#allocation2 + $0x38] sm:$0xff] %v907_v49  ;;  %5503 = vrsqrt.f32 %v880_v47  ;;  %v867_v8 = vpop.xlane.xlu1 %866  ;;  %v865_v9 = vpop.xlane.xlu0 %864 }
 0x207   : > { %v5494_v51 = vpop.eup %5493  ;;  %922 = vst [vmem:[#allocation2 + $0x30] sm:$0xff] %v906_v50  ;;  %v935_v52 = vpack.c.bf16 %v907_v49, %v906_v50  ;;  %v883_v53 = vmax.f32 %v867_v8, 1e-24  ;;  %v882_v54 = vmax.f32 %v865_v9, 1e-24 }
 0x208   : > { %v5496_v55 = vpop.eup %5495  ;;  %v909_v56 = vmul.f32 %v5494_v51, %v6985_v16 }
 0x209   : > { %943 = vst [vmem:[#allocation3 + $0x18] sm:$0xff] %v935_v52  ;;  %v908_v57 = vmul.f32 %v5496_v55, %v6987_v17  ;;  %5505 = vrsqrt.f32 %v883_v53 }
 0x20a   : > { %925 = vst [vmem:[#allocation2 + $0x48] sm:$0xff] %v909_v56  ;;  %5507 = vrsqrt.f32 %v882_v54 }
 0x20b   : > { %v5498_v12 = vpop.eup %5497  ;;  %924 = vst [vmem:[#allocation2 + $0x40] sm:$0xff] %v908_v57  ;;  %v936_v13 = vpack.c.bf16 %v909_v56, %v908_v57 }
 0x20c   : > { %v5500_v58 = vpop.eup %5499  ;;  %v911_v59 = vmul.f32 %v5498_v12, %v6993_v20 }
 0x20d   : > { %944 = vst [vmem:[#allocation3 + $0x20] sm:$0xff] %v936_v13  ;;  %v910_v60 = vmul.f32 %v5500_v58, %v6995_v21 }
 0x20e   : > { %927 = vst [vmem:[#allocation2 + $0x58] sm:$0xff] %v911_v59 }
 0x20f   : > { %v5502_v61 = vpop.eup %5501  ;;  %926 = vst [vmem:[#allocation2 + $0x50] sm:$0xff] %v910_v60  ;;  %v937_v62 = vpack.c.bf16 %v911_v59, %v910_v60 }
 0x210   : > { %v5504_v16 = vpop.eup %5503  ;;  %v913_v63 = vmul.f32 %v5502_v61, %v7001_v24 }
 0x211   : > { %945 = vst [vmem:[#allocation3 + $0x28] sm:$0xff] %v937_v62  ;;  %v912_v17 = vmul.f32 %v5504_v16, %v7003_v25 }
 0x212   : > { %929 = vst [vmem:[#allocation2 + $0x68] sm:$0xff] %v913_v63 }
 0x213   : > { %v5506_v3 = vpop.eup %5505  ;;  %928 = vst [vmem:[#allocation2 + $0x60] sm:$0xff] %v912_v17  ;;  %v938_v4 = vpack.c.bf16 %v913_v63, %v912_v17 }
 0x214   : > { %v5508_v6 = vpop.eup %5507  ;;  %v915_v20 = vmul.f32 %v5506_v3, %v7009_v28 }
 0x215   : > { %946 = vst [vmem:[#allocation3 + $0x30] sm:$0xff] %v938_v4  ;;  %v914_v21 = vmul.f32 %v5508_v6, %v7011_v29 }
 0x216   : > { %931 = vst [vmem:[#allocation2 + $0x78] sm:$0xff] %v915_v20 }
 0x217   : > { %930 = vst [vmem:[#allocation2 + $0x70] sm:$0xff] %v914_v21  ;;  %v939_v7 = vpack.c.bf16 %v915_v20, %v914_v21 }
 0x219   : > { %947 = vst [vmem:[#allocation3 + $0x38] sm:$0xff] %v939_v7 }
 0x21a PF: > { %s8203_s18 = sld [smem:[#allocation35_spill]] }
 0x220   : > { %p4556_p7 = scmp.ne.s32.totalorder %s8203_s18, 0 }
 0x222   : > { %998 = sbr.rel (%p4556_p7) target bundleno = 1576 (0x628), region = 124 }
 0x229   : > { %v1015_v24 = vld [vmem:[#allocation3] sm:$0xff]  ;;  %v1016_v25 = vld [vmem:[#allocation3 + $0x8] sm:$0xff]  ;;  %v6395_v10 = vmov 0   ;;  %v1017_v29 = vld [vmem:[#allocation3 + $0x10] sm:$0xff]  ;;  %s8204_s9 = sld [smem:[#allocation51_spill]]  ;;  %s8208_s4 = sld [smem:[#allocation53_spill]] }
 0x22a   : > { %4873 = vmatprep.subr.bf16.mxu0 %v1015_v24  ;;  %5509 = vset.pattern.permute.xlu0 %v6395_v10  ;;  %v5511_v28 = vld [vmem:[%s6908_s21] sm:$0xff]   ;;  %v1018_v11 = vld [vmem:[#allocation3 + $0x18] sm:$0xff]  ;;  %v1170_v15 = vld [vmem:[%s6942_s6 + $0x10] sm:$0xff]  ;;  %s8209_s22 = sld [smem:[#allocation50_spill]] }
 0x22b   : > { %4874 = vmatpush3.bf16.msra.mxu0 %v1015_v24  ;;  %5510 = vset.pattern.permute.xlu1 %v6395_v10  ;;  %v1168_v14 = vld [vmem:[%s6942_s6] sm:$0xff]  ;;  %v1169_v19 = vld [vmem:[%s6942_s6 + $0x8] sm:$0xff]  ;;  %v1171_v22 = vld [vmem:[%s6942_s6 + $0x18] sm:$0xff] }
 0x22c   : > { %4875 = vmatprep.subr.bf16.mxu0 %v1016_v25  ;;  %1528 = vmatprep.mubr.bf16.mxu1 %v6395_v10  ;;  %v1019_v18 = vld [vmem:[#allocation3 + $0x20] sm:$0xff]  ;;  %v1020_v23 = vld [vmem:[#allocation3 + $0x28] sm:$0xff]  ;;  %v1021_v32 = vld [vmem:[#allocation3 + $0x30] sm:$0xff] }
 0x22d   : > { %4889 = vmatprep.mubr.bf16.mxu0 %v5511_v28  ;;  %1186 = vperm.xlu0 %5509, %v1168_v14   ;;  %v1172_v26 = vld [vmem:[%s6942_s6 + $0x20] sm:$0xff]  ;;  %v1173_v27 = vld [vmem:[%s6942_s6 + $0x28] sm:$0xff]  ;;  %v1174_v33 = vld [vmem:[%s6942_s6 + $0x30] sm:$0xff] }
 0x22e   : > { %1196 = vperm.xlu1 %5510, %v1170_v15   ;;  %v1175_v34 = vld [vmem:[%s6942_s6 + $0x38] sm:$0xff]  ;;  %v1176_v37 = vld [vmem:[%s6942_s6 + $0x40] sm:$0xff]  ;;  %v1177_v39 = vld [vmem:[%s6942_s6 + $0x48] sm:$0xff] }
 0x22f   : > { %4876 = vmatpush3.bf16.msra.mxu0 %v1016_v25  ;;  %v5519_v30 = vld [vmem:[%s8204_s9 + $0x4] ss:$12 sps:$4 sm:$0xff]   ;;  %v5521_v31 = vld [vmem:[%s8204_s9] ss:$12 sps:$4 sm:$0xff]   ;;  %v5523_v35 = vld [vmem:[%s8204_s9 + $0x1c] ss:$12 sps:$4 sm:$0xff]  }
 0x230   : > { %4877 = vmatprep.subr.bf16.mxu0 %v1017_v29  ;;  %1496 = vmatprep.subr.bf16.mxu1 %v5519_v30  ;;  %v5525_v36 = vld [vmem:[%s8204_s9 + $0x18] ss:$12 sps:$4 sm:$0xff]   ;;  %v5527_v0 = vld [vmem:[%s8204_s9 + $0x34] ss:$12 sps:$4 sm:$0xff]   ;;  %v5529_v38 = vld [vmem:[%s8204_s9 + $0x30] ss:$12 sps:$4 sm:$0xff]  }
 0x231   : > { %1191 = vperm.xlu0 %5509, %v1169_v19   ;;  %1497 = vmatpush1.bf16.msra.mxu1 %v5521_v31  ;;  %v1022_v1 = vld [vmem:[#allocation3 + $0x38] sm:$0xff]  ;;  %v1178_v41 = vld [vmem:[%s6942_s6 + $0x50] sm:$0xff]  ;;  %v5512_v5 = vld [vmem:[%s6908_s21 + $0x8] sm:$0xff]  }
 0x232   : > { %1201 = vperm.xlu1 %5510, %v1171_v22   ;;  %1498 = vmatprep.subr.bf16.mxu1 %v5523_v35  ;;  %v5531_v40 = vld [vmem:[%s8204_s9 + $0x4c] ss:$12 sps:$4 sm:$0xff]   ;;  %v5522_v42 = vld [vmem:[%s8204_s9 + $0x8] ss:$12 sps:$4 sm:$0xff]   ;;  %v5535_v44 = vld [vmem:[%s8204_s9 + $0x64] ss:$12 sps:$4 sm:$0xff]  }
 0x233   : > { %4878 = vmatpush3.bf16.msra.mxu0 %v1017_v29  ;;  %v5533_v2 = vld [vmem:[%s8204_s9 + $0x48] ss:$12 sps:$4 sm:$0xff]   ;;  %v1179_v43 = vld [vmem:[%s6942_s6 + $0x58] sm:$0xff]  ;;  %v1180_v46 = vld [vmem:[%s6942_s6 + $0x60] sm:$0xff] }
 0x234   : > { %4879 = vmatprep.subr.bf16.mxu0 %v1018_v11  ;;  %v5513_v45 = vld [vmem:[%s6908_s21 + $0x10] sm:$0xff]   ;;  %v5526_v47 = vld [vmem:[%s8204_s9 + $0x20] ss:$12 sps:$4 sm:$0xff]   ;;  %v5539_v50 = vld [vmem:[%s8204_s9 + $0x7c] ss:$12 sps:$4 sm:$0xff]  }
 0x235   : > { %1206 = vperm.xlu0 %5509, %v1172_v26   ;;  %1499 = vmatpush1.bf16.msra.mxu1 %v5525_v36  ;;  %v5537_v48 = vld [vmem:[%s8204_s9 + $0x60] ss:$12 sps:$4 sm:$0xff]   ;;  %v1182_v8 = vld [vmem:[%s6942_s6 + $0x70] sm:$0xff]  ;;  %v5530_v9 = vld [vmem:[%s8204_s9 + $0x38] ss:$12 sps:$4 sm:$0xff]  }
 0x236   : > { %1211 = vperm.xlu1 %5510, %v1173_v27   ;;  %1500 = vmatprep.subr.bf16.mxu1 %v5527_v0  ;;  %v1181_v49 = vld [vmem:[%s6942_s6 + $0x68] sm:$0xff]  ;;  %v5541_v51 = vld [vmem:[%s8204_s9 + $0x78] ss:$12 sps:$4 sm:$0xff]   ;;  %v5543_v54 = vld [vmem:[%s8204_s9 + $0x94] ss:$12 sps:$4 sm:$0xff]  }
 0x237   : > { %4880 = vmatpush3.bf16.msra.mxu0 %v1018_v11  ;;  %v5514_v52 = vld [vmem:[%s6908_s21 + $0x18] sm:$0xff]   ;;  %v5515_v55 = vld [vmem:[%s6908_s21 + $0x20] sm:$0xff]   ;;  %v5538_v57 = vld [vmem:[%s8204_s9 + $0x68] ss:$12 sps:$4 sm:$0xff]  }
 0x238   : > { %4881 = vmatprep.subr.bf16.mxu0 %v1019_v18  ;;  %v1183_v53 = vld [vmem:[%s6942_s6 + $0x78] sm:$0xff]  ;;  %v5516_v12 = vld [vmem:[%s6908_s21 + $0x28] sm:$0xff]   ;;  %v5517_v13 = vld [vmem:[%s6908_s21 + $0x30] sm:$0xff]   ;;  %s8205_s6 = sld [smem:[#allocation52_spill]] }
 0x239   : > { %1216 = vperm.xlu0 %5509, %v1174_v33   ;;  %1501 = vmatpush1.bf16.msra.mxu1 %v5529_v38  ;;  %v5534_v56 = vld [vmem:[%s8204_s9 + $0x50] ss:$12 sps:$4 sm:$0xff]   ;;  %v5542_v58 = vld [vmem:[%s8204_s9 + $0x80] ss:$12 sps:$4 sm:$0xff]   ;;  %v5546_v61 = vld [vmem:[%s8204_s9 + $0x98] ss:$12 sps:$4 sm:$0xff]  }
 0x23a   : > { %1221 = vperm.xlu1 %5510, %v1175_v34   ;;  %1502 = vmatprep.subr.bf16.mxu1 %v5531_v40  ;;  %v5518_v59 = vld [vmem:[%s6908_s21 + $0x38] sm:$0xff]   ;;  %v5549_v16 = vld [vmem:[%s8204_s9 + $0xa8] ss:$12 sps:$4 sm:$0xff]  }
 0x23b   : > { %4882 = vmatpush3.bf16.msra.mxu0 %v1019_v18  ;;  %v5545_v60 = vld [vmem:[%s8204_s9 + $0x90] ss:$12 sps:$4 sm:$0xff]   ;;  %v5547_v62 = vld [vmem:[%s8204_s9 + $0xac] ss:$12 sps:$4 sm:$0xff]  }
 0x23c   : > { %4883 = vmatprep.subr.bf16.mxu0 %v1020_v23  ;;  %v5550_v63 = vld [vmem:[%s8204_s9 + $0xb0] ss:$12 sps:$4 sm:$0xff]  }
 0x23d   : > { %1226 = vperm.xlu0 %5509, %v1176_v37   ;;  %1503 = vmatpush1.bf16.msra.mxu1 %v5533_v2 }
 0x23e   : > { %1231 = vperm.xlu1 %5510, %v1177_v39   ;;  %1504 = vmatprep.subr.bf16.mxu1 %v5535_v44  ;;  %v5553_v17 = vld [vmem:[%s8205_s6 + $0x4] ss:$12 sps:$4 sm:$0xff]   ;;  %v5575_v3 = vld [vmem:[%s8205_s6 + $0x8] ss:$12 sps:$4 sm:$0xff]   ;;  %v5551_v27 = vld [vmem:[%s8205_s6] ss:$12 sps:$4 sm:$0xff]  }
 0x23f   : > { %4884 = vmatpush3.bf16.msra.mxu0 %v1020_v23  ;;  %v5556_v31 = vld [vmem:[%s8205_s6 + $0x1c] ss:$12 sps:$4 sm:$0xff]   ;;  %v5576_v35 = vld [vmem:[%s8205_s6 + $0x20] ss:$12 sps:$4 sm:$0xff]   ;;  %v5554_v0 = vld [vmem:[%s8205_s6 + $0x18] ss:$12 sps:$4 sm:$0xff]  }
 0x240   : > { %4885 = vmatprep.subr.bf16.mxu0 %v1021_v32  ;;  %v5559_v37 = vld [vmem:[%s8205_s6 + $0x34] ss:$12 sps:$4 sm:$0xff]  }
 0x241   : > { %1236 = vperm.xlu0 %5509, %v1178_v41   ;;  %1505 = vmatpush1.bf16.msra.mxu1 %v5537_v48 }
 0x242   : > { %1241 = vperm.xlu1 %5510, %v1179_v43   ;;  %1506 = vmatprep.subr.bf16.mxu1 %v5539_v50 }
 0x243   : > { %4886 = vmatpush3.bf16.msra.mxu0 %v1021_v32 }
 0x244   : > { %4887 = vmatprep.subr.bf16.mxu0 %v1022_v1 }
 0x245   : > { %1246 = vperm.xlu0 %5509, %v1180_v46   ;;  %1507 = vmatpush1.bf16.msra.mxu1 %v5541_v51  ;;  %v5577_v46 = vld [vmem:[%s8205_s6 + $0x38] ss:$12 sps:$4 sm:$0xff]  }
 0x246   : > { %1251 = vperm.xlu1 %5510, %v1181_v49   ;;  %1508 = vmatprep.subr.bf16.mxu1 %v5543_v54  ;;  %v5578_v49 = vld [vmem:[%s8205_s6 + $0x50] ss:$12 sps:$4 sm:$0xff]  }
 0x247   : > { %4888 = vmatpush3.bf16.msra.mxu0 %v1022_v1 }
 0x248   : > { %4905 = vmatprep.subr.bf16.mxu0 %v5522_v42 }
 0x249   : > { %1256 = vperm.xlu0 %5509, %v1182_v8   ;;  %1509 = vmatpush1.bf16.msra.mxu1 %v5545_v60  ;;  %v5579_v60 = vld [vmem:[%s8205_s6 + $0x68] ss:$12 sps:$4 sm:$0xff]  }
 0x24a   : > { %4890 = vmatmul.mubr.bf16.vlgmr.msra.gmra.mrb[0].mxu0 %v5512_v5  ;;  %1261 = vperm.xlu1 %5510, %v1183_v53  }
 0x24b   : > { %4893 = vmatprep.mubr.bf16.mxu0 %v5513_v45  ;;  %4906 = vmatpush3.bf16.msra.mxu0 %v5522_v42  ;;  %v5557_v45 = vld [vmem:[%s8205_s6 + $0x30] ss:$12 sps:$4 sm:$0xff]  }
 0x24c   : > { %4907 = vmatprep.subr.bf16.mxu0 %v5526_v47  ;;  %1510 = vmatprep.subr.bf16.mxu1 %v5547_v62 }
 0x24d   : > { %1511 = vmatpush1.bf16.msra.mxu1 %v5549_v16  ;;  %v5580_v16 = vld [vmem:[%s8205_s6 + $0x80] ss:$12 sps:$4 sm:$0xff]  }
 0x24e   : > { %1939 = vmatprep.subr.bf16.mxu1 %v5553_v17 }
 0x24f   : > { %4908 = vmatpush3.bf16.msra.mxu0 %v5526_v47  ;;  %v5562_v47 = vld [vmem:[%s8205_s6 + $0x4c] ss:$12 sps:$4 sm:$0xff]  }
 0x250   : > { %4909 = vmatprep.subr.bf16.mxu0 %v5530_v9 }
 0x252   : > { %4894 = vmatmul.mubr.bf16.gmra.mrb[4].mxu0 %v5514_v52 }
 0x253   : > { %4897 = vmatprep.mubr.bf16.mxu0 %v5515_v55  ;;  %4910 = vmatpush3.bf16.msra.mxu0 %v5530_v9  ;;  %v5560_v9 = vld [vmem:[%s8205_s6 + $0x48] ss:$12 sps:$4 sm:$0xff]   ;;  %v5565_v55 = vld [vmem:[%s8205_s6 + $0x64] ss:$12 sps:$4 sm:$0xff]  }
 0x254   : > { %4911 = vmatprep.subr.bf16.mxu0 %v5534_v56 }
 0x257   : > { %4912 = vmatpush3.bf16.msra.mxu0 %v5534_v56 }
 0x258   : > { %4913 = vmatprep.subr.bf16.mxu0 %v5538_v57 }
 0x25a   : > { %4898 = vmatmul.mubr.bf16.gmra.mrb[8].mxu0 %v5516_v12 }
 0x25b   : > { %4901 = vmatprep.mubr.bf16.mxu0 %v5517_v13  ;;  %4914 = vmatpush3.bf16.msra.mxu0 %v5538_v57 }
 0x25c   : > { %4915 = vmatprep.subr.bf16.mxu0 %v5542_v58 }
 0x25f   : > { %4916 = vmatpush3.bf16.msra.mxu0 %v5542_v58 }
 0x260   : > { %4917 = vmatprep.subr.bf16.mxu0 %v5546_v61 }
 0x262   : > { %4902 = vmatmul.mubr.bf16.gmra.mrb[12].mxu0 %v5518_v59  ;;  %v5563_v59 = vld [vmem:[%s8205_s6 + $0x60] ss:$12 sps:$4 sm:$0xff]  }
 0x263   : > { %4918 = vmatpush3.bf16.msra.mxu0 %v5546_v61  ;;  %v5568_v61 = vld [vmem:[%s8205_s6 + $0x7c] ss:$12 sps:$4 sm:$0xff]  }
 0x264   : > { %4919 = vmatprep.subr.bf16.mxu0 %v5550_v63 }
 0x267   : > { %4920 = vmatpush3.bf16.msra.mxu0 %v5550_v63 }
 0x268   : > { %4937 = vmatprep.subr.bf16.mxu0 %v5575_v3 }
 0x2ac   : > { %v1187_v4 = vpop.permute.xlu0 %1186 }
 0x2ad   : > { %v1197_v6 = vpop.permute.xlu1 %1196 }
 0x2b0   : > { %v1192_v20 = vpop.permute.xlu0 %1191 }
 0x2b1   : > { %v1202_v21 = vpop.permute.xlu1 %1201 }
 0x2b4   : > { %v1207_v7 = vpop.permute.xlu0 %1206 }
 0x2b5   : > { %v1212_v24 = vpop.permute.xlu1 %1211 }
 0x2b8   : > { %v1217_v28 = vpop.permute.xlu0 %1216 }
 0x2b9   : > { %v1222_v11 = vpop.permute.xlu1 %1221 }
 0x2bc   : > { %v1227_v32 = vpop.permute.xlu0 %1226 }
 0x2bd   : > { %v1232_v33 = vpop.permute.xlu1 %1231 }
 0x2c0   : > { %v1237_v2 = vpop.permute.xlu0 %1236 }
 0x2c1   : > { %v1242_v43 = vpop.permute.xlu1 %1241 }
 0x2c4   : > { %v1247_v51 = vpop.permute.xlu0 %1246 }
 0x2c5   : > { %v1252_v56 = vpop.permute.xlu1 %1251 }
 0x2c8   : > { %v1257_v63 = vpop.permute.xlu0 %1256 }
 0x31d   : > { %v4891_v25 = vpop.f32.mrb[0].mxu0 }
 0x31e   : > { %v1105_v29 = vpop.f32.mrb[1].mxu0  ;;  %v1266_v15 = vmul.f32 %v4891_v25, %v1197_v6  ;;  %v5566_v6 = vld [vmem:[%s8205_s6 + $0x78] ss:$12 sps:$4 sm:$0xff]  }
 0x31f   : > { %v4892_v14 = vpop.f32.mrb[2].mxu0  ;;  %v1264_v22 = vmul.f32 %v1187_v4, %v1105_v29 }
 0x320   : > { %v1267_v18 = vmul.f32 %v4892_v14, %v1202_v21  ;;  %v1108_v19 = vpop.f32.mrb[3].mxu0  ;;  %v5569_v14 = vld [vmem:[%s8205_s6 + $0x90] ss:$12 sps:$4 sm:$0xff]  }
 0x321   : > { %v1265_v23 = vmul.f32 %v1192_v20, %v1108_v19  ;;  %v5582_v19 = vld [vmem:[%s8205_s6 + $0xb0] ss:$12 sps:$4 sm:$0xff]  }
 0x322   : > { %v1329_v26 = vpack.c.bf16 %v1267_v18, %v1266_v15  ;;  %v5581_v15 = vld [vmem:[%s8205_s6 + $0x98] ss:$12 sps:$4 sm:$0xff]  }
 0x323   : > { %v1328_v30 = vpack.c.bf16 %v1265_v23, %v1264_v22  ;;  %v5574_v18 = vld [vmem:[%s8205_s6 + $0xac] ss:$12 sps:$4 sm:$0xff]   ;;  %v5572_v22 = vld [vmem:[%s8205_s6 + $0xa8] ss:$12 sps:$4 sm:$0xff]   ;;  %v1754_v23 = vld [vmem:[#allocation5] sm:$0xff] }
 0x325   : > { %v4895_v34 = vpop.f32.mrb[4].mxu0  ;;  %1529 = vmatmul.mubr.bf16.vlgmr.msra.gmra.mrb[0].mxu1 %v1328_v30  ;;  %4921 = vmatprep.mubr.bf16.mxu0 %v1328_v30  ;;  %v1757_v30 = vld [vmem:[#allocation5 + $0x18] sm:$0xff] }
 0x326   : > { %1940 = vmatpush1.bf16.msra.mxu1 %v5551_v27  ;;  %v1121_v36 = vpop.f32.mrb[5].mxu0  ;;  %4922 = vmatmul.mubr.bf16.vlgmr.msra.gmra.mrb[16].mxu0 %v1329_v26  ;;  %v1270_v38 = vmul.f32 %v4895_v34, %v1217_v28  ;;  %v1756_v27 = vld [vmem:[#allocation5 + $0x10] sm:$0xff]  ;;  %v1761_v34 = vld [vmem:[#allocation5 + $0x38] sm:$0xff] }
 0x327   : > { %v4896_v1 = vpop.f32.mrb[6].mxu0  ;;  %1538 = vmatprep.mubr.bf16.mxu1 %v6395_v10  ;;  %1941 = vmatprep.subr.bf16.mxu1 %v5556_v31  ;;  %v1268_v41 = vmul.f32 %v1207_v7, %v1121_v36  ;;  %v1758_v31 = vld [vmem:[#allocation5 + $0x20] sm:$0xff] }
 0x328   : > { %v1271_v39 = vmul.f32 %v4896_v1, %v1222_v11  ;;  %v1124_v40 = vpop.f32.mrb[7].mxu0  ;;  %4938 = vmatpush3.bf16.msra.mxu0 %v5575_v3  ;;  %v1262_v3 = vpop.permute.xlu1 %1261 }
 0x329   : > { %v1269_v42 = vmul.f32 %v1212_v24, %v1124_v40  ;;  %4939 = vmatprep.subr.bf16.mxu0 %v5576_v35  ;;  %v5571_v24 = vld [vmem:[%s8205_s6 + $0x94] ss:$12 sps:$4 sm:$0xff]  }
 0x32a   : > { %v7155_v5 = vpack.c.bf16 %v1271_v39, %v1270_v38  ;;  %1942 = vmatpush1.bf16.msra.mxu1 %v5554_v0 }
 0x32b   : > { %v1330_v44 = vpack.c.bf16 %v1269_v42, %v1268_v41  ;;  %1943 = vmatprep.subr.bf16.mxu1 %v5559_v37 }
 0x32c   : > { %4940 = vmatpush3.bf16.msra.mxu0 %v5576_v35 }
 0x32d   : > { %v4899_v48 = vpop.f32.mrb[8].mxu0  ;;  %1539 = vmatmul.mubr.bf16.gmra.mrb[4].mxu1 %v1329_v26  ;;  %4925 = vmatprep.mubr.bf16.mxu0 %v1330_v44  ;;  %v1755_v26 = vld [vmem:[#allocation5 + $0x8] sm:$0xff] }
 0x32e   : > { %v1137_v50 = vpop.f32.mrb[9].mxu0  ;;  %4926 = vmatmul.mubr.bf16.gmra.mrb[20].mxu0 %v7155_v5  ;;  %1548 = vmatprep.mubr.bf16.mxu1 %v6395_v10  ;;  %v1274_v52 = vmul.f32 %v4899_v48, %v1237_v2 }
 0x32f   : > { %v4900_v8 = vpop.f32.mrb[10].mxu0  ;;  %1944 = vmatpush1.bf16.msra.mxu1 %v5557_v45  ;;  %4941 = vmatprep.subr.bf16.mxu0 %v5577_v46  ;;  %v1272_v57 = vmul.f32 %v1227_v32, %v1137_v50  ;;  %v1759_v32 = vld [vmem:[#allocation5 + $0x28] sm:$0xff] }
 0x330   : > { %v1275_v53 = vmul.f32 %v4900_v8, %v1242_v43  ;;  %v1140_v54 = vpop.f32.mrb[11].mxu0  ;;  %1945 = vmatprep.subr.bf16.mxu1 %v5562_v47  ;;  %4942 = vmatpush3.bf16.msra.mxu0 %v5577_v46 }
 0x331   : > { %v1273_v12 = vmul.f32 %v1232_v33, %v1140_v54  ;;  %4943 = vmatprep.subr.bf16.mxu0 %v5578_v49  ;;  %v1760_v33 = vld [vmem:[#allocation5 + $0x30] sm:$0xff] }
 0x332   : > { %v1333_v13 = vpack.c.bf16 %v1275_v53, %v1274_v52 }
 0x333   : > { %v1332_v58 = vpack.c.bf16 %v1273_v12, %v1272_v57  ;;  %1946 = vmatpush1.bf16.msra.mxu1 %v5560_v9 }
 0x334   : > { %1947 = vmatprep.subr.bf16.mxu1 %v5565_v55  ;;  %4944 = vmatpush3.bf16.msra.mxu0 %v5578_v49 }
 0x335   : > { %v4903_v62 = vpop.f32.mrb[12].mxu0  ;;  %1549 = vmatmul.mubr.bf16.gmra.mrb[8].mxu1 %v1330_v44  ;;  %4929 = vmatprep.mubr.bf16.mxu0 %v1332_v58 }
 0x336   : > { %v1153_v17 = vpop.f32.mrb[13].mxu0  ;;  %4930 = vmatmul.mubr.bf16.gmra.mrb[24].mxu0 %v1333_v13  ;;  %1558 = vmatprep.mubr.bf16.mxu1 %v6395_v10  ;;  %v1278_v20 = vmul.f32 %v4903_v62, %v1257_v63  ;;  %v1280_v63 = vld [vmem:[%s8209_s22] sm:$0xff] }
 0x337   : > { %v4904_v4 = vpop.f32.mrb[14].mxu0  ;;  %1948 = vmatpush1.bf16.msra.mxu1 %v5563_v59  ;;  %4945 = vmatprep.subr.bf16.mxu0 %v5579_v60  ;;  %v1276_v25 = vmul.f32 %v1247_v51, %v1153_v17  ;;  %v1796_v51 = vlaneseq }
 0x338   : > { %v1279_v21 = vmul.f32 %v4904_v4, %v1262_v3  ;;  %v1156_v7 = vpop.f32.mrb[15].mxu0  ;;  %1949 = vmatprep.subr.bf16.mxu1 %v5568_v61  ;;  %4946 = vmatpush3.bf16.msra.mxu0 %v5579_v60  ;;  %v5583_v60 = vld [vmem:[#allocation16] sm:$0xff]   ;;  %v5584_v61 = vld [vmem:[#allocation16 + $0x8] sm:$0xff]  }
 0x339   : > { %v1277_v28 = vmul.f32 %v1252_v56, %v1156_v7  ;;  %4947 = vmatprep.subr.bf16.mxu0 %v5580_v16  ;;  %v1797_v53 = vshrl.u32 %v1796_v51, 7  ;;  %v1281_v4 = vld [vmem:[%s8209_s22 + $0x8] sm:$0xff]  ;;  %v1283_v7 = vld [vmem:[%s8209_s22 + $0x18] sm:$0xff] }
 0x33a   : > { %v1335_v29 = vpack.c.bf16 %v1279_v21, %v1278_v20  ;;  %v5585_v21 = vld [vmem:[#allocation16 + $0x10] sm:$0xff]   ;;  %v1287_v51 = vld [vmem:[%s8209_s22 + $0x38] sm:$0xff] }
 0x33b   : > { %v1334_v11 = vpack.c.bf16 %v1277_v28, %v1276_v25  ;;  %1950 = vmatpush1.bf16.msra.mxu1 %v5566_v6  ;;  %v1798_v57 = vsub.s32 0, %v1797_v53  ;;  %v1806_v12 = vsub.s32 2, %v1797_v53  ;;  %v1802_v59 = vsub.s32 1, %v1797_v53  ;;  %v1284_v28 = vld [vmem:[%s8209_s22 + $0x20] sm:$0xff] }
 0x33c   : > { %1951 = vmatprep.subr.bf16.mxu1 %v5571_v24  ;;  %4948 = vmatpush3.bf16.msra.mxu0 %v5580_v16  ;;  %v5587_v53 = vld [vmem:[#allocation16 + $0x20] sm:$0xff]  }
 0x33d   : > { %1559 = vmatmul.mubr.bf16.gmra.mrb[12].mxu1 %v7155_v5  ;;  %4933 = vmatprep.mubr.bf16.mxu0 %v1334_v11 }
 0x33e   : > { %4934 = vmatmul.mubr.bf16.gmra.mrb[28].mxu0 %v1335_v29  ;;  %1568 = vmatprep.mubr.bf16.mxu1 %v6395_v10 }
 0x33f   : > { %1952 = vmatpush1.bf16.msra.mxu1 %v5569_v14  ;;  %4949 = vmatprep.subr.bf16.mxu0 %v5581_v15 }
 0x340   : > { %1953 = vmatprep.subr.bf16.mxu1 %v5574_v18  ;;  %4950 = vmatpush3.bf16.msra.mxu0 %v5581_v15  ;;  %v5586_v18 = vld [vmem:[#allocation16 + $0x18] sm:$0xff]  }
 0x341   : > { %4951 = vmatprep.subr.bf16.mxu0 %v5582_v19  ;;  %4953 = vmatprep.mubr.bf16.mxu0 %v1754_v23 }
 0x343   : > { %1954 = vmatpush1.bf16.msra.mxu1 %v5572_v22 }
 0x344   : > { %4952 = vmatpush3.bf16.msra.mxu0 %v5582_v19 }
 0x345   : > { %1569 = vmatmul.mubr.bf16.gmra.mrb[16].mxu1 %v1332_v58  ;;  %v1794_v58 = vld [vmem:[%s8208_s4] sm:$0x7]  ;;  %4969 = vmatprep.subr.bf16.mxu0 %v5583_v60 }
 0x346   : > { %1578 = vmatprep.mubr.bf16.mxu1 %v6395_v10  ;;  %v7283_v62 = vrot.slane %v1794_v58, %v1798_v57  ;;  %v7285_v16 = vrot.slane %v1794_v58, %v1806_v12  ;;  %v7290_v17 = vrot.slane %v1794_v58, %v1802_v59  ;;  %v1289_v58 = vld [vmem:[%s8209_s22 + $0x48] sm:$0xff] }
 0x347   : > { %4954 = vmatmul.mubr.bf16.vlgmr.msra.gmra.mrb[32].mxu0 %v1755_v26 }
 0x348   : > { %4957 = vmatprep.mubr.bf16.mxu0 %v1756_v27  ;;  %4970 = vmatpush3.bf16.msra.mxu0 %v5583_v60  ;;  %v5145_v25 = vadd.f32 %v7283_v62, %v1280_v63  ;;  %v5147_v14 = vadd.f32 %v7290_v17, %v1281_v4  ;;  %v5149_v15 = vadd.f32 %v7283_v62, %v1283_v7 }
 0x349   : > { %4971 = vmatprep.subr.bf16.mxu0 %v5584_v61  ;;  %v5151_v22 = vadd.f32 %v7290_v17, %v1284_v28  ;;  %v5157_v4 = vadd.f32 %v7283_v62, %v1289_v58 }
 0x34c   : > { %4972 = vmatpush3.bf16.msra.mxu0 %v5584_v61  ;;  %v1290_v61 = vld [vmem:[%s8209_s22 + $0x50] sm:$0xff] }
 0x34d   : > { %1579 = vmatmul.mubr.bf16.gmra.mrb[20].mxu1 %v1333_v13  ;;  %4973 = vmatprep.subr.bf16.mxu0 %v5585_v21 }
 0x34e   : > { %1588 = vmatprep.mubr.bf16.mxu1 %v6395_v10 }
 0x34f   : > { %4958 = vmatmul.mubr.bf16.gmra.mrb[36].mxu0 %v1757_v30 }
 0x350   : > { %4961 = vmatprep.mubr.bf16.mxu0 %v1758_v31  ;;  %4974 = vmatpush3.bf16.msra.mxu0 %v5585_v21  ;;  %v5588_v21 = vld [vmem:[#allocation16 + $0x28] sm:$0xff]  }
 0x351   : > { %4975 = vmatprep.subr.bf16.mxu0 %v5586_v18 }
 0x354   : > { %4976 = vmatpush3.bf16.msra.mxu0 %v5586_v18 }
 0x355   : > { %1589 = vmatmul.mubr.bf16.gmra.mrb[24].mxu1 %v1334_v11  ;;  %4977 = vmatprep.subr.bf16.mxu0 %v5587_v53 }
 0x356   : > { %1598 = vmatprep.mubr.bf16.mxu1 %v6395_v10 }
 0x357   : > { %4962 = vmatmul.mubr.bf16.gmra.mrb[40].mxu0 %v1759_v32 }
 0x358   : > { %4965 = vmatprep.mubr.bf16.mxu0 %v1760_v33  ;;  %4978 = vmatpush3.bf16.msra.mxu0 %v5587_v53 }
 0x359   : > { %4979 = vmatprep.subr.bf16.mxu0 %v5588_v21 }
 0x35c   : > { %4980 = vmatpush3.bf16.msra.mxu0 %v5588_v21 }
 0x35d   : > { %1599 = vmatmul.mubr.bf16.gmra.mrb[28].mxu1 %v1335_v29 }
 0x35e   : > { %1971 = vmatprep.mubr.bf16.mxu1 %v6395_v10 }
 0x35f   : > { %4966 = vmatmul.mubr.bf16.gmra.mrb[44].mxu0 %v1761_v34 }
 0x365   : > { %1972 = vmatmul.mubr.bf16.vlgmr.msra.gmra.mrb[0].mxu1 %v1754_v23 }
 0x366   : > { %1981 = vmatprep.mubr.bf16.mxu1 %v6395_v10 }
 0x36d   : > { %1982 = vmatmul.mubr.bf16.gmra.mrb[4].mxu1 %v1755_v26 }
 0x36e   : > { %1991 = vmatprep.mubr.bf16.mxu1 %v6395_v10 }
 0x375   : > { %1992 = vmatmul.mubr.bf16.gmra.mrb[8].mxu1 %v1756_v27 }
 0x376   : > { %2001 = vmatprep.mubr.bf16.mxu1 %v6395_v10 }
 0x37d   : > { %2002 = vmatmul.mubr.bf16.gmra.mrb[12].mxu1 %v1757_v30 }
 0x37e   : > { %2011 = vmatprep.mubr.bf16.mxu1 %v6395_v10 }
 0x385   : > { %2012 = vmatmul.mubr.bf16.gmra.mrb[16].mxu1 %v1758_v31  ;;  %v1286_v31 = vld [vmem:[%s8209_s22 + $0x30] sm:$0xff] }
 0x386   : > { %2021 = vmatprep.mubr.bf16.mxu1 %v6395_v10  ;;  %v5153_v60 = vadd.f32 %v7283_v62, %v1286_v31 }
 0x38d   : > { %2022 = vmatmul.mubr.bf16.gmra.mrb[20].mxu1 %v1759_v32 }
 0x38e   : > { %2031 = vmatprep.mubr.bf16.mxu1 %v6395_v10 }
 0x395   : > { %2032 = vmatmul.mubr.bf16.gmra.mrb[24].mxu1 %v1760_v33 }
 0x396   : > { %2041 = vmatprep.mubr.bf16.mxu1 %v6395_v10 }
 0x39d   : > { %2042 = vmatmul.mubr.bf16.gmra.mrb[28].mxu1 %v1761_v34 }
 0x3f9   : > { %v7224_v35 = vpop.f32.mrb[16].mxu0 }
 0x3fa   : > { %v7226_v36 = vpop.f32.mrb[17].mxu0 }
 0x3fb   : > { %v7228_v0 = vpop.f32.mrb[18].mxu0 }
 0x3fc   : > { %v7230_v1 = vpop.f32.mrb[19].mxu0 }
 0x401   : > { %v7232_v37 = vpop.f32.mrb[20].mxu0 }
 0x402   : > { %v7234_v38 = vpop.f32.mrb[21].mxu0 }
 0x403   : > { %v7236_v39 = vpop.f32.mrb[22].mxu0 }
 0x404   : > { %v7238_v40 = vpop.f32.mrb[23].mxu0 }
 0x409   : > { %v7240_v41 = vpop.f32.mrb[24].mxu0 }
 0x40a   : > { %v7242_v10 = vpop.f32.mrb[25].mxu0 }
 0x40b   : > { %v7244_v42 = vpop.f32.mrb[26].mxu0 }
 0x40c   : > { %v7246_v2 = vpop.f32.mrb[27].mxu0 }
 0x411   : > { %v7248_v5 = vpop.f32.mrb[28].mxu0 }
 0x412   : > { %8206 = vst [vmem:[#allocation44_spill] sm:$0xff] %v7248_v5  ;;  %v7250_v43 = vpop.f32.mrb[29].mxu0 }
 0x413   : > { %v7252_v44 = vpop.f32.mrb[30].mxu0 }
 0x414   : > { %8207 = vst [vmem:[#allocation45_spill] sm:$0xff] %v7252_v44  ;;  %v7254_v45 = vpop.f32.mrb[31].mxu0 }
 0x41a   : > { %v7256_v46 = vpop.f32.mrb[32].mxu0 }
 0x41b   : > { %v7258_v47 = vpop.f32.mrb[33].mxu0 }
 0x41c   : > { %v7260_v48 = vpop.f32.mrb[34].mxu0 }
 0x41d   : > { %v7262_v49 = vpop.f32.mrb[35].mxu0 }
 0x422   : > { %v7264_v50 = vpop.f32.mrb[36].mxu0 }
 0x423   : > { %v7266_v8 = vpop.f32.mrb[37].mxu0 }
 0x424   : > { %v7268_v9 = vpop.f32.mrb[38].mxu0 }
 0x425   : > { %v7270_v52 = vpop.f32.mrb[39].mxu0 }
 0x42a   : > { %v7272_v54 = vpop.f32.mrb[40].mxu0 }
 0x42b   : > { %v7274_v55 = vpop.f32.mrb[41].mxu0 }
 0x42c   : > { %v7276_v56 = vpop.f32.mrb[42].mxu0 }
 0x42d   : > { %v7278_v13 = vpop.f32.mrb[43].mxu0 }
 0x432   : > { %v4967_v3 = vpop.f32.mrb[44].mxu0 }
 0x433   : > { %v7296_v6 = vadd.f32 %v4967_v3, %v7285_v16  ;;  %v7298_v20 = vpop.f32.mrb[45].mxu0  ;;  %v5155_v3 = vadd.f32 %v7290_v17, %v1287_v51  ;;  %v1296_v51 = vld [vmem:[%s8209_s22 + $0x80] sm:$0xff] }
 0x434   : > { %v4968_v24 = vpop.f32.mrb[46].mxu0 }
 0x435   : > { %8210 = vst [vmem:[#allocation46_spill] sm:$0xff] %v7296_v6  ;;  %v7308_v29 = vadd.f32 %v4968_v24, %v7285_v16  ;;  %v7310_v11 = vpop.f32.mrb[47].mxu0  ;;  %v5159_v24 = vadd.f32 %v7290_v17, %v1290_v61 }
 0x437   : > { %8211 = vst [vmem:[#allocation47_spill] sm:$0xff] %v7308_v29 }
 0x438   : > { %v1973_v19 = vpop.f32.mrb[0].mxu1 }
 0x439   : > { %v5146_v23 = vadd.f32 %v5145_v25, %v1973_v19  ;;  %v1975_v26 = vpop.f32.mrb[1].mxu1  ;;  %v1292_v19 = vld [vmem:[%s8209_s22 + $0x60] sm:$0xff] }
 0x43a   : > { %v5148_v27 = vadd.f32 %v5147_v14, %v1975_v26  ;;  %v1977_v30 = vpop.f32.mrb[2].mxu1  ;;  %v1293_v26 = vld [vmem:[%s8209_s22 + $0x68] sm:$0xff] }
 0x43b   : > { %v4613_v32 = vmul.f32 -1.442695, %v5146_v23  ;;  %v5150_v33 = vadd.f32 %v5149_v15, %v1977_v30  ;;  %v1979_v34 = vpop.f32.mrb[3].mxu1 }
 0x43c   : > { %v4629_v57 = vmul.f32 -1.442695, %v5148_v27  ;;  %v5152_v12 = vadd.f32 %v5151_v22, %v1979_v34  ;;  %v5589_v27 = vld [vmem:[#allocation16 + $0x30] sm:$0xff]   ;;  %v5161_v34 = vadd.f32 %v7283_v62, %v1292_v19 }
 0x43d   : > { %5599 = vpow2.f32 %v4613_v32  ;;  %v4614_v59 = vmul.f32 -1.442695, %v5150_v33  ;;  %v1295_v32 = vld [vmem:[%s8209_s22 + $0x78] sm:$0xff]  ;;  %4981 = vmatprep.subr.bf16.mxu0 %v5589_v27 }
 0x43e   : > { %5601 = vpow2.f32 %v4629_v57  ;;  %v4630_v63 = vmul.f32 -1.442695, %v5152_v12  ;;  %v5163_v57 = vadd.f32 %v7290_v17, %v1293_v26  ;;  %v5165_v58 = vadd.f32 %v7283_v62, %v1295_v32  ;;  %4982 = vmatpush3.bf16.msra.mxu0 %v5589_v27 }
 0x43f   : > { %5603 = vpow2.f32 %v4614_v59  ;;  %v5590_v59 = vld [vmem:[#allocation16 + $0x38] sm:$0xff]  }
 0x440   : > { %v1983_v7 = vpop.f32.mrb[4].mxu1  ;;  %5605 = vpow2.f32 %v4630_v63  ;;  %4983 = vmatprep.subr.bf16.mxu0 %v5590_v59 }
 0x441   : > { %v5154_v25 = vadd.f32 %v5153_v60, %v1983_v7  ;;  %v1985_v28 = vpop.f32.mrb[5].mxu1  ;;  %v1299_v7 = vld [vmem:[%s8209_s22 + $0x98] sm:$0xff] }
 0x442   : > { %v5156_v14 = vadd.f32 %v5155_v3, %v1985_v28  ;;  %v1987_v15 = vpop.f32.mrb[6].mxu1  ;;  %v5167_v3 = vadd.f32 %v7290_v17, %v1296_v51  ;;  %v1307_v51 = vld [vmem:[%s8209_s22 + $0xd8] sm:$0xff]  ;;  %4984 = vmatpush3.bf16.msra.mxu0 %v5590_v59 }
 0x443   : > { %v4615_v22 = vmul.f32 -1.442695, %v5154_v25  ;;  %v5158_v18 = vadd.f32 %v5157_v4, %v1987_v15  ;;  %v1989_v23 = vpop.f32.mrb[7].mxu1  ;;  %v1298_v4 = vld [vmem:[%s8209_s22 + $0x90] sm:$0xff] }
 0x444   : > { %v4631_v30 = vmul.f32 -1.442695, %v5156_v14  ;;  %v5160_v31 = vadd.f32 %v5159_v24, %v1989_v23  ;;  %v1301_v14 = vld [vmem:[%s8209_s22 + $0xa8] sm:$0xff]  ;;  %v1304_v23 = vld [vmem:[%s8209_s22 + $0xc0] sm:$0xff]  ;;  %v5169_v32 = vadd.f32 %v7283_v62, %v1298_v4 }
 0x445   : > { %5607 = vpow2.f32 %v4615_v22  ;;  %v4616_v33 = vmul.f32 -1.442695, %v5158_v18  ;;  %v1302_v18 = vld [vmem:[%s8209_s22 + $0xb0] sm:$0xff]  ;;  %v7379_v4 = vadd.f32 %v7283_v62, %v1304_v23 }
 0x446   : > { %5609 = vpow2.f32 %v4631_v30  ;;  %v4632_v53 = vmul.f32 -1.442695, %v5160_v31 }
 0x447   : > { %v5600_v12 = vpop.eup %5599  ;;  %5611 = vpow2.f32 %v4616_v33  ;;  %v5171_v33 = vadd.f32 %v7290_v17, %v1299_v7  ;;  %v1313_v7 = vld [vmem:[%s8209_s22 + $0x108] sm:$0xff] }
 0x448   : > { %v5602_v60 = vpop.eup %5601  ;;  %v2229_v61 = vadd.f32 1.0, %v5600_v12  ;;  %v1993_v63 = vpop.f32.mrb[8].mxu1  ;;  %5613 = vpow2.f32 %v4632_v53  ;;  %v5173_v12 = vadd.f32 %v7283_v62, %v1301_v14  ;;  %v7406_v59 = vadd.f32 %v7283_v62, %v1313_v7 }
 0x449   : > { %v5604_v21 = vpop.eup %5603  ;;  %v2341_v24 = vadd.f32 1.0, %v5602_v60  ;;  %v5162_v25 = vadd.f32 %v5161_v34, %v1993_v63  ;;  %v1995_v28 = vpop.f32.mrb[9].mxu1  ;;  %v1305_v34 = vld [vmem:[%s8209_s22 + $0xc8] sm:$0xff]  ;;  %v1310_v60 = vld [vmem:[%s8209_s22 + $0xf0] sm:$0xff]  ;;  %v5175_v63 = vadd.f32 %v7290_v17, %v1302_v18 }
 0x44a   : > { %5615 = vrcp.f32 %v2229_v61  ;;  %v2230_v15 = vadd.f32 1.0, %v5604_v21  ;;  %v5164_v19 = vadd.f32 %v5163_v57, %v1995_v28  ;;  %v1997_v22 = vpop.f32.mrb[10].mxu1  ;;  %v5606_v53 = vpop.eup %5605 }
 0x44b   : > { %v4617_v26 = vmul.f32 -1.442695, %v5162_v25  ;;  %v5166_v30 = vadd.f32 %v5165_v58, %v1997_v22  ;;  %v1999_v31 = vpop.f32.mrb[11].mxu1  ;;  %v1308_v58 = vld [vmem:[%s8209_s22 + $0xe0] sm:$0xff]  ;;  %v7388_v25 = vadd.f32 %v7290_v17, %v1305_v34  ;;  %v2342_v14 = vadd.f32 1.0, %v5606_v53  ;;  %v1314_v22 = vld [vmem:[%s8209_s22 + $0x110] sm:$0xff] }
 0x44c   : > { %5617 = vrcp.f32 %v2230_v15  ;;  %v4633_v57 = vmul.f32 -1.442695, %v5164_v19  ;;  %v5168_v27 = vadd.f32 %v5167_v3, %v1999_v31  ;;  %v1311_v3 = vld [vmem:[%s8209_s22 + $0xf8] sm:$0xff]  ;;  %v7394_v15 = vadd.f32 %v7290_v17, %v1308_v58  ;;  %v1282_v58 = vld [vmem:[%s8209_s22 + $0x10] sm:$0xff] }
 0x44d   : > { %5619 = vrcp.f32 %v2341_v24  ;;  %v4618_v61 = vmul.f32 -1.442695, %v5166_v30  ;;  %v7391_v24 = vadd.f32 %v7283_v62, %v1307_v51  ;;  %v7397_v19 = vadd.f32 %v7283_v62, %v1310_v60 }
 0x44e   : > { %5621 = vpow2.f32 %v4617_v26  ;;  %v4634_v21 = vmul.f32 -1.442695, %v5168_v27  ;;  %v7403_v30 = vadd.f32 %v7290_v17, %v1311_v3  ;;  %v1316_v27 = vld [vmem:[%s8209_s22 + $0x120] sm:$0xff]  ;;  %v7417_v7 = vadd.f32 %v7290_v17, %v1314_v22  ;;  %v1285_v22 = vld [vmem:[%s8209_s22 + $0x28] sm:$0xff] }
 0x44f   : > { %v5608_v28 = vpop.eup %5607  ;;  %5623 = vpow2.f32 %v4633_v57  ;;  %v2087_v57 = vadd.f32 %v7258_v47, %v7285_v16 }
 0x450   : > { %v5610_v18 = vpop.eup %5609  ;;  %v2231_v23 = vadd.f32 1.0, %v5608_v28  ;;  %5625 = vpow2.f32 %v4618_v61  ;;  %v2003_v26 = vpop.f32.mrb[12].mxu1 }
 0x451   : > { %v5612_v31 = vpop.eup %5611  ;;  %v2343_v34 = vadd.f32 1.0, %v5610_v18  ;;  %5627 = vpow2.f32 %v4634_v21  ;;  %v5170_v51 = vadd.f32 %v5169_v32, %v2003_v26  ;;  %v2005_v53 = vpop.f32.mrb[13].mxu1  ;;  %v2090_v18 = vadd.f32 %v7262_v49, %v7285_v16  ;;  %v1317_v26 = vld [vmem:[%s8209_s22 + $0x128] sm:$0xff] }
 0x452   : > { %5629 = vrcp.f32 %v2231_v23  ;;  %v2232_v60 = vadd.f32 1.0, %v5612_v31  ;;  %v5172_v61 = vadd.f32 %v5171_v33, %v2005_v53  ;;  %v2007_v3 = vpop.f32.mrb[14].mxu1  ;;  %v5614_v32 = vpop.eup %5613  ;;  %v1319_v33 = vld [vmem:[%s8209_s22 + $0x138] sm:$0xff]  ;;  %v7431_v31 = vadd.f32 %v7283_v62, %v1316_v27 }
 0x453   : > { %5631 = vrcp.f32 %v2342_v14  ;;  %v4619_v21 = vmul.f32 -1.442695, %v5170_v51  ;;  %v5174_v28 = vadd.f32 %v5173_v12, %v2007_v3  ;;  %v2009_v47 = vpop.f32.mrb[15].mxu1  ;;  %v1708_v49 = vadd.f32 %v7226_v36, %v1282_v58  ;;  %v1320_v3 = vld [vmem:[%s8209_s22 + $0x140] sm:$0xff] }
 0x454   : > { %v5616_v23 = vpop.eup %5615  ;;  %5633 = vrcp.f32 %v2232_v60  ;;  %v4635_v14 = vmul.f32 -1.442695, %v5172_v61  ;;  %v5176_v12 = vadd.f32 %v5175_v63, %v2009_v47  ;;  %v2344_v44 = vadd.f32 1.0, %v5614_v32  ;;  %v1288_v36 = vld [vmem:[%s8209_s22 + $0x40] sm:$0xff]  ;;  %v1322_v60 = vld [vmem:[%s8209_s22 + $0x150] sm:$0xff]  ;;  %v1291_v32 = vld [vmem:[%s8209_s22 + $0x58] sm:$0xff] }
 0x455   : > { %5635 = vrcp.f32 %v2343_v34  ;;  %v4620_v51 = vmul.f32 -1.442695, %v5174_v28  ;;  %v2389_v53 = vmul.f32 %v5616_v23, %v2087_v57  ;;  %v7438_v6 = vadd.f32 %v7290_v17, %v1317_v26 }
 0x456   : > { %v5618_v29 = vpop.eup %5617  ;;  %5637 = vpow2.f32 %v4619_v21  ;;  %v7441_v63 = vadd.f32 %v7283_v62, %v1319_v33  ;;  %v1711_v34 = vadd.f32 %v7230_v1, %v1285_v22  ;;  %v2095_v21 = vadd.f32 %v7256_v46, %v7285_v16  ;;  %v1323_v22 = vld [vmem:[%s8209_s22 + $0x158] sm:$0xff] }
 0x457   : > { %v7443_v27 = vpop.eup %5619  ;;  %5639 = vpow2.f32 %v4635_v14  ;;  %v2405_v57 = vadd.f32 %v2389_v53, %v1708_v49  ;;  %v2390_v58 = vmul.f32 %v5618_v29, %v2090_v18  ;;  %v4636_v28 = vmul.f32 -1.442695, %v5176_v12  ;;  %v1325_v53 = vld [vmem:[%s8209_s22 + $0x168] sm:$0xff] }
 0x458   : > { %v5622_v61 = vpop.eup %5621  ;;  %5641 = vpow2.f32 %v4620_v51  ;;  %v2013_v47 = vpop.f32.mrb[16].mxu1  ;;  %v7458_v1 = vadd.f32 %v7290_v17, %v1320_v3  ;;  %v1714_v46 = vadd.f32 %v7224_v35, %v1288_v36  ;;  %v7466_v51 = vadd.f32 %v7283_v62, %v1322_v60  ;;  %v1300_v35 = vld [vmem:[%s8209_s22 + $0xa0] sm:$0xff] }
 0x459   : > { %v5624_v26 = vpop.eup %5623  ;;  %v2233_v29 = vadd.f32 1.0, %v5622_v61  ;;  %5643 = vtanh.f32 %v2405_v57  ;;  %v2406_v18 = vadd.f32 %v2390_v58, %v1711_v34  ;;  %v5178_v33 = vadd.f32 %v7379_v4, %v2013_v47  ;;  %v2015_v23 = vpop.f32.mrb[17].mxu1  ;;  %v1326_v4 = vld [vmem:[%s8209_s22 + $0x170] sm:$0xff] }
 0x45a   : > { %v5626_v14 = vpop.eup %5625  ;;  %5645 = vrcp.f32 %v2344_v44  ;;  %v2345_v12 = vadd.f32 1.0, %v5624_v26  ;;  %v2017_v49 = vpop.f32.mrb[18].mxu1  ;;  %v1717_v34 = vadd.f32 %v7228_v0, %v1291_v32  ;;  %v1294_v44 = vld [vmem:[%s8209_s22 + $0x70] sm:$0xff]  ;;  %v2098_v57 = vadd.f32 %v7260_v48, %v7285_v16 }
 0x45b   : > { %v5628_v3 = vpop.eup %5627  ;;  %5647 = vrcp.f32 %v2233_v29  ;;  %v2234_v36 = vadd.f32 1.0, %v5626_v14  ;;  %v2019_v58 = vpop.f32.mrb[19].mxu1  ;;  %v4621_v61 = vmul.f32 -1.442695, %v5178_v33  ;;  %v5180_v47 = vadd.f32 %v7388_v25, %v2015_v23 }
 0x45c   : > { %v5630_v60 = vpop.eup %5629  ;;  %5649 = vpow2.f32 %v4636_v28  ;;  %v7485_v0 = vadd.f32 %v7290_v17, %v1323_v22  ;;  %v7490_v5 = vadd.f32 %v7283_v62, %v1325_v53  ;;  %v7493_v29 = vadd.f32 %v7290_v17, %v1326_v4 }
 0x45d   : > { %v7487_v32 = vpop.eup %5631  ;;  %5651 = vrcp.f32 %v2234_v36  ;;  %v2391_v26 = vmul.f32 %v5630_v60, %v2095_v21  ;;  %v7496_v14 = vadd.f32 %v7232_v37, %v1300_v35  ;;  %v1720_v28 = vadd.f32 %v7234_v38, %v1294_v44 }
 0x45e   : > { %v5634_v48 = vpop.eup %5633  ;;  %5653 = vrcp.f32 %v2345_v12  ;;  %v2346_v25 = vadd.f32 1.0, %v5628_v3  ;;  %v2103_v62 = vadd.f32 %v7266_v8, %v7285_v16  ;;  %v4637_v17 = vmul.f32 -1.442695, %v5180_v47  ;;  %v1297_v8 = vld [vmem:[%s8209_s22 + $0x88] sm:$0xff] }
 0x45f   : > { %v7499_v33 = vpop.eup %5635  ;;  %v2407_v23 = vadd.f32 %v2391_v26, %v1714_v46  ;;  %v2392_v22 = vmul.f32 %v5634_v48, %v2098_v57  ;;  %5655 = vtanh.f32 %v2406_v18  ;;  %v5182_v53 = vadd.f32 %v7391_v24, %v2017_v49  ;;  %v2149_v18 = vld [vmem:[#allocation4] sm:$0xff] }
 0x460   : > { %v5638_v21 = vpop.eup %5637  ;;  %5657 = vpow2.f32 %v4621_v61  ;;  %v2023_v4 = vpop.f32.mrb[20].mxu1  ;;  %v2106_v37 = vadd.f32 %v7270_v52, %v7285_v16  ;;  %v5184_v46 = vadd.f32 %v7394_v15, %v2019_v58  ;;  %v2437_v52 = vsub.f32 1.0, %v7443_v27 }
 0x461   : > { %v5640_v38 = vpop.eup %5639  ;;  %v2235_v12 = vadd.f32 1.0, %v5638_v21  ;;  %5659 = vtanh.f32 %v2407_v23  ;;  %v2408_v3 = vadd.f32 %v2392_v22, %v1717_v34  ;;  %v2025_v35 = vpop.f32.mrb[21].mxu1  ;;  %v5186_v24 = vadd.f32 %v7397_v19, %v2023_v4 }
 0x462   : > { %v5642_v44 = vpop.eup %5641  ;;  %5661 = vrcp.f32 %v2346_v25  ;;  %v2347_v36 = vadd.f32 1.0, %v5640_v38  ;;  %v2027_v49 = vpop.f32.mrb[22].mxu1  ;;  %v5188_v34 = vadd.f32 %v7403_v30, %v2025_v35  ;;  %v4622_v47 = vmul.f32 -1.442695, %v5182_v53  ;;  %v1303_v30 = vld [vmem:[%s8209_s22 + $0xb8] sm:$0xff]  ;;  %v2150_v53 = vld [vmem:[#allocation4 + $0x8] sm:$0xff] }
 0x463   : > { %v5644_v57 = vpop.eup %5643  ;;  %5663 = vrcp.f32 %v2235_v12  ;;  %v2236_v60 = vadd.f32 1.0, %v5642_v44  ;;  %v5190_v15 = vadd.f32 %v7406_v59, %v2027_v49  ;;  %v2029_v58 = vpop.f32.mrb[23].mxu1  ;;  %v2469_v48 = vmul.f32 %v7443_v27, %v2149_v18 }
 0x464   : > { %v7514_v61 = vpop.eup %5645  ;;  %5665 = vpow2.f32 %v4637_v17  ;;  %v2453_v26 = vmul.f32 %v5644_v57, %v2437_v52  ;;  %v1723_v19 = vadd.f32 %v7238_v40, %v1297_v8  ;;  %v4638_v23 = vmul.f32 -1.442695, %v5184_v46 }
 0x465   : > { %v5648_v25 = vpop.eup %5647  ;;  %5667 = vrcp.f32 %v2236_v60  ;;  %v2438_v22 = vsub.f32 1.0, %v7487_v32  ;;  %v4623_v59 = vmul.f32 -1.442695, %v5186_v24  ;;  %v4639_v27 = vmul.f32 -1.442695, %v5188_v34  ;;  %v2151_v60 = vld [vmem:[#allocation4 + $0x10] sm:$0xff] }
 0x466   : > { %v5650_v21 = vpop.eup %5649  ;;  %5669 = vtanh.f32 %v2408_v3  ;;  %v2393_v4 = vmul.f32 %v5648_v25, %v2103_v62  ;;  %v7522_v17 = vadd.f32 %v2469_v48, %v2453_v26  ;;  %v4624_v12 = vmul.f32 -1.442695, %v5190_v15 }
 0x467   : > { %v5652_v38 = vpop.eup %5651  ;;  %5671 = vrcp.f32 %v2347_v36  ;;  %v5192_v40 = vadd.f32 %v7417_v7, %v2029_v58  ;;  %v1729_v62 = vadd.f32 %v7236_v39, %v1303_v30  ;;  %v2111_v36 = vadd.f32 %v7264_v50, %v7285_v16  ;;  %v1309_v50 = vld [vmem:[%s8209_s22 + $0xe8] sm:$0xff] }
 0x468   : > { %v7525_v46 = vpop.eup %5653  ;;  %5673 = vpow2.f32 %v4622_v47  ;;  %v2409_v35 = vadd.f32 %v2393_v4, %v1720_v28  ;;  %v2394_v18 = vmul.f32 %v5652_v38, %v2106_v37  ;;  %v2033_v44 = vpop.f32.mrb[24].mxu1  ;;  %v2501_v3 = vmul.f32 %v7522_v17, %v7522_v17  ;;  %v1306_v28 = vld [vmem:[%s8209_s22 + $0xd0] sm:$0xff] }
 0x469   : > { %v5656_v8 = vpop.eup %5655  ;;  %5675 = vpow2.f32 %v4638_v23  ;;  %v7532_v24 = vpop.f32.mrb[25].mxu1  ;;  %v2470_v7 = vmul.f32 %v7487_v32, %v2150_v53  ;;  %v2439_v39 = vsub.f32 1.0, %v7499_v33  ;;  %v2348_v15 = vadd.f32 1.0, %v5650_v21 }
 0x46a   : > { %v5658_v49 = vpop.eup %5657  ;;  %5677 = vpow2.f32 %v4623_v59  ;;  %v2410_v37 = vadd.f32 %v2394_v18, %v1723_v19  ;;  %2517 = vadd.xlane.f32.xlu0 %v2501_v3  ;;  %v2037_v52 = vpop.f32.mrb[26].mxu1  ;;  %v2454_v57 = vmul.f32 %v5656_v8, %v2438_v22  ;;  %v5194_v58 = vadd.f32 %v7431_v31, %v2033_v44 }
 0x46b   : > { %v5660_v34 = vpop.eup %5659  ;;  %v2237_v32 = vadd.f32 1.0, %v5658_v49  ;;  %5679 = vpow2.f32 %v4639_v27  ;;  %v2039_v47 = vpop.f32.mrb[27].mxu1  ;;  %v4640_v48 = vmul.f32 -1.442695, %v5192_v40  ;;  %v2114_v25 = vadd.f32 %v7268_v9, %v7285_v16 }
 0x46c   : > { %v7543_v26 = vpop.eup %5661  ;;  %5681 = vpow2.f32 %v4624_v12  ;;  %v7547_v19 = vadd.f32 %v2470_v7, %v2454_v57  ;;  %v7550_v22 = vadd.f32 %v7242_v10, %v1306_v28  ;;  %v2455_v21 = vmul.f32 %v5660_v34, %v2439_v39  ;;  %v2152_v10 = vld [vmem:[#allocation4 + $0x18] sm:$0xff] }
 0x46d   : > { %v5664_v23 = vpop.eup %5663  ;;  %5683 = vrcp.f32 %v2237_v32  ;;  %v2471_v30 = vmul.f32 %v7499_v33, %v2151_v60  ;;  %v7554_v31 = vadd.f32 %v7246_v2, %v1309_v50  ;;  %v4625_v38 = vmul.f32 -1.442695, %v5194_v58  ;;  %v2153_v60 = vld [vmem:[#allocation4 + $0x20] sm:$0xff] }
 0x46e   : > { %v5666_v59 = vpop.eup %5665  ;;  %v2395_v4 = vmul.f32 %v5664_v23, %v2111_v36  ;;  %5685 = vtanh.f32 %v2409_v35  ;;  %v2502_v53 = vmul.f32 %v7547_v19, %v7547_v19  ;;  %v2440_v12 = vsub.f32 1.0, %v7514_v61 }
 0x46f   : > { %v5668_v9 = vpop.eup %5667  ;;  %5687 = vrcp.f32 %v2348_v15  ;;  %v7558_v27 = vadd.f32 %v2471_v30, %v2455_v21  ;;  %v7564_v35 = vadd.f32 %v7272_v54, %v7285_v16  ;;  %v2119_v8 = vadd.f32 %v7274_v55, %v7285_v16  ;;  %v2154_v15 = vld [vmem:[#allocation4 + $0x28] sm:$0xff] }
 0x470   : > { %v5670_v40 = vpop.eup %5669  ;;  %v2411_v33 = vadd.f32 %v2395_v4, %v7496_v14  ;;  %5689 = vpow2.f32 %v4640_v48  ;;  %v2396_v18 = vmul.f32 %v5668_v9, %v2114_v25  ;;  %2519 = vadd.xlane.f32.xlu1 %v2502_v53  ;;  %v2043_v2 = vpop.f32.mrb[28].mxu1  ;;  %v7574_v57 = vadd.f32 %v7278_v13, %v7285_v16 }
 0x471   : > { %v7566_v44 = vpop.eup %5671  ;;  %5691 = vtanh.f32 %v2410_v37  ;;  %v2045_v3 = vpop.f32.mrb[29].mxu1  ;;  %v2503_v36 = vmul.f32 %v7558_v27, %v7558_v27  ;;  %v2456_v7 = vmul.f32 %v5670_v40, %v2440_v12  ;;  %v2472_v54 = vmul.f32 %v7514_v61, %v2152_v10 }
 0x472   : > { %v5674_v14 = vpop.eup %5673  ;;  %5693 = vtanh.f32 %v2411_v33  ;;  %v2412_v49 = vadd.f32 %v2396_v18, %v1729_v62  ;;  %v2047_v28 = vpop.f32.mrb[30].mxu1  ;;  %v5198_v55 = vadd.f32 %v7441_v63, %v2037_v52  ;;  %v2441_v50 = vsub.f32 1.0, %v7525_v46 }
 0x473   : > { %v5676_v37 = vpop.eup %5675  ;;  %v2238_v39 = vadd.f32 1.0, %v5674_v14  ;;  %5695 = vpow2.f32 %v4625_v38  ;;  %v2049_v34 = vpop.f32.mrb[31].mxu1  ;;  %v2349_v58 = vadd.f32 1.0, %v5666_v59  ;;  %v5196_v62 = vadd.f32 %v7438_v6, %v7532_v24  ;;  %v2155_v38 = vld [vmem:[#allocation4 + $0x30] sm:$0xff] }
 0x474   : > { %v5678_v32 = vpop.eup %5677  ;;  %5697 = vtanh.f32 %v2412_v49  ;;  %v5200_v13 = vadd.f32 %v7458_v1, %v2039_v47  ;;  %2521 = vadd.xlane.f32.xlu1 %v2503_v36  ;;  %v7582_v25 = vadd.f32 %v2472_v54, %v2456_v7  ;;  %v2473_v63 = vmul.f32 %v7525_v46, %v2153_v60  ;;  %v2156_v49 = vld [vmem:[#allocation4 + $0x38] sm:$0xff] }
 0x475   : > { %v5680_v61 = vpop.eup %5679  ;;  %5699 = vrcp.f32 %v2238_v39  ;;  %v2239_v48 = vadd.f32 1.0, %v5678_v32  ;;  %v2350_v23 = vadd.f32 1.0, %v5676_v37  ;;  %v5202_v21 = vadd.f32 %v7466_v51, %v2043_v2  ;;  %v2629_v37 = vld [vmem:[#allocation3] sm:$0xff] }
 0x476   : > { %v5682_v52 = vpop.eup %5681  ;;  %v2442_v30 = vsub.f32 1.0, %v7543_v26  ;;  %v2474_v59 = vmul.f32 %v7543_v26, %v2154_v15  ;;  %v4626_v1 = vmul.f32 -1.442695, %v5198_v55  ;;  %v2504_v24 = vmul.f32 %v7582_v25, %v7582_v25  ;;  %4985 = vmatprep.mubr.bf16.mxu0 %v2629_v37 }
 0x477   : > { %v5684_v4 = vpop.eup %5683  ;;  %5701 = vrcp.f32 %v2239_v48  ;;  %v2240_v6 = vadd.f32 1.0, %v5682_v52  ;;  %v4641_v53 = vmul.f32 -1.442695, %v5196_v62  ;;  %v4642_v9 = vmul.f32 -1.442695, %v5200_v13 }
 0x478   : > { %v5686_v47 = vpop.eup %5685  ;;  %5703 = vrcp.f32 %v2349_v58  ;;  %v2397_v46 = vmul.f32 %v5684_v4, %v2119_v8  ;;  %v2351_v12 = vadd.f32 1.0, %v5680_v61  ;;  %v5206_v51 = vadd.f32 %v7490_v5, %v2047_v28  ;;  %2523 = vadd.xlane.f32.xlu0 %v2504_v24 }
 0x479   : > { %v5688_v10 = vpop.eup %5687  ;;  %5705 = vrcp.f32 %v2240_v6  ;;  %v2457_v26 = vmul.f32 %v5686_v47, %v2441_v50  ;;  %v4627_v33 = vmul.f32 -1.442695, %v5202_v21  ;;  %v2443_v2 = vsub.f32 1.0, %v7566_v44  ;;  %v1315_v21 = vld [vmem:[%s8209_s22 + $0x118] sm:$0xff] }
 0x47a   : > { %v5690_v40 = vpop.eup %5689  ;;  %5707 = vrcp.f32 %v2350_v23  ;;  %v2413_v18 = vadd.f32 %v2397_v46, %v7550_v22  ;;  %v5204_v7 = vadd.f32 %v7485_v0, %v2045_v3  ;;  %v2475_v14 = vmul.f32 %v7566_v44, %v2155_v38  ;;  %v2630_v0 = vld [vmem:[#allocation3 + $0x8] sm:$0xff]  ;;  %v5591_v3 = vld [vmem:[#allocation16] sm:$0xff]  }
 0x47b   : > { %v5692_v36 = vpop.eup %5691  ;;  %5709 = vpow2.f32 %v4626_v1  ;;  %v7594_v8 = vadd.f32 %v2473_v63, %v2457_v26  ;;  %v5208_v5 = vadd.f32 %v7493_v29, %v2049_v34  ;;  %v2444_v60 = vsub.f32 1.0, %v5688_v10  ;;  %4986 = vmatmul.mubr.bf16.vlgmr.msra.gmra.mrb[48].mxu0 %v2630_v0  ;;  %v1312_v34 = vld [vmem:[%s8209_s22 + $0x100] sm:$0xff]  ;;  %5001 = vmatprep.subr.bf16.mxu0 %v5591_v3 }
 0x47c   : > { %v5694_v54 = vpop.eup %5693  ;;  %5711 = vpow2.f32 %v4641_v53  ;;  %v2458_v28 = vmul.f32 %v5692_v36, %v2442_v30  ;;  %v4628_v22 = vmul.f32 -1.442695, %v5206_v51  ;;  %v2476_v58 = vmul.f32 %v5688_v10, %v2156_v49  ;;  %5002 = vmatpush3.bf16.msra.mxu0 %v5591_v3  ;;  %5129 = vmatprep.subr.bf16.mxu1 %v5591_v3  ;;  %v5593_v51 = vld [vmem:[#allocation16 + $0x10] sm:$0xff]  }
 0x47d   : > { %v5696_v39 = vpop.eup %5695  ;;  %5713 = vrcp.f32 %v2351_v12  ;;  %v2505_v55 = vmul.f32 %v7594_v8, %v7594_v8  ;;  %v2459_v50 = vmul.f32 %v5694_v54, %v2443_v2  ;;  %v2352_v62 = vadd.f32 1.0, %v5690_v40  ;;  %5137 = vmatpush3.bf16.msra.mxu1 %v5591_v3  ;;  %v2632_v12 = vld [vmem:[#allocation3 + $0x18] sm:$0xff]  ;;  %v1318_v36 = vld [vmem:[%s8209_s22 + $0x130] sm:$0xff]  ;;  %v2157_v54 = vld [vmem:[#allocation4 + $0x40] sm:$0xff] }
 0x47e   : > { %v5698_v15 = vpop.eup %5697  ;;  %v2241_v44 = vadd.f32 1.0, %v5696_v39  ;;  %5715 = vpow2.f32 %v4627_v33  ;;  %v7600_v32 = vadd.f32 %v2474_v59, %v2458_v28  ;;  %v2130_v48 = vadd.f32 %v7276_v56, %v7285_v16  ;;  %v5592_v56 = vld [vmem:[#allocation16 + $0x8] sm:$0xff]   ;;  %v2633_v3 = vld [vmem:[#allocation3 + $0x20] sm:$0xff] }
 0x47f   : > { %v5700_v29 = vpop.eup %5699  ;;  %5717 = vpow2.f32 %v4642_v9  ;;  %2525 = vadd.xlane.f32.xlu1 %v2505_v55  ;;  %v7605_v13 = vadd.f32 %v2475_v14, %v2459_v50  ;;  %v2460_v61 = vmul.f32 %v5698_v15, %v2444_v60  ;;  %v4643_v30 = vmul.f32 -1.442695, %v5204_v7  ;;  %5003 = vmatprep.subr.bf16.mxu0 %v5592_v56 }
 0x480   : > { %5719 = vrcp.f32 %v2241_v44  ;;  %v2398_v63 = vmul.f32 %v5700_v29, %v7574_v57  ;;  %v2506_v52 = vmul.f32 %v7600_v32, %v7600_v32  ;;  %v1738_v6 = vadd.f32 %v7240_v41, %v1312_v34  ;;  %5004 = vmatpush3.bf16.msra.mxu0 %v5592_v56  ;;  %5130 = vmatprep.subr.bf16.mxu1 %v5592_v56  ;;  %v2634_v34 = vld [vmem:[#allocation3 + $0x28] sm:$0xff] }
 0x481   : > { %v5702_v23 = vpop.eup %5701  ;;  %5721 = vtanh.f32 %v2413_v18  ;;  %v2507_v59 = vmul.f32 %v7605_v13, %v7605_v13  ;;  %v7617_v4 = vadd.f32 %v2476_v58, %v2460_v61  ;;  %v4644_v53 = vmul.f32 -1.442695, %v5208_v5  ;;  %5138 = vmatpush3.bf16.msra.mxu1 %v5592_v56  ;;  %5005 = vmatprep.subr.bf16.mxu0 %v5593_v51  ;;  %v5594_v5 = vld [vmem:[#allocation16 + $0x18] sm:$0xff]  }
 0x482   : > { %v5704_v57 = vpop.eup %5703  ;;  %v2399_v1 = vmul.f32 %v5702_v23, %v7564_v35  ;;  %5723 = vpow2.f32 %v4628_v22  ;;  %v2414_v24 = vadd.f32 %v2398_v63, %v7554_v31  ;;  %2527 = vadd.xlane.f32.xlu0 %v2506_v52  ;;  %v1741_v38 = vadd.f32 %v7244_v42, %v1315_v21  ;;  %v2631_v35 = vld [vmem:[#allocation3 + $0x10] sm:$0xff]  ;;  %5131 = vmatprep.subr.bf16.mxu1 %v5593_v51  ;;  %v2158_v22 = vld [vmem:[#allocation4 + $0x48] sm:$0xff] }
 0x483   : > { %v5706_v47 = vpop.eup %5705  ;;  %5725 = vrcp.f32 %v2352_v62  ;;  %2529 = vadd.xlane.f32.xlu1 %v2507_v59  ;;  %v2508_v9 = vmul.f32 %v7617_v4, %v7617_v4  ;;  %4989 = vmatprep.mubr.bf16.mxu0 %v2631_v35  ;;  %v2135_v42 = vadd.f32 %v7298_v20, %v7285_v16  ;;  %v2445_v60 = vsub.f32 1.0, %v5704_v57  ;;  %v5595_v62 = vld [vmem:[#allocation16 + $0x20] sm:$0xff]   ;;  %v2159_v52 = vld [vmem:[#allocation4 + $0x50] sm:$0xff]  ;;  %v1321_v21 = vld [vmem:[%s8209_s22 + $0x148] sm:$0xff] }
 0x484   : > { %v7624_v46 = vpop.eup %5707  ;;  %v2415_v10 = vadd.f32 %v2399_v1, %v1738_v6  ;;  %v2400_v41 = vmul.f32 %v5706_v47, %v2130_v48  ;;  %5727 = vtanh.f32 %v2414_v24  ;;  %4990 = vmatmul.mubr.bf16.gmra.mrb[52].mxu0 %v2632_v12  ;;  %v1744_v20 = vadd.f32 %v7250_v43, %v1318_v36  ;;  %v2160_v47 = vld [vmem:[#allocation4 + $0x58] sm:$0xff] }
 0x485   : > { %v5710_v31 = vpop.eup %5709  ;;  %5729 = vpow2.f32 %v4643_v30  ;;  %5006 = vmatpush3.bf16.msra.mxu0 %v5593_v51  ;;  %5139 = vmatpush3.bf16.msra.mxu1 %v5593_v51  ;;  %v2477_v0 = vmul.f32 %v5704_v57, %v2157_v54  ;;  %v2446_v29 = vsub.f32 1.0, %v7624_v46  ;;  %v2138_v61 = vadd.f32 %v7310_v11, %v7285_v16  ;;  %v2636_v36 = vld [vmem:[#allocation3 + $0x38] sm:$0xff]  ;;  %v8213_v54 = vld [vmem:[#allocation46_spill] sm:$0xff] }
 0x486   : > { %v5712_v26 = vpop.eup %5711  ;;  %v2242_v40 = vadd.f32 1.0, %v5710_v31  ;;  %5731 = vtanh.f32 %v2415_v10  ;;  %v2416_v33 = vadd.f32 %v2400_v41, %v1741_v38  ;;  %2531 = vadd.xlane.f32.xlu0 %v2508_v9  ;;  %5007 = vmatprep.subr.bf16.mxu0 %v5594_v5  ;;  %v2478_v63 = vmul.f32 %v7624_v46, %v2158_v22  ;;  %v1324_v10 = vld [vmem:[%s8209_s22 + $0x160] sm:$0xff] }
 0x487   : > { %v5714_v18 = vpop.eup %5713  ;;  %5733 = vpow2.f32 %v4644_v53  ;;  %v2353_v14 = vadd.f32 1.0, %v5712_v26  ;;  %5132 = vmatprep.subr.bf16.mxu1 %v5594_v5  ;;  %4993 = vmatprep.mubr.bf16.mxu0 %v2633_v3  ;;  %v5596_v53 = vld [vmem:[#allocation16 + $0x28] sm:$0xff]   ;;  %v1747_v46 = vadd.f32 %v7254_v45, %v1321_v21  ;;  %v2635_v45 = vld [vmem:[#allocation3 + $0x30] sm:$0xff] }
 0x488   : > { %v5716_v2 = vpop.eup %5715  ;;  %5735 = vrcp.f32 %v2242_v40  ;;  %v2447_v56 = vsub.f32 1.0, %v5714_v18  ;;  %v2479_v24 = vmul.f32 %v5714_v18, %v2159_v52  ;;  %v2162_v52 = vld [vmem:[#allocation4 + $0x68] sm:$0xff] }
 0x489   : > { %v5718_v7 = vpop.eup %5717  ;;  %v2243_v49 = vadd.f32 1.0, %v5716_v2  ;;  %5737 = vtanh.f32 %v2416_v33  ;;  %5008 = vmatpush3.bf16.msra.mxu0 %v5594_v5  ;;  %5140 = vmatpush3.bf16.msra.mxu1 %v5594_v5 }
 0x48a   : > { %v5720_v28 = vpop.eup %5719  ;;  %v2354_v30 = vadd.f32 1.0, %v5718_v7  ;;  %5009 = vmatprep.subr.bf16.mxu0 %v5595_v62  ;;  %5133 = vmatprep.subr.bf16.mxu1 %v5595_v62  ;;  %v5597_v7 = vld [vmem:[#allocation16 + $0x30] sm:$0xff]  }
 0x48b   : > { %v5722_v37 = vpop.eup %5721  ;;  %5739 = vrcp.f32 %v2243_v49  ;;  %v2401_v39 = vmul.f32 %v5720_v28, %v2135_v42 }
 0x48c   : > { %v5724_v55 = vpop.eup %5723  ;;  %v2461_v50 = vmul.f32 %v5722_v37, %v2445_v60  ;;  %5741 = vrcp.f32 %v2353_v14  ;;  %4994 = vmatmul.mubr.bf16.gmra.mrb[56].mxu0 %v2634_v34  ;;  %v8212_v14 = vld [vmem:[#allocation44_spill] sm:$0xff]  ;;  %v1327_v60 = vld [vmem:[%s8209_s22 + $0x178] sm:$0xff] }
 0x48d   : > { %v5726_v15 = vpop.eup %5725  ;;  %v2244_v44 = vadd.f32 1.0, %v5724_v55  ;;  %v2417_v58 = vadd.f32 %v2401_v39, %v1744_v20  ;;  %5010 = vmatpush3.bf16.msra.mxu0 %v5595_v62  ;;  %5141 = vmatpush3.bf16.msra.mxu1 %v5595_v62  ;;  %v1750_v49 = vadd.f32 %v8212_v14, %v1324_v10  ;;  %v2161_v55 = vld [vmem:[#allocation4 + $0x60] sm:$0xff] }
 0x48e   : > { %v5728_v43 = vpop.eup %5727  ;;  %v7636_v48 = vadd.f32 %v2477_v0, %v2461_v50  ;;  %v2448_v31 = vsub.f32 1.0, %v5726_v15  ;;  %5011 = vmatprep.subr.bf16.mxu0 %v5596_v53  ;;  %5134 = vmatprep.subr.bf16.mxu1 %v5596_v53  ;;  %v2480_v26 = vmul.f32 %v5726_v15, %v2160_v47  ;;  %v5598_v50 = vld [vmem:[#allocation16 + $0x38] sm:$0xff]   ;;  %v8214_v0 = vld [vmem:[#allocation45_spill] sm:$0xff] }
 0x48f   : > { %v5730_v23 = vpop.eup %5729  ;;  %5743 = vrcp.f32 %v2244_v44  ;;  %v2462_v59 = vmul.f32 %v5728_v43, %v2446_v29  ;;  %4997 = vmatprep.mubr.bf16.mxu0 %v2635_v45  ;;  %v1753_v3 = vadd.f32 %v8214_v0, %v1327_v60  ;;  %v8215_v15 = vld [vmem:[#allocation47_spill] sm:$0xff] }
 0x490   : > { %v5732_v57 = vpop.eup %5731  ;;  %v2509_v16 = vmul.f32 %v7636_v48, %v7636_v48  ;;  %5745 = vtanh.f32 %v2417_v58  ;;  %v2355_v38 = vadd.f32 1.0, %v5730_v23 }
 0x491   : > { %v5734_v11 = vpop.eup %5733  ;;  %v7644_v6 = vadd.f32 %v2478_v63, %v2462_v59  ;;  %v2463_v1 = vmul.f32 %v5732_v57, %v2447_v56  ;;  %5747 = vrcp.f32 %v2354_v30  ;;  %5012 = vmatpush3.bf16.msra.mxu0 %v5596_v53  ;;  %5142 = vmatpush3.bf16.msra.mxu1 %v5596_v53 }
 0x492   : > { %v5736_v9 = vpop.eup %5735  ;;  %2533 = vadd.xlane.f32.xlu0 %v2509_v16  ;;  %v2356_v33 = vadd.f32 1.0, %v5734_v11  ;;  %5749 = vrcp.f32 %v2355_v38  ;;  %5013 = vmatprep.subr.bf16.mxu0 %v5597_v7  ;;  %v2163_v16 = vld [vmem:[#allocation4 + $0x70] sm:$0xff]  ;;  %v2164_v38 = vld [vmem:[#allocation4 + $0x78] sm:$0xff] }
 0x493   : > { %v2402_v41 = vmul.f32 %v5736_v9, %v2138_v61  ;;  %v7650_v35 = vadd.f32 %v2479_v24, %v2463_v1  ;;  %v5738_v12 = vpop.eup %5737  ;;  %v2510_v51 = vmul.f32 %v7644_v6, %v7644_v6  ;;  %5135 = vmatprep.subr.bf16.mxu1 %v5597_v7 }
 0x494   : > { %v2464_v2 = vmul.f32 %v5738_v12, %v2448_v31  ;;  %4998 = vmatmul.mubr.bf16.gmra.mrb[60].mxu0 %v2636_v36 }
 0x495   : > { %v5740_v40 = vpop.eup %5739  ;;  %v2418_v18 = vadd.f32 %v2402_v41, %v1747_v46  ;;  %v2511_v42 = vmul.f32 %v7650_v35, %v7650_v35  ;;  %5014 = vmatpush3.bf16.msra.mxu0 %v5597_v7  ;;  %5143 = vmatpush3.bf16.msra.mxu1 %v5597_v7 }
 0x496   : > { %v2403_v5 = vmul.f32 %v5740_v40, %v8213_v54  ;;  %2535 = vadd.xlane.f32.xlu0 %v2510_v51  ;;  %v5742_v28 = vpop.eup %5741  ;;  %v7661_v37 = vadd.f32 %v2480_v26, %v2464_v2  ;;  %5015 = vmatprep.subr.bf16.mxu0 %v5598_v50 }
 0x497   : > { %5751 = vtanh.f32 %v2418_v18  ;;  %2537 = vadd.xlane.f32.xlu1 %v2511_v42  ;;  %v2449_v58 = vsub.f32 1.0, %v5742_v28  ;;  %v2481_v43 = vmul.f32 %v5742_v28, %v2161_v55  ;;  %5136 = vmatprep.subr.bf16.mxu1 %v5598_v50 }
 0x498   : > { %v2419_v20 = vadd.f32 %v2403_v5, %v1750_v49  ;;  %5753 = vrcp.f32 %v2356_v33  ;;  %v2512_v22 = vmul.f32 %v7661_v37, %v7661_v37 }
 0x499   : > { %v5744_v39 = vpop.eup %5743  ;;  %5016 = vmatpush3.bf16.msra.mxu0 %v5598_v50  ;;  %5144 = vmatpush3.bf16.msra.mxu1 %v5598_v50 }
 0x49a   : > { %5755 = vtanh.f32 %v2419_v20  ;;  %v2404_v44 = vmul.f32 %v5744_v39, %v8215_v15  ;;  %v5746_v29 = vpop.eup %5745  ;;  %2539 = vadd.xlane.f32.xlu0 %v2512_v22 }
 0x49b   : > { %v2465_v62 = vmul.f32 %v5746_v29, %v2449_v58  ;;  %v5748_v61 = vpop.eup %5747 }
 0x49c   : > { %v2420_v34 = vadd.f32 %v2404_v44, %v1753_v3  ;;  %v5750_v23 = vpop.eup %5749  ;;  %v2450_v30 = vsub.f32 1.0, %v5748_v61  ;;  %v2482_v57 = vmul.f32 %v5748_v61, %v2162_v52 }
 0x49d   : > { %v7667_v63 = vadd.f32 %v2481_v43, %v2465_v62  ;;  %v2451_v1 = vsub.f32 1.0, %v5750_v23  ;;  %v2483_v9 = vmul.f32 %v5750_v23, %v2163_v16 }
 0x49e   : > { %5757 = vtanh.f32 %v2420_v34 }
 0x49f   : > { %v2513_v21 = vmul.f32 %v7667_v63, %v7667_v63 }
 0x4a1   : > { %v5752_v59 = vpop.eup %5751  ;;  %2541 = vadd.xlane.f32.xlu1 %v2513_v21 }
 0x4a2   : > { %v2466_v56 = vmul.f32 %v5752_v59, %v2450_v30  ;;  %v5754_v11 = vpop.eup %5753 }
 0x4a3   : > { %v2452_v41 = vsub.f32 1.0, %v5754_v11  ;;  %v2484_v26 = vmul.f32 %v5754_v11, %v2164_v38 }
 0x4a4   : > { %v5756_v24 = vpop.eup %5755  ;;  %v7671_v47 = vadd.f32 %v2482_v57, %v2466_v56 }
 0x4a5   : > { %v2467_v53 = vmul.f32 %v5756_v24, %v2451_v1 }
 0x4a6   : > { %v2514_v46 = vmul.f32 %v7671_v47, %v7671_v47 }
 0x4a7   : > { %v7675_v10 = vadd.f32 %v2483_v9, %v2467_v53 }
 0x4a8   : > { %v5758_v31 = vpop.eup %5757  ;;  %2543 = vadd.xlane.f32.xlu0 %v2514_v46 }
 0x4a9   : > { %v2515_v12 = vmul.f32 %v7675_v10, %v7675_v10  ;;  %v2468_v51 = vmul.f32 %v5758_v31, %v2452_v41 }
 0x4ab   : > { %2545 = vadd.xlane.f32.xlu1 %v2515_v12  ;;  %v7679_v45 = vadd.f32 %v2484_v26, %v2468_v51 }
 0x4ad   : > { %v2516_v40 = vmul.f32 %v7679_v45, %v7679_v45 }
 0x4af   : > { %2547 = vadd.xlane.f32.xlu0 %v2516_v40 }
 0x4f7   : > { %v2518_v33 = vpop.xlane.xlu0 %2517 }
 0x4f8   : > { %v2549_v18 = vmax.f32 %v2518_v33, 1e-24 }
 0x4fa   : > { %5759 = vrsqrt.f32 %v2549_v18 }
 0x4fd   : > { %v2520_v42 = vpop.xlane.xlu1 %2519 }
 0x4fe   : > { %v2550_v2 = vmax.f32 %v2520_v42, 1e-24 }
 0x500   : > { %5761 = vrsqrt.f32 %v2550_v2 }
 0x501   : > { %v2522_v36 = vpop.xlane.xlu1 %2521 }
 0x502   : > { %v2551_v7 = vmax.f32 %v2522_v36, 1e-24 }
 0x504   : > { %v5760_v14 = vpop.eup %5759  ;;  %5763 = vrsqrt.f32 %v2551_v7 }
 0x505   : > { %v2581_v49 = vmul.f32 %v5760_v14, %v7522_v17  ;;  %v2524_v54 = vpop.xlane.xlu0 %2523 }
 0x506   : > { %v2552_v5 = vmax.f32 %v2524_v54, 1e-24 }
 0x507   : > { %2597 = vst [vmem:[#allocation4] sm:$0xff] %v2581_v49 }
 0x508   : > { %5765 = vrsqrt.f32 %v2552_v5 }
 0x50a   : > { %v5762_v28 = vpop.eup %5761 }
 0x50b   : > { %v2582_v60 = vmul.f32 %v5762_v28, %v7547_v19 }
 0x50c   : > { %v2526_v20 = vpop.xlane.xlu1 %2525 }
 0x50d   : > { %2598 = vst [vmem:[#allocation4 + $0x8] sm:$0xff] %v2582_v60  ;;  %v2613_v39 = vpack.c.bf16 %v2582_v60, %v2581_v49  ;;  %v2553_v22 = vmax.f32 %v2526_v20, 1e-24 }
 0x50e   : > { %v5764_v55 = vpop.eup %5763 }
 0x50f   : > { %2621 = vst [vmem:[#allocation5] sm:$0xff] %v2613_v39  ;;  %v2583_v50 = vmul.f32 %v5764_v55, %v7558_v27  ;;  %5767 = vrsqrt.f32 %v2553_v22  ;;  %v2528_v0 = vpop.xlane.xlu0 %2527  ;;  %5017 = vmatprep.mubr.bf16.mxu0 %v2613_v39 }
 0x510   : > { %v2554_v3 = vmax.f32 %v2528_v0, 1e-24  ;;  %v2530_v17 = vpop.xlane.xlu1 %2529 }
 0x511   : > { %2599 = vst [vmem:[#allocation4 + $0x10] sm:$0xff] %v2583_v50  ;;  %v2555_v15 = vmax.f32 %v2530_v17, 1e-24 }
 0x512   : > { %5769 = vrsqrt.f32 %v2554_v3  ;;  %v5766_v44 = vpop.eup %5765 }
 0x513   : > { %5771 = vrsqrt.f32 %v2555_v15  ;;  %v2532_v58 = vpop.xlane.xlu0 %2531  ;;  %v2584_v19 = vmul.f32 %v5766_v44, %v7582_v25 }
 0x514   : > { %v2556_v29 = vmax.f32 %v2532_v58, 1e-24 }
 0x515   : > { %2600 = vst [vmem:[#allocation4 + $0x18] sm:$0xff] %v2584_v19  ;;  %v2614_v34 = vpack.c.bf16 %v2584_v19, %v2583_v50 }
 0x516   : > { %5773 = vrsqrt.f32 %v2556_v29 }
 0x517   : > { %2622 = vst [vmem:[#allocation5 + $0x8] sm:$0xff] %v2614_v34  ;;  %5018 = vmatmul.mubr.bf16.vlgmr.msra.gmra.mrb[64].mxu0 %v2614_v34 }
 0x519   : > { %v5768_v27 = vpop.eup %5767 }
 0x51a   : > { %v2585_v62 = vmul.f32 %v5768_v27, %v7594_v8 }
 0x51c   : > { %v5770_v43 = vpop.eup %5769  ;;  %2601 = vst [vmem:[#allocation4 + $0x20] sm:$0xff] %v2585_v62 }
 0x51d   : > { %v5772_v61 = vpop.eup %5771  ;;  %v2586_v52 = vmul.f32 %v5770_v43, %v7600_v32 }
 0x51e   : > { %v2587_v23 = vmul.f32 %v5772_v61, %v7605_v13 }
 0x51f   : > { %2602 = vst [vmem:[#allocation4 + $0x28] sm:$0xff] %v2586_v52  ;;  %v2615_v21 = vpack.c.bf16 %v2586_v52, %v2585_v62  ;;  %v2534_v30 = vpop.xlane.xlu0 %2533 }
 0x520   : > { %v5774_v25 = vpop.eup %5773  ;;  %2603 = vst [vmem:[#allocation4 + $0x30] sm:$0xff] %v2587_v23  ;;  %v2557_v59 = vmax.f32 %v2534_v30, 1e-24 }
 0x521   : > { %2623 = vst [vmem:[#allocation5 + $0x10] sm:$0xff] %v2615_v21  ;;  %v2588_v56 = vmul.f32 %v5774_v25, %v7617_v4  ;;  %5021 = vmatprep.mubr.bf16.mxu0 %v2615_v21 }
 0x522   : > { %5775 = vrsqrt.f32 %v2557_v59 }
 0x523   : > { %2604 = vst [vmem:[#allocation4 + $0x38] sm:$0xff] %v2588_v56  ;;  %v2616_v8 = vpack.c.bf16 %v2588_v56, %v2587_v23  ;;  %v2536_v57 = vpop.xlane.xlu0 %2535 }
 0x524   : > { %v2558_v16 = vmax.f32 %v2536_v57, 1e-24  ;;  %v2538_v11 = vpop.xlane.xlu1 %2537 }
 0x525   : > { %2624 = vst [vmem:[#allocation5 + $0x18] sm:$0xff] %v2616_v8  ;;  %v2559_v32 = vmax.f32 %v2538_v11, 1e-24  ;;  %5022 = vmatmul.mubr.bf16.gmra.mrb[68].mxu0 %v2616_v8 }
 0x526   : > { %5777 = vrsqrt.f32 %v2558_v16 }
 0x527   : > { %5779 = vrsqrt.f32 %v2559_v32  ;;  %v2540_v13 = vpop.xlane.xlu0 %2539 }
 0x528   : > { %v2560_v1 = vmax.f32 %v2540_v13, 1e-24 }
 0x52a   : > { %5781 = vrsqrt.f32 %v2560_v1 }
 0x52c   : > { %v5776_v24 = vpop.eup %5775 }
 0x52d   : > { %v2589_v53 = vmul.f32 %v5776_v24, %v7636_v48 }
 0x52e   : > { %v2542_v4 = vpop.xlane.xlu1 %2541 }
 0x52f   : > { %2605 = vst [vmem:[#allocation4 + $0x40] sm:$0xff] %v2589_v53  ;;  %v2561_v46 = vmax.f32 %v2542_v4, 1e-24 }
 0x530   : > { %v5778_v9 = vpop.eup %5777 }
 0x531   : > { %v5780_v38 = vpop.eup %5779  ;;  %v2590_v41 = vmul.f32 %v5778_v9, %v7644_v6  ;;  %5783 = vrsqrt.f32 %v2561_v46 }
 0x532   : > { %v2591_v31 = vmul.f32 %v5780_v38, %v7650_v35 }
 0x533   : > { %2606 = vst [vmem:[#allocation4 + $0x48] sm:$0xff] %v2590_v41  ;;  %v2617_v12 = vpack.c.bf16 %v2590_v41, %v2589_v53 }
 0x534   : > { %2607 = vst [vmem:[#allocation4 + $0x50] sm:$0xff] %v2591_v31  ;;  %v5782_v51 = vpop.eup %5781 }
 0x535   : > { %2625 = vst [vmem:[#allocation5 + $0x20] sm:$0xff] %v2617_v12  ;;  %v2544_v26 = vpop.xlane.xlu0 %2543  ;;  %5025 = vmatprep.mubr.bf16.mxu1 %v2617_v12  ;;  %v2592_v40 = vmul.f32 %v5782_v51, %v7661_v37 }
 0x536   : > { %v2562_v48 = vmax.f32 %v2544_v26, 1e-24 }
 0x537   : > { %2608 = vst [vmem:[#allocation4 + $0x58] sm:$0xff] %v2592_v40  ;;  %v2618_v33 = vpack.c.bf16 %v2592_v40, %v2591_v31 }
 0x538   : > { %5785 = vrsqrt.f32 %v2562_v48  ;;  %v2546_v18 = vpop.xlane.xlu1 %2545 }
 0x539   : > { %v2563_v42 = vmax.f32 %v2546_v18, 1e-24  ;;  %2626 = vst [vmem:[#allocation5 + $0x28] sm:$0xff] %v2618_v33  ;;  %5026 = vmatmul.mubr.bf16.vlgmr.msra.gmra.mrb[32].mxu1 %v2618_v33 }
 0x53b   : > { %5787 = vrsqrt.f32 %v2563_v42  ;;  %v5784_v6 = vpop.eup %5783 }
 0x53c   : > { %v2548_v35 = vpop.xlane.xlu0 %2547  ;;  %v2593_v2 = vmul.f32 %v5784_v6, %v7667_v63 }
 0x53d   : > { %v2564_v36 = vmax.f32 %v2548_v35, 1e-24 }
 0x53e   : > { %2609 = vst [vmem:[#allocation4 + $0x60] sm:$0xff] %v2593_v2 }
 0x53f   : > { %5789 = vrsqrt.f32 %v2564_v36 }
 0x542   : > { %v5786_v7 = vpop.eup %5785 }
 0x543   : > { %v2594_v14 = vmul.f32 %v5786_v7, %v7671_v47 }
 0x545   : > { %v5788_v37 = vpop.eup %5787  ;;  %2610 = vst [vmem:[#allocation4 + $0x68] sm:$0xff] %v2594_v14  ;;  %v2619_v49 = vpack.c.bf16 %v2594_v14, %v2593_v2 }
 0x546   : > { %v2595_v54 = vmul.f32 %v5788_v37, %v7675_v10 }
 0x547   : > { %2627 = vst [vmem:[#allocation5 + $0x30] sm:$0xff] %v2619_v49  ;;  %5029 = vmatprep.mubr.bf16.mxu1 %v2619_v49 }
 0x548   : > { %2611 = vst [vmem:[#allocation4 + $0x70] sm:$0xff] %v2595_v54 }
 0x549   : > { %v5790_v5 = vpop.eup %5789 }
 0x54a   : > { %v2596_v28 = vmul.f32 %v5790_v5, %v7679_v45 }
 0x54c   : > { %2612 = vst [vmem:[#allocation4 + $0x78] sm:$0xff] %v2596_v28  ;;  %v2620_v60 = vpack.c.bf16 %v2596_v28, %v2595_v54 }
 0x54e   : > { %2628 = vst [vmem:[#allocation5 + $0x38] sm:$0xff] %v2620_v60  ;;  %5030 = vmatmul.mubr.bf16.gmra.mrb[36].mxu1 %v2620_v60  ;;  %v4987_v63 = vpop.f32.mrb[48].mxu0 }
 0x54f   : > { %v2735_v20 = vpop.f32.mrb[49].mxu0 }
 0x550   : > { %v4988_v39 = vpop.f32.mrb[50].mxu0 }
 0x551   : > { %v2799_v22 = vpack.c.bf16 %v4988_v39, %v4987_v63  ;;  %v2738_v47 = vpop.f32.mrb[51].mxu0 }
 0x552   : > { %v2798_v55 = vpack.c.bf16 %v2738_v47, %v2735_v20 }
 0x553   : > { %2807 = vst [vmem:[#allocation6 + $0x8] sm:$0xff] %v2799_v22 }
 0x554   : > { %2806 = vst [vmem:[#allocation6] sm:$0xff] %v2798_v55 }
 0x557   : > { %v4991_v50 = vpop.f32.mrb[52].mxu0 }
 0x558   : > { %v2751_v10 = vpop.f32.mrb[53].mxu0 }
 0x559   : > { %v4992_v0 = vpop.f32.mrb[54].mxu0 }
 0x55a   : > { %v2801_v3 = vpack.c.bf16 %v4992_v0, %v4991_v50  ;;  %v2754_v17 = vpop.f32.mrb[55].mxu0 }
 0x55b   : > { %v2800_v15 = vpack.c.bf16 %v2754_v17, %v2751_v10 }
 0x55c   : > { %2809 = vst [vmem:[#allocation6 + $0x18] sm:$0xff] %v2801_v3 }
 0x55d   : > { %2808 = vst [vmem:[#allocation6 + $0x10] sm:$0xff] %v2800_v15 }
 0x55f   : > { %v4995_v45 = vpop.f32.mrb[56].mxu0 }
 0x560   : > { %v2767_v44 = vpop.f32.mrb[57].mxu0 }
 0x561   : > { %v4996_v58 = vpop.f32.mrb[58].mxu0 }
 0x562   : > { %v2803_v19 = vpack.c.bf16 %v4996_v58, %v4995_v45  ;;  %v2770_v29 = vpop.f32.mrb[59].mxu0 }
 0x563   : > { %v2802_v34 = vpack.c.bf16 %v2770_v29, %v2767_v44 }
 0x564   : > { %2811 = vst [vmem:[#allocation6 + $0x28] sm:$0xff] %v2803_v19 }
 0x565   : > { %2810 = vst [vmem:[#allocation6 + $0x20] sm:$0xff] %v2802_v34 }
 0x567   : > { %v4999_v27 = vpop.f32.mrb[60].mxu0 }
 0x568   : > { %v2783_v62 = vpop.f32.mrb[61].mxu0 }
 0x569   : > { %v5000_v43 = vpop.f32.mrb[62].mxu0 }
 0x56a   : > { %v2805_v61 = vpack.c.bf16 %v5000_v43, %v4999_v27  ;;  %v2786_v52 = vpop.f32.mrb[63].mxu0 }
 0x56b   : > { %v2804_v23 = vpack.c.bf16 %v2786_v52, %v2783_v62 }
 0x56c   : > { %2813 = vst [vmem:[#allocation6 + $0x38] sm:$0xff] %v2805_v61 }
 0x56d   : > { %2812 = vst [vmem:[#allocation6 + $0x30] sm:$0xff] %v2804_v23 }
 0x5ea   : > { %v5019_v21 = vpop.f32.mrb[64].mxu0 }
 0x5eb   : > { %v2920_v30 = vpop.f32.mrb[65].mxu0 }
 0x5ec   : > { %v5020_v25 = vpop.f32.mrb[66].mxu0 }
 0x5ed   : > { %v2984_v59 = vpack.c.bf16 %v5020_v25, %v5019_v21  ;;  %v2923_v56 = vpop.f32.mrb[67].mxu0 }
 0x5ee   : > { %v2983_v8 = vpack.c.bf16 %v2923_v56, %v2920_v30 }
 0x5ef   : > { %2992 = vst [vmem:[#allocation7 + $0x8] sm:$0xff] %v2984_v59 }
 0x5f0   : > { %2991 = vst [vmem:[#allocation7] sm:$0xff] %v2983_v8 }
 0x5f8   : > { %v5023_v57 = vpop.f32.mrb[68].mxu0 }
 0x5f9   : > { %v2936_v16 = vpop.f32.mrb[69].mxu0 }
 0x5fa   : > { %v5024_v11 = vpop.f32.mrb[70].mxu0 }
 0x5fb   : > { %v2986_v32 = vpack.c.bf16 %v5024_v11, %v5023_v57  ;;  %v2939_v13 = vpop.f32.mrb[71].mxu0 }
 0x5fc   : > { %v2985_v1 = vpack.c.bf16 %v2939_v13, %v2936_v16 }
 0x5fd   : > { %2994 = vst [vmem:[#allocation7 + $0x18] sm:$0xff] %v2986_v32 }
 0x5fe   : > { %2993 = vst [vmem:[#allocation7 + $0x10] sm:$0xff] %v2985_v1 }
 0x60c   : > { %v5027_v24 = vpop.f32.mrb[32].mxu1 }
 0x60d   : > { %v2952_v53 = vpop.f32.mrb[33].mxu1 }
 0x60e   : > { %v5028_v4 = vpop.f32.mrb[34].mxu1 }
 0x60f   : > { %v2988_v9 = vpack.c.bf16 %v5028_v4, %v5027_v24  ;;  %v2955_v46 = vpop.f32.mrb[35].mxu1 }
 0x610   : > { %v2987_v38 = vpack.c.bf16 %v2955_v46, %v2952_v53 }
 0x611   : > { %2996 = vst [vmem:[#allocation7 + $0x28] sm:$0xff] %v2988_v9 }
 0x612   : > { %2995 = vst [vmem:[#allocation7 + $0x20] sm:$0xff] %v2987_v38 }
 0x621   : > { %v5031_v41 = vpop.f32.mrb[36].mxu1 }
 0x622   : > { %v2968_v31 = vpop.f32.mrb[37].mxu1 }
 0x623   : > { %v5032_v12 = vpop.f32.mrb[38].mxu1 }
 0x624   : > { %v2990_v51 = vpack.c.bf16 %v5032_v12, %v5031_v41  ;;  %v2971_v26 = vpop.f32.mrb[39].mxu1 }
 0x625   : > { %v2989_v40 = vpack.c.bf16 %v2971_v26, %v2968_v31 }
 0x626   : > { %2998 = vst [vmem:[#allocation7 + $0x38] sm:$0xff] %v2990_v51 }
 0x627   : > { %2997 = vst [vmem:[#allocation7 + $0x30] sm:$0xff] %v2989_v40 }
 0x628 PF: > { %v3023_v48 = vld [vmem:[#allocation7] sm:$0xff]  ;;  %v3024_v33 = vld [vmem:[#allocation7 + $0x8] sm:$0xff]  ;;  %v6396_v18 = vmov 0   ;;  %v3025_v6 = vld [vmem:[#allocation7 + $0x10] sm:$0xff]  ;;  %s8217_s18 = sld [smem:[#allocation57_spill]]  ;;  %s8218_s21 = sld [smem:[#allocation55_spill]] }
 0x629   : > { %5033 = vmatprep.subr.bf16.mxu0 %v3023_v48  ;;  %5791 = vset.pattern.permute.xlu0 %v6396_v18  ;;  %v5793_v42 = vld [vmem:[%s6925_s15] sm:$0xff]   ;;  %v3026_v35 = vld [vmem:[#allocation7 + $0x18] sm:$0xff]  ;;  %v3211_v7 = vld [vmem:[%s6949_s29 + $0x10] sm:$0xff]  ;;  %s6397_s17 = smov [#allocation23]   ;;  %p8219_p2 = scmp.eq.s32.totalorder %s6547_s20, 5 }
 0x62a   : > { %5034 = vmatpush3.bf16.msra.mxu0 %v3023_v48  ;;  %5792 = vset.pattern.permute.xlu1 %v6396_v18  ;;  %v3027_v2 = vld [vmem:[#allocation7 + $0x20] sm:$0xff]  ;;  %v3028_v14 = vld [vmem:[#allocation7 + $0x28] sm:$0xff]  ;;  %v3212_v49 = vld [vmem:[%s6949_s29 + $0x18] sm:$0xff]  ;;  %s4290_s14 = sshll.u32 %s6397_s17, 4  ;;  %s4291_s14 = int_to_ptr.vmem [resolvable:$true] %s4290_s14 }
 0x62b   : > { %5035 = vmatprep.subr.bf16.mxu0 %v3024_v33  ;;  %3560 = vmatprep.mubr.bf16.mxu1 %v6396_v18  ;;  %v3209_v36 = vld [vmem:[%s6949_s29] sm:$0xff]  ;;  %v3210_v37 = vld [vmem:[%s6949_s29 + $0x8] sm:$0xff]  ;;  %v3215_v60 = vld [vmem:[%s6949_s29 + $0x30] sm:$0xff]  ;;  %s6207_s19 = scalar_lea.vmem %s4291_s14, 2048  ;;  %p6214_p12 = scmp.lt.s32.totalorder %s4291_s14, %s4291_s14 }
 0x62c   : > { %5049 = vmatprep.mubr.bf16.mxu0 %v5793_v42  ;;  %3219 = vperm.xlu0 %5791, %v3209_v36   ;;  %v3213_v54 = vld [vmem:[%s6949_s29 + $0x20] sm:$0xff]  ;;  %v3214_v28 = vld [vmem:[%s6949_s29 + $0x28] sm:$0xff]  ;;  %v3216_v20 = vld [vmem:[%s6949_s29 + $0x38] sm:$0xff]  ;;  %s8216_s29 = sld [smem:[#allocation35_spill]]  ;;  %p6208_p10 = scmp.ne.s32.totalorder %s4291_s14, %s6207_s19 }
 0x62d   : > { %3229 = vperm.xlu1 %5792, %v3211_v7   ;;  %v3030_v63 = vld [vmem:[#allocation7 + $0x38] sm:$0xff]  ;;  %v3007_v39 = vld [vmem:[#allocation6] sm:$0xff]  ;;  %v5794_v22 = vld [vmem:[%s6925_s15 + $0x8] sm:$0xff]   ;;  %p6215_p9 = scmp.lt.s32.totalorder %s6207_s19, %s6207_s19 }
 0x62e   : > { %5036 = vmatpush3.bf16.msra.mxu0 %v3024_v33  ;;  %v3029_v5 = vld [vmem:[#allocation7 + $0x30] sm:$0xff]  ;;  %v3008_v55 = vld [vmem:[#allocation6 + $0x8] sm:$0xff]  ;;  %v5796_v10 = vld [vmem:[%s6925_s15 + $0x18] sm:$0xff]   ;;  %p6209_p3 = pnand %p6208_p10, %p8219_p2 }
 0x62f   : > { %5037 = vmatprep.subr.bf16.mxu0 %v3025_v6  ;;  %v5795_v47 = vld [vmem:[%s6925_s15 + $0x10] sm:$0xff]   ;;  %v5797_v0 = vld [vmem:[%s6918_s2] sm:$0xff]   ;;  %v3010_v3 = vld [vmem:[#allocation6 + $0x18] sm:$0xff]  ;;  %p6216_p5 = por %p6215_p9, %p6214_p12 }
 0x630   : > { %3224 = vperm.xlu0 %5791, %v3210_v37   ;;  %v3009_v50 = vld [vmem:[#allocation6 + $0x10] sm:$0xff]  ;;  %v3011_v17 = vld [vmem:[#allocation6 + $0x20] sm:$0xff]  ;;  %v3012_v15 = vld [vmem:[#allocation6 + $0x28] sm:$0xff]  ;;  %p6210_p8 = pneg %p6209_p3 }
 0x631   : > { %3234 = vperm.xlu1 %5792, %v3212_v49   ;;  %v3013_v45 = vld [vmem:[#allocation6 + $0x30] sm:$0xff]  ;;  %v3014_v44 = vld [vmem:[#allocation6 + $0x38] sm:$0xff]  ;;  %v5798_v58 = vld [vmem:[%s6918_s2 + $0x8] sm:$0xff]  }
 0x632   : > { %5038 = vmatpush3.bf16.msra.mxu0 %v3025_v6  ;;  %v5799_v19 = vld [vmem:[%s6918_s2 + $0x10] sm:$0xff]   ;;  %v5800_v29 = vld [vmem:[%s6918_s2 + $0x18] sm:$0xff]   ;;  %v5803_v27 = vld [vmem:[#allocation13] ss:$12 sps:$4 sm:$0xff]   ;;  %s4669_s2 = sshll.u32 %s8216_s29, 6  ;;  %p6217_p1 = pnand %p6216_p5, %p6210_p8 }
 0x633   : > { %5039 = vmatprep.subr.bf16.mxu0 %v3026_v35  ;;  %v5801_v34 = vld [vmem:[#allocation13 + $0x4] ss:$12 sps:$4 sm:$0xff]   ;;  %v5804_v62 = vld [vmem:[#allocation13 + $0x1c] ss:$12 sps:$4 sm:$0xff]   ;;  %v5807_v61 = vld [vmem:[#allocation13 + $0x34] ss:$12 sps:$4 sm:$0xff]  }
 0x634   : > { %3239 = vperm.xlu0 %5791, %v3213_v54   ;;  %3528 = vmatprep.subr.bf16.mxu1 %v5801_v34  ;;  %v5806_v43 = vld [vmem:[#allocation13 + $0x18] ss:$12 sps:$4 sm:$0xff]   ;;  %v5809_v52 = vld [vmem:[#allocation13 + $0x30] ss:$12 sps:$4 sm:$0xff]   ;;  %v5812_v21 = vld [vmem:[#allocation13 + $0x48] ss:$12 sps:$4 sm:$0xff]  }
 0x635   : > { %3244 = vperm.xlu1 %5792, %v3214_v28   ;;  %3529 = vmatpush1.bf16.msra.mxu1 %v5803_v27  ;;  %v5810_v23 = vld [vmem:[#allocation13 + $0x4c] ss:$12 sps:$4 sm:$0xff]   ;;  %v5824_v34 = vld [vmem:[#allocation13 + $0xa8] ss:$12 sps:$4 sm:$0xff]   ;;  %s3666_s15 = sshra.s32 %s4669_s2, 4  ;;  %s7884_s13 = scalar_lea.vmem [#allocation2], %s4669_s2 }
 0x636   : > { %5040 = vmatpush3.bf16.msra.mxu0 %v3026_v35  ;;  %3530 = vmatprep.subr.bf16.mxu1 %v5804_v62  ;;  %v7750_v27 = vld [vmem:[#allocation13 + $0x8] ss:$12 sps:$4 sm:$0xff]   ;;  %s4694_s27 = sshll.u32 %s3666_s15, 3 }
 0x637   : > { %5041 = vmatprep.subr.bf16.mxu0 %v3027_v2  ;;  %v5854_v62 = vld [vmem:[#allocation14 + $0x8] ss:$12 sps:$4 sm:$0xff]   ;;  %s7756_s4 = scalar_lea.vmem [#allocation3], %s4694_s27 }
 0x638   : > { %3249 = vperm.xlu0 %5791, %v3215_v60  }
 0x639   : > { %3254 = vperm.xlu1 %5792, %v3216_v20   ;;  %3531 = vmatpush1.bf16.msra.mxu1 %v5806_v43  ;;  %v5858_v43 = vld [vmem:[#allocation14 + $0x20] ss:$12 sps:$4 sm:$0xff]  }
 0x63a   : > { %5042 = vmatpush3.bf16.msra.mxu0 %v3027_v2  ;;  %3532 = vmatprep.subr.bf16.mxu1 %v5807_v61  ;;  %v7759_v61 = vld [vmem:[%s7756_s4] sm:$0xff] }
 0x63b   : > { %5043 = vmatprep.subr.bf16.mxu0 %v3028_v14 }
 0x63d   : > { %3533 = vmatpush1.bf16.msra.mxu1 %v5809_v52  ;;  %v5859_v52 = vld [vmem:[#allocation14 + $0x38] ss:$12 sps:$4 sm:$0xff]  }
 0x63e   : > { %5044 = vmatpush3.bf16.msra.mxu0 %v3028_v14  ;;  %3534 = vmatprep.subr.bf16.mxu1 %v5810_v23  ;;  %v5860_v23 = vld [vmem:[#allocation14 + $0x50] ss:$12 sps:$4 sm:$0xff]  }
 0x63f   : > { %5045 = vmatprep.subr.bf16.mxu0 %v3029_v5 }
 0x641   : > { %3535 = vmatpush1.bf16.msra.mxu1 %v5812_v21  ;;  %v5861_v21 = vld [vmem:[#allocation14 + $0x68] ss:$12 sps:$4 sm:$0xff]  }
 0x642   : > { %5046 = vmatpush3.bf16.msra.mxu0 %v3029_v5 }
 0x643   : > { %5047 = vmatprep.subr.bf16.mxu0 %v3030_v63 }
 0x646   : > { %5048 = vmatpush3.bf16.msra.mxu0 %v3030_v63 }
 0x647   : > { %5057 = vmatprep.subr.bf16.mxu0 %v3007_v39 }
 0x649   : > { %5050 = vmatmul.mubr.bf16.vlgmr.msra.gmra.mrb[0].mxu0 %v5794_v22 }
 0x64a   : > { %5058 = vmatpush3.bf16.msra.mxu0 %v3007_v39  ;;  %5053 = vmatprep.mubr.bf16.mxu0 %v5795_v47 }
 0x64b   : > { %5059 = vmatprep.subr.bf16.mxu0 %v3008_v55 }
 0x64e   : > { %5060 = vmatpush3.bf16.msra.mxu0 %v3008_v55 }
 0x64f   : > { %5061 = vmatprep.subr.bf16.mxu0 %v3009_v50 }
 0x651   : > { %5054 = vmatmul.mubr.bf16.gmra.mrb[4].mxu0 %v5796_v10 }
 0x652   : > { %5062 = vmatpush3.bf16.msra.mxu0 %v3009_v50  ;;  %5073 = vmatprep.mubr.bf16.mxu0 %v5797_v0 }
 0x653   : > { %5063 = vmatprep.subr.bf16.mxu0 %v3010_v3 }
 0x656   : > { %5064 = vmatpush3.bf16.msra.mxu0 %v3010_v3 }
 0x657   : > { %5065 = vmatprep.subr.bf16.mxu0 %v3011_v17 }
 0x65a   : > { %5066 = vmatpush3.bf16.msra.mxu0 %v3011_v17  ;;  %v5813_v17 = vld [vmem:[#allocation13 + $0x64] ss:$12 sps:$4 sm:$0xff]  }
 0x65b   : > { %5067 = vmatprep.subr.bf16.mxu0 %v3012_v15  ;;  %3536 = vmatprep.subr.bf16.mxu1 %v5813_v17  ;;  %v5831_v17 = vld [vmem:[#allocation13 + $0x98] ss:$12 sps:$4 sm:$0xff]  }
 0x65e   : > { %5068 = vmatpush3.bf16.msra.mxu0 %v3012_v15  ;;  %v5815_v15 = vld [vmem:[#allocation13 + $0x60] ss:$12 sps:$4 sm:$0xff]  }
 0x65f   : > { %5069 = vmatprep.subr.bf16.mxu0 %v3013_v45  ;;  %3537 = vmatpush1.bf16.msra.mxu1 %v5815_v15 }
 0x662   : > { %5070 = vmatpush3.bf16.msra.mxu0 %v3013_v45  ;;  %v5816_v45 = vld [vmem:[#allocation13 + $0x7c] ss:$12 sps:$4 sm:$0xff]  }
 0x663   : > { %5071 = vmatprep.subr.bf16.mxu0 %v3014_v44  ;;  %3538 = vmatprep.subr.bf16.mxu1 %v5816_v45 }
 0x666   : > { %5072 = vmatpush3.bf16.msra.mxu0 %v3014_v44  ;;  %v5818_v44 = vld [vmem:[#allocation13 + $0x78] ss:$12 sps:$4 sm:$0xff]  }
 0x667   : > { %3539 = vmatpush1.bf16.msra.mxu1 %v5818_v44  ;;  %5105 = vmatprep.subr.bf16.mxu0 %v5854_v62  ;;  %v5835_v44 = vld [vmem:[#allocation14 + $0x4] ss:$12 sps:$4 sm:$0xff]  }
 0x669   : > { %5074 = vmatmul.mubr.bf16.vlgmr.msra.gmra.mrb[0].mxu0 %v5798_v58  ;;  %v5819_v58 = vld [vmem:[#allocation13 + $0x94] ss:$12 sps:$4 sm:$0xff]  }
 0x66a   : > { %5077 = vmatprep.mubr.bf16.mxu0 %v5799_v19  ;;  %v5821_v19 = vld [vmem:[#allocation13 + $0x90] ss:$12 sps:$4 sm:$0xff]   ;;  %3540 = vmatprep.subr.bf16.mxu1 %v5819_v58  ;;  %v5833_v58 = vld [vmem:[#allocation14] ss:$12 sps:$4 sm:$0xff]  }
 0x66b   : > { %3541 = vmatpush1.bf16.msra.mxu1 %v5821_v19  ;;  %5106 = vmatpush3.bf16.msra.mxu0 %v5854_v62  ;;  %v5838_v19 = vld [vmem:[#allocation14 + $0x1c] ss:$12 sps:$4 sm:$0xff]   ;;  %v5847_v62 = vld [vmem:[#allocation14 + $0x64] ss:$12 sps:$4 sm:$0xff]  }
 0x66c   : > { %5107 = vmatprep.subr.bf16.mxu0 %v5858_v43 }
 0x66f   : > { %5108 = vmatpush3.bf16.msra.mxu0 %v5858_v43  ;;  %v5845_v43 = vld [vmem:[#allocation14 + $0x60] ss:$12 sps:$4 sm:$0xff]  }
 0x670   : > { %5109 = vmatprep.subr.bf16.mxu0 %v5859_v52 }
 0x671   : > { %5078 = vmatmul.mubr.bf16.gmra.mrb[4].mxu0 %v5800_v29  ;;  %v5822_v29 = vld [vmem:[#allocation13 + $0xac] ss:$12 sps:$4 sm:$0xff]  }
 0x672   : > { %3542 = vmatprep.subr.bf16.mxu1 %v5822_v29  ;;  %5121 = vmatprep.mubr.bf16.mxu0 %v7759_v61  ;;  %v5836_v29 = vld [vmem:[#allocation14 + $0x18] ss:$12 sps:$4 sm:$0xff]  }
 0x673   : > { %3543 = vmatpush1.bf16.msra.mxu1 %v5824_v34  ;;  %5110 = vmatpush3.bf16.msra.mxu0 %v5859_v52  ;;  %v5844_v34 = vld [vmem:[#allocation14 + $0x4c] ss:$12 sps:$4 sm:$0xff]   ;;  %v5850_v52 = vld [vmem:[#allocation14 + $0x7c] ss:$12 sps:$4 sm:$0xff]  }
 0x674   : > { %5081 = vmatprep.subr.bf16.mxu1 %v7750_v27  ;;  %5111 = vmatprep.subr.bf16.mxu0 %v5860_v23 }
 0x677   : > { %5112 = vmatpush3.bf16.msra.mxu0 %v5860_v23  ;;  %v5848_v23 = vld [vmem:[#allocation14 + $0x78] ss:$12 sps:$4 sm:$0xff]  }
 0x678   : > { %5113 = vmatprep.subr.bf16.mxu0 %v5861_v21 }
 0x67b   : > { %5114 = vmatpush3.bf16.msra.mxu0 %v5861_v21  ;;  %v5853_v21 = vld [vmem:[#allocation14 + $0x94] ss:$12 sps:$4 sm:$0xff]  }
 0x6ab   : > { %v3220_v30 = vpop.permute.xlu0 %3219 }
 0x6ac   : > { %v3230_v25 = vpop.permute.xlu1 %3229 }
 0x6af   : > { %v3225_v59 = vpop.permute.xlu0 %3224 }
 0x6b0   : > { %v3235_v56 = vpop.permute.xlu1 %3234 }
 0x6b3   : > { %v3240_v11 = vpop.permute.xlu0 %3239 }
 0x6b4   : > { %v3245_v46 = vpop.permute.xlu1 %3244 }
 0x6b7   : > { %v3250_v51 = vpop.permute.xlu0 %3249 }
 0x6b8   : > { %v3255_v36 = vpop.permute.xlu1 %3254 }
 0x73c   : > { %v5075_v8 = vpop.f32.mrb[0].mxu0 }
 0x73d   : > { %v3259_v57 = vmul.f32 %v5075_v8, %v3230_v25  ;;  %v3178_v16 = vpop.f32.mrb[1].mxu0  ;;  %v5863_v25 = vld [vmem:[#allocation14 + $0x98] ss:$12 sps:$4 sm:$0xff]   ;;  %v7766_v8 = vld [vmem:[%s7756_s4 + $0x10] sm:$0xff] }
 0x73e   : > { %v3257_v32 = vmul.f32 %v3220_v30, %v3178_v16  ;;  %v5076_v13 = vpop.f32.mrb[2].mxu0  ;;  %v5862_v30 = vld [vmem:[#allocation14 + $0x80] ss:$12 sps:$4 sm:$0xff]  }
 0x73f   : > { %v3260_v1 = vmul.f32 %v5076_v13, %v3235_v56  ;;  %v3181_v24 = vpop.f32.mrb[3].mxu0  ;;  %v3275_v53 = vmul.f32 0.22916667, %v3259_v57  ;;  %vm3267_vm1 = vcmp.ge.f32.partialorder %v3259_v57, 0.0  ;;  %5115 = vmatprep.subr.bf16.mxu0 %v5862_v30  ;;  %v7763_v56 = vld [vmem:[%s7756_s4 + $0x8] sm:$0xff] }
 0x740   : > { %v3273_v4 = vmul.f32 0.22916667, %v3257_v32  ;;  %v3258_v9 = vmul.f32 %v3225_v59, %v3181_v24  ;;  %vm3265_vm0 = vcmp.ge.f32.partialorder %v3257_v32, 0.0  ;;  %5116 = vmatpush3.bf16.msra.mxu0 %v5862_v30  ;;  %v5864_v59 = vld [vmem:[#allocation14 + $0xb0] ss:$12 sps:$4 sm:$0xff]  }
 0x741   : > { %v3276_v31 = vmul.f32 0.22916667, %v3260_v1  ;;  %v7724_v48 = vsel %vm3267_vm1, %v3259_v57, %v3275_v53  ;;  %vm3268_vm3 = vcmp.ge.f32.partialorder %v3260_v1, 0.0  ;;  %5117 = vmatprep.subr.bf16.mxu0 %v5863_v25  ;;  %v7771_v57 = vld [vmem:[%s7756_s4 + $0x18] sm:$0xff] }
 0x742   : > { %v3274_v38 = vmul.f32 0.22916667, %v3258_v9  ;;  %v7718_v41 = vsel %vm3265_vm0, %v3257_v32, %v3273_v4  ;;  %vm3266_vm2 = vcmp.ge.f32.partialorder %v3258_v9, 0.0  ;;  %v3291_v37 = vmul.f32 %v7724_v48, %v7724_v48  ;;  %v5851_v30 = vld [vmem:[#allocation14 + $0x90] ss:$12 sps:$4 sm:$0xff]  }
 0x743   : > { %v3289_v12 = vmul.f32 %v7718_v41, %v7718_v41  ;;  %v7730_v49 = vsel %vm3268_vm3, %v3260_v1, %v3276_v31 }
 0x744   : > { %v5079_v26 = vpop.f32.mrb[4].mxu0  ;;  %v7722_v40 = vsel %vm3266_vm2, %v3258_v9, %v3274_v38  ;;  %v3292_v20 = vmul.f32 %v7730_v49, %v7730_v49  ;;  %5118 = vmatpush3.bf16.msra.mxu0 %v5863_v25  ;;  %v5857_v25 = vld [vmem:[#allocation14 + $0xac] ss:$12 sps:$4 sm:$0xff]  }
 0x745   : > { %v3263_v33 = vmul.f32 %v5079_v26, %v3250_v51  ;;  %3297 = vadd.xlane.f32.xlu0 %v3289_v12  ;;  %v3194_v42 = vpop.f32.mrb[5].mxu0  ;;  %v3290_v6 = vmul.f32 %v7722_v40, %v7722_v40  ;;  %5119 = vmatprep.subr.bf16.mxu0 %v5864_v59 }
 0x746   : > { %v3261_v35 = vmul.f32 %v3240_v11, %v3194_v42  ;;  %v5080_v2 = vpop.f32.mrb[6].mxu0 }
 0x747   : > { %v3279_v7 = vmul.f32 0.22916667, %v3263_v33  ;;  %3299 = vadd.xlane.f32.xlu1 %v3290_v6  ;;  %v3197_v14 = vpop.f32.mrb[7].mxu0  ;;  %v3264_v5 = vmul.f32 %v5080_v2, %v3255_v36  ;;  %vm3271_vm5 = vcmp.ge.f32.partialorder %v3263_v33, 0.0 }
 0x748   : > { %v3277_v54 = vmul.f32 0.22916667, %v3261_v35  ;;  %v3262_v28 = vmul.f32 %v3245_v46, %v3197_v14  ;;  %vm3269_vm4 = vcmp.ge.f32.partialorder %v3261_v35, 0.0  ;;  %5120 = vmatpush3.bf16.msra.mxu0 %v5864_v59  ;;  %v5855_v59 = vld [vmem:[#allocation14 + $0xa8] ss:$12 sps:$4 sm:$0xff]  }
 0x749   : > { %3301 = vadd.xlane.f32.xlu0 %v3291_v37  ;;  %v3280_v22 = vmul.f32 0.22916667, %v3264_v5  ;;  %v7738_v47 = vsel %vm3271_vm5, %v3263_v33, %v3279_v7  ;;  %vm3272_vm7 = vcmp.ge.f32.partialorder %v3264_v5, 0.0  ;;  %v5827_v37 = vld [vmem:[#allocation13 + $0x38] ss:$12 sps:$4 sm:$0xff]  }
 0x74a   : > { %v3278_v60 = vmul.f32 0.22916667, %v3262_v28  ;;  %v7732_v63 = vsel %vm3269_vm4, %v3261_v35, %v3277_v54  ;;  %vm3270_vm6 = vcmp.ge.f32.partialorder %v3262_v28, 0.0  ;;  %v3295_v50 = vmul.f32 %v7738_v47, %v7738_v47  ;;  %v5826_v35 = vld [vmem:[#allocation13 + $0x20] ss:$12 sps:$4 sm:$0xff]  }
 0x74b   : > { %v3293_v39 = vmul.f32 %v7732_v63, %v7732_v63  ;;  %v7746_v0 = vsel %vm3272_vm7, %v3264_v5, %v3280_v22  ;;  %5122 = vmatmul.mubr.bf16.vlgmr.msra.gmra.mrb[8].mxu0 %v7763_v56 }
 0x74c   : > { %v7740_v55 = vsel %vm3270_vm6, %v3262_v28, %v3278_v60  ;;  %v3296_v3 = vmul.f32 %v7746_v0, %v7746_v0  ;;  %5125 = vmatprep.mubr.bf16.mxu0 %v7766_v8  ;;  %v5828_v28 = vld [vmem:[#allocation13 + $0x50] ss:$12 sps:$4 sm:$0xff]  }
 0x74d   : > { %3303 = vadd.xlane.f32.xlu0 %v3292_v20  ;;  %3305 = vadd.xlane.f32.xlu1 %v3293_v39  ;;  %v3294_v10 = vmul.f32 %v7740_v55, %v7740_v55  ;;  %v5829_v39 = vld [vmem:[#allocation13 + $0x68] ss:$12 sps:$4 sm:$0xff]  }
 0x751   : > { %3309 = vadd.xlane.f32.xlu1 %v3295_v50  ;;  %3307 = vadd.xlane.f32.xlu0 %v3294_v10  ;;  %v5830_v50 = vld [vmem:[#allocation13 + $0x80] ss:$12 sps:$4 sm:$0xff]  }
 0x753   : > { %5126 = vmatmul.mubr.bf16.gmra.mrb[12].mxu0 %v7771_v57 }
 0x755   : > { %3311 = vadd.xlane.f32.xlu0 %v3296_v3 }
 0x7d2   : > { %v3298_v16 = vpop.xlane.xlu0 %3297 }
 0x7d3   : > { %v3313_v11 = vmax.f32 %v3298_v16, 1e-24 }
 0x7d4   : > { %v3300_v32 = vpop.xlane.xlu1 %3299 }
 0x7d5   : > { %5865 = vrsqrt.f32 %v3313_v11  ;;  %v3314_v13 = vmax.f32 %v3300_v32, 1e-24 }
 0x7d6   : > { %v3302_v1 = vpop.xlane.xlu0 %3301 }
 0x7d7   : > { %5867 = vrsqrt.f32 %v3314_v13  ;;  %v3315_v24 = vmax.f32 %v3302_v1, 1e-24 }
 0x7d9   : > { %5869 = vrsqrt.f32 %v3315_v24 }
 0x7da   : > { %v3304_v53 = vpop.xlane.xlu0 %3303  ;;  %v3306_v9 = vpop.xlane.xlu1 %3305 }
 0x7db   : > { %v3316_v4 = vmax.f32 %v3304_v53, 1e-24  ;;  %v3317_v51 = vmax.f32 %v3306_v9, 1e-24 }
 0x7dd   : > { %5871 = vrsqrt.f32 %v3316_v4 }
 0x7de   : > { %v3308_v46 = vpop.xlane.xlu0 %3307  ;;  %v3310_v36 = vpop.xlane.xlu1 %3309 }
 0x7df   : > { %v5866_v38 = vpop.eup %5865  ;;  %v3318_v31 = vmax.f32 %v3308_v46, 1e-24  ;;  %v3319_v54 = vmax.f32 %v3310_v36, 1e-24 }
 0x7e0   : > { %v3329_v26 = vmul.f32 %v5866_v38, %v7718_v41 }
 0x7e1   : > { %v5868_v12 = vpop.eup %5867  ;;  %5873 = vrsqrt.f32 %v3318_v31  ;;  %v3385_v31 = vlaneseq }
 0x7e2   : > { %v3330_v33 = vmul.f32 %v5868_v12, %v7722_v40  ;;  %v3312_v42 = vpop.xlane.xlu0 %3311  ;;  %5875 = vrsqrt.f32 %v3317_v51 }
 0x7e3   : > { %v5870_v2 = vpop.eup %5869  ;;  %v3320_v14 = vmax.f32 %v3312_v42, 1e-24  ;;  %v7826_v12 = vshrl.u32 %v3385_v31, 7  ;;  %v7836_v42 = vld [vmem:[%s8218_s21] sm:$0x7] }
 0x7e4   : > { %v3347_v6 = vpack.c.bf16 %v3330_v33, %v3329_v26  ;;  %v3331_v40 = vmul.f32 %v5870_v2, %v7724_v48  ;;  %v3706_v26 = vld [vmem:[%s8217_s18] sm:$0x7] }
 0x7e5   : > { %5877 = vrsqrt.f32 %v3320_v14  ;;  %v3387_v51 = vsub.s32 0, %v7826_v12  ;;  %v3391_v33 = vsub.s32 1, %v7826_v12 }
 0x7e6   : > { %3561 = vmatmul.mubr.bf16.vlgmr.msra.gmra.mrb[0].mxu1 %v3347_v6  ;;  %5879 = vrsqrt.f32 %v3319_v54 }
 0x7e7   : > { %v5872_v7 = vpop.eup %5871  ;;  %5082 = vmatpush3.bf16.msra.mxu1 %v7750_v27  ;;  %3570 = vmatprep.mubr.bf16.mxu1 %v6396_v18  ;;  %v5842_v27 = vld [vmem:[#allocation14 + $0x48] ss:$12 sps:$4 sm:$0xff]   ;;  %v3392_v2 = vrot.slane %v7836_v42, %v3391_v33  ;;  %v3715_v36 = vrot.slane %v3706_v26, %v3391_v33 }
 0x7e8   : > { %5083 = vmatprep.subr.bf16.mxu1 %v5826_v35  ;;  %v3332_v41 = vmul.f32 %v5872_v7, %v7730_v49 }
 0x7e9   : > { %v7842_v14 = vadd.f32 %v3715_v36, %v3392_v2 }
 0x7ea   : > { %v3348_v5 = vpack.c.bf16 %v3332_v41, %v3331_v40 }
 0x7eb   : > { %5084 = vmatpush3.bf16.msra.mxu1 %v5826_v35  ;;  %v5874_v60 = vpop.eup %5873  ;;  %v3711_v35 = vrot.slane %v3706_v26, %v3387_v51 }
 0x7ec   : > { %5085 = vmatprep.subr.bf16.mxu1 %v5827_v37  ;;  %v5876_v20 = vpop.eup %5875  ;;  %v3334_v22 = vmul.f32 %v5874_v60, %v7740_v55 }
 0x7ed   : > { %v3333_v49 = vmul.f32 %v5876_v20, %v7732_v63  ;;  %v5832_v63 = vld [vmem:[#allocation13 + $0xb0] ss:$12 sps:$4 sm:$0xff]  }
 0x7ee   : > { %3571 = vmatmul.mubr.bf16.gmra.mrb[4].mxu1 %v3348_v5 }
 0x7ef   : > { %5086 = vmatpush3.bf16.msra.mxu1 %v5827_v37  ;;  %3580 = vmatprep.mubr.bf16.mxu1 %v6396_v18  ;;  %v3349_v48 = vpack.c.bf16 %v3334_v22, %v3333_v49  ;;  %v5878_v10 = vpop.eup %5877 }
 0x7f0   : > { %5087 = vmatprep.subr.bf16.mxu1 %v5828_v28  ;;  %v5880_v3 = vpop.eup %5879  ;;  %v3336_v15 = vmul.f32 %v5878_v10, %v7746_v0  ;;  %v5841_v0 = vld [vmem:[#allocation14 + $0x34] ss:$12 sps:$4 sm:$0xff]  }
 0x7f1   : > { %v3335_v45 = vmul.f32 %v5880_v3, %v7738_v47  ;;  %v5839_v47 = vld [vmem:[#allocation14 + $0x30] ss:$12 sps:$4 sm:$0xff]  }
 0x7f3   : > { %5088 = vmatpush3.bf16.msra.mxu1 %v5828_v28  ;;  %v3350_v55 = vpack.c.bf16 %v3336_v15, %v3335_v45 }
 0x7f4   : > { %5089 = vmatprep.subr.bf16.mxu1 %v5829_v39 }
 0x7f6   : > { %3581 = vmatmul.mubr.bf16.gmra.mrb[8].mxu1 %v3349_v48 }
 0x7f7   : > { %5090 = vmatpush3.bf16.msra.mxu1 %v5829_v39  ;;  %3590 = vmatprep.mubr.bf16.mxu1 %v6396_v18 }
 0x7f8   : > { %5091 = vmatprep.subr.bf16.mxu1 %v5830_v50 }
 0x7fb   : > { %5092 = vmatpush3.bf16.msra.mxu1 %v5830_v50 }
 0x7fc   : > { %5093 = vmatprep.subr.bf16.mxu1 %v5831_v17 }
 0x7fe   : > { %3591 = vmatmul.mubr.bf16.gmra.mrb[12].mxu1 %v3350_v55 }
 0x7ff   : > { %5094 = vmatpush3.bf16.msra.mxu1 %v5831_v17  ;;  %5097 = vmatprep.mubr.bf16.mxu1 %v3347_v6  ;;  %v3388_v6 = vrot.slane %v7836_v42, %v3387_v51 }
 0x800   : > { %5095 = vmatprep.subr.bf16.mxu1 %v5832_v63 }
 0x801   : > { %v7840_v7 = vadd.f32 %v3711_v35, %v3388_v6 }
 0x803   : > { %5096 = vmatpush3.bf16.msra.mxu1 %v5832_v63 }
 0x804   : > { %3851 = vmatprep.subr.bf16.mxu1 %v5835_v44 }
 0x806   : > { %5098 = vmatmul.mubr.bf16.vlgmr.msra.gmra.mrb[16].mxu1 %v3348_v5 }
 0x807   : > { %3852 = vmatpush1.bf16.msra.mxu1 %v5833_v58  ;;  %5101 = vmatprep.mubr.bf16.mxu1 %v3349_v48 }
 0x808   : > { %3853 = vmatprep.subr.bf16.mxu1 %v5838_v19 }
 0x80b   : > { %3854 = vmatpush1.bf16.msra.mxu1 %v5836_v29 }
 0x80c   : > { %3855 = vmatprep.subr.bf16.mxu1 %v5841_v0 }
 0x80e   : > { %5102 = vmatmul.mubr.bf16.gmra.mrb[20].mxu1 %v3350_v55 }
 0x80f   : > { %3856 = vmatpush1.bf16.msra.mxu1 %v5839_v47  ;;  %3883 = vmatprep.mubr.bf16.mxu1 %v6396_v18 }
 0x810   : > { %3857 = vmatprep.subr.bf16.mxu1 %v5844_v34 }
 0x813   : > { %3858 = vmatpush1.bf16.msra.mxu1 %v5842_v27 }
 0x814   : > { %3859 = vmatprep.subr.bf16.mxu1 %v5847_v62 }
 0x817   : > { %3860 = vmatpush1.bf16.msra.mxu1 %v5845_v43 }
 0x818   : > { %3861 = vmatprep.subr.bf16.mxu1 %v5850_v52  ;;  %v3395_v52 = vsub.s32 2, %v7826_v12 }
 0x81a   : > { %v7856_v35 = vrot.slane %v3706_v26, %v3395_v52 }
 0x81b   : > { %3862 = vmatpush1.bf16.msra.mxu1 %v5848_v23 }
 0x81c   : > { %3863 = vmatprep.subr.bf16.mxu1 %v5853_v21 }
 0x81e   : > { %v7794_v16 = vpop.f32.mrb[8].mxu0 }
 0x81f   : > { %3864 = vmatpush1.bf16.msra.mxu1 %v5851_v30  ;;  %v7796_v11 = vpop.f32.mrb[9].mxu0 }
 0x820   : > { %3865 = vmatprep.subr.bf16.mxu1 %v5857_v25  ;;  %v7798_v32 = vpop.f32.mrb[10].mxu0 }
 0x821   : > { %v7800_v13 = vpop.f32.mrb[11].mxu0 }
 0x823   : > { %3866 = vmatpush1.bf16.msra.mxu1 %v5855_v59 }
 0x826   : > { %3884 = vmatmul.mubr.bf16.vlgmr.msra.gmra.mrb[0].mxu1 %v7759_v61  ;;  %v7802_v61 = vpop.f32.mrb[12].mxu0 }
 0x827   : > { %3893 = vmatprep.mubr.bf16.mxu1 %v6396_v18  ;;  %v7804_v1 = vpop.f32.mrb[13].mxu0 }
 0x82e   : > { %3894 = vmatmul.mubr.bf16.gmra.mrb[4].mxu1 %v7763_v56  ;;  %v7806_v56 = vpop.f32.mrb[14].mxu0 }
 0x82f   : > { %3903 = vmatprep.mubr.bf16.mxu1 %v6396_v18  ;;  %v7808_v24 = vpop.f32.mrb[15].mxu0 }
 0x836   : > { %3904 = vmatmul.mubr.bf16.gmra.mrb[8].mxu1 %v7766_v8 }
 0x837   : > { %3913 = vmatprep.mubr.bf16.mxu1 %v6396_v18 }
 0x83e   : > { %3914 = vmatmul.mubr.bf16.gmra.mrb[12].mxu1 %v7771_v57 }
 0x8d9   : > { %v7810_v8 = vpop.f32.mrb[16].mxu1 }
 0x8da   : > { %v7812_v18 = vpop.f32.mrb[17].mxu1 }
 0x8db   : > { %v7814_v57 = vpop.f32.mrb[18].mxu1 }
 0x8dc   : > { %v7816_v53 = vpop.f32.mrb[19].mxu1 }
 0x8e1   : > { %v7818_v4 = vpop.f32.mrb[20].mxu1 }
 0x8e2   : > { %v7820_v9 = vpop.f32.mrb[21].mxu1 }
 0x8e3   : > { %v7822_v46 = vpop.f32.mrb[22].mxu1 }
 0x8e4   : > { %v7824_v38 = vpop.f32.mrb[23].mxu1 }
 0x8f9   : > { %v3885_v37 = vpop.f32.mrb[0].mxu1 }
 0x8fa   : > { %v5242_v41 = vadd.f32 %v7840_v7, %v3885_v37  ;;  %v3887_v54 = vpop.f32.mrb[1].mxu1 }
 0x8fb   : > { %v5244_v40 = vadd.f32 %v7842_v14, %v3887_v54  ;;  %v3889_v5 = vpop.f32.mrb[2].mxu1 }
 0x8fc   : > { %v4719_v28 = vmul.f32 -1.442695, %v5242_v41  ;;  %v5246_v60 = vadd.f32 %v7840_v7, %v3889_v5  ;;  %v3891_v20 = vpop.f32.mrb[3].mxu1  ;;  %v7860_v41 = vrot.slane %v7836_v42, %v3395_v52 }
 0x8fd   : > { %v4727_v39 = vmul.f32 -1.442695, %v5244_v40  ;;  %v5248_v22 = vadd.f32 %v7842_v14, %v3891_v20  ;;  %v3959_v20 = vadd.f32 %v7796_v11, %v7856_v35 }
 0x8fe   : > { %5881 = vpow2.f32 %v4719_v28  ;;  %v4720_v49 = vmul.f32 -1.442695, %v5246_v60  ;;  %v3636_v11 = vadd.f32 %v7812_v18, %v7860_v41  ;;  %v3967_v18 = vadd.f32 %v7794_v16, %v7856_v35 }
 0x8ff   : > { %v4728_v48 = vmul.f32 -1.442695, %v5248_v22 }
 0x900   : > { %5883 = vpow2.f32 %v4720_v49  ;;  %v3962_v49 = vadd.f32 %v7800_v13, %v7856_v35 }
 0x901   : > { %5885 = vpow2.f32 %v4727_v39  ;;  %v3895_v50 = vpop.f32.mrb[4].mxu1 }
 0x902   : > { %v5250_v10 = vadd.f32 %v7840_v7, %v3895_v50  ;;  %v3897_v3 = vpop.f32.mrb[5].mxu1  ;;  %5887 = vpow2.f32 %v4728_v48 }
 0x903   : > { %v5252_v17 = vadd.f32 %v7842_v14, %v3897_v3  ;;  %v3899_v15 = vpop.f32.mrb[6].mxu1 }
 0x904   : > { %v4721_v45 = vmul.f32 -1.442695, %v5250_v10  ;;  %v5254_v55 = vadd.f32 %v7840_v7, %v3899_v15  ;;  %v3901_v63 = vpop.f32.mrb[7].mxu1 }
 0x905   : > { %v4729_v44 = vmul.f32 -1.442695, %v5252_v17  ;;  %v5256_v29 = vadd.f32 %v7842_v14, %v3901_v63 }
 0x906   : > { %5889 = vpow2.f32 %v4721_v45  ;;  %v4722_v58 = vmul.f32 -1.442695, %v5254_v55 }
 0x907   : > { %v4730_v30 = vmul.f32 -1.442695, %v5256_v29 }
 0x908   : > { %v5882_v19 = vpop.eup %5881  ;;  %5891 = vpow2.f32 %v4722_v58  ;;  %v3639_v58 = vadd.f32 %v7816_v53, %v7860_v41  ;;  %v3970_v53 = vadd.f32 %v7798_v32, %v7856_v35 }
 0x909   : > { %v4021_v0 = vadd.f32 1.0, %v5882_v19  ;;  %v3905_v47 = vpop.f32.mrb[8].mxu1  ;;  %5893 = vpow2.f32 %v4729_v44 }
 0x90a   : > { %v5884_v34 = vpop.eup %5883  ;;  %v5258_v27 = vadd.f32 %v7840_v7, %v3905_v47  ;;  %v3907_v62 = vpop.f32.mrb[9].mxu1 }
 0x90b   : > { %v5886_v43 = vpop.eup %5885  ;;  %5895 = vrcp.f32 %v4021_v0  ;;  %v4022_v23 = vadd.f32 1.0, %v5884_v34  ;;  %v3909_v21 = vpop.f32.mrb[10].mxu1  ;;  %v5260_v59 = vadd.f32 %v7842_v14, %v3907_v62 }
 0x90c   : > { %v4723_v25 = vmul.f32 -1.442695, %v5258_v27  ;;  %v5262_v31 = vadd.f32 %v7840_v7, %v3909_v21  ;;  %v3911_v51 = vpop.f32.mrb[11].mxu1  ;;  %v4077_v33 = vadd.f32 1.0, %v5886_v43  ;;  %v5888_v2 = vpop.eup %5887 }
 0x90d   : > { %5897 = vrcp.f32 %v4022_v23  ;;  %v4731_v12 = vmul.f32 -1.442695, %v5260_v59  ;;  %v5264_v37 = vadd.f32 %v7842_v14, %v3911_v51  ;;  %v4078_v28 = vadd.f32 1.0, %v5888_v2 }
 0x90e   : > { %v4724_v6 = vmul.f32 -1.442695, %v5262_v31  ;;  %5899 = vpow2.f32 %v4723_v25  ;;  %v3647_v51 = vadd.f32 %v7814_v57, %v7860_v41 }
 0x90f   : > { %5901 = vpow2.f32 %v4730_v30  ;;  %v4732_v48 = vmul.f32 -1.442695, %v5264_v37  ;;  %v3644_v30 = vadd.f32 %v7810_v8, %v7860_v41  ;;  %v3339_v8 = vld [vmem:[%s7884_s13] sm:$0xff] }
 0x910   : > { %v5890_v36 = vpop.eup %5889  ;;  %5903 = vpow2.f32 %v4724_v6 }
 0x911   : > { %v4023_v54 = vadd.f32 1.0, %v5890_v36  ;;  %v3915_v40 = vpop.f32.mrb[12].mxu1  ;;  %5905 = vrcp.f32 %v4077_v33 }
 0x912   : > { %v5892_v5 = vpop.eup %5891  ;;  %v5266_v60 = vadd.f32 %v7840_v7, %v3915_v40  ;;  %v3917_v26 = vpop.f32.mrb[13].mxu1  ;;  %v3975_v40 = vadd.f32 %v7804_v1, %v7856_v35  ;;  %v3652_v1 = vadd.f32 %v7820_v9, %v7860_v41 }
 0x913   : > { %5907 = vrcp.f32 %v4023_v54  ;;  %v4024_v39 = vadd.f32 1.0, %v5892_v5  ;;  %v3919_v22 = vpop.f32.mrb[14].mxu1  ;;  %v5894_v42 = vpop.eup %5893  ;;  %v5268_v15 = vadd.f32 %v7842_v14, %v3917_v26 }
 0x914   : > { %5909 = vpow2.f32 %v4731_v12  ;;  %v4725_v50 = vmul.f32 -1.442695, %v5266_v60  ;;  %v5270_v10 = vadd.f32 %v7840_v7, %v3919_v22  ;;  %v3921_v3 = vpop.f32.mrb[15].mxu1  ;;  %v4079_v44 = vadd.f32 1.0, %v5894_v42 }
 0x915   : > { %v5896_v17 = vpop.eup %5895  ;;  %5911 = vrcp.f32 %v4024_v39  ;;  %v5272_v13 = vadd.f32 %v7842_v14, %v3921_v3  ;;  %v4733_v0 = vmul.f32 -1.442695, %v5268_v15  ;;  %v3978_v60 = vadd.f32 %v7808_v24, %v7856_v35 }
 0x916   : > { %5913 = vrcp.f32 %v4078_v28  ;;  %v4726_v45 = vmul.f32 -1.442695, %v5270_v10  ;;  %v4101_v55 = vmul.f32 %v5896_v17, %v3959_v20  ;;  %v3340_v10 = vld [vmem:[%s7884_s13 + $0x8] sm:$0xff]  ;;  %v3655_v24 = vadd.f32 %v7824_v38, %v7860_v41 }
 0x917   : > { %v5898_v63 = vpop.eup %5897  ;;  %5915 = vpow2.f32 %v4725_v50  ;;  %v4734_v43 = vmul.f32 -1.442695, %v5272_v13  ;;  %v3983_v38 = vadd.f32 %v7802_v61, %v7856_v35 }
 0x918   : > { %5917 = vpow2.f32 %v4732_v48  ;;  %v4109_v7 = vadd.f32 %v4101_v55, %v3636_v11  ;;  %v4102_v19 = vmul.f32 %v5898_v63, %v3962_v49  ;;  %v5900_v29 = vpop.eup %5899  ;;  %v3341_v63 = vld [vmem:[%s7884_s13 + $0x10] sm:$0xff] }
 0x919   : > { %5919 = vpow2.f32 %v4726_v45  ;;  %v5902_v47 = vpop.eup %5901  ;;  %v4025_v34 = vadd.f32 1.0, %v5900_v29 }
 0x91a   : > { %5921 = vtanh.f32 %v4109_v7  ;;  %v4110_v27 = vadd.f32 %v4102_v19, %v3639_v58  ;;  %v5904_v62 = vpop.eup %5903  ;;  %v4080_v59 = vadd.f32 1.0, %v5902_v47 }
 0x91b   : > { %5923 = vrcp.f32 %v4079_v44  ;;  %v5906_v14 = vpop.eup %5905  ;;  %v4026_v52 = vadd.f32 1.0, %v5904_v62 }
 0x91c   : > { %5925 = vrcp.f32 %v4025_v34  ;;  %v4125_v57 = vsub.f32 1.0, %v5906_v14  ;;  %v4141_v22 = vmul.f32 %v5906_v14, %v3339_v8  ;;  %v3986_v14 = vadd.f32 %v7806_v56, %v7856_v35 }
 0x91d   : > { %v5908_v23 = vpop.eup %5907  ;;  %5927 = vpow2.f32 %v4733_v0 }
 0x91e   : > { %v5910_v21 = vpop.eup %5909  ;;  %5929 = vrcp.f32 %v4026_v52  ;;  %v4103_v16 = vmul.f32 %v5908_v23, %v3967_v18 }
 0x91f   : > { %v5912_v25 = vpop.eup %5911  ;;  %5931 = vpow2.f32 %v4734_v43  ;;  %v4081_v2 = vadd.f32 1.0, %v5910_v21  ;;  %v3660_v43 = vadd.f32 %v7818_v4, %v7860_v41  ;;  %v3342_v21 = vld [vmem:[%s7884_s13 + $0x18] sm:$0xff] }
 0x920   : > { %v5914_v31 = vpop.eup %5913  ;;  %v4111_v33 = vadd.f32 %v4103_v16, %v3644_v30  ;;  %v4104_v6 = vmul.f32 %v5912_v25, %v3970_v53  ;;  %5933 = vtanh.f32 %v4110_v27  ;;  %v3663_v16 = vadd.f32 %v7822_v46, %v7860_v41 }
 0x921   : > { %v5916_v32 = vpop.eup %5915  ;;  %v4126_v17 = vsub.f32 1.0, %v5914_v31  ;;  %v4142_v9 = vmul.f32 %v5914_v31, %v3340_v10 }
 0x922   : > { %v5918_v36 = vpop.eup %5917  ;;  %v4027_v12 = vadd.f32 1.0, %v5916_v32  ;;  %5935 = vtanh.f32 %v4111_v33  ;;  %v4112_v37 = vadd.f32 %v4104_v6, %v3647_v51  ;;  %v3343_v32 = vld [vmem:[%s7884_s13 + $0x20] sm:$0xff] }
 0x923   : > { %v5920_v54 = vpop.eup %5919  ;;  %5937 = vrcp.f32 %v4080_v59  ;;  %v4082_v20 = vadd.f32 1.0, %v5918_v36  ;;  %v3344_v36 = vld [vmem:[%s7884_s13 + $0x28] sm:$0xff] }
 0x924   : > { %v5922_v5 = vpop.eup %5921  ;;  %5939 = vrcp.f32 %v4027_v12  ;;  %v4028_v28 = vadd.f32 1.0, %v5920_v54 }
 0x925   : > { %v5924_v26 = vpop.eup %5923  ;;  %5941 = vrcp.f32 %v4081_v2  ;;  %v4133_v39 = vmul.f32 %v5922_v5, %v4125_v57 }
 0x926   : > { %v5926_v49 = vpop.eup %5925  ;;  %5943 = vrcp.f32 %v4028_v28  ;;  %v4127_v13 = vsub.f32 1.0, %v5924_v26  ;;  %v4143_v0 = vmul.f32 %v5924_v26, %v3341_v63 }
 0x927   : > { %v5928_v42 = vpop.eup %5927  ;;  %5945 = vtanh.f32 %v4112_v37  ;;  %v4105_v48 = vmul.f32 %v5926_v49, %v3975_v40  ;;  %v7893_v50 = vadd.f32 %v4141_v22, %v4133_v39  ;;  %v3345_v22 = vld [vmem:[%s7884_s13 + $0x30] sm:$0xff] }
 0x928   : > { %v5930_v3 = vpop.eup %5929  ;;  %5947 = vrcp.f32 %v4082_v20  ;;  %v4083_v58 = vadd.f32 1.0, %v5928_v42 }
 0x929   : > { %v5932_v15 = vpop.eup %5931  ;;  %v4113_v11 = vadd.f32 %v4105_v48, %v3652_v1  ;;  %v4106_v45 = vmul.f32 %v5930_v3, %v3978_v60  ;;  %v4157_v55 = vmul.f32 %v7893_v50, %v7893_v50  ;;  %v3346_v48 = vld [vmem:[%s7884_s13 + $0x38] sm:$0xff] }
 0x92a   : > { %v5934_v44 = vpop.eup %5933  ;;  %v4084_v34 = vadd.f32 1.0, %v5932_v15 }
 0x92b   : > { %5949 = vtanh.f32 %v4113_v11  ;;  %v4114_v7 = vadd.f32 %v4106_v45, %v3655_v24  ;;  %4165 = vadd.xlane.f32.xlu1 %v4157_v55  ;;  %v4134_v19 = vmul.f32 %v5934_v44, %v4126_v17 }
 0x92c   : > { %v5936_v29 = vpop.eup %5935 }
 0x92d   : > { %v5938_v47 = vpop.eup %5937  ;;  %5951 = vtanh.f32 %v4114_v7  ;;  %v7903_v18 = vadd.f32 %v4142_v9, %v4134_v19  ;;  %v4135_v27 = vmul.f32 %v5936_v29, %v4127_v13  ;;  %v4229_v9 = vld [vmem:[#allocation4] sm:$0xff]  ;;  %v4230_v13 = vld [vmem:[#allocation4 + $0x8] sm:$0xff]  ;;  %v4232_v7 = vld [vmem:[#allocation4 + $0x18] sm:$0xff] }
 0x92e   : > { %v5940_v62 = vpop.eup %5939  ;;  %5953 = vrcp.f32 %v4083_v58  ;;  %v4128_v25 = vsub.f32 1.0, %v5938_v47  ;;  %v4144_v51 = vmul.f32 %v5938_v47, %v3342_v21  ;;  %v4231_v58 = vld [vmem:[#allocation4 + $0x10] sm:$0xff]  ;;  %v4233_v19 = vld [vmem:[#allocation4 + $0x20] sm:$0xff]  ;;  %v4234_v29 = vld [vmem:[#allocation4 + $0x28] sm:$0xff]  ;;  %4245 = vst [vmem:[#allocation23] sm:$0xff] %v4229_v9 }
 0x92f   : > { %v5942_v52 = vpop.eup %5941  ;;  %v4107_v53 = vmul.f32 %v5940_v62, %v3983_v38  ;;  %v4158_v61 = vmul.f32 %v7903_v18, %v7903_v18  ;;  %v7911_v23 = vadd.f32 %v4143_v0, %v4135_v27  ;;  %5955 = vrcp.f32 %v4084_v34  ;;  %4246 = vst [vmem:[#allocation23 + $0x8] sm:$0xff] %v4230_v13  ;;  %4247 = vst [vmem:[#allocation23 + $0x10] sm:$0xff] %v4231_v58  ;;  %v4235_v38 = vld [vmem:[#allocation4 + $0x30] sm:$0xff]  ;;  %v4236_v0 = vld [vmem:[#allocation4 + $0x38] sm:$0xff] }
 0x930   : > { %v5944_v30 = vpop.eup %5943  ;;  %v4129_v46 = vsub.f32 1.0, %v5942_v52  ;;  %v4145_v8 = vmul.f32 %v5942_v52, %v3343_v32  ;;  %v4237_v47 = vld [vmem:[#allocation4 + $0x40] sm:$0xff]  ;;  %4248 = vst [vmem:[#allocation23 + $0x18] sm:$0xff] %v4232_v7  ;;  %4249 = vst [vmem:[#allocation23 + $0x20] sm:$0xff] %v4233_v19  ;;  %v4238_v34 = vld [vmem:[#allocation4 + $0x48] sm:$0xff] }
 0x931   : > { %v5946_v59 = vpop.eup %5945  ;;  %v4115_v4 = vadd.f32 %v4107_v53, %v3660_v43  ;;  %v4108_v56 = vmul.f32 %v5944_v30, %v3986_v14  ;;  %4167 = vadd.xlane.f32.xlu0 %v4158_v61  ;;  %v4159_v35 = vmul.f32 %v7911_v23, %v7911_v23  ;;  %4250 = vst [vmem:[#allocation23 + $0x28] sm:$0xff] %v4234_v29  ;;  %v4239_v27 = vld [vmem:[#allocation4 + $0x50] sm:$0xff]  ;;  %v4240_v62 = vld [vmem:[#allocation4 + $0x58] sm:$0xff]  ;;  %4251 = vst [vmem:[#allocation23 + $0x30] sm:$0xff] %v4235_v38 }
 0x932   : > { %v4136_v31 = vmul.f32 %v5946_v59, %v4128_v25  ;;  %v5948_v33 = vpop.eup %5947  ;;  %4252 = vst [vmem:[#allocation23 + $0x38] sm:$0xff] %v4236_v0  ;;  %4253 = vst [vmem:[#allocation23 + $0x40] sm:$0xff] %v4237_v47  ;;  %v4241_v43 = vld [vmem:[#allocation4 + $0x60] sm:$0xff]  ;;  %v4242_v14 = vld [vmem:[#allocation4 + $0x68] sm:$0xff] }
 0x933   : > { %5957 = vtanh.f32 %v4115_v4  ;;  %v4116_v6 = vadd.f32 %v4108_v56, %v3663_v16  ;;  %4169 = vadd.xlane.f32.xlu1 %v4159_v35  ;;  %v4130_v54 = vsub.f32 1.0, %v5948_v33  ;;  %v4146_v28 = vmul.f32 %v5948_v33, %v3344_v36  ;;  %v4243_v52 = vld [vmem:[#allocation4 + $0x70] sm:$0xff]  ;;  %4254 = vst [vmem:[#allocation23 + $0x48] sm:$0xff] %v4238_v34  ;;  %4255 = vst [vmem:[#allocation23 + $0x50] sm:$0xff] %v4239_v27  ;;  %v4244_v53 = vld [vmem:[#allocation4 + $0x78] sm:$0xff] }
 0x934   : > { %v7919_v2 = vadd.f32 %v4144_v51, %v4136_v31  ;;  %4256 = vst [vmem:[#allocation23 + $0x58] sm:$0xff] %v4240_v62  ;;  %4257 = vst [vmem:[#allocation23 + $0x60] sm:$0xff] %v4241_v43 }
 0x935   : > { %v5950_v41 = vpop.eup %5949  ;;  %5959 = vtanh.f32 %v4116_v6  ;;  %4258 = vst [vmem:[#allocation23 + $0x68] sm:$0xff] %v4242_v14  ;;  %4259 = vst [vmem:[#allocation23 + $0x70] sm:$0xff] %v4243_v52 }
 0x936   : > { %v4160_v12 = vmul.f32 %v7919_v2, %v7919_v2  ;;  %v4137_v37 = vmul.f32 %v5950_v41, %v4129_v46  ;;  %4260 = vst [vmem:[#allocation23 + $0x78] sm:$0xff] %v4244_v53 }
 0x937   : > { %v5952_v40 = vpop.eup %5951 }
 0x938   : > { %4171 = vadd.xlane.f32.xlu0 %v4160_v12  ;;  %v7924_v57 = vadd.f32 %v4145_v8, %v4137_v37  ;;  %v4138_v5 = vmul.f32 %v5952_v40, %v4130_v54  ;;  %v5954_v60 = vpop.eup %5953 }
 0x939   : > { %v5956_v39 = vpop.eup %5955  ;;  %v4131_v42 = vsub.f32 1.0, %v5954_v60  ;;  %v4147_v3 = vmul.f32 %v5954_v60, %v3345_v22 }
 0x93a   : > { %v4161_v26 = vmul.f32 %v7924_v57, %v7924_v57  ;;  %v7928_v20 = vadd.f32 %v4146_v28, %v4138_v5  ;;  %v4132_v24 = vsub.f32 1.0, %v5956_v39  ;;  %v4148_v45 = vmul.f32 %v5956_v39, %v3346_v48 }
 0x93c   : > { %4173 = vadd.xlane.f32.xlu1 %v4161_v26  ;;  %v4162_v49 = vmul.f32 %v7928_v20, %v7928_v20 }
 0x93d   : > { %v5958_v1 = vpop.eup %5957 }
 0x93e   : > { %4175 = vadd.xlane.f32.xlu0 %v4162_v49  ;;  %v4139_v10 = vmul.f32 %v5958_v1, %v4131_v42 }
 0x93f   : > { %v5960_v17 = vpop.eup %5959 }
 0x940   : > { %v7934_v15 = vadd.f32 %v4147_v3, %v4139_v10  ;;  %v4140_v11 = vmul.f32 %v5960_v17, %v4132_v24 }
 0x942   : > { %v4163_v55 = vmul.f32 %v7934_v15, %v7934_v15  ;;  %v7938_v63 = vadd.f32 %v4148_v45, %v4140_v11 }
 0x944   : > { %4177 = vadd.xlane.f32.xlu1 %v4163_v55  ;;  %v4164_v44 = vmul.f32 %v7938_v63, %v7938_v63 }
 0x946   : > { %4179 = vadd.xlane.f32.xlu0 %v4164_v44 }
 0x947   : > { %6220 = shalt.err (!%p6217_p1)
}
 0x948   : > { %s8220_s29 = sld [smem:[#allocation65_spill]]  ;;  %p8222_p13 = pmov %p8219_p2 }
 0x94e   : > { %s8221_s2 = smov %s8220_s29  ;;  %s6221_s15 = scalar_lea.hbm %s8220_s29, 2048 }
 0x94f   : > { %p6222_p4 = scmp.ne.s32.totalorder %s8221_s2, %s6221_s15  ;;  %p6227_p6 = scmp.lt.u32.totalorder %s6221_s15, %s8221_s2 }
 0x951   : > { %p6223_p11 = pnand %p6222_p4, %p8222_p13 }
 0x953   : > { %p6224_p0 = pneg %p6223_p11 }
 0x955   : > { %p6229_p7 = pnand %p6227_p6, %p6224_p0 }
 0x957   : > { %6232 = shalt.err (!%p6229_p7)
}
 0x958   : > { %s6398_s8 = smov 128   ;;  %s6399_s12 = smov 8  }
 0x959   : > { %p8223_p10 = pmov %p8219_p2  ;;  %s4277_s29 = sshll.u32 %s6951_s28, 4  ;;  %s7996_s29 = int_to_ptr.vmem [resolvable:$true] %s4277_s29 }
 0x95a   : > { %s8225_s7 = sld [smem:[#allocation64_spill]]  ;;  %s6233_s18 = scalar_lea.vmem %s7996_s29, 1024 }
 0x95b   : > { %5325 = dma.vmem_to_hbm [thread:$0]  (%p8223_p10), %s4291_s14, 2048, %s8221_s2, [#allocation24], %s6398_s8, %s6398_s8, %s6399_s12  }
 0x95c   : > { %s8224_s14 = sld [smem:[#allocation36_spill]]  ;;  %p6234_p2 = scmp.ne.s32.totalorder %s7996_s29, %s6233_s18 }
 0x95d   : > { %p8226_p3 = scmp.ne.s32.totalorder %s8179_s23, 0  ;;  %s6400_s21 = smov [#allocation22]  }
 0x95e   : > { %s6237_s17 = sshll.u32 %s6400_s21, 4  ;;  %s6238_s17 = int_to_ptr.vmem [resolvable:$false] %s6237_s17 }
 0x95f   : > { %p6235_p8 = pnand %p6234_p2, %p8226_p3  ;;  %p6240_p9 = scmp.lt.s32.totalorder %s7996_s29, %s6238_s17 }
 0x961   : > { %p6236_p12 = pneg %p6235_p8 }
 0x962   : > { %s4737_s19 = sshll.u32 %s8224_s14, 4  ;;  %s6239_s14 = scalar_lea.vmem %s6238_s17, 2048 }
 0x963   : > { %s4274_s3 = sadd.s32 %s4737_s19, %s6934_s0  ;;  %s4262_s0 = scalar_lea.sflag [#allocation10], %s6915_s11 }
 0x964   : > { %s4738_s5 = sshll.u32 %s4274_s3, 7  ;;  %p6241_p5 = scmp.lt.s32.totalorder %s6239_s14, %s6233_s18 }
 0x965   : > { %s7994_s10 = scalar_lea.hbm %s8225_s7, %s4738_s5 }
 0x966   : > { %p6242_p1 = por %p6241_p5, %p6240_p9 }
 0x968   : > { %p6243_p4 = pnand %p6242_p1, %p6236_p12 }
 0x9b8   : > { %v4166_v61 = vpop.xlane.xlu1 %4165 }
 0x9b9   : > { %v4181_v21 = vmax.f32 %v4166_v61, 1e-24 }
 0x9bb   : > { %5961 = vrsqrt.f32 %v4181_v21 }
 0x9be   : > { %v4168_v30 = vpop.xlane.xlu0 %4167 }
 0x9bf   : > { %v4182_v16 = vmax.f32 %v4168_v30, 1e-24 }
 0x9c0   : > { %v4170_v25 = vpop.xlane.xlu1 %4169 }
 0x9c1   : > { %5963 = vrsqrt.f32 %v4182_v16  ;;  %v4183_v59 = vmax.f32 %v4170_v25, 1e-24 }
 0x9c3   : > { %5965 = vrsqrt.f32 %v4183_v59 }
 0x9c5   : > { %v5962_v4 = vpop.eup %5961  ;;  %v4172_v56 = vpop.xlane.xlu0 %4171 }
 0x9c6   : > { %v4197_v35 = vmul.f32 %v5962_v4, %v7893_v50  ;;  %v4184_v31 = vmax.f32 %v4172_v56, 1e-24 }
 0x9c8   : > { %4205 = vst [vmem:[%s7884_s13] sm:$0xff] %v4197_v35  ;;  %4221 = vst [vmem:[%s6951_s28] sm:$0xff] %v4197_v35  ;;  %5967 = vrsqrt.f32 %v4184_v31 }
 0x9c9   : > { %v4174_v51 = vpop.xlane.xlu1 %4173 }
 0x9ca   : > { %v4185_v33 = vmax.f32 %v4174_v51, 1e-24 }
 0x9cb   : > { %v5964_v6 = vpop.eup %5963  ;;  %v4176_v32 = vpop.xlane.xlu0 %4175 }
 0x9cc   : > { %v4198_v46 = vmul.f32 %v5964_v6, %v7903_v18  ;;  %5969 = vrsqrt.f32 %v4185_v33  ;;  %v4186_v41 = vmax.f32 %v4176_v32, 1e-24 }
 0x9cd   : > { %v5966_v36 = vpop.eup %5965 }
 0x9ce   : > { %4206 = vst [vmem:[%s7884_s13 + $0x8] sm:$0xff] %v4198_v46  ;;  %v4213_v12 = vpack.c.bf16 %v4198_v46, %v4197_v35  ;;  %4222 = vst [vmem:[%s6951_s28 + $0x8] sm:$0xff] %v4198_v46  ;;  %v4199_v50 = vmul.f32 %v5966_v36, %v7911_v23  ;;  %5971 = vrsqrt.f32 %v4186_v41 }
 0x9d0   : > { %4217 = vst [vmem:[%s7756_s4] sm:$0xff] %v4213_v12  ;;  %4207 = vst [vmem:[%s7884_s13 + $0x10] sm:$0xff] %v4199_v50 }
 0x9d1   : > { %4223 = vst [vmem:[%s6951_s28 + $0x10] sm:$0xff] %v4199_v50  ;;  %v4178_v37 = vpop.xlane.xlu1 %4177 }
 0x9d2   : > { %v5968_v8 = vpop.eup %5967  ;;  %v4187_v18 = vmax.f32 %v4178_v37, 1e-24 }
 0x9d3   : > { %v4200_v54 = vmul.f32 %v5968_v8, %v7919_v2  ;;  %v4180_v40 = vpop.xlane.xlu0 %4179 }
 0x9d4   : > { %5973 = vrsqrt.f32 %v4187_v18  ;;  %v4188_v5 = vmax.f32 %v4180_v40, 1e-24 }
 0x9d5   : > { %4208 = vst [vmem:[%s7884_s13 + $0x18] sm:$0xff] %v4200_v54  ;;  %v4214_v23 = vpack.c.bf16 %v4200_v54, %v4199_v50  ;;  %4224 = vst [vmem:[%s6951_s28 + $0x18] sm:$0xff] %v4200_v54 }
 0x9d6   : > { %v5970_v28 = vpop.eup %5969  ;;  %5975 = vrsqrt.f32 %v4188_v5 }
 0x9d7   : > { %4218 = vst [vmem:[%s7756_s4 + $0x8] sm:$0xff] %v4214_v23  ;;  %v4201_v60 = vmul.f32 %v5970_v28, %v7924_v57 }
 0x9d8   : > { %v5972_v26 = vpop.eup %5971 }
 0x9d9   : > { %4209 = vst [vmem:[%s7884_s13 + $0x20] sm:$0xff] %v4201_v60  ;;  %4225 = vst [vmem:[%s6951_s28 + $0x20] sm:$0xff] %v4201_v60  ;;  %v4202_v2 = vmul.f32 %v5972_v26, %v7928_v20 }
 0x9db   : > { %4210 = vst [vmem:[%s7884_s13 + $0x28] sm:$0xff] %v4202_v2  ;;  %v4215_v39 = vpack.c.bf16 %v4202_v2, %v4201_v60  ;;  %4226 = vst [vmem:[%s6951_s28 + $0x28] sm:$0xff] %v4202_v2 }
 0x9dd   : > { %4219 = vst [vmem:[%s7756_s4 + $0x10] sm:$0xff] %v4215_v39 }
 0x9de   : > { %v5974_v22 = vpop.eup %5973 }
 0x9df   : > { %v4203_v57 = vmul.f32 %v5974_v22, %v7934_v15 }
 0x9e0   : > { %v5976_v49 = vpop.eup %5975 }
 0x9e1   : > { %4211 = vst [vmem:[%s7884_s13 + $0x30] sm:$0xff] %v4203_v57  ;;  %4227 = vst [vmem:[%s6951_s28 + $0x30] sm:$0xff] %v4203_v57  ;;  %v4204_v42 = vmul.f32 %v5976_v49, %v7938_v63 }
 0x9e3   : > { %4212 = vst [vmem:[%s7884_s13 + $0x38] sm:$0xff] %v4204_v42  ;;  %v4216_v20 = vpack.c.bf16 %v4204_v42, %v4203_v57  ;;  %4228 = vst [vmem:[%s6951_s28 + $0x38] sm:$0xff] %v4204_v42 }
 0x9e4   : > { %6246 = shalt.err (!%p6243_p4)
}
 0x9e5   : > { %s6247_s28 = scalar_lea.hbm %s7994_s10, 1024  ;;  %s6251_s3 = scalar_lea.hbm %s8225_s7, 6144 }
 0x9e6   : > { %p6248_p13 = scmp.ne.s32.totalorder %s7994_s10, %s6247_s28  ;;  %p6252_p6 = scmp.lt.u32.totalorder %s7994_s10, %s8225_s7 }
 0x9e7   : > { %p6253_p7 = scmp.lt.u32.totalorder %s6251_s3, %s6247_s28  ;;  %p6255_p2 = scmp.lt.u32.totalorder %s6247_s28, %s7994_s10 }
 0x9e8   : > { %p6249_p11 = pnand %p6248_p13, %p8226_p3 }
 0x9e9   : > { %p6254_p10 = por %p6253_p7, %p6252_p6 }
 0x9ea   : > { %p6250_p0 = pneg %p6249_p11 }
 0x9eb   : > { %p6256_p8 = por %p6255_p2, %p6254_p10 }
 0x9ed   : > { %p6257_p12 = pnand %p6256_p8, %p6250_p0 }
 0x9ef   : > { %6260 = shalt.err (!%p6257_p12)
}
 0x9f0   : > { %5323 = dma.vmem_to_hbm [thread:$0]  (%p8226_p3), %s7996_s29, 1024, %s7994_s10, %s4262_s0, %s6398_s8, %s6398_s8, %s6399_s12  }
 0x9f1   : > { %4220 = vst [vmem:[%s7756_s4 + $0x18] sm:$0xff] %v4216_v20  ;;  %p8227_p9 = scmp.eq.s32.totalorder %s6547_s20, 5 }
 0x9f3   : > { %6330 = dma.done.wait (%p8227_p9), [#allocation24], 2048   ;;  %p8228_p5 = pmov %p8227_p9 }
 0x9f5   : > { %6332 = vsyncadd (%p8228_p5), [#allocation24], 4294965248 }
 0x9f6 PF: > { %p5372_p1 = scmp.ge.s32.totalorder %s6379_s1, 2  ;;  %s4309_s23 = sand.u32 1, %s6339_s24  }
 0x9f7   : > { %p8229_p4 = scmp.ne.s32.totalorder %s8180_s30, 0  ;;  %s4310_s11 = scalar_lea.sflag [#allocation10], %s4309_s23 }
 0x9f9   : > { %p5356_p13 = pnand %p5372_p1, %p8229_p4 }
 0x9fb   : > { %6334 = dma.done.wait (!%p5356_p13), %s4310_s11, 1024  }
 0x9fc   : > { %6336 = vsyncadd (!%p5356_p13), %s4310_s11, 4294966272  ;;  %s41_s1 = sadd.s32 1, %s6379_s1   ;;  %s8230_s27 = sld [smem:[#allocation33_spill]] }
 0x9fd   : > { %p38_p3 = scmp.ge.s32.totalorder %s41_s1, 8   ;;  %s8231_s28 = sld [smem:[#allocation34_spill]] }
 0x9fe   : > { %s8232_s29 = sld [smem:[#allocation43_spill]]  ;;  %s8233_s0 = sld [smem:[#allocation37_spill]] }
 0x9ff   : > { %s8234_s30 = sld [smem:[#allocation38_spill]]  ;;  %s8235_s18 = sld [smem:[#allocation41_spill]] }
 0xa00   : > { %s8236_s19 = sld [smem:[#allocation42_spill]]  ;;  %s8237_s24 = smov %s6343_s25 }
 0xa01   : > { %s8238_s25 = smov %s6347_s26  ;;  %s8239_s26 = smov %s6797_s16 }
 0xa02   :  { %40 = sbr.rel (!%p38_p3) target bundleno = 34 (0x22), region = 198 }
 0xa09   :  { %4315 = vsyncpa [#allocation9], 1 }
 0xa0a   :  { %4317 = vsyncpa [#allocation9 + $0x1], 1 }
 0xa0b   :  { %4318 = vsyncpa [#allocation12], 1 }
 0xa0c   :  { %4319 = vsyncpa [#allocation15], 1 }
 0xa0d   :  { %4320 = vsyncpa [#allocation18], 1 }
 0xa0e   :  { %4322 = vsyncpa [#allocation18 + $0x1], 1 }
 0xa0f   :  { %4323 = vsyncpa [#allocation21], 1 }
 0xa10   :  { %4325 = vsyncpa [#allocation21 + $0x1], 1 }
 0xa11   :  { %4326 = vsyncpa [#allocation10], 1 }
 0xa12   :  { %4328 = vsyncpa [#allocation10 + $0x1], 1 }
 0xa13   :  { %4329 = vsyncpa [#allocation24], 1 }

// kernel: tpu_custom_call.1
= control target key start
LH: loop header
LB: loop body
LE: loop exit
PB: predicated region body
PF: predicated region fallthrough
CT: control target
= control target key end

     0   :  { %s8069_s0 = inlined_call_operand.hbm [shape: f32[128,128], index: 0, kind: input, shape index: {}]   ;;  %s8070_s1 = inlined_call_operand.hbm [shape: f32[128,128], index: 1, kind: input, shape index: {}]   ;;  %s8071_s2 = inlined_call_operand.vmem [shape: f32[128,384], index: 2, kind: input, shape index: {}]   ;;  %s8072_s3 = inlined_call_operand.vmem [shape: bf16[128,384], index: 3, kind: input, shape index: {}]   ;;  %s8073_s4 = inlined_call_operand.vmem [shape: bf16[128,384], index: 4, kind: input, shape index: {}]   ;;  %s8074_s5 = inlined_call_operand.vmem [shape: f32[1,384], index: 5, kind: input, shape index: {}]   ;;  %s8075_s6 = inlined_call_operand.hbm [shape: bf16[128,384], index: 6, kind: input, shape index: {}]   ;;  %s8076_s7 = inlined_call_operand.vmem [shape: f32[1,384], index: 7, kind: input, shape index: {}]   ;;  %s8077_s8 = inlined_call_operand.hbm [shape: bf16[128,384], index: 8, kind: input, shape index: {}]   ;;  %s8078_s9 = inlined_call_operand.vmem [shape: f32[1,384], index: 9, kind: input, shape index: {}]   ;;  %s8079_s10 = inlined_call_operand.hbm [shape: bf16[128,128], index: 10, kind: input, shape index: {}]   ;;  %s8080_s11 = inlined_call_operand.hbm [shape: bf16[3,128,128], index: 11, kind: input, shape index: {}]   ;;  %s8081_s12 = inlined_call_operand.vmem [shape: f32[3,128,1], index: 12, kind: input, shape index: {}]   ;;  %s8082_s13 = inlined_call_operand.hbm [shape: bf16[3,128,128], index: 13, kind: input, shape index: {}]   ;;  %s8083_s14 = inlined_call_operand.hbm [shape: bf16[3,128,128], index: 14, kind: input, shape index: {}]   ;;  %s8084_s15 = inlined_call_operand.vmem [shape: f32[3,128,1], index: 15, kind: input, shape index: {}]   ;;  %s8085_s16 = inlined_call_operand.hbm [shape: f32[3,128,128], index: 16, kind: output, shape index: {0}]   ;;  %s8086_s17 = inlined_call_operand.hbm [shape: f32[128,128], index: 17, kind: output, shape index: {1}]  }
   0x1   :  { %8128 = sst [smem:[#allocation48_spill]] %s8069_s0 }
   0x2   :  { %8129 = sst [smem:[#allocation49_spill]] %s8070_s1 }
   0x3   :  { %8130 = sst [smem:[#allocation50_spill]] %s8071_s2 }
   0x4   :  { %8131 = sst [smem:[#allocation51_spill]] %s8072_s3 }
   0x5   :  { %8132 = sst [smem:[#allocation52_spill]] %s8073_s4 }
   0x6   :  { %8133 = sst [smem:[#allocation53_spill]] %s8074_s5 }
   0x7   :  { %8134 = sst [smem:[#allocation54_spill]] %s8075_s6 }
   0x8   :  { %8135 = sst [smem:[#allocation55_spill]] %s8076_s7 }
   0x9   :  { %8136 = sst [smem:[#allocation56_spill]] %s8077_s8 }
   0xa   :  { %8137 = sst [smem:[#allocation57_spill]] %s8078_s9 }
   0xb   :  { %8138 = sst [smem:[#allocation58_spill]] %s8079_s10 }
   0xc   :  { %8139 = sst [smem:[#allocation59_spill]] %s8080_s11 }
   0xd   :  { %8140 = sst [smem:[#allocation60_spill]] %s8081_s12 }
   0xe   :  { %8141 = sst [smem:[#allocation61_spill]] %s8082_s13 }
   0xf   :  { %8142 = sst [smem:[#allocation62_spill]] %s8083_s14 }
  0x10   :  { %8143 = sst [smem:[#allocation63_spill]] %s8084_s15 }
  0x11   :  { %8144 = sst [smem:[#allocation64_spill]] %s8085_s16 }
  0x12   :  { %8145 = sst [smem:[#allocation65_spill]] %s8086_s17 }
  0x13   :  { %23 = vsyncpa [#allocation9], 0 }
  0x14   :  { %24 = vsyncpa [#allocation12], 0 }
  0x15   :  { %25 = vsyncpa [#allocation15], 0 }
  0x16   :  { %26 = vsyncpa [#allocation18], 0 }
  0x17   :  { %28 = vsyncpa [#allocation18 + $0x1], 0 }
  0x18   :  { %29 = vsyncpa [#allocation21], 0 }
  0x19   :  { %31 = vsyncpa [#allocation21 + $0x1], 0 }
  0x1a   :  { %32 = vsyncpa [#allocation10], 0 }
  0x1b   :  { %34 = vsyncpa [#allocation10 + $0x1], 0 }
  0x1c   :  { %35 = vsyncpa [#allocation24], 0  ;;  %s6491_s24 = smov 0   ;;  %s6493_s25 = smov 0  }
  0x1d   :  { %s6495_s26 = smov 0   ;;  %s6497_s27 = smov 0  }
  0x1e   :  { %s6499_s28 = smov 0   ;;  %s6501_s29 = smov 0  }
  0x1f   :  { %s6503_s0 = smov 0   ;;  %s6505_s30 = smov 0  }
  0x20   :  { %s6507_s18 = smov 0   ;;  %s6509_s19 = smov 0  }
  0x21   :  { %s6511_s1 = smov 0  }
  0x22 LB: > { %8146 = sst [smem:[#allocation33_spill]] %s6355_s28  ;;  %s6547_s20 = sadd.s32 4294967295, %s6379_s1   ;;  %s6379_s1 = sphi %s6511_s1, %s41_s1   ;;  %s6375_s19 = sphi %s6509_s19, %s8236_s19   ;;  %s6371_s18 = sphi %s6507_s18, %s8235_s18   ;;  %s6367_s30 = sphi %s6505_s30, %s8234_s30   ;;  %s6363_s0 = sphi %s6503_s0, %s8233_s0   ;;  %s6359_s29 = sphi %s6501_s29, %s8232_s29   ;;  %s6355_s28 = sphi %s6499_s28, %s8231_s28   ;;  %s6351_s27 = sphi %s6497_s27, %s8230_s27   ;;  %s6347_s26 = sphi %s6495_s26, %s8239_s26   ;;  %s6343_s25 = sphi %s6493_s25, %s8238_s25   ;;  %s6339_s24 = sphi %s6491_s24, %s8237_s24  }
  0x23   : > { %8147 = sst [smem:[#allocation34_spill]] %s6359_s29  ;;  %p4523_p0 = scmp.ge.s32.totalorder %s6379_s1, 1 }
  0x24   : > { %8148 = sst [smem:[#allocation35_spill]] %s6363_s0  ;;  %p8094_p1 = scmp.eq.s32.totalorder %s6547_s20, 0 }
  0x25   : > { %8149 = sst [smem:[#allocation36_spill]] %s6367_s30  ;;  %p474_p2 = scmp.lt.s32.totalorder %s6379_s1, 7 }
  0x26   : > { %8150 = sst [smem:[#allocation37_spill]] %s6371_s18  ;;  %s6381_s22 = smov [#allocation11]  }
  0x27   : > { %8151 = sst [smem:[#allocation38_spill]] %s6375_s19  ;;  %p6552_p3 = pnand %p4523_p0, %p474_p2 }
  0x28   : > { %s499_s23 = sshll.u32 %s6381_s22, 4  ;;  %s6382_s17 = smov [#allocation14]   ;;  %s500_s23 = int_to_ptr.vmem [resolvable:$true] %s499_s23 }
  0x29   : > { %s8152_s21 = scalar_select %p6552_p3, 1, 0 }
  0x2a   : > { %p5329_p4 = pneg %p6552_p3  ;;  %s540_s7 = sshll.u32 %s6382_s17, 4  ;;  %s6564_s7 = int_to_ptr.vmem [resolvable:$true] %s540_s7 }
  0x2b   : > { %8153 = sst [smem:[#allocation39_spill]] %s8152_s21  ;;  %s8155_s5 = sld [smem:[#allocation49_spill]] }
  0x2c   : > { %p6560_p5 = pnand %p5329_p4, %p8094_p1 }
  0x2e   : > { %s8154_s16 = scalar_select %p6560_p5, 1, 0 }
  0x2f   : > { %p6574_p7 = pneg %p6560_p5 }
  0x31   : > { %s5977_s4 = scalar_lea.hbm %s8155_s5, 2048 }
  0x32   : > { %p5978_p6 = scmp.ne.s32.totalorder %s8155_s5, %s5977_s4  ;;  %p5984_p10 = scmp.lt.u32.totalorder %s5977_s4, %s8155_s5 }
  0x34   : > { %p5980_p8 = pnand %p6574_p7, %p5978_p6 }
  0x36   : > { %p5981_p9 = pneg %p5980_p8 }
  0x38   : > { %p5986_p11 = pnand %p5984_p10, %p5981_p9 }
  0x3a   : > { %5989 = shalt.err (!%p5986_p11)
}
  0x3b   : > { %s5990_s2 = scalar_lea.vmem %s500_s23, 2048  ;;  %p5998_p2 = scmp.lt.s32.totalorder %s500_s23, %s500_s23 }
  0x3c   : > { %p5991_p12 = scmp.ne.s32.totalorder %s500_s23, %s5990_s2  ;;  %p5999_p4 = scmp.lt.s32.totalorder %s5990_s2, %s5990_s2 }
  0x3e   : > { %p5993_p13 = pnand %p5991_p12, %p6574_p7  ;;  %p6000_p1 = por %p5999_p4, %p5998_p2 }
  0x40   : > { %p5994_p0 = pneg %p5993_p13 }
  0x42   : > { %p6001_p3 = pnand %p6000_p1, %p5994_p0 }
  0x44   : > { %6004 = shalt.err (!%p6001_p3)
}
  0x45   : > { %s8101_s3 = smov 128   ;;  %s8109_s9 = smov 8  }
  0x46   : > { %5335 = dma.hbm_to_vmem [thread:$0]  (!%p6560_p5), %s8155_s5, 2048, %s500_s23, [#allocation12], %s8101_s3, %s8101_s3, %s8109_s9  }
  0x47   : > { %s8157_s8 = sld [smem:[#allocation56_spill]] }
  0x4d   : > { %s6005_s0 = scalar_lea.hbm %s8157_s8, 3072 }
  0x4e   : > { %p6006_p1 = scmp.ne.s32.totalorder %s8157_s8, %s6005_s0  ;;  %p6012_p8 = scmp.lt.u32.totalorder %s6005_s0, %s8157_s8 }
  0x50   : > { %p6008_p3 = pnand %p6006_p1, %p6574_p7 }
  0x52   : > { %p6009_p6 = pneg %p6008_p3 }
  0x54   : > { %p6014_p9 = pnand %p6012_p8, %p6009_p6 }
  0x56   : > { %6017 = shalt.err (!%p6014_p9)
}
  0x57   : > { %s6018_s23 = scalar_lea.vmem %s6564_s7, 3072  ;;  %p6026_p13 = scmp.lt.s32.totalorder %s6564_s7, %s6564_s7 }
  0x58   : > { %p6019_p10 = scmp.ne.s32.totalorder %s6564_s7, %s6018_s23  ;;  %p6027_p0 = scmp.lt.s32.totalorder %s6018_s23, %s6018_s23 }
  0x5a   : > { %p6021_p11 = pnand %p6019_p10, %p6574_p7  ;;  %p6028_p2 = por %p6027_p0, %p6026_p13 }
  0x5c   : > { %p6022_p12 = pneg %p6021_p11 }
  0x5e   : > { %p6029_p4 = pnand %p6028_p2, %p6022_p12 }
  0x60   : > { %6032 = shalt.err (!%p6029_p4)
}
  0x61   : > { %s8102_s30 = smov 192   ;;  %s8108_s14 = smov 12  }
  0x62   : > { %5341 = dma.hbm_to_vmem [thread:$0]  (!%p6560_p5), %s8157_s8, 3072, %s6564_s7, [#allocation15], %s8102_s30, %s8102_s30, %s8108_s14  }
  0x63   : > { %p298_p1 = scmp.ne.s32.totalorder %s6359_s29, %s6355_s28  ;;  %p8104_p3 = scmp.eq.s32.totalorder %s6379_s1, 0 }
  0x64   : > { %p304_p6 = scmp.ne.s32.totalorder %s6355_s28, %s6351_s27  ;;  %p8158_p9 = scmp.eq.s32.totalorder %s6547_s20, 0 }
  0x65   : > { %p300_p8 = por %p8104_p3, %p298_p1  ;;  %p8103_p11 = scmp.lt.s32.totalorder %s6379_s1, 6 }
  0x66   : > { %p6630_p10 = por %p8158_p9, %p304_p6  ;;  %s570_s17 = sand.u32 1, %s6379_s1  }
  0x67   : > { %s572_s2 = sand.u32 1, %s6359_s29   ;;  %s4743_s3 = sshll.u32 %s6375_s19, 10 }
  0x68   : > { %s8159_s15 = scalar_select %p6630_p10, 1, 0 }
  0x69   : > { %s4530_s23 = sshll.u32 %s572_s2, 6  ;;  %s8161_s11 = sld [smem:[#allocation59_spill]] }
  0x6a   : > { %8160 = sst [smem:[#allocation40_spill]] %s8159_s15  ;;  %s574_s27 = scalar_lea.vmem [#allocation17], %s4530_s23 }
  0x6b   : > { %s581_s12 = sshll.u32 %s574_s27, 4  ;;  %p6647_p12 = pnand %p8103_p11, %p300_p8  ;;  %s6643_s12 = int_to_ptr.vmem [resolvable:$true] %s581_s12 }
  0x6c   : > { %s6651_s2 = scalar_lea.sflag [#allocation18], %s570_s17 }
  0x6d   : > { %p6035_p0 = pneg %p6647_p12 }
  0x6f   : > { %s6641_s21 = scalar_lea.hbm %s8161_s11, %s4743_s3  ;;  %s6038_s7 = scalar_lea.hbm %s8161_s11, 3072 }
  0x70   : > { %s6033_s0 = scalar_lea.hbm %s6641_s21, 1024  ;;  %p6039_p1 = scmp.lt.u32.totalorder %s6641_s21, %s8161_s11 }
  0x71   : > { %p6034_p13 = scmp.ne.s32.totalorder %s6641_s21, %s6033_s0  ;;  %p6040_p6 = scmp.lt.u32.totalorder %s6038_s7, %s6033_s0 }
  0x72   : > { %p6042_p9 = scmp.lt.u32.totalorder %s6033_s0, %s6641_s21 }
  0x73   : > { %p6036_p2 = pnand %p6035_p0, %p6034_p13  ;;  %p6041_p8 = por %p6040_p6, %p6039_p1 }
  0x75   : > { %p6037_p4 = pneg %p6036_p2  ;;  %p6043_p11 = por %p6042_p9, %p6041_p8 }
  0x77   : > { %p6044_p3 = pnand %p6043_p11, %p6037_p4 }
  0x79   : > { %6047 = shalt.err (!%p6044_p3)
}
  0x7a   : > { %s6048_s17 = scalar_lea.vmem %s6643_s12, 1024  ;;  %s6387_s3 = smov [#allocation17]  }
  0x7b   : > { %p6049_p13 = scmp.ne.s32.totalorder %s6643_s12, %s6048_s17  ;;  %s6053_s23 = sshll.u32 %s6387_s3, 4  ;;  %s6054_s23 = int_to_ptr.vmem [resolvable:$false] %s6053_s23 }
  0x7c   : > { %s6055_s30 = scalar_lea.vmem %s6054_s23, 2048  ;;  %p6056_p5 = scmp.lt.s32.totalorder %s6643_s12, %s6054_s23 }
  0x7d   : > { %p6051_p2 = pnand %p6049_p13, %p6035_p0  ;;  %p6057_p1 = scmp.lt.s32.totalorder %s6055_s30, %s6048_s17 }
  0x7f   : > { %p6052_p10 = pneg %p6051_p2  ;;  %p6058_p6 = por %p6057_p1, %p6056_p5 }
  0x81   : > { %p6059_p8 = pnand %p6058_p6, %p6052_p10 }
  0x83   : > { %6062 = shalt.err (!%p6059_p8)
}
  0x84   : > { %s8113_s0 = smov 64   ;;  %s8115_s7 = smov 4  }
  0x85   : > { %5348 = dma.hbm_to_vmem [thread:$0]  (!%p6647_p12), %s6641_s21, 1024, %s6643_s12, %s6651_s2, %s8113_s0, %s8113_s0, %s8115_s7  }
  0x86   : > { %s6390_s27 = smov [#allocation8]   ;;  %s6391_s23 = smov [#allocation13]  }
  0x87   : > { %s486_s3 = sshll.u32 %s6390_s27, 4  ;;  %s524_s17 = sshll.u32 %s6391_s23, 4  ;;  %s487_s3 = int_to_ptr.vmem [resolvable:$true] %s486_s3  ;;  %s525_s17 = int_to_ptr.vmem [resolvable:$true] %s524_s17 }
  0x88   : > { %s8163_s9 = sld [smem:[#allocation48_spill]] }
  0x8e   : > { %s6063_s5 = scalar_lea.hbm %s8163_s9, 2048 }
  0x8f   : > { %p6064_p5 = scmp.ne.s32.totalorder %s8163_s9, %s6063_s5  ;;  %p6070_p11 = scmp.lt.u32.totalorder %s6063_s5, %s8163_s9 }
  0x91   : > { %p6066_p3 = pnand %p6064_p5, %p6574_p7 }
  0x93   : > { %p6067_p10 = pneg %p6066_p3 }
  0x95   : > { %p6072_p12 = pnand %p6070_p11, %p6067_p10 }
  0x97   : > { %6075 = shalt.err (!%p6072_p12)
}
  0x98   : > { %s6076_s12 = scalar_lea.vmem %s487_s3, 2048  ;;  %p6084_p13 = scmp.lt.s32.totalorder %s487_s3, %s487_s3 }
  0x99   : > { %p6077_p0 = scmp.ne.s32.totalorder %s487_s3, %s6076_s12  ;;  %p6085_p2 = scmp.lt.s32.totalorder %s6076_s12, %s6076_s12 }
  0x9b   : > { %p6079_p4 = pnand %p6077_p0, %p6574_p7  ;;  %p6086_p1 = por %p6085_p2, %p6084_p13 }
  0x9d   : > { %p6080_p9 = pneg %p6079_p4 }
  0x9f   : > { %p6087_p6 = pnand %p6086_p1, %p6080_p9 }
  0xa1   : > { %6090 = shalt.err (!%p6087_p6)
}
  0xa2   : > { %p8164_p8 = scmp.ne.s32.totalorder %s8154_s16, 0  ;;  %s8165_s8 = smov 8  }
  0xa3   : > { %s8166_s11 = smov 128   ;;  %s8167_s6 = sld [smem:[#allocation54_spill]] }
  0xa4   : > { %5332 = dma.hbm_to_vmem [thread:$0]  (!%p8164_p8), %s8163_s9, 2048, %s487_s3, [#allocation9], %s8166_s11, %s8166_s11, %s8165_s8  }
  0xa9   : > { %s6091_s27 = scalar_lea.hbm %s8167_s6, 3072 }
  0xaa   : > { %p6092_p5 = scmp.ne.s32.totalorder %s8167_s6, %s6091_s27  ;;  %p6098_p11 = scmp.lt.u32.totalorder %s6091_s27, %s8167_s6 }
  0xac   : > { %p6094_p3 = pnand %p6092_p5, %p6574_p7 }
  0xae   : > { %p6095_p10 = pneg %p6094_p3 }
  0xb0   : > { %p6100_p12 = pnand %p6098_p11, %p6095_p10 }
  0xb2   : > { %6103 = shalt.err (!%p6100_p12)
}
  0xb3   : > { %s6104_s14 = scalar_lea.vmem %s525_s17, 3072  ;;  %p6112_p13 = scmp.lt.s32.totalorder %s525_s17, %s525_s17 }
  0xb4   : > { %p6105_p0 = scmp.ne.s32.totalorder %s525_s17, %s6104_s14  ;;  %p6113_p2 = scmp.lt.s32.totalorder %s6104_s14, %s6104_s14 }
  0xb6   : > { %p6107_p4 = pnand %p6105_p0, %p6574_p7  ;;  %p6114_p1 = por %p6113_p2, %p6112_p13 }
  0xb8   : > { %p6108_p9 = pneg %p6107_p4 }
  0xba   : > { %p6115_p6 = pnand %p6114_p1, %p6108_p9 }
  0xbc   : > { %6118 = shalt.err (!%p6115_p6)
}
  0xbd   : > { %s8168_s3 = smov 12   ;;  %s8169_s8 = smov 192  }
  0xbe   : > { %5338 = dma.hbm_to_vmem [thread:$0]  (!%p8164_p8), %s8167_s6, 3072, %s525_s17, [#allocation12], %s8169_s8, %s8169_s8, %s8168_s3  }
  0xbf   : > { %s6392_s15 = smov [#allocation16]   ;;  %s8170_s10 = sld [smem:[#allocation58_spill]] }
  0xc0   : > { %s556_s21 = sshll.u32 %s6392_s15, 4  ;;  %s557_s21 = int_to_ptr.vmem [resolvable:$true] %s556_s21 }
  0xc5   : > { %s6119_s30 = scalar_lea.hbm %s8170_s10, 1024 }
  0xc6   : > { %p6120_p5 = scmp.ne.s32.totalorder %s8170_s10, %s6119_s30  ;;  %p6126_p11 = scmp.lt.u32.totalorder %s6119_s30, %s8170_s10 }
  0xc8   : > { %p6122_p3 = pnand %p6120_p5, %p6574_p7 }
  0xca   : > { %p6123_p10 = pneg %p6122_p3 }
  0xcc   : > { %p6128_p12 = pnand %p6126_p11, %p6123_p10 }
  0xce   : > { %6131 = shalt.err (!%p6128_p12)
}
  0xcf   : > { %s6132_s17 = scalar_lea.vmem %s557_s21, 1024  ;;  %p6140_p13 = scmp.lt.s32.totalorder %s557_s21, %s557_s21 }
  0xd0   : > { %p6133_p0 = scmp.ne.s32.totalorder %s557_s21, %s6132_s17  ;;  %p6141_p2 = scmp.lt.s32.totalorder %s6132_s17, %s6132_s17 }
  0xd2   : > { %p6135_p4 = pnand %p6133_p0, %p6574_p7  ;;  %p6142_p1 = por %p6141_p2, %p6140_p13 }
  0xd4   : > { %p6136_p9 = pneg %p6135_p4 }
  0xd6   : > { %p6143_p6 = pnand %p6142_p1, %p6136_p9 }
  0xd8   : > { %6146 = shalt.err (!%p6143_p6)
}
  0xd9   : > { %s8171_s3 = smov 64   ;;  %s4522_s16 = sadd.s32 4294967294, %s6379_s1  }
  0xda   : > { %5344 = dma.hbm_to_vmem [thread:$0]  (!%p8164_p8), %s8170_s10, 1024, %s557_s21, [#allocation15], %s8171_s3, %s8171_s3, %s8115_s7  }
  0xdb   : > { %s50_s22 = sadd.s32 1, %s6371_s18  ;;  %s345_s11 = sadd.s32 1, %s6347_s26 }
  0xdc   : > { %p51_p7 = scmp.ge.s32.totalorder %s50_s22, 2  ;;  %p352_p5 = scmp.ne.s32.totalorder %s6347_s26, %s6343_s25 }
  0xdd   : > { %p358_p3 = scmp.ne.s32.totalorder %s6343_s25, %s6339_s24  ;;  %s8173_s5 = sadd.s32 1, %s6375_s19 }
  0xde   : > { %s8241_s22 = smov (%p51_p7, %s50_s22), 0  ;;  %s8243_s5 = smov (!%p51_p7, %s8173_s5), %s6375_s19 }
  0xdf   : > { %8172 = sst [smem:[#allocation41_spill]] %s8241_s22  ;;  %s341_s15 = ssub.s32 %s6371_s18, %s8241_s22 }
  0xe0   : > { %p8174_p10 = scmp.eq.s32.totalorder %s6379_s1, 0  ;;  %p55_p11 = scmp.ge.s32.totalorder %s8243_s5, 3 }
  0xe1   : > { %p8176_p12 = scmp.eq.s32.totalorder %s6547_s20, 0  ;;  %p8119_p4 = scmp.eq.s32.totalorder %s6547_s20, 5 }
  0xe2   : > { %p6761_p8 = por %p352_p5, %p8174_p10  ;;  %p446_p9 = scmp.eq.s32.totalorder %s4522_s16, 5 }
  0xe3   : > { %p6767_p0 = por %p358_p3, %p8176_p12  ;;  %s8245_s5 = smov (%p55_p11, %s8243_s5), 0 }
  0xe4   : > { %8178 = sst [smem:[#allocation42_spill]] %s8245_s5  ;;  %p6776_p13 = por %p8119_p4, %p352_p5 }
  0xe5   : > { %p6780_p2 = por %p446_p9, %p358_p3  ;;  %s288_s4 = ssub.s32 %s6375_s19, %s8245_s5 }
  0xe6   : > { %s8179_s23 = scalar_select %p6776_p13, 1, 0 }
  0xe7   : > { %s8180_s30 = scalar_select %p6780_p2, 1, 0 }
  0xe8   : > { %s8120_s12 = sand.u32 1, %s6347_s26   ;;  %p289_p1 = scmp.eq.s32.totalorder %s288_s4, 0 }
  0xe9   : > { %s342_s14 = sor.u32 %s341_s15, %s288_s4  ;;  %s6789_s17 = sshll.u32 %s8120_s12, 5 }
  0xea   : > { %p343_p6 = scmp.eq.s32.totalorder %s342_s14, 0  ;;  %s8181_s0 = sadd.s32 1, %s6359_s29 }
  0xeb   : > { %s6794_s8 = scalar_select %p289_p1, %s6359_s29, %s8181_s0  }
  0xec   : > { %s6797_s16 = scalar_select %p343_p6, %s6347_s26, %s345_s11  }
  0xed   : > { %8182 = sst [smem:[#allocation43_spill]] %s6794_s8  ;;  %s4534_s7 = sshll.u32 %s6371_s18, 3 }
  0xee   : > { %s4535_s6 = sshll.u32 %s6375_s19, 4  ;;  %s603_s9 = scalar_lea.vmem [#allocation19], %s6789_s17 }
  0xef   : > { %s612_s10 = sshll.u32 %s603_s9, 4  ;;  %s6802_s22 = sadd.s32 %s4535_s6, %s4534_s7  ;;  %s6804_s10 = int_to_ptr.vmem [resolvable:$true] %s612_s10 }
  0xf0   : > { %s4536_s15 = sshll.u32 %s6802_s22, 6  ;;  %p8183_p7 = scmp.lt.s32.totalorder %s6379_s1, 6 }
  0xf1   : > { %s8185_s13 = sld [smem:[#allocation61_spill]] }
  0xf2   : > { %p6811_p5 = pnand %p8183_p7, %p6761_p8 }
  0xf4   : > { %p6149_p10 = pneg %p6811_p5 }
  0xf7   : > { %s6820_s9 = scalar_lea.hbm %s8185_s13, %s4536_s15  ;;  %s6152_s0 = scalar_lea.hbm %s8185_s13, 3072 }
  0xf8   : > { %s6147_s6 = scalar_lea.hbm %s6820_s9, 512  ;;  %p6153_p12 = scmp.lt.u32.totalorder %s6820_s9, %s8185_s13 }
  0xf9   : > { %p6148_p3 = scmp.ne.s32.totalorder %s6820_s9, %s6147_s6  ;;  %p6154_p9 = scmp.lt.u32.totalorder %s6152_s0, %s6147_s6 }
  0xfa   : > { %p6156_p6 = scmp.lt.u32.totalorder %s6147_s6, %s6820_s9 }
  0xfb   : > { %p6150_p8 = pnand %p6149_p10, %p6148_p3  ;;  %p6155_p1 = por %p6154_p9, %p6153_p12 }
  0xfd   : > { %p6151_p11 = pneg %p6150_p8  ;;  %p6157_p7 = por %p6156_p6, %p6155_p1 }
  0xff   : > { %p6158_p4 = pnand %p6157_p7, %p6151_p11 }
 0x101   : > { %6161 = shalt.err (!%p6158_p4)
}
 0x102   : > { %s6162_s12 = scalar_lea.vmem %s6804_s10, 512  ;;  %s6393_s7 = smov [#allocation19]  }
 0x103   : > { %p6163_p3 = scmp.ne.s32.totalorder %s6804_s10, %s6162_s12  ;;  %s6167_s21 = sshll.u32 %s6393_s7, 4  ;;  %s6168_s21 = int_to_ptr.vmem [resolvable:$false] %s6167_s21 }
 0x104   : > { %s6169_s11 = scalar_lea.vmem %s6168_s21, 1024  ;;  %p6170_p13 = scmp.lt.s32.totalorder %s6804_s10, %s6168_s21 }
 0x105   : > { %p6165_p8 = pnand %p6163_p3, %p6149_p10  ;;  %p6171_p12 = scmp.lt.s32.totalorder %s6169_s11, %s6162_s12 }
 0x107   : > { %p6166_p2 = pneg %p6165_p8  ;;  %p6172_p9 = por %p6171_p12, %p6170_p13 }
 0x109   : > { %p6173_p1 = pnand %p6172_p9, %p6166_p2 }
 0x10b   : > { %6176 = shalt.err (!%p6173_p1)
}
 0x10c   : > { %s8186_s6 = smov 4   ;;  %s8187_s12 = sld [smem:[#allocation62_spill]] }
 0x10d   : > { %5351 = dma.hbm_to_vmem [thread:$0]  (!%p6811_p5), %s6820_s9, 512, %s6804_s10, %s6651_s2, %s8171_s3, %s8171_s3, %s8186_s6  }
 0x10e   : > { %s626_s21 = scalar_lea.vmem [#allocation20], %s6789_s17  ;;  %s8188_s13 = sand.u32 1, %s6347_s26  }
 0x10f   : > { %s635_s11 = sshll.u32 %s626_s21, 4  ;;  %s6863_s5 = scalar_lea.sflag [#allocation21], %s8188_s13  ;;  %s6859_s11 = int_to_ptr.vmem [resolvable:$true] %s635_s11 }
 0x112   : > { %s6856_s7 = scalar_lea.hbm %s8187_s12, %s4536_s15  ;;  %s6182_s22 = scalar_lea.hbm %s8187_s12, 3072 }
 0x113   : > { %s6177_s19 = scalar_lea.hbm %s6856_s7, 512  ;;  %p6183_p11 = scmp.lt.u32.totalorder %s6856_s7, %s8187_s12 }
 0x114   : > { %p6178_p4 = scmp.ne.s32.totalorder %s6856_s7, %s6177_s19  ;;  %p6184_p6 = scmp.lt.u32.totalorder %s6182_s22, %s6177_s19 }
 0x115   : > { %p6186_p3 = scmp.lt.u32.totalorder %s6177_s19, %s6856_s7 }
 0x116   : > { %p6180_p13 = pnand %p6178_p4, %p6149_p10  ;;  %p6185_p7 = por %p6184_p6, %p6183_p11 }
 0x118   : > { %p6181_p2 = pneg %p6180_p13  ;;  %p6187_p8 = por %p6186_p3, %p6185_p7 }
 0x11a   : > { %p6188_p12 = pnand %p6187_p8, %p6181_p2 }
 0x11c   : > { %6191 = shalt.err (!%p6188_p12)
}
 0x11d   : > { %s6192_s13 = scalar_lea.vmem %s6859_s11, 512  ;;  %s6394_s17 = smov [#allocation20]  }
 0x11e   : > { %p6193_p9 = scmp.ne.s32.totalorder %s6859_s11, %s6192_s13  ;;  %s6197_s0 = sshll.u32 %s6394_s17, 4  ;;  %s6198_s0 = int_to_ptr.vmem [resolvable:$false] %s6197_s0 }
 0x11f   : > { %s6199_s14 = scalar_lea.vmem %s6198_s0, 1024  ;;  %p6200_p13 = scmp.lt.s32.totalorder %s6859_s11, %s6198_s0 }
 0x120   : > { %p6195_p1 = pnand %p6193_p9, %p6149_p10  ;;  %p6201_p11 = scmp.lt.s32.totalorder %s6199_s14, %s6192_s13 }
 0x122   : > { %p6196_p4 = pneg %p6195_p1  ;;  %p6202_p6 = por %p6201_p11, %p6200_p13 }
 0x124   : > { %p6203_p7 = pnand %p6202_p6, %p6196_p4 }
 0x126   : > { %6206 = shalt.err (!%p6203_p7)
}
 0x127   : > { %5354 = dma.hbm_to_vmem [thread:$0]  (!%p6811_p5), %s6856_s7, 512, %s6859_s11, %s6863_s5, %s8171_s3, %s8171_s3, %s8186_s6  }
 0x128   : > { %s8189_s19 = sld [smem:[#allocation39_spill]] }
 0x12e   : > { %p8190_p10 = scmp.ne.s32.totalorder %s8189_s19, 0 }
 0x12f   : > { %p8191_p2 = scmp.eq.s32.totalorder (!%p8190_p10), %s6547_s20, 0 }
 0x130   : > { %660 = sbr.rel (%p8190_p10) target bundleno = 2550 (0x9f6), region = 84 }
 0x137   : > { %6306 = dma.done.wait (%p8191_p2), [#allocation9], 2048   ;;  %p8192_p3 = pmov %p8191_p2 }
 0x138   : > { %p8193_p8 = pmov %p8191_p2 }
 0x139   : > { %6308 = vsyncadd (%p8192_p3), [#allocation9], 4294965248 }
 0x13a   : > { %6310 = dma.done.wait (%p8193_p8), [#allocation12], 5120   ;;  %p8194_p12 = pmov %p8191_p2 }
 0x13b   : > { %p8195_p9 = pmov %p8191_p2 }
 0x13c   : > { %6312 = vsyncadd (%p8194_p12), [#allocation12], 4294962176 }
 0x13d   : > { %6314 = dma.done.wait (%p8195_p9), [#allocation15], 4096   ;;  %p8196_p5 = pmov %p8191_p2 }
 0x13e   : > { %s8197_s3 = sld [smem:[#allocation40_spill]]  ;;  %s682_s5 = sand.u32 1, %s6547_s20  }
 0x13f   : > { %6316 = vsyncadd (%p8196_p5), [#allocation15], 4294963200  ;;  %s684_s4 = sand.u32 1, %s6355_s28   ;;  %s683_s7 = scalar_lea.sflag [#allocation18], %s682_s5 }
 0x140   : > { %s4547_s6 = sshll.u32 %s684_s4, 6 }
 0x141   : > { %s6908_s21 = scalar_lea.vmem [#allocation17], %s4547_s6 }
 0x144   : > { %p8198_p1 = scmp.ne.s32.totalorder %s8197_s3, 0 }
 0x146   : > { %6318 = dma.done.wait (%p8198_p1), %s683_s7, 1024  }
 0x147   : > { %6320 = vsyncadd (%p8198_p1), %s683_s7, 4294966272  ;;  %s6915_s11 = sand.u32 1, %s6343_s25  }
 0x148   : > { %s4548_s10 = sshll.u32 %s6915_s11, 5 }
 0x149   : > { %s6918_s2 = scalar_lea.vmem [#allocation19], %s4548_s10 }
 0x14a   : > { %6322 = dma.done.wait (%p6767_p0), %s683_s7, 512  }
 0x14b   : > { %6324 = vsyncadd (%p6767_p0), %s683_s7, 4294966784  ;;  %s701_s22 = scalar_lea.sflag [#allocation21], %s6915_s11  ;;  %s6925_s15 = scalar_lea.vmem [#allocation20], %s4548_s10 }
 0x14c   : > { %6326 = dma.done.wait (%p6767_p0), %s701_s22, 512  }
 0x14d   : > { %6328 = vsyncadd (%p6767_p0), %s701_s22, 4294966784  ;;  %s8199_s9 = sld [smem:[#allocation36_spill]]  ;;  %s8200_s13 = sld [smem:[#allocation35_spill]] }
 0x14e   : > { %s4550_s17 = sshll.u32 %s6915_s11, 6  ;;  %s8201_s4 = sld [smem:[#allocation60_spill]] }
 0x14f   : > { %s8202_s8 = sld [smem:[#allocation63_spill]]  ;;  %s6951_s28 = scalar_lea.vmem [#allocation22], %s4550_s17 }
 0x153   : > { %p779_p4 = scmp.lt.s32.totalorder %s8199_s9, 2  ;;  %s6934_s0 = sshll.u32 %s8200_s13, 3 }
 0x154   : > { %p789_p13 = scmp.lt.s32.totalorder %s6934_s0, 15  ;;  %p798_p11 = scmp.eq.s32.totalorder %s8199_s9, 0 }
 0x155   : > { %s780_s14 = scalar_select %p779_p4, %s8199_s9, 2 }
 0x156   : > { %p799_p0 = scmp.eq.s32.totalorder %s8200_s13, 0 }
 0x157   : > { %s4744_s19 = sshll.u32 %s780_s14, 7  ;;  %s4554_s3 = sshll.u32 %s780_s14, 4 }
 0x158   : > { %s6942_s6 = scalar_lea.vmem %s8201_s4, %s4744_s19  ;;  %p800_p6 = pnand %p799_p0, %p798_p11 }
 0x159   : > { %s790_s7 = scalar_select %p789_p13, %s6934_s0, 15 }
 0x15a   : > { %803 = sbr.rel (%p800_p6) target bundleno = 538 (0x21a), region = 120  ;;  %v6953_v0 = vld [vmem:[#allocation8 + $0x10] sm:$0xff] (!%p800_p6)  ;;  %v6955_v1 = vld [vmem:[#allocation8] sm:$0xff] (!%p800_p6)  ;;  %v6957_v2 = vld [vmem:[#allocation8 + $0x18] sm:$0xff] (!%p800_p6) }
 0x15b   : > { %s792_s10 = sadd.s32 %s4554_s3, %s790_s7  ;;  %v822_v3 = vmul.f32 (!%p800_p6), %v6953_v0, %v6953_v0  ;;  %v820_v4 = vmul.f32 (!%p800_p6), %v6955_v1, %v6955_v1  ;;  %v6963_v5 = vld [vmem:[#allocation8 + $0x8] sm:$0xff] (!%p800_p6)  ;;  %v823_v6 = vmul.f32 (!%p800_p6), %v6957_v2, %v6957_v2  ;;  %v6971_v9 = vld [vmem:[#allocation8 + $0x20] sm:$0xff] (!%p800_p6)  ;;  %v6977_v12 = vld [vmem:[#allocation8 + $0x38] sm:$0xff] (!%p800_p6) }
 0x15c   : > { %s4555_s22 = sshll.u32 %s792_s10, 3  ;;  %v821_v7 = vmul.f32 (!%p800_p6), %v6963_v5, %v6963_v5  ;;  %v6969_v8 = vld [vmem:[#allocation8 + $0x28] sm:$0xff] (!%p800_p6)  ;;  %v824_v11 = vmul.f32 (!%p800_p6), %v6971_v9, %v6971_v9  ;;  %v6979_v13 = vld [vmem:[#allocation8 + $0x30] sm:$0xff] (!%p800_p6)  ;;  %v827_v14 = vmul.f32 (!%p800_p6), %v6977_v12, %v6977_v12  ;;  %v6987_v17 = vld [vmem:[#allocation8 + $0x40] sm:$0xff] (!%p800_p6) }
 0x15d   : > { %s6949_s29 = scalar_lea.vmem %s8202_s8, %s4555_s22  ;;  %840 = vadd.xlane.f32.xlu1 (!%p800_p6), %v822_v3  ;;  %836 = vadd.xlane.f32.xlu0 (!%p800_p6), %v820_v4  ;;  %v825_v10 = vmul.f32 (!%p800_p6), %v6969_v8, %v6969_v8  ;;  %v826_v15 = vmul.f32 (!%p800_p6), %v6979_v13, %v6979_v13  ;;  %v6985_v16 = vld [vmem:[#allocation8 + $0x48] sm:$0xff] (!%p800_p6)  ;;  %v828_v19 = vmul.f32 (!%p800_p6), %v6987_v17, %v6987_v17  ;;  %v6993_v20 = vld [vmem:[#allocation8 + $0x58] sm:$0xff] (!%p800_p6)  ;;  %v6995_v21 = vld [vmem:[#allocation8 + $0x50] sm:$0xff] (!%p800_p6) }
 0x15e   : > { %v829_v18 = vmul.f32 (!%p800_p6), %v6985_v16, %v6985_v16  ;;  %v831_v22 = vmul.f32 (!%p800_p6), %v6993_v20, %v6993_v20  ;;  %v830_v23 = vmul.f32 (!%p800_p6), %v6995_v21, %v6995_v21  ;;  %v7001_v24 = vld [vmem:[#allocation8 + $0x68] sm:$0xff] (!%p800_p6)  ;;  %v7003_v25 = vld [vmem:[#allocation8 + $0x60] sm:$0xff] (!%p800_p6)  ;;  %v7009_v28 = vld [vmem:[#allocation8 + $0x78] sm:$0xff] (!%p800_p6) }
 0x15f   : > { %v833_v26 = vmul.f32 (!%p800_p6), %v7001_v24, %v7001_v24  ;;  %v832_v27 = vmul.f32 (!%p800_p6), %v7003_v25, %v7003_v25  ;;  %v7011_v29 = vld [vmem:[#allocation8 + $0x70] sm:$0xff] (!%p800_p6)  ;;  %v835_v30 = vmul.f32 (!%p800_p6), %v7009_v28, %v7009_v28  ;;  %v948_v32 = vld [vmem:[#allocation11] sm:$0xff] (!%p800_p6)  ;;  %v949_v33 = vld [vmem:[#allocation11 + $0x8] sm:$0xff] (!%p800_p6) }
 0x160   : > { %v834_v31 = vmul.f32 (!%p800_p6), %v7011_v29, %v7011_v29  ;;  %v950_v34 = vld [vmem:[#allocation11 + $0x10] sm:$0xff] (!%p800_p6)  ;;  %v951_v35 = vld [vmem:[#allocation11 + $0x18] sm:$0xff] (!%p800_p6)  ;;  %v952_v36 = vld [vmem:[#allocation11 + $0x20] sm:$0xff] (!%p800_p6)  ;;  %964 = vst [vmem:[#allocation4] sm:$0xff] (!%p800_p6), %v948_v32  ;;  %v980_v38 = vpack.c.bf16 (!%p800_p6), %v949_v33, %v948_v32 }
 0x161   : > { %842 = vadd.xlane.f32.xlu1 %v823_v6  ;;  %838 = vadd.xlane.f32.xlu0 %v821_v7  ;;  %v953_v37 = vld [vmem:[#allocation11 + $0x28] sm:$0xff]  ;;  %965 = vst [vmem:[#allocation4 + $0x8] sm:$0xff] %v949_v33  ;;  %966 = vst [vmem:[#allocation4 + $0x10] sm:$0xff] %v950_v34  ;;  %v954_v39 = vld [vmem:[#allocation11 + $0x30] sm:$0xff]  ;;  %v981_v42 = vpack.c.bf16 %v951_v35, %v950_v34 }
 0x162   : > { %v955_v40 = vld [vmem:[#allocation11 + $0x38] sm:$0xff]  ;;  %v956_v41 = vld [vmem:[#allocation11 + $0x40] sm:$0xff]  ;;  %967 = vst [vmem:[#allocation4 + $0x18] sm:$0xff] %v951_v35  ;;  %968 = vst [vmem:[#allocation4 + $0x20] sm:$0xff] %v952_v36  ;;  %v982_v43 = vpack.c.bf16 %v953_v37, %v952_v36 }
 0x163   : > { %969 = vst [vmem:[#allocation4 + $0x28] sm:$0xff] %v953_v37  ;;  %v957_v44 = vld [vmem:[#allocation11 + $0x48] sm:$0xff]  ;;  %v958_v45 = vld [vmem:[#allocation11 + $0x50] sm:$0xff]  ;;  %v959_v46 = vld [vmem:[#allocation11 + $0x58] sm:$0xff]  ;;  %v983_v47 = vpack.c.bf16 %v955_v40, %v954_v39 }
 0x164   : > { %970 = vst [vmem:[#allocation4 + $0x30] sm:$0xff] %v954_v39  ;;  %971 = vst [vmem:[#allocation4 + $0x38] sm:$0xff] %v955_v40  ;;  %v960_v48 = vld [vmem:[#allocation11 + $0x60] sm:$0xff]  ;;  %v961_v49 = vld [vmem:[#allocation11 + $0x68] sm:$0xff]  ;;  %v984_v51 = vpack.c.bf16 %v957_v44, %v956_v41  ;;  %v985_v52 = vpack.c.bf16 %v959_v46, %v958_v45 }
 0x165   : > { %846 = vadd.xlane.f32.xlu1 %v825_v10  ;;  %844 = vadd.xlane.f32.xlu0 %v824_v11  ;;  %972 = vst [vmem:[#allocation4 + $0x40] sm:$0xff] %v956_v41  ;;  %988 = vst [vmem:[#allocation5] sm:$0xff] %v980_v38  ;;  %v962_v50 = vld [vmem:[#allocation11 + $0x70] sm:$0xff]  ;;  %v963_v53 = vld [vmem:[#allocation11 + $0x78] sm:$0xff]  ;;  %v986_v54 = vpack.c.bf16 %v961_v49, %v960_v48 }
 0x166   : > { %973 = vst [vmem:[#allocation4 + $0x48] sm:$0xff] %v957_v44  ;;  %974 = vst [vmem:[#allocation4 + $0x50] sm:$0xff] %v958_v45  ;;  %v987_v55 = vpack.c.bf16 %v963_v53, %v962_v50 }
 0x167   : > { %975 = vst [vmem:[#allocation4 + $0x58] sm:$0xff] %v959_v46  ;;  %989 = vst [vmem:[#allocation5 + $0x8] sm:$0xff] %v981_v42 }
 0x168   : > { %990 = vst [vmem:[#allocation5 + $0x10] sm:$0xff] %v982_v43  ;;  %976 = vst [vmem:[#allocation4 + $0x60] sm:$0xff] %v960_v48 }
 0x169   : > { %850 = vadd.xlane.f32.xlu1 %v827_v14  ;;  %848 = vadd.xlane.f32.xlu0 %v826_v15  ;;  %977 = vst [vmem:[#allocation4 + $0x68] sm:$0xff] %v961_v49  ;;  %978 = vst [vmem:[#allocation4 + $0x70] sm:$0xff] %v962_v50 }
 0x16a   : > { %991 = vst [vmem:[#allocation5 + $0x18] sm:$0xff] %v983_v47  ;;  %979 = vst [vmem:[#allocation4 + $0x78] sm:$0xff] %v963_v53 }
 0x16b   : > { %992 = vst [vmem:[#allocation5 + $0x20] sm:$0xff] %v984_v51  ;;  %993 = vst [vmem:[#allocation5 + $0x28] sm:$0xff] %v985_v52 }
 0x16c   : > { %994 = vst [vmem:[#allocation5 + $0x30] sm:$0xff] %v986_v54  ;;  %995 = vst [vmem:[#allocation5 + $0x38] sm:$0xff] %v987_v55 }
 0x16d   : > { %854 = vadd.xlane.f32.xlu1 %v829_v18  ;;  %852 = vadd.xlane.f32.xlu0 %v828_v19 }
 0x171   : > { %858 = vadd.xlane.f32.xlu1 %v831_v22  ;;  %856 = vadd.xlane.f32.xlu0 %v830_v23 }
 0x175   : > { %862 = vadd.xlane.f32.xlu1 %v833_v26  ;;  %860 = vadd.xlane.f32.xlu0 %v832_v27 }
 0x179   : > { %866 = vadd.xlane.f32.xlu1 %v835_v30  ;;  %864 = vadd.xlane.f32.xlu0 %v834_v31 }
 0x1ea   : > { %v841_v56 = vpop.xlane.xlu1 %840  ;;  %v837_v57 = vpop.xlane.xlu0 %836 }
 0x1eb   : > { %v870_v58 = vmax.f32 %v841_v56, 1e-24  ;;  %v868_v59 = vmax.f32 %v837_v57, 1e-24 }
 0x1ed   : > { %5477 = vrsqrt.f32 %v870_v58 }
 0x1ee   : > { %5479 = vrsqrt.f32 %v868_v59  ;;  %v843_v60 = vpop.xlane.xlu1 %842  ;;  %v839_v61 = vpop.xlane.xlu0 %838 }
 0x1ef   : > { %v871_v62 = vmax.f32 %v843_v60, 1e-24  ;;  %v869_v63 = vmax.f32 %v839_v61, 1e-24 }
 0x1f1   : > { %5481 = vrsqrt.f32 %v871_v62 }
 0x1f2   : > { %5483 = vrsqrt.f32 %v869_v63  ;;  %v847_v3 = vpop.xlane.xlu1 %846  ;;  %v845_v4 = vpop.xlane.xlu0 %844 }
 0x1f3   : > { %v873_v6 = vmax.f32 %v847_v3, 1e-24  ;;  %v872_v7 = vmax.f32 %v845_v4, 1e-24 }
 0x1f5   : > { %5485 = vrsqrt.f32 %v873_v6 }
 0x1f6   : > { %5487 = vrsqrt.f32 %v872_v7  ;;  %v851_v10 = vpop.xlane.xlu1 %850  ;;  %v849_v11 = vpop.xlane.xlu0 %848 }
 0x1f7   : > { %v5478_v14 = vpop.eup %5477  ;;  %v875_v15 = vmax.f32 %v851_v10, 1e-24  ;;  %v874_v18 = vmax.f32 %v849_v11, 1e-24 }
 0x1f8   : > { %v5480_v19 = vpop.eup %5479  ;;  %v902_v22 = vmul.f32 %v5478_v14, %v6953_v0 }
 0x1f9   : > { %v900_v23 = vmul.f32 %v5480_v19, %v6955_v1  ;;  %5489 = vrsqrt.f32 %v875_v15 }
 0x1fa   : > { %918 = vst [vmem:[#allocation2 + $0x10] sm:$0xff] %v902_v22  ;;  %5491 = vrsqrt.f32 %v874_v18  ;;  %v855_v26 = vpop.xlane.xlu1 %854  ;;  %v853_v27 = vpop.xlane.xlu0 %852 }
 0x1fb   : > { %v5482_v30 = vpop.eup %5481  ;;  %916 = vst [vmem:[#allocation2] sm:$0xff] %v900_v23  ;;  %v877_v31 = vmax.f32 %v855_v26, 1e-24  ;;  %v876_v32 = vmax.f32 %v853_v27, 1e-24 }
 0x1fc   : > { %v5484_v33 = vpop.eup %5483  ;;  %v903_v34 = vmul.f32 %v5482_v30, %v6957_v2 }
 0x1fd   : > { %v901_v35 = vmul.f32 %v5484_v33, %v6963_v5  ;;  %5493 = vrsqrt.f32 %v877_v31 }
 0x1fe   : > { %919 = vst [vmem:[#allocation2 + $0x18] sm:$0xff] %v903_v34  ;;  %v933_v36 = vpack.c.bf16 %v903_v34, %v902_v22  ;;  %5495 = vrsqrt.f32 %v876_v32  ;;  %v859_v0 = vpop.xlane.xlu1 %858  ;;  %v857_v1 = vpop.xlane.xlu0 %856 }
 0x1ff   : > { %v5486_v37 = vpop.eup %5485  ;;  %917 = vst [vmem:[#allocation2 + $0x8] sm:$0xff] %v901_v35  ;;  %v932_v38 = vpack.c.bf16 %v901_v35, %v900_v23  ;;  %v879_v39 = vmax.f32 %v859_v0, 1e-24  ;;  %v878_v40 = vmax.f32 %v857_v1, 1e-24 }
 0x200   : > { %v5488_v41 = vpop.eup %5487  ;;  %941 = vst [vmem:[#allocation3 + $0x8] sm:$0xff] %v933_v36  ;;  %v905_v42 = vmul.f32 %v5486_v37, %v6969_v8 }
 0x201   : > { %940 = vst [vmem:[#allocation3] sm:$0xff] %v932_v38  ;;  %v904_v2 = vmul.f32 %v5488_v41, %v6971_v9  ;;  %5497 = vrsqrt.f32 %v879_v39 }
 0x202   : > { %921 = vst [vmem:[#allocation2 + $0x28] sm:$0xff] %v905_v42  ;;  %5499 = vrsqrt.f32 %v878_v40  ;;  %v863_v5 = vpop.xlane.xlu1 %862  ;;  %v861_v43 = vpop.xlane.xlu0 %860 }
 0x203   : > { %v5490_v44 = vpop.eup %5489  ;;  %920 = vst [vmem:[#allocation2 + $0x20] sm:$0xff] %v904_v2  ;;  %v934_v45 = vpack.c.bf16 %v905_v42, %v904_v2  ;;  %v881_v46 = vmax.f32 %v863_v5, 1e-24  ;;  %v880_v47 = vmax.f32 %v861_v43, 1e-24 }
 0x204   : > { %v5492_v48 = vpop.eup %5491  ;;  %v907_v49 = vmul.f32 %v5490_v44, %v6977_v12 }
 0x205   : > { %942 = vst [vmem:[#allocation3 + $0x10] sm:$0xff] %v934_v45  ;;  %v906_v50 = vmul.f32 %v5492_v48, %v6979_v13  ;;  %5501 = vrsqrt.f32 %v881_v46 }
 0x206   : > { %923 = vst [vmem:[#allocation2 + $0x38] sm:$0xff] %v907_v49  ;;  %5503 = vrsqrt.f32 %v880_v47  ;;  %v867_v8 = vpop.xlane.xlu1 %866  ;;  %v865_v9 = vpop.xlane.xlu0 %864 }
 0x207   : > { %v5494_v51 = vpop.eup %5493  ;;  %922 = vst [vmem:[#allocation2 + $0x30] sm:$0xff] %v906_v50  ;;  %v935_v52 = vpack.c.bf16 %v907_v49, %v906_v50  ;;  %v883_v53 = vmax.f32 %v867_v8, 1e-24  ;;  %v882_v54 = vmax.f32 %v865_v9, 1e-24 }
 0x208   : > { %v5496_v55 = vpop.eup %5495  ;;  %v909_v56 = vmul.f32 %v5494_v51, %v6985_v16 }
 0x209   : > { %943 = vst [vmem:[#allocation3 + $0x18] sm:$0xff] %v935_v52  ;;  %v908_v57 = vmul.f32 %v5496_v55, %v6987_v17  ;;  %5505 = vrsqrt.f32 %v883_v53 }
 0x20a   : > { %925 = vst [vmem:[#allocation2 + $0x48] sm:$0xff] %v909_v56  ;;  %5507 = vrsqrt.f32 %v882_v54 }
 0x20b   : > { %v5498_v12 = vpop.eup %5497  ;;  %924 = vst [vmem:[#allocation2 + $0x40] sm:$0xff] %v908_v57  ;;  %v936_v13 = vpack.c.bf16 %v909_v56, %v908_v57 }
 0x20c   : > { %v5500_v58 = vpop.eup %5499  ;;  %v911_v59 = vmul.f32 %v5498_v12, %v6993_v20 }
 0x20d   : > { %944 = vst [vmem:[#allocation3 + $0x20] sm:$0xff] %v936_v13  ;;  %v910_v60 = vmul.f32 %v5500_v58, %v6995_v21 }
 0x20e   : > { %927 = vst [vmem:[#allocation2 + $0x58] sm:$0xff] %v911_v59 }
 0x20f   : > { %v5502_v61 = vpop.eup %5501  ;;  %926 = vst [vmem:[#allocation2 + $0x50] sm:$0xff] %v910_v60  ;;  %v937_v62 = vpack.c.bf16 %v911_v59, %v910_v60 }
 0x210   : > { %v5504_v16 = vpop.eup %5503  ;;  %v913_v63 = vmul.f32 %v5502_v61, %v7001_v24 }
 0x211   : > { %945 = vst [vmem:[#allocation3 + $0x28] sm:$0xff] %v937_v62  ;;  %v912_v17 = vmul.f32 %v5504_v16, %v7003_v25 }
 0x212   : > { %929 = vst [vmem:[#allocation2 + $0x68] sm:$0xff] %v913_v63 }
 0x213   : > { %v5506_v3 = vpop.eup %5505  ;;  %928 = vst [vmem:[#allocation2 + $0x60] sm:$0xff] %v912_v17  ;;  %v938_v4 = vpack.c.bf16 %v913_v63, %v912_v17 }
 0x214   : > { %v5508_v6 = vpop.eup %5507  ;;  %v915_v20 = vmul.f32 %v5506_v3, %v7009_v28 }
 0x215   : > { %946 = vst [vmem:[#allocation3 + $0x30] sm:$0xff] %v938_v4  ;;  %v914_v21 = vmul.f32 %v5508_v6, %v7011_v29 }
 0x216   : > { %931 = vst [vmem:[#allocation2 + $0x78] sm:$0xff] %v915_v20 }
 0x217   : > { %930 = vst [vmem:[#allocation2 + $0x70] sm:$0xff] %v914_v21  ;;  %v939_v7 = vpack.c.bf16 %v915_v20, %v914_v21 }
 0x219   : > { %947 = vst [vmem:[#allocation3 + $0x38] sm:$0xff] %v939_v7 }
 0x21a PF: > { %s8203_s18 = sld [smem:[#allocation35_spill]] }
 0x220   : > { %p4556_p7 = scmp.ne.s32.totalorder %s8203_s18, 0 }
 0x222   : > { %998 = sbr.rel (%p4556_p7) target bundleno = 1576 (0x628), region = 124 }
 0x229   : > { %v1015_v24 = vld [vmem:[#allocation3] sm:$0xff]  ;;  %v1016_v25 = vld [vmem:[#allocation3 + $0x8] sm:$0xff]  ;;  %v6395_v10 = vmov 0   ;;  %v1017_v29 = vld [vmem:[#allocation3 + $0x10] sm:$0xff]  ;;  %s8204_s9 = sld [smem:[#allocation51_spill]]  ;;  %s8208_s4 = sld [smem:[#allocation53_spill]] }
 0x22a   : > { %4873 = vmatprep.subr.bf16.mxu0 %v1015_v24  ;;  %5509 = vset.pattern.permute.xlu0 %v6395_v10  ;;  %v5511_v28 = vld [vmem:[%s6908_s21] sm:$0xff]   ;;  %v1018_v11 = vld [vmem:[#allocation3 + $0x18] sm:$0xff]  ;;  %v1170_v15 = vld [vmem:[%s6942_s6 + $0x10] sm:$0xff]  ;;  %s8209_s22 = sld [smem:[#allocation50_spill]] }
 0x22b   : > { %4874 = vmatpush3.bf16.msra.mxu0 %v1015_v24  ;;  %5510 = vset.pattern.permute.xlu1 %v6395_v10  ;;  %v1168_v14 = vld [vmem:[%s6942_s6] sm:$0xff]  ;;  %v1169_v19 = vld [vmem:[%s6942_s6 + $0x8] sm:$0xff]  ;;  %v1171_v22 = vld [vmem:[%s6942_s6 + $0x18] sm:$0xff] }
 0x22c   : > { %4875 = vmatprep.subr.bf16.mxu0 %v1016_v25  ;;  %1528 = vmatprep.mubr.bf16.mxu1 %v6395_v10  ;;  %v1019_v18 = vld [vmem:[#allocation3 + $0x20] sm:$0xff]  ;;  %v1020_v23 = vld [vmem:[#allocation3 + $0x28] sm:$0xff]  ;;  %v1021_v32 = vld [vmem:[#allocation3 + $0x30] sm:$0xff] }
 0x22d   : > { %4889 = vmatprep.mubr.bf16.mxu0 %v5511_v28  ;;  %1186 = vperm.xlu0 %5509, %v1168_v14   ;;  %v1172_v26 = vld [vmem:[%s6942_s6 + $0x20] sm:$0xff]  ;;  %v1173_v27 = vld [vmem:[%s6942_s6 + $0x28] sm:$0xff]  ;;  %v1174_v33 = vld [vmem:[%s6942_s6 + $0x30] sm:$0xff] }
 0x22e   : > { %1196 = vperm.xlu1 %5510, %v1170_v15   ;;  %v1175_v34 = vld [vmem:[%s6942_s6 + $0x38] sm:$0xff]  ;;  %v1176_v37 = vld [vmem:[%s6942_s6 + $0x40] sm:$0xff]  ;;  %v1177_v39 = vld [vmem:[%s6942_s6 + $0x48] sm:$0xff] }
 0x22f   : > { %4876 = vmatpush3.bf16.msra.mxu0 %v1016_v25  ;;  %v5519_v30 = vld [vmem:[%s8204_s9 + $0x4] ss:$12 sps:$4 sm:$0xff]   ;;  %v5521_v31 = vld [vmem:[%s8204_s9] ss:$12 sps:$4 sm:$0xff]   ;;  %v5523_v35 = vld [vmem:[%s8204_s9 + $0x1c] ss:$12 sps:$4 sm:$0xff]  }
 0x230   : > { %4877 = vmatprep.subr.bf16.mxu0 %v1017_v29  ;;  %1496 = vmatprep.subr.bf16.mxu1 %v5519_v30  ;;  %v5525_v36 = vld [vmem:[%s8204_s9 + $0x18] ss:$12 sps:$4 sm:$0xff]   ;;  %v5527_v0 = vld [vmem:[%s8204_s9 + $0x34] ss:$12 sps:$4 sm:$0xff]   ;;  %v5529_v38 = vld [vmem:[%s8204_s9 + $0x30] ss:$12 sps:$4 sm:$0xff]  }
 0x231   : > { %1191 = vperm.xlu0 %5509, %v1169_v19   ;;  %1497 = vmatpush1.bf16.msra.mxu1 %v5521_v31  ;;  %v1022_v1 = vld [vmem:[#allocation3 + $0x38] sm:$0xff]  ;;  %v1178_v41 = vld [vmem:[%s6942_s6 + $0x50] sm:$0xff]  ;;  %v5512_v5 = vld [vmem:[%s6908_s21 + $0x8] sm:$0xff]  }
 0x232   : > { %1201 = vperm.xlu1 %5510, %v1171_v22   ;;  %1498 = vmatprep.subr.bf16.mxu1 %v5523_v35  ;;  %v5531_v40 = vld [vmem:[%s8204_s9 + $0x4c] ss:$12 sps:$4 sm:$0xff]   ;;  %v5522_v42 = vld [vmem:[%s8204_s9 + $0x8] ss:$12 sps:$4 sm:$0xff]   ;;  %v5535_v44 = vld [vmem:[%s8204_s9 + $0x64] ss:$12 sps:$4 sm:$0xff]  }
 0x233   : > { %4878 = vmatpush3.bf16.msra.mxu0 %v1017_v29  ;;  %v5533_v2 = vld [vmem:[%s8204_s9 + $0x48] ss:$12 sps:$4 sm:$0xff]   ;;  %v1179_v43 = vld [vmem:[%s6942_s6 + $0x58] sm:$0xff]  ;;  %v1180_v46 = vld [vmem:[%s6942_s6 + $0x60] sm:$0xff] }
 0x234   : > { %4879 = vmatprep.subr.bf16.mxu0 %v1018_v11  ;;  %v5513_v45 = vld [vmem:[%s6908_s21 + $0x10] sm:$0xff]   ;;  %v5526_v47 = vld [vmem:[%s8204_s9 + $0x20] ss:$12 sps:$4 sm:$0xff]   ;;  %v5539_v50 = vld [vmem:[%s8204_s9 + $0x7c] ss:$12 sps:$4 sm:$0xff]  }
 0x235   : > { %1206 = vperm.xlu0 %5509, %v1172_v26   ;;  %1499 = vmatpush1.bf16.msra.mxu1 %v5525_v36  ;;  %v5537_v48 = vld [vmem:[%s8204_s9 + $0x60] ss:$12 sps:$4 sm:$0xff]   ;;  %v1182_v8 = vld [vmem:[%s6942_s6 + $0x70] sm:$0xff]  ;;  %v5530_v9 = vld [vmem:[%s8204_s9 + $0x38] ss:$12 sps:$4 sm:$0xff]  }
 0x236   : > { %1211 = vperm.xlu1 %5510, %v1173_v27   ;;  %1500 = vmatprep.subr.bf16.mxu1 %v5527_v0  ;;  %v1181_v49 = vld [vmem:[%s6942_s6 + $0x68] sm:$0xff]  ;;  %v5541_v51 = vld [vmem:[%s8204_s9 + $0x78] ss:$12 sps:$4 sm:$0xff]   ;;  %v5543_v54 = vld [vmem:[%s8204_s9 + $0x94] ss:$12 sps:$4 sm:$0xff]  }
 0x237   : > { %4880 = vmatpush3.bf16.msra.mxu0 %v1018_v11  ;;  %v5514_v52 = vld [vmem:[%s6908_s21 + $0x18] sm:$0xff]   ;;  %v5515_v55 = vld [vmem:[%s6908_s21 + $0x20] sm:$0xff]   ;;  %v5538_v57 = vld [vmem:[%s8204_s9 + $0x68] ss:$12 sps:$4 sm:$0xff]  }
 0x238   : > { %4881 = vmatprep.subr.bf16.mxu0 %v1019_v18  ;;  %v1183_v53 = vld [vmem:[%s6942_s6 + $0x78] sm:$0xff]  ;;  %v5516_v12 = vld [vmem:[%s6908_s21 + $0x28] sm:$0xff]   ;;  %v5517_v13 = vld [vmem:[%s6908_s21 + $0x30] sm:$0xff]   ;;  %s8205_s6 = sld [smem:[#allocation52_spill]] }
 0x239   : > { %1216 = vperm.xlu0 %5509, %v1174_v33   ;;  %1501 = vmatpush1.bf16.msra.mxu1 %v5529_v38  ;;  %v5534_v56 = vld [vmem:[%s8204_s9 + $0x50] ss:$12 sps:$4 sm:$0xff]   ;;  %v5542_v58 = vld [vmem:[%s8204_s9 + $0x80] ss:$12 sps:$4 sm:$0xff]   ;;  %v5546_v61 = vld [vmem:[%s8204_s9 + $0x98] ss:$12 sps:$4 sm:$0xff]  }
 0x23a   : > { %1221 = vperm.xlu1 %5510, %v1175_v34   ;;  %1502 = vmatprep.subr.bf16.mxu1 %v5531_v40  ;;  %v5518_v59 = vld [vmem:[%s6908_s21 + $0x38] sm:$0xff]   ;;  %v5549_v16 = vld [vmem:[%s8204_s9 + $0xa8] ss:$12 sps:$4 sm:$0xff]  }
 0x23b   : > { %4882 = vmatpush3.bf16.msra.mxu0 %v1019_v18  ;;  %v5545_v60 = vld [vmem:[%s8204_s9 + $0x90] ss:$12 sps:$4 sm:$0xff]   ;;  %v5547_v62 = vld [vmem:[%s8204_s9 + $0xac] ss:$12 sps:$4 sm:$0xff]  }
 0x23c   : > { %4883 = vmatprep.subr.bf16.mxu0 %v1020_v23  ;;  %v5550_v63 = vld [vmem:[%s8204_s9 + $0xb0] ss:$12 sps:$4 sm:$0xff]  }
 0x23d   : > { %1226 = vperm.xlu0 %5509, %v1176_v37   ;;  %1503 = vmatpush1.bf16.msra.mxu1 %v5533_v2 }
 0x23e   : > { %1231 = vperm.xlu1 %5510, %v1177_v39   ;;  %1504 = vmatprep.subr.bf16.mxu1 %v5535_v44  ;;  %v5553_v17 = vld [vmem:[%s8205_s6 + $0x4] ss:$12 sps:$4 sm:$0xff]   ;;  %v5575_v3 = vld [vmem:[%s8205_s6 + $0x8] ss:$12 sps:$4 sm:$0xff]   ;;  %v5551_v27 = vld [vmem:[%s8205_s6] ss:$12 sps:$4 sm:$0xff]  }
 0x23f   : > { %4884 = vmatpush3.bf16.msra.mxu0 %v1020_v23  ;;  %v5556_v31 = vld [vmem:[%s8205_s6 + $0x1c] ss:$12 sps:$4 sm:$0xff]   ;;  %v5576_v35 = vld [vmem:[%s8205_s6 + $0x20] ss:$12 sps:$4 sm:$0xff]   ;;  %v5554_v0 = vld [vmem:[%s8205_s6 + $0x18] ss:$12 sps:$4 sm:$0xff]  }
 0x240   : > { %4885 = vmatprep.subr.bf16.mxu0 %v1021_v32  ;;  %v5559_v37 = vld [vmem:[%s8205_s6 + $0x34] ss:$12 sps:$4 sm:$0xff]  }
 0x241   : > { %1236 = vperm.xlu0 %5509, %v1178_v41   ;;  %1505 = vmatpush1.bf16.msra.mxu1 %v5537_v48 }
 0x242   : > { %1241 = vperm.xlu1 %5510, %v1179_v43   ;;  %1506 = vmatprep.subr.bf16.mxu1 %v5539_v50 }
 0x243   : > { %4886 = vmatpush3.bf16.msra.mxu0 %v1021_v32 }
 0x244   : > { %4887 = vmatprep.subr.bf16.mxu0 %v1022_v1 }
 0x245   : > { %1246 = vperm.xlu0 %5509, %v1180_v46   ;;  %1507 = vmatpush1.bf16.msra.mxu1 %v5541_v51  ;;  %v5577_v46 = vld [vmem:[%s8205_s6 + $0x38] ss:$12 sps:$4 sm:$0xff]  }
 0x246   : > { %1251 = vperm.xlu1 %5510, %v1181_v49   ;;  %1508 = vmatprep.subr.bf16.mxu1 %v5543_v54  ;;  %v5578_v49 = vld [vmem:[%s8205_s6 + $0x50] ss:$12 sps:$4 sm:$0xff]  }
 0x247   : > { %4888 = vmatpush3.bf16.msra.mxu0 %v1022_v1 }
 0x248   : > { %4905 = vmatprep.subr.bf16.mxu0 %v5522_v42 }
 0x249   : > { %1256 = vperm.xlu0 %5509, %v1182_v8   ;;  %1509 = vmatpush1.bf16.msra.mxu1 %v5545_v60  ;;  %v5579_v60 = vld [vmem:[%s8205_s6 + $0x68] ss:$12 sps:$4 sm:$0xff]  }
 0x24a   : > { %4890 = vmatmul.mubr.bf16.vlgmr.msra.gmra.mrb[0].mxu0 %v5512_v5  ;;  %1261 = vperm.xlu1 %5510, %v1183_v53  }
 0x24b   : > { %4893 = vmatprep.mubr.bf16.mxu0 %v5513_v45  ;;  %4906 = vmatpush3.bf16.msra.mxu0 %v5522_v42  ;;  %v5557_v45 = vld [vmem:[%s8205_s6 + $0x30] ss:$12 sps:$4 sm:$0xff]  }
 0x24c   : > { %4907 = vmatprep.subr.bf16.mxu0 %v5526_v47  ;;  %1510 = vmatprep.subr.bf16.mxu1 %v5547_v62 }
 0x24d   : > { %1511 = vmatpush1.bf16.msra.mxu1 %v5549_v16  ;;  %v5580_v16 = vld [vmem:[%s8205_s6 + $0x80] ss:$12 sps:$4 sm:$0xff]  }
 0x24e   : > { %1939 = vmatprep.subr.bf16.mxu1 %v5553_v17 }
 0x24f   : > { %4908 = vmatpush3.bf16.msra.mxu0 %v5526_v47  ;;  %v5562_v47 = vld [vmem:[%s8205_s6 + $0x4c] ss:$12 sps:$4 sm:$0xff]  }
 0x250   : > { %4909 = vmatprep.subr.bf16.mxu0 %v5530_v9 }
 0x252   : > { %4894 = vmatmul.mubr.bf16.gmra.mrb[4].mxu0 %v5514_v52 }
 0x253   : > { %4897 = vmatprep.mubr.bf16.mxu0 %v5515_v55  ;;  %4910 = vmatpush3.bf16.msra.mxu0 %v5530_v9  ;;  %v5560_v9 = vld [vmem:[%s8205_s6 + $0x48] ss:$12 sps:$4 sm:$0xff]   ;;  %v5565_v55 = vld [vmem:[%s8205_s6 + $0x64] ss:$12 sps:$4 sm:$0xff]  }
 0x254   : > { %4911 = vmatprep.subr.bf16.mxu0 %v5534_v56 }
 0x257   : > { %4912 = vmatpush3.bf16.msra.mxu0 %v5534_v56 }
 0x258   : > { %4913 = vmatprep.subr.bf16.mxu0 %v5538_v57 }
 0x25a   : > { %4898 = vmatmul.mubr.bf16.gmra.mrb[8].mxu0 %v5516_v12 }
 0x25b   : > { %4901 = vmatprep.mubr.bf16.mxu0 %v5517_v13  ;;  %4914 = vmatpush3.bf16.msra.mxu0 %v5538_v57 }
 0x25c   : > { %4915 = vmatprep.subr.bf16.mxu0 %v5542_v58 }
 0x25f   : > { %4916 = vmatpush3.bf16.msra.mxu0 %v5542_v58 }
 0x260   : > { %4917 = vmatprep.subr.bf16.mxu0 %v5546_v61 }
 0x262   : > { %4902 = vmatmul.mubr.bf16.gmra.mrb[12].mxu0 %v5518_v59  ;;  %v5563_v59 = vld [vmem:[%s8205_s6 + $0x60] ss:$12 sps:$4 sm:$0xff]  }
 0x263   : > { %4918 = vmatpush3.bf16.msra.mxu0 %v5546_v61  ;;  %v5568_v61 = vld [vmem:[%s8205_s6 + $0x7c] ss:$12 sps:$4 sm:$0xff]  }
 0x264   : > { %4919 = vmatprep.subr.bf16.mxu0 %v5550_v63 }
 0x267   : > { %4920 = vmatpush3.bf16.msra.mxu0 %v5550_v63 }
 0x268   : > { %4937 = vmatprep.subr.bf16.mxu0 %v5575_v3 }
 0x2ac   : > { %v1187_v4 = vpop.permute.xlu0 %1186 }
 0x2ad   : > { %v1197_v6 = vpop.permute.xlu1 %1196 }
 0x2b0   : > { %v1192_v20 = vpop.permute.xlu0 %1191 }
 0x2b1   : > { %v1202_v21 = vpop.permute.xlu1 %1201 }
 0x2b4   : > { %v1207_v7 = vpop.permute.xlu0 %1206 }
 0x2b5   : > { %v1212_v24 = vpop.permute.xlu1 %1211 }
 0x2b8   : > { %v1217_v28 = vpop.permute.xlu0 %1216 }
 0x2b9   : > { %v1222_v11 = vpop.permute.xlu1 %1221 }
 0x2bc   : > { %v1227_v32 = vpop.permute.xlu0 %1226 }
 0x2bd   : > { %v1232_v33 = vpop.permute.xlu1 %1231 }
 0x2c0   : > { %v1237_v2 = vpop.permute.xlu0 %1236 }
 0x2c1   : > { %v1242_v43 = vpop.permute.xlu1 %1241 }
 0x2c4   : > { %v1247_v51 = vpop.permute.xlu0 %1246 }
 0x2c5   : > { %v1252_v56 = vpop.permute.xlu1 %1251 }
 0x2c8   : > { %v1257_v63 = vpop.permute.xlu0 %1256 }
 0x31d   : > { %v4891_v25 = vpop.f32.mrb[0].mxu0 }
 0x31e   : > { %v1105_v29 = vpop.f32.mrb[1].mxu0  ;;  %v1266_v15 = vmul.f32 %v4891_v25, %v1197_v6  ;;  %v5566_v6 = vld [vmem:[%s8205_s6 + $0x78] ss:$12 sps:$4 sm:$0xff]  }
 0x31f   : > { %v4892_v14 = vpop.f32.mrb[2].mxu0  ;;  %v1264_v22 = vmul.f32 %v1187_v4, %v1105_v29 }
 0x320   : > { %v1267_v18 = vmul.f32 %v4892_v14, %v1202_v21  ;;  %v1108_v19 = vpop.f32.mrb[3].mxu0  ;;  %v5569_v14 = vld [vmem:[%s8205_s6 + $0x90] ss:$12 sps:$4 sm:$0xff]  }
 0x321   : > { %v1265_v23 = vmul.f32 %v1192_v20, %v1108_v19  ;;  %v5582_v19 = vld [vmem:[%s8205_s6 + $0xb0] ss:$12 sps:$4 sm:$0xff]  }
 0x322   : > { %v1329_v26 = vpack.c.bf16 %v1267_v18, %v1266_v15  ;;  %v5581_v15 = vld [vmem:[%s8205_s6 + $0x98] ss:$12 sps:$4 sm:$0xff]  }
 0x323   : > { %v1328_v30 = vpack.c.bf16 %v1265_v23, %v1264_v22  ;;  %v5574_v18 = vld [vmem:[%s8205_s6 + $0xac] ss:$12 sps:$4 sm:$0xff]   ;;  %v5572_v22 = vld [vmem:[%s8205_s6 + $0xa8] ss:$12 sps:$4 sm:$0xff]   ;;  %v1754_v23 = vld [vmem:[#allocation5] sm:$0xff] }
 0x325   : > { %v4895_v34 = vpop.f32.mrb[4].mxu0  ;;  %1529 = vmatmul.mubr.bf16.vlgmr.msra.gmra.mrb[0].mxu1 %v1328_v30  ;;  %4921 = vmatprep.mubr.bf16.mxu0 %v1328_v30  ;;  %v1757_v30 = vld [vmem:[#allocation5 + $0x18] sm:$0xff] }
 0x326   : > { %1940 = vmatpush1.bf16.msra.mxu1 %v5551_v27  ;;  %v1121_v36 = vpop.f32.mrb[5].mxu0  ;;  %4922 = vmatmul.mubr.bf16.vlgmr.msra.gmra.mrb[16].mxu0 %v1329_v26  ;;  %v1270_v38 = vmul.f32 %v4895_v34, %v1217_v28  ;;  %v1756_v27 = vld [vmem:[#allocation5 + $0x10] sm:$0xff]  ;;  %v1761_v34 = vld [vmem:[#allocation5 + $0x38] sm:$0xff] }
 0x327   : > { %v4896_v1 = vpop.f32.mrb[6].mxu0  ;;  %1538 = vmatprep.mubr.bf16.mxu1 %v6395_v10  ;;  %1941 = vmatprep.subr.bf16.mxu1 %v5556_v31  ;;  %v1268_v41 = vmul.f32 %v1207_v7, %v1121_v36  ;;  %v1758_v31 = vld [vmem:[#allocation5 + $0x20] sm:$0xff] }
 0x328   : > { %v1271_v39 = vmul.f32 %v4896_v1, %v1222_v11  ;;  %v1124_v40 = vpop.f32.mrb[7].mxu0  ;;  %4938 = vmatpush3.bf16.msra.mxu0 %v5575_v3  ;;  %v1262_v3 = vpop.permute.xlu1 %1261 }
 0x329   : > { %v1269_v42 = vmul.f32 %v1212_v24, %v1124_v40  ;;  %4939 = vmatprep.subr.bf16.mxu0 %v5576_v35  ;;  %v5571_v24 = vld [vmem:[%s8205_s6 + $0x94] ss:$12 sps:$4 sm:$0xff]  }
 0x32a   : > { %v7155_v5 = vpack.c.bf16 %v1271_v39, %v1270_v38  ;;  %1942 = vmatpush1.bf16.msra.mxu1 %v5554_v0 }
 0x32b   : > { %v1330_v44 = vpack.c.bf16 %v1269_v42, %v1268_v41  ;;  %1943 = vmatprep.subr.bf16.mxu1 %v5559_v37 }
 0x32c   : > { %4940 = vmatpush3.bf16.msra.mxu0 %v5576_v35 }
 0x32d   : > { %v4899_v48 = vpop.f32.mrb[8].mxu0  ;;  %1539 = vmatmul.mubr.bf16.gmra.mrb[4].mxu1 %v1329_v26  ;;  %4925 = vmatprep.mubr.bf16.mxu0 %v1330_v44  ;;  %v1755_v26 = vld [vmem:[#allocation5 + $0x8] sm:$0xff] }
 0x32e   : > { %v1137_v50 = vpop.f32.mrb[9].mxu0  ;;  %4926 = vmatmul.mubr.bf16.gmra.mrb[20].mxu0 %v7155_v5  ;;  %1548 = vmatprep.mubr.bf16.mxu1 %v6395_v10  ;;  %v1274_v52 = vmul.f32 %v4899_v48, %v1237_v2 }
 0x32f   : > { %v4900_v8 = vpop.f32.mrb[10].mxu0  ;;  %1944 = vmatpush1.bf16.msra.mxu1 %v5557_v45  ;;  %4941 = vmatprep.subr.bf16.mxu0 %v5577_v46  ;;  %v1272_v57 = vmul.f32 %v1227_v32, %v1137_v50  ;;  %v1759_v32 = vld [vmem:[#allocation5 + $0x28] sm:$0xff] }
 0x330   : > { %v1275_v53 = vmul.f32 %v4900_v8, %v1242_v43  ;;  %v1140_v54 = vpop.f32.mrb[11].mxu0  ;;  %1945 = vmatprep.subr.bf16.mxu1 %v5562_v47  ;;  %4942 = vmatpush3.bf16.msra.mxu0 %v5577_v46 }
 0x331   : > { %v1273_v12 = vmul.f32 %v1232_v33, %v1140_v54  ;;  %4943 = vmatprep.subr.bf16.mxu0 %v5578_v49  ;;  %v1760_v33 = vld [vmem:[#allocation5 + $0x30] sm:$0xff] }
 0x332   : > { %v1333_v13 = vpack.c.bf16 %v1275_v53, %v1274_v52 }
 0x333   : > { %v1332_v58 = vpack.c.bf16 %v1273_v12, %v1272_v57  ;;  %1946 = vmatpush1.bf16.msra.mxu1 %v5560_v9 }
 0x334   : > { %1947 = vmatprep.subr.bf16.mxu1 %v5565_v55  ;;  %4944 = vmatpush3.bf16.msra.mxu0 %v5578_v49 }
 0x335   : > { %v4903_v62 = vpop.f32.mrb[12].mxu0  ;;  %1549 = vmatmul.mubr.bf16.gmra.mrb[8].mxu1 %v1330_v44  ;;  %4929 = vmatprep.mubr.bf16.mxu0 %v1332_v58 }
 0x336   : > { %v1153_v17 = vpop.f32.mrb[13].mxu0  ;;  %4930 = vmatmul.mubr.bf16.gmra.mrb[24].mxu0 %v1333_v13  ;;  %1558 = vmatprep.mubr.bf16.mxu1 %v6395_v10  ;;  %v1278_v20 = vmul.f32 %v4903_v62, %v1257_v63  ;;  %v1280_v63 = vld [vmem:[%s8209_s22] sm:$0xff] }
 0x337   : > { %v4904_v4 = vpop.f32.mrb[14].mxu0  ;;  %1948 = vmatpush1.bf16.msra.mxu1 %v5563_v59  ;;  %4945 = vmatprep.subr.bf16.mxu0 %v5579_v60  ;;  %v1276_v25 = vmul.f32 %v1247_v51, %v1153_v17  ;;  %v1796_v51 = vlaneseq }
 0x338   : > { %v1279_v21 = vmul.f32 %v4904_v4, %v1262_v3  ;;  %v1156_v7 = vpop.f32.mrb[15].mxu0  ;;  %1949 = vmatprep.subr.bf16.mxu1 %v5568_v61  ;;  %4946 = vmatpush3.bf16.msra.mxu0 %v5579_v60  ;;  %v5583_v60 = vld [vmem:[#allocation16] sm:$0xff]   ;;  %v5584_v61 = vld [vmem:[#allocation16 + $0x8] sm:$0xff]  }
 0x339   : > { %v1277_v28 = vmul.f32 %v1252_v56, %v1156_v7  ;;  %4947 = vmatprep.subr.bf16.mxu0 %v5580_v16  ;;  %v1797_v53 = vshrl.u32 %v1796_v51, 7  ;;  %v1281_v4 = vld [vmem:[%s8209_s22 + $0x8] sm:$0xff]  ;;  %v1283_v7 = vld [vmem:[%s8209_s22 + $0x18] sm:$0xff] }
 0x33a   : > { %v1335_v29 = vpack.c.bf16 %v1279_v21, %v1278_v20  ;;  %v5585_v21 = vld [vmem:[#allocation16 + $0x10] sm:$0xff]   ;;  %v1287_v51 = vld [vmem:[%s8209_s22 + $0x38] sm:$0xff] }
 0x33b   : > { %v1334_v11 = vpack.c.bf16 %v1277_v28, %v1276_v25  ;;  %1950 = vmatpush1.bf16.msra.mxu1 %v5566_v6  ;;  %v1798_v57 = vsub.s32 0, %v1797_v53  ;;  %v1806_v12 = vsub.s32 2, %v1797_v53  ;;  %v1802_v59 = vsub.s32 1, %v1797_v53  ;;  %v1284_v28 = vld [vmem:[%s8209_s22 + $0x20] sm:$0xff] }
 0x33c   : > { %1951 = vmatprep.subr.bf16.mxu1 %v5571_v24  ;;  %4948 = vmatpush3.bf16.msra.mxu0 %v5580_v16  ;;  %v5587_v53 = vld [vmem:[#allocation16 + $0x20] sm:$0xff]  }
 0x33d   : > { %1559 = vmatmul.mubr.bf16.gmra.mrb[12].mxu1 %v7155_v5  ;;  %4933 = vmatprep.mubr.bf16.mxu0 %v1334_v11 }
 0x33e   : > { %4934 = vmatmul.mubr.bf16.gmra.mrb[28].mxu0 %v1335_v29  ;;  %1568 = vmatprep.mubr.bf16.mxu1 %v6395_v10 }
 0x33f   : > { %1952 = vmatpush1.bf16.msra.mxu1 %v5569_v14  ;;  %4949 = vmatprep.subr.bf16.mxu0 %v5581_v15 }
 0x340   : > { %1953 = vmatprep.subr.bf16.mxu1 %v5574_v18  ;;  %4950 = vmatpush3.bf16.msra.mxu0 %v5581_v15  ;;  %v5586_v18 = vld [vmem:[#allocation16 + $0x18] sm:$0xff]  }
 0x341   : > { %4951 = vmatprep.subr.bf16.mxu0 %v5582_v19  ;;  %4953 = vmatprep.mubr.bf16.mxu0 %v1754_v23 }
 0x343   : > { %1954 = vmatpush1.bf16.msra.mxu1 %v5572_v22 }
 0x344   : > { %4952 = vmatpush3.bf16.msra.mxu0 %v5582_v19 }
 0x345   : > { %1569 = vmatmul.mubr.bf16.gmra.mrb[16].mxu1 %v1332_v58  ;;  %v1794_v58 = vld [vmem:[%s8208_s4] sm:$0x7]  ;;  %4969 = vmatprep.subr.bf16.mxu0 %v5583_v60 }
 0x346   : > { %1578 = vmatprep.mubr.bf16.mxu1 %v6395_v10  ;;  %v7283_v62 = vrot.slane %v1794_v58, %v1798_v57  ;;  %v7285_v16 = vrot.slane %v1794_v58, %v1806_v12  ;;  %v7290_v17 = vrot.slane %v1794_v58, %v1802_v59  ;;  %v1289_v58 = vld [vmem:[%s8209_s22 + $0x48] sm:$0xff] }
 0x347   : > { %4954 = vmatmul.mubr.bf16.vlgmr.msra.gmra.mrb[32].mxu0 %v1755_v26 }
 0x348   : > { %4957 = vmatprep.mubr.bf16.mxu0 %v1756_v27  ;;  %4970 = vmatpush3.bf16.msra.mxu0 %v5583_v60  ;;  %v5145_v25 = vadd.f32 %v7283_v62, %v1280_v63  ;;  %v5147_v14 = vadd.f32 %v7290_v17, %v1281_v4  ;;  %v5149_v15 = vadd.f32 %v7283_v62, %v1283_v7 }
 0x349   : > { %4971 = vmatprep.subr.bf16.mxu0 %v5584_v61  ;;  %v5151_v22 = vadd.f32 %v7290_v17, %v1284_v28  ;;  %v5157_v4 = vadd.f32 %v7283_v62, %v1289_v58 }
 0x34c   : > { %4972 = vmatpush3.bf16.msra.mxu0 %v5584_v61  ;;  %v1290_v61 = vld [vmem:[%s8209_s22 + $0x50] sm:$0xff] }
 0x34d   : > { %1579 = vmatmul.mubr.bf16.gmra.mrb[20].mxu1 %v1333_v13  ;;  %4973 = vmatprep.subr.bf16.mxu0 %v5585_v21 }
 0x34e   : > { %1588 = vmatprep.mubr.bf16.mxu1 %v6395_v10 }
 0x34f   : > { %4958 = vmatmul.mubr.bf16.gmra.mrb[36].mxu0 %v1757_v30 }
 0x350   : > { %4961 = vmatprep.mubr.bf16.mxu0 %v1758_v31  ;;  %4974 = vmatpush3.bf16.msra.mxu0 %v5585_v21  ;;  %v5588_v21 = vld [vmem:[#allocation16 + $0x28] sm:$0xff]  }
 0x351   : > { %4975 = vmatprep.subr.bf16.mxu0 %v5586_v18 }
 0x354   : > { %4976 = vmatpush3.bf16.msra.mxu0 %v5586_v18 }
 0x355   : > { %1589 = vmatmul.mubr.bf16.gmra.mrb[24].mxu1 %v1334_v11  ;;  %4977 = vmatprep.subr.bf16.mxu0 %v5587_v53 }
 0x356   : > { %1598 = vmatprep.mubr.bf16.mxu1 %v6395_v10 }
 0x357   : > { %4962 = vmatmul.mubr.bf16.gmra.mrb[40].mxu0 %v1759_v32 }
 0x358   : > { %4965 = vmatprep.mubr.bf16.mxu0 %v1760_v33  ;;  %4978 = vmatpush3.bf16.msra.mxu0 %v5587_v53 }
 0x359   : > { %4979 = vmatprep.subr.bf16.mxu0 %v5588_v21 }
 0x35c   : > { %4980 = vmatpush3.bf16.msra.mxu0 %v5588_v21 }
 0x35d   : > { %1599 = vmatmul.mubr.bf16.gmra.mrb[28].mxu1 %v1335_v29 }
 0x35e   : > { %1971 = vmatprep.mubr.bf16.mxu1 %v6395_v10 }
 0x35f   : > { %4966 = vmatmul.mubr.bf16.gmra.mrb[44].mxu0 %v1761_v34 }
 0x365   : > { %1972 = vmatmul.mubr.bf16.vlgmr.msra.gmra.mrb[0].mxu1 %v1754_v23 }
 0x366   : > { %1981 = vmatprep.mubr.bf16.mxu1 %v6395_v10 }
 0x36d   : > { %1982 = vmatmul.mubr.bf16.gmra.mrb[4].mxu1 %v1755_v26 }
 0x36e   : > { %1991 = vmatprep.mubr.bf16.mxu1 %v6395_v10 }
 0x375   : > { %1992 = vmatmul.mubr.bf16.gmra.mrb[8].mxu1 %v1756_v27 }
 0x376   : > { %2001 = vmatprep.mubr.bf16.mxu1 %v6395_v10 }
 0x37d   : > { %2002 = vmatmul.mubr.bf16.gmra.mrb[12].mxu1 %v1757_v30 }
 0x37e   : > { %2011 = vmatprep.mubr.bf16.mxu1 %v6395_v10 }
 0x385   : > { %2012 = vmatmul.mubr.bf16.gmra.mrb[16].mxu1 %v1758_v31  ;;  %v1286_v31 = vld [vmem:[%s8209_s22 + $0x30] sm:$0xff] }
 0x386   : > { %2021 = vmatprep.mubr.bf16.mxu1 %v6395_v10  ;;  %v5153_v60 = vadd.f32 %v7283_v62, %v1286_v31 }
 0x38d   : > { %2022 = vmatmul.mubr.bf16.gmra.mrb[20].mxu1 %v1759_v32 }
 0x38e   : > { %2031 = vmatprep.mubr.bf16.mxu1 %v6395_v10 }
 0x395   : > { %2032 = vmatmul.mubr.bf16.gmra.mrb[24].mxu1 %v1760_v33 }
 0x396   : > { %2041 = vmatprep.mubr.bf16.mxu1 %v6395_v10 }
 0x39d   : > { %2042 = vmatmul.mubr.bf16.gmra.mrb[28].mxu1 %v1761_v34 }
 0x3f9   : > { %v7224_v35 = vpop.f32.mrb[16].mxu0 }
 0x3fa   : > { %v7226_v36 = vpop.f32.mrb[17].mxu0 }
 0x3fb   : > { %v7228_v0 = vpop.f32.mrb[18].mxu0 }
 0x3fc   : > { %v7230_v1 = vpop.f32.mrb[19].mxu0 }
 0x401   : > { %v7232_v37 = vpop.f32.mrb[20].mxu0 }
 0x402   : > { %v7234_v38 = vpop.f32.mrb[21].mxu0 }
 0x403   : > { %v7236_v39 = vpop.f32.mrb[22].mxu0 }
 0x404   : > { %v7238_v40 = vpop.f32.mrb[23].mxu0 }
 0x409   : > { %v7240_v41 = vpop.f32.mrb[24].mxu0 }
 0x40a   : > { %v7242_v10 = vpop.f32.mrb[25].mxu0 }
 0x40b   : > { %v7244_v42 = vpop.f32.mrb[26].mxu0 }
 0x40c   : > { %v7246_v2 = vpop.f32.mrb[27].mxu0 }
 0x411   : > { %v7248_v5 = vpop.f32.mrb[28].mxu0 }
 0x412   : > { %8206 = vst [vmem:[#allocation44_spill] sm:$0xff] %v7248_v5  ;;  %v7250_v43 = vpop.f32.mrb[29].mxu0 }
 0x413   : > { %v7252_v44 = vpop.f32.mrb[30].mxu0 }
 0x414   : > { %8207 = vst [vmem:[#allocation45_spill] sm:$0xff] %v7252_v44  ;;  %v7254_v45 = vpop.f32.mrb[31].mxu0 }
 0x41a   : > { %v7256_v46 = vpop.f32.mrb[32].mxu0 }
 0x41b   : > { %v7258_v47 = vpop.f32.mrb[33].mxu0 }
 0x41c   : > { %v7260_v48 = vpop.f32.mrb[34].mxu0 }
 0x41d   : > { %v7262_v49 = vpop.f32.mrb[35].mxu0 }
 0x422   : > { %v7264_v50 = vpop.f32.mrb[36].mxu0 }
 0x423   : > { %v7266_v8 = vpop.f32.mrb[37].mxu0 }
 0x424   : > { %v7268_v9 = vpop.f32.mrb[38].mxu0 }
 0x425   : > { %v7270_v52 = vpop.f32.mrb[39].mxu0 }
 0x42a   : > { %v7272_v54 = vpop.f32.mrb[40].mxu0 }
 0x42b   : > { %v7274_v55 = vpop.f32.mrb[41].mxu0 }
 0x42c   : > { %v7276_v56 = vpop.f32.mrb[42].mxu0 }
 0x42d   : > { %v7278_v13 = vpop.f32.mrb[43].mxu0 }
 0x432   : > { %v4967_v3 = vpop.f32.mrb[44].mxu0 }
 0x433   : > { %v7296_v6 = vadd.f32 %v4967_v3, %v7285_v16  ;;  %v7298_v20 = vpop.f32.mrb[45].mxu0  ;;  %v5155_v3 = vadd.f32 %v7290_v17, %v1287_v51  ;;  %v1296_v51 = vld [vmem:[%s8209_s22 + $0x80] sm:$0xff] }
 0x434   : > { %v4968_v24 = vpop.f32.mrb[46].mxu0 }
 0x435   : > { %8210 = vst [vmem:[#allocation46_spill] sm:$0xff] %v7296_v6  ;;  %v7308_v29 = vadd.f32 %v4968_v24, %v7285_v16  ;;  %v7310_v11 = vpop.f32.mrb[47].mxu0  ;;  %v5159_v24 = vadd.f32 %v7290_v17, %v1290_v61 }
 0x437   : > { %8211 = vst [vmem:[#allocation47_spill] sm:$0xff] %v7308_v29 }
 0x438   : > { %v1973_v19 = vpop.f32.mrb[0].mxu1 }
 0x439   : > { %v5146_v23 = vadd.f32 %v5145_v25, %v1973_v19  ;;  %v1975_v26 = vpop.f32.mrb[1].mxu1  ;;  %v1292_v19 = vld [vmem:[%s8209_s22 + $0x60] sm:$0xff] }
 0x43a   : > { %v5148_v27 = vadd.f32 %v5147_v14, %v1975_v26  ;;  %v1977_v30 = vpop.f32.mrb[2].mxu1  ;;  %v1293_v26 = vld [vmem:[%s8209_s22 + $0x68] sm:$0xff] }
 0x43b   : > { %v4613_v32 = vmul.f32 -1.442695, %v5146_v23  ;;  %v5150_v33 = vadd.f32 %v5149_v15, %v1977_v30  ;;  %v1979_v34 = vpop.f32.mrb[3].mxu1 }
 0x43c   : > { %v4629_v57 = vmul.f32 -1.442695, %v5148_v27  ;;  %v5152_v12 = vadd.f32 %v5151_v22, %v1979_v34  ;;  %v5589_v27 = vld [vmem:[#allocation16 + $0x30] sm:$0xff]   ;;  %v5161_v34 = vadd.f32 %v7283_v62, %v1292_v19 }
 0x43d   : > { %5599 = vpow2.f32 %v4613_v32  ;;  %v4614_v59 = vmul.f32 -1.442695, %v5150_v33  ;;  %v1295_v32 = vld [vmem:[%s8209_s22 + $0x78] sm:$0xff]  ;;  %4981 = vmatprep.subr.bf16.mxu0 %v5589_v27 }
 0x43e   : > { %5601 = vpow2.f32 %v4629_v57  ;;  %v4630_v63 = vmul.f32 -1.442695, %v5152_v12  ;;  %v5163_v57 = vadd.f32 %v7290_v17, %v1293_v26  ;;  %v5165_v58 = vadd.f32 %v7283_v62, %v1295_v32  ;;  %4982 = vmatpush3.bf16.msra.mxu0 %v5589_v27 }
 0x43f   : > { %5603 = vpow2.f32 %v4614_v59  ;;  %v5590_v59 = vld [vmem:[#allocation16 + $0x38] sm:$0xff]  }
 0x440   : > { %v1983_v7 = vpop.f32.mrb[4].mxu1  ;;  %5605 = vpow2.f32 %v4630_v63  ;;  %4983 = vmatprep.subr.bf16.mxu0 %v5590_v59 }
 0x441   : > { %v5154_v25 = vadd.f32 %v5153_v60, %v1983_v7  ;;  %v1985_v28 = vpop.f32.mrb[5].mxu1  ;;  %v1299_v7 = vld [vmem:[%s8209_s22 + $0x98] sm:$0xff] }
 0x442   : > { %v5156_v14 = vadd.f32 %v5155_v3, %v1985_v28  ;;  %v1987_v15 = vpop.f32.mrb[6].mxu1  ;;  %v5167_v3 = vadd.f32 %v7290_v17, %v1296_v51  ;;  %v1307_v51 = vld [vmem:[%s8209_s22 + $0xd8] sm:$0xff]  ;;  %4984 = vmatpush3.bf16.msra.mxu0 %v5590_v59 }
 0x443   : > { %v4615_v22 = vmul.f32 -1.442695, %v5154_v25  ;;  %v5158_v18 = vadd.f32 %v5157_v4, %v1987_v15  ;;  %v1989_v23 = vpop.f32.mrb[7].mxu1  ;;  %v1298_v4 = vld [vmem:[%s8209_s22 + $0x90] sm:$0xff] }
 0x444   : > { %v4631_v30 = vmul.f32 -1.442695, %v5156_v14  ;;  %v5160_v31 = vadd.f32 %v5159_v24, %v1989_v23  ;;  %v1301_v14 = vld [vmem:[%s8209_s22 + $0xa8] sm:$0xff]  ;;  %v1304_v23 = vld [vmem:[%s8209_s22 + $0xc0] sm:$0xff]  ;;  %v5169_v32 = vadd.f32 %v7283_v62, %v1298_v4 }
 0x445   : > { %5607 = vpow2.f32 %v4615_v22  ;;  %v4616_v33 = vmul.f32 -1.442695, %v5158_v18  ;;  %v1302_v18 = vld [vmem:[%s8209_s22 + $0xb0] sm:$0xff]  ;;  %v7379_v4 = vadd.f32 %v7283_v62, %v1304_v23 }
 0x446   : > { %5609 = vpow2.f32 %v4631_v30  ;;  %v4632_v53 = vmul.f32 -1.442695, %v5160_v31 }
 0x447   : > { %v5600_v12 = vpop.eup %5599  ;;  %5611 = vpow2.f32 %v4616_v33  ;;  %v5171_v33 = vadd.f32 %v7290_v17, %v1299_v7  ;;  %v1313_v7 = vld [vmem:[%s8209_s22 + $0x108] sm:$0xff] }
 0x448   : > { %v5602_v60 = vpop.eup %5601  ;;  %v2229_v61 = vadd.f32 1.0, %v5600_v12  ;;  %v1993_v63 = vpop.f32.mrb[8].mxu1  ;;  %5613 = vpow2.f32 %v4632_v53  ;;  %v5173_v12 = vadd.f32 %v7283_v62, %v1301_v14  ;;  %v7406_v59 = vadd.f32 %v7283_v62, %v1313_v7 }
 0x449   : > { %v5604_v21 = vpop.eup %5603  ;;  %v2341_v24 = vadd.f32 1.0, %v5602_v60  ;;  %v5162_v25 = vadd.f32 %v5161_v34, %v1993_v63  ;;  %v1995_v28 = vpop.f32.mrb[9].mxu1  ;;  %v1305_v34 = vld [vmem:[%s8209_s22 + $0xc8] sm:$0xff]  ;;  %v1310_v60 = vld [vmem:[%s8209_s22 + $0xf0] sm:$0xff]  ;;  %v5175_v63 = vadd.f32 %v7290_v17, %v1302_v18 }
 0x44a   : > { %5615 = vrcp.f32 %v2229_v61  ;;  %v2230_v15 = vadd.f32 1.0, %v5604_v21  ;;  %v5164_v19 = vadd.f32 %v5163_v57, %v1995_v28  ;;  %v1997_v22 = vpop.f32.mrb[10].mxu1  ;;  %v5606_v53 = vpop.eup %5605 }
 0x44b   : > { %v4617_v26 = vmul.f32 -1.442695, %v5162_v25  ;;  %v5166_v30 = vadd.f32 %v5165_v58, %v1997_v22  ;;  %v1999_v31 = vpop.f32.mrb[11].mxu1  ;;  %v1308_v58 = vld [vmem:[%s8209_s22 + $0xe0] sm:$0xff]  ;;  %v7388_v25 = vadd.f32 %v7290_v17, %v1305_v34  ;;  %v2342_v14 = vadd.f32 1.0, %v5606_v53  ;;  %v1314_v22 = vld [vmem:[%s8209_s22 + $0x110] sm:$0xff] }
 0x44c   : > { %5617 = vrcp.f32 %v2230_v15  ;;  %v4633_v57 = vmul.f32 -1.442695, %v5164_v19  ;;  %v5168_v27 = vadd.f32 %v5167_v3, %v1999_v31  ;;  %v1311_v3 = vld [vmem:[%s8209_s22 + $0xf8] sm:$0xff]  ;;  %v7394_v15 = vadd.f32 %v7290_v17, %v1308_v58  ;;  %v1282_v58 = vld [vmem:[%s8209_s22 + $0x10] sm:$0xff] }
 0x44d   : > { %5619 = vrcp.f32 %v2341_v24  ;;  %v4618_v61 = vmul.f32 -1.442695, %v5166_v30  ;;  %v7391_v24 = vadd.f32 %v7283_v62, %v1307_v51  ;;  %v7397_v19 = vadd.f32 %v7283_v62, %v1310_v60 }
 0x44e   : > { %5621 = vpow2.f32 %v4617_v26  ;;  %v4634_v21 = vmul.f32 -1.442695, %v5168_v27  ;;  %v7403_v30 = vadd.f32 %v7290_v17, %v1311_v3  ;;  %v1316_v27 = vld [vmem:[%s8209_s22 + $0x120] sm:$0xff]  ;;  %v7417_v7 = vadd.f32 %v7290_v17, %v1314_v22  ;;  %v1285_v22 = vld [vmem:[%s8209_s22 + $0x28] sm:$0xff] }
 0x44f   : > { %v5608_v28 = vpop.eup %5607  ;;  %5623 = vpow2.f32 %v4633_v57  ;;  %v2087_v57 = vadd.f32 %v7258_v47, %v7285_v16 }
 0x450   : > { %v5610_v18 = vpop.eup %5609  ;;  %v2231_v23 = vadd.f32 1.0, %v5608_v28  ;;  %5625 = vpow2.f32 %v4618_v61  ;;  %v2003_v26 = vpop.f32.mrb[12].mxu1 }
 0x451   : > { %v5612_v31 = vpop.eup %5611  ;;  %v2343_v34 = vadd.f32 1.0, %v5610_v18  ;;  %5627 = vpow2.f32 %v4634_v21  ;;  %v5170_v51 = vadd.f32 %v5169_v32, %v2003_v26  ;;  %v2005_v53 = vpop.f32.mrb[13].mxu1  ;;  %v2090_v18 = vadd.f32 %v7262_v49, %v7285_v16  ;;  %v1317_v26 = vld [vmem:[%s8209_s22 + $0x128] sm:$0xff] }
 0x452   : > { %5629 = vrcp.f32 %v2231_v23  ;;  %v2232_v60 = vadd.f32 1.0, %v5612_v31  ;;  %v5172_v61 = vadd.f32 %v5171_v33, %v2005_v53  ;;  %v2007_v3 = vpop.f32.mrb[14].mxu1  ;;  %v5614_v32 = vpop.eup %5613  ;;  %v1319_v33 = vld [vmem:[%s8209_s22 + $0x138] sm:$0xff]  ;;  %v7431_v31 = vadd.f32 %v7283_v62, %v1316_v27 }
 0x453   : > { %5631 = vrcp.f32 %v2342_v14  ;;  %v4619_v21 = vmul.f32 -1.442695, %v5170_v51  ;;  %v5174_v28 = vadd.f32 %v5173_v12, %v2007_v3  ;;  %v2009_v47 = vpop.f32.mrb[15].mxu1  ;;  %v1708_v49 = vadd.f32 %v7226_v36, %v1282_v58  ;;  %v1320_v3 = vld [vmem:[%s8209_s22 + $0x140] sm:$0xff] }
 0x454   : > { %v5616_v23 = vpop.eup %5615  ;;  %5633 = vrcp.f32 %v2232_v60  ;;  %v4635_v14 = vmul.f32 -1.442695, %v5172_v61  ;;  %v5176_v12 = vadd.f32 %v5175_v63, %v2009_v47  ;;  %v2344_v44 = vadd.f32 1.0, %v5614_v32  ;;  %v1288_v36 = vld [vmem:[%s8209_s22 + $0x40] sm:$0xff]  ;;  %v1322_v60 = vld [vmem:[%s8209_s22 + $0x150] sm:$0xff]  ;;  %v1291_v32 = vld [vmem:[%s8209_s22 + $0x58] sm:$0xff] }
 0x455   : > { %5635 = vrcp.f32 %v2343_v34  ;;  %v4620_v51 = vmul.f32 -1.442695, %v5174_v28  ;;  %v2389_v53 = vmul.f32 %v5616_v23, %v2087_v57  ;;  %v7438_v6 = vadd.f32 %v7290_v17, %v1317_v26 }
 0x456   : > { %v5618_v29 = vpop.eup %5617  ;;  %5637 = vpow2.f32 %v4619_v21  ;;  %v7441_v63 = vadd.f32 %v7283_v62, %v1319_v33  ;;  %v1711_v34 = vadd.f32 %v7230_v1, %v1285_v22  ;;  %v2095_v21 = vadd.f32 %v7256_v46, %v7285_v16  ;;  %v1323_v22 = vld [vmem:[%s8209_s22 + $0x158] sm:$0xff] }
 0x457   : > { %v7443_v27 = vpop.eup %5619  ;;  %5639 = vpow2.f32 %v4635_v14  ;;  %v2405_v57 = vadd.f32 %v2389_v53, %v1708_v49  ;;  %v2390_v58 = vmul.f32 %v5618_v29, %v2090_v18  ;;  %v4636_v28 = vmul.f32 -1.442695, %v5176_v12  ;;  %v1325_v53 = vld [vmem:[%s8209_s22 + $0x168] sm:$0xff] }
 0x458   : > { %v5622_v61 = vpop.eup %5621  ;;  %5641 = vpow2.f32 %v4620_v51  ;;  %v2013_v47 = vpop.f32.mrb[16].mxu1  ;;  %v7458_v1 = vadd.f32 %v7290_v17, %v1320_v3  ;;  %v1714_v46 = vadd.f32 %v7224_v35, %v1288_v36  ;;  %v7466_v51 = vadd.f32 %v7283_v62, %v1322_v60  ;;  %v1300_v35 = vld [vmem:[%s8209_s22 + $0xa0] sm:$0xff] }
 0x459   : > { %v5624_v26 = vpop.eup %5623  ;;  %v2233_v29 = vadd.f32 1.0, %v5622_v61  ;;  %5643 = vtanh.f32 %v2405_v57  ;;  %v2406_v18 = vadd.f32 %v2390_v58, %v1711_v34  ;;  %v5178_v33 = vadd.f32 %v7379_v4, %v2013_v47  ;;  %v2015_v23 = vpop.f32.mrb[17].mxu1  ;;  %v1326_v4 = vld [vmem:[%s8209_s22 + $0x170] sm:$0xff] }
 0x45a   : > { %v5626_v14 = vpop.eup %5625  ;;  %5645 = vrcp.f32 %v2344_v44  ;;  %v2345_v12 = vadd.f32 1.0, %v5624_v26  ;;  %v2017_v49 = vpop.f32.mrb[18].mxu1  ;;  %v1717_v34 = vadd.f32 %v7228_v0, %v1291_v32  ;;  %v1294_v44 = vld [vmem:[%s8209_s22 + $0x70] sm:$0xff]  ;;  %v2098_v57 = vadd.f32 %v7260_v48, %v7285_v16 }
 0x45b   : > { %v5628_v3 = vpop.eup %5627  ;;  %5647 = vrcp.f32 %v2233_v29  ;;  %v2234_v36 = vadd.f32 1.0, %v5626_v14  ;;  %v2019_v58 = vpop.f32.mrb[19].mxu1  ;;  %v4621_v61 = vmul.f32 -1.442695, %v5178_v33  ;;  %v5180_v47 = vadd.f32 %v7388_v25, %v2015_v23 }
 0x45c   : > { %v5630_v60 = vpop.eup %5629  ;;  %5649 = vpow2.f32 %v4636_v28  ;;  %v7485_v0 = vadd.f32 %v7290_v17, %v1323_v22  ;;  %v7490_v5 = vadd.f32 %v7283_v62, %v1325_v53  ;;  %v7493_v29 = vadd.f32 %v7290_v17, %v1326_v4 }
 0x45d   : > { %v7487_v32 = vpop.eup %5631  ;;  %5651 = vrcp.f32 %v2234_v36  ;;  %v2391_v26 = vmul.f32 %v5630_v60, %v2095_v21  ;;  %v7496_v14 = vadd.f32 %v7232_v37, %v1300_v35  ;;  %v1720_v28 = vadd.f32 %v7234_v38, %v1294_v44 }
 0x45e   : > { %v5634_v48 = vpop.eup %5633  ;;  %5653 = vrcp.f32 %v2345_v12  ;;  %v2346_v25 = vadd.f32 1.0, %v5628_v3  ;;  %v2103_v62 = vadd.f32 %v7266_v8, %v7285_v16  ;;  %v4637_v17 = vmul.f32 -1.442695, %v5180_v47  ;;  %v1297_v8 = vld [vmem:[%s8209_s22 + $0x88] sm:$0xff] }
 0x45f   : > { %v7499_v33 = vpop.eup %5635  ;;  %v2407_v23 = vadd.f32 %v2391_v26, %v1714_v46  ;;  %v2392_v22 = vmul.f32 %v5634_v48, %v2098_v57  ;;  %5655 = vtanh.f32 %v2406_v18  ;;  %v5182_v53 = vadd.f32 %v7391_v24, %v2017_v49  ;;  %v2149_v18 = vld [vmem:[#allocation4] sm:$0xff] }
 0x460   : > { %v5638_v21 = vpop.eup %5637  ;;  %5657 = vpow2.f32 %v4621_v61  ;;  %v2023_v4 = vpop.f32.mrb[20].mxu1  ;;  %v2106_v37 = vadd.f32 %v7270_v52, %v7285_v16  ;;  %v5184_v46 = vadd.f32 %v7394_v15, %v2019_v58  ;;  %v2437_v52 = vsub.f32 1.0, %v7443_v27 }
 0x461   : > { %v5640_v38 = vpop.eup %5639  ;;  %v2235_v12 = vadd.f32 1.0, %v5638_v21  ;;  %5659 = vtanh.f32 %v2407_v23  ;;  %v2408_v3 = vadd.f32 %v2392_v22, %v1717_v34  ;;  %v2025_v35 = vpop.f32.mrb[21].mxu1  ;;  %v5186_v24 = vadd.f32 %v7397_v19, %v2023_v4 }
 0x462   : > { %v5642_v44 = vpop.eup %5641  ;;  %5661 = vrcp.f32 %v2346_v25  ;;  %v2347_v36 = vadd.f32 1.0, %v5640_v38  ;;  %v2027_v49 = vpop.f32.mrb[22].mxu1  ;;  %v5188_v34 = vadd.f32 %v7403_v30, %v2025_v35  ;;  %v4622_v47 = vmul.f32 -1.442695, %v5182_v53  ;;  %v1303_v30 = vld [vmem:[%s8209_s22 + $0xb8] sm:$0xff]  ;;  %v2150_v53 = vld [vmem:[#allocation4 + $0x8] sm:$0xff] }
 0x463   : > { %v5644_v57 = vpop.eup %5643  ;;  %5663 = vrcp.f32 %v2235_v12  ;;  %v2236_v60 = vadd.f32 1.0, %v5642_v44  ;;  %v5190_v15 = vadd.f32 %v7406_v59, %v2027_v49  ;;  %v2029_v58 = vpop.f32.mrb[23].mxu1  ;;  %v2469_v48 = vmul.f32 %v7443_v27, %v2149_v18 }
 0x464   : > { %v7514_v61 = vpop.eup %5645  ;;  %5665 = vpow2.f32 %v4637_v17  ;;  %v2453_v26 = vmul.f32 %v5644_v57, %v2437_v52  ;;  %v1723_v19 = vadd.f32 %v7238_v40, %v1297_v8  ;;  %v4638_v23 = vmul.f32 -1.442695, %v5184_v46 }
 0x465   : > { %v5648_v25 = vpop.eup %5647  ;;  %5667 = vrcp.f32 %v2236_v60  ;;  %v2438_v22 = vsub.f32 1.0, %v7487_v32  ;;  %v4623_v59 = vmul.f32 -1.442695, %v5186_v24  ;;  %v4639_v27 = vmul.f32 -1.442695, %v5188_v34  ;;  %v2151_v60 = vld [vmem:[#allocation4 + $0x10] sm:$0xff] }
 0x466   : > { %v5650_v21 = vpop.eup %5649  ;;  %5669 = vtanh.f32 %v2408_v3  ;;  %v2393_v4 = vmul.f32 %v5648_v25, %v2103_v62  ;;  %v7522_v17 = vadd.f32 %v2469_v48, %v2453_v26  ;;  %v4624_v12 = vmul.f32 -1.442695, %v5190_v15 }
 0x467   : > { %v5652_v38 = vpop.eup %5651  ;;  %5671 = vrcp.f32 %v2347_v36  ;;  %v5192_v40 = vadd.f32 %v7417_v7, %v2029_v58  ;;  %v1729_v62 = vadd.f32 %v7236_v39, %v1303_v30  ;;  %v2111_v36 = vadd.f32 %v7264_v50, %v7285_v16  ;;  %v1309_v50 = vld [vmem:[%s8209_s22 + $0xe8] sm:$0xff] }
 0x468   : > { %v7525_v46 = vpop.eup %5653  ;;  %5673 = vpow2.f32 %v4622_v47  ;;  %v2409_v35 = vadd.f32 %v2393_v4, %v1720_v28  ;;  %v2394_v18 = vmul.f32 %v5652_v38, %v2106_v37  ;;  %v2033_v44 = vpop.f32.mrb[24].mxu1  ;;  %v2501_v3 = vmul.f32 %v7522_v17, %v7522_v17  ;;  %v1306_v28 = vld [vmem:[%s8209_s22 + $0xd0] sm:$0xff] }
 0x469   : > { %v5656_v8 = vpop.eup %5655  ;;  %5675 = vpow2.f32 %v4638_v23  ;;  %v7532_v24 = vpop.f32.mrb[25].mxu1  ;;  %v2470_v7 = vmul.f32 %v7487_v32, %v2150_v53  ;;  %v2439_v39 = vsub.f32 1.0, %v7499_v33  ;;  %v2348_v15 = vadd.f32 1.0, %v5650_v21 }
 0x46a   : > { %v5658_v49 = vpop.eup %5657  ;;  %5677 = vpow2.f32 %v4623_v59  ;;  %v2410_v37 = vadd.f32 %v2394_v18, %v1723_v19  ;;  %2517 = vadd.xlane.f32.xlu0 %v2501_v3  ;;  %v2037_v52 = vpop.f32.mrb[26].mxu1  ;;  %v2454_v57 = vmul.f32 %v5656_v8, %v2438_v22  ;;  %v5194_v58 = vadd.f32 %v7431_v31, %v2033_v44 }
 0x46b   : > { %v5660_v34 = vpop.eup %5659  ;;  %v2237_v32 = vadd.f32 1.0, %v5658_v49  ;;  %5679 = vpow2.f32 %v4639_v27  ;;  %v2039_v47 = vpop.f32.mrb[27].mxu1  ;;  %v4640_v48 = vmul.f32 -1.442695, %v5192_v40  ;;  %v2114_v25 = vadd.f32 %v7268_v9, %v7285_v16 }
 0x46c   : > { %v7543_v26 = vpop.eup %5661  ;;  %5681 = vpow2.f32 %v4624_v12  ;;  %v7547_v19 = vadd.f32 %v2470_v7, %v2454_v57  ;;  %v7550_v22 = vadd.f32 %v7242_v10, %v1306_v28  ;;  %v2455_v21 = vmul.f32 %v5660_v34, %v2439_v39  ;;  %v2152_v10 = vld [vmem:[#allocation4 + $0x18] sm:$0xff] }
 0x46d   : > { %v5664_v23 = vpop.eup %5663  ;;  %5683 = vrcp.f32 %v2237_v32  ;;  %v2471_v30 = vmul.f32 %v7499_v33, %v2151_v60  ;;  %v7554_v31 = vadd.f32 %v7246_v2, %v1309_v50  ;;  %v4625_v38 = vmul.f32 -1.442695, %v5194_v58  ;;  %v2153_v60 = vld [vmem:[#allocation4 + $0x20] sm:$0xff] }
 0x46e   : > { %v5666_v59 = vpop.eup %5665  ;;  %v2395_v4 = vmul.f32 %v5664_v23, %v2111_v36  ;;  %5685 = vtanh.f32 %v2409_v35  ;;  %v2502_v53 = vmul.f32 %v7547_v19, %v7547_v19  ;;  %v2440_v12 = vsub.f32 1.0, %v7514_v61 }
 0x46f   : > { %v5668_v9 = vpop.eup %5667  ;;  %5687 = vrcp.f32 %v2348_v15  ;;  %v7558_v27 = vadd.f32 %v2471_v30, %v2455_v21  ;;  %v7564_v35 = vadd.f32 %v7272_v54, %v7285_v16  ;;  %v2119_v8 = vadd.f32 %v7274_v55, %v7285_v16  ;;  %v2154_v15 = vld [vmem:[#allocation4 + $0x28] sm:$0xff] }
 0x470   : > { %v5670_v40 = vpop.eup %5669  ;;  %v2411_v33 = vadd.f32 %v2395_v4, %v7496_v14  ;;  %5689 = vpow2.f32 %v4640_v48  ;;  %v2396_v18 = vmul.f32 %v5668_v9, %v2114_v25  ;;  %2519 = vadd.xlane.f32.xlu1 %v2502_v53  ;;  %v2043_v2 = vpop.f32.mrb[28].mxu1  ;;  %v7574_v57 = vadd.f32 %v7278_v13, %v7285_v16 }
 0x471   : > { %v7566_v44 = vpop.eup %5671  ;;  %5691 = vtanh.f32 %v2410_v37  ;;  %v2045_v3 = vpop.f32.mrb[29].mxu1  ;;  %v2503_v36 = vmul.f32 %v7558_v27, %v7558_v27  ;;  %v2456_v7 = vmul.f32 %v5670_v40, %v2440_v12  ;;  %v2472_v54 = vmul.f32 %v7514_v61, %v2152_v10 }
 0x472   : > { %v5674_v14 = vpop.eup %5673  ;;  %5693 = vtanh.f32 %v2411_v33  ;;  %v2412_v49 = vadd.f32 %v2396_v18, %v1729_v62  ;;  %v2047_v28 = vpop.f32.mrb[30].mxu1  ;;  %v5198_v55 = vadd.f32 %v7441_v63, %v2037_v52  ;;  %v2441_v50 = vsub.f32 1.0, %v7525_v46 }
 0x473   : > { %v5676_v37 = vpop.eup %5675  ;;  %v2238_v39 = vadd.f32 1.0, %v5674_v14  ;;  %5695 = vpow2.f32 %v4625_v38  ;;  %v2049_v34 = vpop.f32.mrb[31].mxu1  ;;  %v2349_v58 = vadd.f32 1.0, %v5666_v59  ;;  %v5196_v62 = vadd.f32 %v7438_v6, %v7532_v24  ;;  %v2155_v38 = vld [vmem:[#allocation4 + $0x30] sm:$0xff] }
 0x474   : > { %v5678_v32 = vpop.eup %5677  ;;  %5697 = vtanh.f32 %v2412_v49  ;;  %v5200_v13 = vadd.f32 %v7458_v1, %v2039_v47  ;;  %2521 = vadd.xlane.f32.xlu1 %v2503_v36  ;;  %v7582_v25 = vadd.f32 %v2472_v54, %v2456_v7  ;;  %v2473_v63 = vmul.f32 %v7525_v46, %v2153_v60  ;;  %v2156_v49 = vld [vmem:[#allocation4 + $0x38] sm:$0xff] }
 0x475   : > { %v5680_v61 = vpop.eup %5679  ;;  %5699 = vrcp.f32 %v2238_v39  ;;  %v2239_v48 = vadd.f32 1.0, %v5678_v32  ;;  %v2350_v23 = vadd.f32 1.0, %v5676_v37  ;;  %v5202_v21 = vadd.f32 %v7466_v51, %v2043_v2  ;;  %v2629_v37 = vld [vmem:[#allocation3] sm:$0xff] }
 0x476   : > { %v5682_v52 = vpop.eup %5681  ;;  %v2442_v30 = vsub.f32 1.0, %v7543_v26  ;;  %v2474_v59 = vmul.f32 %v7543_v26, %v2154_v15  ;;  %v4626_v1 = vmul.f32 -1.442695, %v5198_v55  ;;  %v2504_v24 = vmul.f32 %v7582_v25, %v7582_v25  ;;  %4985 = vmatprep.mubr.bf16.mxu0 %v2629_v37 }
 0x477   : > { %v5684_v4 = vpop.eup %5683  ;;  %5701 = vrcp.f32 %v2239_v48  ;;  %v2240_v6 = vadd.f32 1.0, %v5682_v52  ;;  %v4641_v53 = vmul.f32 -1.442695, %v5196_v62  ;;  %v4642_v9 = vmul.f32 -1.442695, %v5200_v13 }
 0x478   : > { %v5686_v47 = vpop.eup %5685  ;;  %5703 = vrcp.f32 %v2349_v58  ;;  %v2397_v46 = vmul.f32 %v5684_v4, %v2119_v8  ;;  %v2351_v12 = vadd.f32 1.0, %v5680_v61  ;;  %v5206_v51 = vadd.f32 %v7490_v5, %v2047_v28  ;;  %2523 = vadd.xlane.f32.xlu0 %v2504_v24 }
 0x479   : > { %v5688_v10 = vpop.eup %5687  ;;  %5705 = vrcp.f32 %v2240_v6  ;;  %v2457_v26 = vmul.f32 %v5686_v47, %v2441_v50  ;;  %v4627_v33 = vmul.f32 -1.442695, %v5202_v21  ;;  %v2443_v2 = vsub.f32 1.0, %v7566_v44  ;;  %v1315_v21 = vld [vmem:[%s8209_s22 + $0x118] sm:$0xff] }
 0x47a   : > { %v5690_v40 = vpop.eup %5689  ;;  %5707 = vrcp.f32 %v2350_v23  ;;  %v2413_v18 = vadd.f32 %v2397_v46, %v7550_v22  ;;  %v5204_v7 = vadd.f32 %v7485_v0, %v2045_v3  ;;  %v2475_v14 = vmul.f32 %v7566_v44, %v2155_v38  ;;  %v2630_v0 = vld [vmem:[#allocation3 + $0x8] sm:$0xff]  ;;  %v5591_v3 = vld [vmem:[#allocation16] sm:$0xff]  }
 0x47b   : > { %v5692_v36 = vpop.eup %5691  ;;  %5709 = vpow2.f32 %v4626_v1  ;;  %v7594_v8 = vadd.f32 %v2473_v63, %v2457_v26  ;;  %v5208_v5 = vadd.f32 %v7493_v29, %v2049_v34  ;;  %v2444_v60 = vsub.f32 1.0, %v5688_v10  ;;  %4986 = vmatmul.mubr.bf16.vlgmr.msra.gmra.mrb[48].mxu0 %v2630_v0  ;;  %v1312_v34 = vld [vmem:[%s8209_s22 + $0x100] sm:$0xff]  ;;  %5001 = vmatprep.subr.bf16.mxu0 %v5591_v3 }
 0x47c   : > { %v5694_v54 = vpop.eup %5693  ;;  %5711 = vpow2.f32 %v4641_v53  ;;  %v2458_v28 = vmul.f32 %v5692_v36, %v2442_v30  ;;  %v4628_v22 = vmul.f32 -1.442695, %v5206_v51  ;;  %v2476_v58 = vmul.f32 %v5688_v10, %v2156_v49  ;;  %5002 = vmatpush3.bf16.msra.mxu0 %v5591_v3  ;;  %5129 = vmatprep.subr.bf16.mxu1 %v5591_v3  ;;  %v5593_v51 = vld [vmem:[#allocation16 + $0x10] sm:$0xff]  }
 0x47d   : > { %v5696_v39 = vpop.eup %5695  ;;  %5713 = vrcp.f32 %v2351_v12  ;;  %v2505_v55 = vmul.f32 %v7594_v8, %v7594_v8  ;;  %v2459_v50 = vmul.f32 %v5694_v54, %v2443_v2  ;;  %v2352_v62 = vadd.f32 1.0, %v5690_v40  ;;  %5137 = vmatpush3.bf16.msra.mxu1 %v5591_v3  ;;  %v2632_v12 = vld [vmem:[#allocation3 + $0x18] sm:$0xff]  ;;  %v1318_v36 = vld [vmem:[%s8209_s22 + $0x130] sm:$0xff]  ;;  %v2157_v54 = vld [vmem:[#allocation4 + $0x40] sm:$0xff] }
 0x47e   : > { %v5698_v15 = vpop.eup %5697  ;;  %v2241_v44 = vadd.f32 1.0, %v5696_v39  ;;  %5715 = vpow2.f32 %v4627_v33  ;;  %v7600_v32 = vadd.f32 %v2474_v59, %v2458_v28  ;;  %v2130_v48 = vadd.f32 %v7276_v56, %v7285_v16  ;;  %v5592_v56 = vld [vmem:[#allocation16 + $0x8] sm:$0xff]   ;;  %v2633_v3 = vld [vmem:[#allocation3 + $0x20] sm:$0xff] }
 0x47f   : > { %v5700_v29 = vpop.eup %5699  ;;  %5717 = vpow2.f32 %v4642_v9  ;;  %2525 = vadd.xlane.f32.xlu1 %v2505_v55  ;;  %v7605_v13 = vadd.f32 %v2475_v14, %v2459_v50  ;;  %v2460_v61 = vmul.f32 %v5698_v15, %v2444_v60  ;;  %v4643_v30 = vmul.f32 -1.442695, %v5204_v7  ;;  %5003 = vmatprep.subr.bf16.mxu0 %v5592_v56 }
 0x480   : > { %5719 = vrcp.f32 %v2241_v44  ;;  %v2398_v63 = vmul.f32 %v5700_v29, %v7574_v57  ;;  %v2506_v52 = vmul.f32 %v7600_v32, %v7600_v32  ;;  %v1738_v6 = vadd.f32 %v7240_v41, %v1312_v34  ;;  %5004 = vmatpush3.bf16.msra.mxu0 %v5592_v56  ;;  %5130 = vmatprep.subr.bf16.mxu1 %v5592_v56  ;;  %v2634_v34 = vld [vmem:[#allocation3 + $0x28] sm:$0xff] }
 0x481   : > { %v5702_v23 = vpop.eup %5701  ;;  %5721 = vtanh.f32 %v2413_v18  ;;  %v2507_v59 = vmul.f32 %v7605_v13, %v7605_v13  ;;  %v7617_v4 = vadd.f32 %v2476_v58, %v2460_v61  ;;  %v4644_v53 = vmul.f32 -1.442695, %v5208_v5  ;;  %5138 = vmatpush3.bf16.msra.mxu1 %v5592_v56  ;;  %5005 = vmatprep.subr.bf16.mxu0 %v5593_v51  ;;  %v5594_v5 = vld [vmem:[#allocation16 + $0x18] sm:$0xff]  }
 0x482   : > { %v5704_v57 = vpop.eup %5703  ;;  %v2399_v1 = vmul.f32 %v5702_v23, %v7564_v35  ;;  %5723 = vpow2.f32 %v4628_v22  ;;  %v2414_v24 = vadd.f32 %v2398_v63, %v7554_v31  ;;  %2527 = vadd.xlane.f32.xlu0 %v2506_v52  ;;  %v1741_v38 = vadd.f32 %v7244_v42, %v1315_v21  ;;  %v2631_v35 = vld [vmem:[#allocation3 + $0x10] sm:$0xff]  ;;  %5131 = vmatprep.subr.bf16.mxu1 %v5593_v51  ;;  %v2158_v22 = vld [vmem:[#allocation4 + $0x48] sm:$0xff] }
 0x483   : > { %v5706_v47 = vpop.eup %5705  ;;  %5725 = vrcp.f32 %v2352_v62  ;;  %2529 = vadd.xlane.f32.xlu1 %v2507_v59  ;;  %v2508_v9 = vmul.f32 %v7617_v4, %v7617_v4  ;;  %4989 = vmatprep.mubr.bf16.mxu0 %v2631_v35  ;;  %v2135_v42 = vadd.f32 %v7298_v20, %v7285_v16  ;;  %v2445_v60 = vsub.f32 1.0, %v5704_v57  ;;  %v5595_v62 = vld [vmem:[#allocation16 + $0x20] sm:$0xff]   ;;  %v2159_v52 = vld [vmem:[#allocation4 + $0x50] sm:$0xff]  ;;  %v1321_v21 = vld [vmem:[%s8209_s22 + $0x148] sm:$0xff] }
 0x484   : > { %v7624_v46 = vpop.eup %5707  ;;  %v2415_v10 = vadd.f32 %v2399_v1, %v1738_v6  ;;  %v2400_v41 = vmul.f32 %v5706_v47, %v2130_v48  ;;  %5727 = vtanh.f32 %v2414_v24  ;;  %4990 = vmatmul.mubr.bf16.gmra.mrb[52].mxu0 %v2632_v12  ;;  %v1744_v20 = vadd.f32 %v7250_v43, %v1318_v36  ;;  %v2160_v47 = vld [vmem:[#allocation4 + $0x58] sm:$0xff] }
 0x485   : > { %v5710_v31 = vpop.eup %5709  ;;  %5729 = vpow2.f32 %v4643_v30  ;;  %5006 = vmatpush3.bf16.msra.mxu0 %v5593_v51  ;;  %5139 = vmatpush3.bf16.msra.mxu1 %v5593_v51  ;;  %v2477_v0 = vmul.f32 %v5704_v57, %v2157_v54  ;;  %v2446_v29 = vsub.f32 1.0, %v7624_v46  ;;  %v2138_v61 = vadd.f32 %v7310_v11, %v7285_v16  ;;  %v2636_v36 = vld [vmem:[#allocation3 + $0x38] sm:$0xff]  ;;  %v8213_v54 = vld [vmem:[#allocation46_spill] sm:$0xff] }
 0x486   : > { %v5712_v26 = vpop.eup %5711  ;;  %v2242_v40 = vadd.f32 1.0, %v5710_v31  ;;  %5731 = vtanh.f32 %v2415_v10  ;;  %v2416_v33 = vadd.f32 %v2400_v41, %v1741_v38  ;;  %2531 = vadd.xlane.f32.xlu0 %v2508_v9  ;;  %5007 = vmatprep.subr.bf16.mxu0 %v5594_v5  ;;  %v2478_v63 = vmul.f32 %v7624_v46, %v2158_v22  ;;  %v1324_v10 = vld [vmem:[%s8209_s22 + $0x160] sm:$0xff] }
 0x487   : > { %v5714_v18 = vpop.eup %5713  ;;  %5733 = vpow2.f32 %v4644_v53  ;;  %v2353_v14 = vadd.f32 1.0, %v5712_v26  ;;  %5132 = vmatprep.subr.bf16.mxu1 %v5594_v5  ;;  %4993 = vmatprep.mubr.bf16.mxu0 %v2633_v3  ;;  %v5596_v53 = vld [vmem:[#allocation16 + $0x28] sm:$0xff]   ;;  %v1747_v46 = vadd.f32 %v7254_v45, %v1321_v21  ;;  %v2635_v45 = vld [vmem:[#allocation3 + $0x30] sm:$0xff] }
 0x488   : > { %v5716_v2 = vpop.eup %5715  ;;  %5735 = vrcp.f32 %v2242_v40  ;;  %v2447_v56 = vsub.f32 1.0, %v5714_v18  ;;  %v2479_v24 = vmul.f32 %v5714_v18, %v2159_v52  ;;  %v2162_v52 = vld [vmem:[#allocation4 + $0x68] sm:$0xff] }
 0x489   : > { %v5718_v7 = vpop.eup %5717  ;;  %v2243_v49 = vadd.f32 1.0, %v5716_v2  ;;  %5737 = vtanh.f32 %v2416_v33  ;;  %5008 = vmatpush3.bf16.msra.mxu0 %v5594_v5  ;;  %5140 = vmatpush3.bf16.msra.mxu1 %v5594_v5 }
 0x48a   : > { %v5720_v28 = vpop.eup %5719  ;;  %v2354_v30 = vadd.f32 1.0, %v5718_v7  ;;  %5009 = vmatprep.subr.bf16.mxu0 %v5595_v62  ;;  %5133 = vmatprep.subr.bf16.mxu1 %v5595_v62  ;;  %v5597_v7 = vld [vmem:[#allocation16 + $0x30] sm:$0xff]  }
 0x48b   : > { %v5722_v37 = vpop.eup %5721  ;;  %5739 = vrcp.f32 %v2243_v49  ;;  %v2401_v39 = vmul.f32 %v5720_v28, %v2135_v42 }
 0x48c   : > { %v5724_v55 = vpop.eup %5723  ;;  %v2461_v50 = vmul.f32 %v5722_v37, %v2445_v60  ;;  %5741 = vrcp.f32 %v2353_v14  ;;  %4994 = vmatmul.mubr.bf16.gmra.mrb[56].mxu0 %v2634_v34  ;;  %v8212_v14 = vld [vmem:[#allocation44_spill] sm:$0xff]  ;;  %v1327_v60 = vld [vmem:[%s8209_s22 + $0x178] sm:$0xff] }
 0x48d   : > { %v5726_v15 = vpop.eup %5725  ;;  %v2244_v44 = vadd.f32 1.0, %v5724_v55  ;;  %v2417_v58 = vadd.f32 %v2401_v39, %v1744_v20  ;;  %5010 = vmatpush3.bf16.msra.mxu0 %v5595_v62  ;;  %5141 = vmatpush3.bf16.msra.mxu1 %v5595_v62  ;;  %v1750_v49 = vadd.f32 %v8212_v14, %v1324_v10  ;;  %v2161_v55 = vld [vmem:[#allocation4 + $0x60] sm:$0xff] }
 0x48e   : > { %v5728_v43 = vpop.eup %5727  ;;  %v7636_v48 = vadd.f32 %v2477_v0, %v2461_v50  ;;  %v2448_v31 = vsub.f32 1.0, %v5726_v15  ;;  %5011 = vmatprep.subr.bf16.mxu0 %v5596_v53  ;;  %5134 = vmatprep.subr.bf16.mxu1 %v5596_v53  ;;  %v2480_v26 = vmul.f32 %v5726_v15, %v2160_v47  ;;  %v5598_v50 = vld [vmem:[#allocation16 + $0x38] sm:$0xff]   ;;  %v8214_v0 = vld [vmem:[#allocation45_spill] sm:$0xff] }
 0x48f   : > { %v5730_v23 = vpop.eup %5729  ;;  %5743 = vrcp.f32 %v2244_v44  ;;  %v2462_v59 = vmul.f32 %v5728_v43, %v2446_v29  ;;  %4997 = vmatprep.mubr.bf16.mxu0 %v2635_v45  ;;  %v1753_v3 = vadd.f32 %v8214_v0, %v1327_v60  ;;  %v8215_v15 = vld [vmem:[#allocation47_spill] sm:$0xff] }
 0x490   : > { %v5732_v57 = vpop.eup %5731  ;;  %v2509_v16 = vmul.f32 %v7636_v48, %v7636_v48  ;;  %5745 = vtanh.f32 %v2417_v58  ;;  %v2355_v38 = vadd.f32 1.0, %v5730_v23 }
 0x491   : > { %v5734_v11 = vpop.eup %5733  ;;  %v7644_v6 = vadd.f32 %v2478_v63, %v2462_v59  ;;  %v2463_v1 = vmul.f32 %v5732_v57, %v2447_v56  ;;  %5747 = vrcp.f32 %v2354_v30  ;;  %5012 = vmatpush3.bf16.msra.mxu0 %v5596_v53  ;;  %5142 = vmatpush3.bf16.msra.mxu1 %v5596_v53 }
 0x492   : > { %v5736_v9 = vpop.eup %5735  ;;  %2533 = vadd.xlane.f32.xlu0 %v2509_v16  ;;  %v2356_v33 = vadd.f32 1.0, %v5734_v11  ;;  %5749 = vrcp.f32 %v2355_v38  ;;  %5013 = vmatprep.subr.bf16.mxu0 %v5597_v7  ;;  %v2163_v16 = vld [vmem:[#allocation4 + $0x70] sm:$0xff]  ;;  %v2164_v38 = vld [vmem:[#allocation4 + $0x78] sm:$0xff] }
 0x493   : > { %v2402_v41 = vmul.f32 %v5736_v9, %v2138_v61  ;;  %v7650_v35 = vadd.f32 %v2479_v24, %v2463_v1  ;;  %v5738_v12 = vpop.eup %5737  ;;  %v2510_v51 = vmul.f32 %v7644_v6, %v7644_v6  ;;  %5135 = vmatprep.subr.bf16.mxu1 %v5597_v7 }
 0x494   : > { %v2464_v2 = vmul.f32 %v5738_v12, %v2448_v31  ;;  %4998 = vmatmul.mubr.bf16.gmra.mrb[60].mxu0 %v2636_v36 }
 0x495   : > { %v5740_v40 = vpop.eup %5739  ;;  %v2418_v18 = vadd.f32 %v2402_v41, %v1747_v46  ;;  %v2511_v42 = vmul.f32 %v7650_v35, %v7650_v35  ;;  %5014 = vmatpush3.bf16.msra.mxu0 %v5597_v7  ;;  %5143 = vmatpush3.bf16.msra.mxu1 %v5597_v7 }
 0x496   : > { %v2403_v5 = vmul.f32 %v5740_v40, %v8213_v54  ;;  %2535 = vadd.xlane.f32.xlu0 %v2510_v51  ;;  %v5742_v28 = vpop.eup %5741  ;;  %v7661_v37 = vadd.f32 %v2480_v26, %v2464_v2  ;;  %5015 = vmatprep.subr.bf16.mxu0 %v5598_v50 }
 0x497   : > { %5751 = vtanh.f32 %v2418_v18  ;;  %2537 = vadd.xlane.f32.xlu1 %v2511_v42  ;;  %v2449_v58 = vsub.f32 1.0, %v5742_v28  ;;  %v2481_v43 = vmul.f32 %v5742_v28, %v2161_v55  ;;  %5136 = vmatprep.subr.bf16.mxu1 %v5598_v50 }
 0x498   : > { %v2419_v20 = vadd.f32 %v2403_v5, %v1750_v49  ;;  %5753 = vrcp.f32 %v2356_v33  ;;  %v2512_v22 = vmul.f32 %v7661_v37, %v7661_v37 }
 0x499   : > { %v5744_v39 = vpop.eup %5743  ;;  %5016 = vmatpush3.bf16.msra.mxu0 %v5598_v50  ;;  %5144 = vmatpush3.bf16.msra.mxu1 %v5598_v50 }
 0x49a   : > { %5755 = vtanh.f32 %v2419_v20  ;;  %v2404_v44 = vmul.f32 %v5744_v39, %v8215_v15  ;;  %v5746_v29 = vpop.eup %5745  ;;  %2539 = vadd.xlane.f32.xlu0 %v2512_v22 }
 0x49b   : > { %v2465_v62 = vmul.f32 %v5746_v29, %v2449_v58  ;;  %v5748_v61 = vpop.eup %5747 }
 0x49c   : > { %v2420_v34 = vadd.f32 %v2404_v44, %v1753_v3  ;;  %v5750_v23 = vpop.eup %5749  ;;  %v2450_v30 = vsub.f32 1.0, %v5748_v61  ;;  %v2482_v57 = vmul.f32 %v5748_v61, %v2162_v52 }
 0x49d   : > { %v7667_v63 = vadd.f32 %v2481_v43, %v2465_v62  ;;  %v2451_v1 = vsub.f32 1.0, %v5750_v23  ;;  %v2483_v9 = vmul.f32 %v5750_v23, %v2163_v16 }
 0x49e   : > { %5757 = vtanh.f32 %v2420_v34 }
 0x49f   : > { %v2513_v21 = vmul.f32 %v7667_v63, %v7667_v63 }
 0x4a1   : > { %v5752_v59 = vpop.eup %5751  ;;  %2541 = vadd.xlane.f32.xlu1 %v2513_v21 }
 0x4a2   : > { %v2466_v56 = vmul.f32 %v5752_v59, %v2450_v30  ;;  %v5754_v11 = vpop.eup %5753 }
 0x4a3   : > { %v2452_v41 = vsub.f32 1.0, %v5754_v11  ;;  %v2484_v26 = vmul.f32 %v5754_v11, %v2164_v38 }
 0x4a4   : > { %v5756_v24 = vpop.eup %5755  ;;  %v7671_v47 = vadd.f32 %v2482_v57, %v2466_v56 }
 0x4a5   : > { %v2467_v53 = vmul.f32 %v5756_v24, %v2451_v1 }
 0x4a6   : > { %v2514_v46 = vmul.f32 %v7671_v47, %v7671_v47 }
 0x4a7   : > { %v7675_v10 = vadd.f32 %v2483_v9, %v2467_v53 }
 0x4a8   : > { %v5758_v31 = vpop.eup %5757  ;;  %2543 = vadd.xlane.f32.xlu0 %v2514_v46 }
 0x4a9   : > { %v2515_v12 = vmul.f32 %v7675_v10, %v7675_v10  ;;  %v2468_v51 = vmul.f32 %v5758_v31, %v2452_v41 }
 0x4ab   : > { %2545 = vadd.xlane.f32.xlu1 %v2515_v12  ;;  %v7679_v45 = vadd.f32 %v2484_v26, %v2468_v51 }
 0x4ad   : > { %v2516_v40 = vmul.f32 %v7679_v45, %v7679_v45 }
 0x4af   : > { %2547 = vadd.xlane.f32.xlu0 %v2516_v40 }
 0x4f7   : > { %v2518_v33 = vpop.xlane.xlu0 %2517 }
 0x4f8   : > { %v2549_v18 = vmax.f32 %v2518_v33, 1e-24 }
 0x4fa   : > { %5759 = vrsqrt.f32 %v2549_v18 }
 0x4fd   : > { %v2520_v42 = vpop.xlane.xlu1 %2519 }
 0x4fe   : > { %v2550_v2 = vmax.f32 %v2520_v42, 1e-24 }
 0x500   : > { %5761 = vrsqrt.f32 %v2550_v2 }
 0x501   : > { %v2522_v36 = vpop.xlane.xlu1 %2521 }
 0x502   : > { %v2551_v7 = vmax.f32 %v2522_v36, 1e-24 }
 0x504   : > { %v5760_v14 = vpop.eup %5759  ;;  %5763 = vrsqrt.f32 %v2551_v7 }
 0x505   : > { %v2581_v49 = vmul.f32 %v5760_v14, %v7522_v17  ;;  %v2524_v54 = vpop.xlane.xlu0 %2523 }
 0x506   : > { %v2552_v5 = vmax.f32 %v2524_v54, 1e-24 }
 0x507   : > { %2597 = vst [vmem:[#allocation4] sm:$0xff] %v2581_v49 }
 0x508   : > { %5765 = vrsqrt.f32 %v2552_v5 }
 0x50a   : > { %v5762_v28 = vpop.eup %5761 }
 0x50b   : > { %v2582_v60 = vmul.f32 %v5762_v28, %v7547_v19 }
 0x50c   : > { %v2526_v20 = vpop.xlane.xlu1 %2525 }
 0x50d   : > { %2598 = vst [vmem:[#allocation4 + $0x8] sm:$0xff] %v2582_v60  ;;  %v2613_v39 = vpack.c.bf16 %v2582_v60, %v2581_v49  ;;  %v2553_v22 = vmax.f32 %v2526_v20, 1e-24 }
 0x50e   : > { %v5764_v55 = vpop.eup %5763 }
 0x50f   : > { %2621 = vst [vmem:[#allocation5] sm:$0xff] %v2613_v39  ;;  %v2583_v50 = vmul.f32 %v5764_v55, %v7558_v27  ;;  %5767 = vrsqrt.f32 %v2553_v22  ;;  %v2528_v0 = vpop.xlane.xlu0 %2527  ;;  %5017 = vmatprep.mubr.bf16.mxu0 %v2613_v39 }
 0x510   : > { %v2554_v3 = vmax.f32 %v2528_v0, 1e-24  ;;  %v2530_v17 = vpop.xlane.xlu1 %2529 }
 0x511   : > { %2599 = vst [vmem:[#allocation4 + $0x10] sm:$0xff] %v2583_v50  ;;  %v2555_v15 = vmax.f32 %v2530_v17, 1e-24 }
 0x512   : > { %5769 = vrsqrt.f32 %v2554_v3  ;;  %v5766_v44 = vpop.eup %5765 }
 0x513   : > { %5771 = vrsqrt.f32 %v2555_v15  ;;  %v2532_v58 = vpop.xlane.xlu0 %2531  ;;  %v2584_v19 = vmul.f32 %v5766_v44, %v7582_v25 }
 0x514   : > { %v2556_v29 = vmax.f32 %v2532_v58, 1e-24 }
 0x515   : > { %2600 = vst [vmem:[#allocation4 + $0x18] sm:$0xff] %v2584_v19  ;;  %v2614_v34 = vpack.c.bf16 %v2584_v19, %v2583_v50 }
 0x516   : > { %5773 = vrsqrt.f32 %v2556_v29 }
 0x517   : > { %2622 = vst [vmem:[#allocation5 + $0x8] sm:$0xff] %v2614_v34  ;;  %5018 = vmatmul.mubr.bf16.vlgmr.msra.gmra.mrb[64].mxu0 %v2614_v34 }
 0x519   : > { %v5768_v27 = vpop.eup %5767 }
 0x51a   : > { %v2585_v62 = vmul.f32 %v5768_v27, %v7594_v8 }
 0x51c   : > { %v5770_v43 = vpop.eup %5769  ;;  %2601 = vst [vmem:[#allocation4 + $0x20] sm:$0xff] %v2585_v62 }
 0x51d   : > { %v5772_v61 = vpop.eup %5771  ;;  %v2586_v52 = vmul.f32 %v5770_v43, %v7600_v32 }
 0x51e   : > { %v2587_v23 = vmul.f32 %v5772_v61, %v7605_v13 }
 0x51f   : > { %2602 = vst [vmem:[#allocation4 + $0x28] sm:$0xff] %v2586_v52  ;;  %v2615_v21 = vpack.c.bf16 %v2586_v52, %v2585_v62  ;;  %v2534_v30 = vpop.xlane.xlu0 %2533 }
 0x520   : > { %v5774_v25 = vpop.eup %5773  ;;  %2603 = vst [vmem:[#allocation4 + $0x30] sm:$0xff] %v2587_v23  ;;  %v2557_v59 = vmax.f32 %v2534_v30, 1e-24 }
 0x521   : > { %2623 = vst [vmem:[#allocation5 + $0x10] sm:$0xff] %v2615_v21  ;;  %v2588_v56 = vmul.f32 %v5774_v25, %v7617_v4  ;;  %5021 = vmatprep.mubr.bf16.mxu0 %v2615_v21 }
 0x522   : > { %5775 = vrsqrt.f32 %v2557_v59 }
 0x523   : > { %2604 = vst [vmem:[#allocation4 + $0x38] sm:$0xff] %v2588_v56  ;;  %v2616_v8 = vpack.c.bf16 %v2588_v56, %v2587_v23  ;;  %v2536_v57 = vpop.xlane.xlu0 %2535 }
 0x524   : > { %v2558_v16 = vmax.f32 %v2536_v57, 1e-24  ;;  %v2538_v11 = vpop.xlane.xlu1 %2537 }
 0x525   : > { %2624 = vst [vmem:[#allocation5 + $0x18] sm:$0xff] %v2616_v8  ;;  %v2559_v32 = vmax.f32 %v2538_v11, 1e-24  ;;  %5022 = vmatmul.mubr.bf16.gmra.mrb[68].mxu0 %v2616_v8 }
 0x526   : > { %5777 = vrsqrt.f32 %v2558_v16 }
 0x527   : > { %5779 = vrsqrt.f32 %v2559_v32  ;;  %v2540_v13 = vpop.xlane.xlu0 %2539 }
 0x528   : > { %v2560_v1 = vmax.f32 %v2540_v13, 1e-24 }
 0x52a   : > { %5781 = vrsqrt.f32 %v2560_v1 }
 0x52c   : > { %v5776_v24 = vpop.eup %5775 }
 0x52d   : > { %v2589_v53 = vmul.f32 %v5776_v24, %v7636_v48 }
 0x52e   : > { %v2542_v4 = vpop.xlane.xlu1 %2541 }
 0x52f   : > { %2605 = vst [vmem:[#allocation4 + $0x40] sm:$0xff] %v2589_v53  ;;  %v2561_v46 = vmax.f32 %v2542_v4, 1e-24 }
 0x530   : > { %v5778_v9 = vpop.eup %5777 }
 0x531   : > { %v5780_v38 = vpop.eup %5779  ;;  %v2590_v41 = vmul.f32 %v5778_v9, %v7644_v6  ;;  %5783 = vrsqrt.f32 %v2561_v46 }
 0x532   : > { %v2591_v31 = vmul.f32 %v5780_v38, %v7650_v35 }
 0x533   : > { %2606 = vst [vmem:[#allocation4 + $0x48] sm:$0xff] %v2590_v41  ;;  %v2617_v12 = vpack.c.bf16 %v2590_v41, %v2589_v53 }
 0x534   : > { %2607 = vst [vmem:[#allocation4 + $0x50] sm:$0xff] %v2591_v31  ;;  %v5782_v51 = vpop.eup %5781 }
 0x535   : > { %2625 = vst [vmem:[#allocation5 + $0x20] sm:$0xff] %v2617_v12  ;;  %v2544_v26 = vpop.xlane.xlu0 %2543  ;;  %5025 = vmatprep.mubr.bf16.mxu1 %v2617_v12  ;;  %v2592_v40 = vmul.f32 %v5782_v51, %v7661_v37 }
 0x536   : > { %v2562_v48 = vmax.f32 %v2544_v26, 1e-24 }
 0x537   : > { %2608 = vst [vmem:[#allocation4 + $0x58] sm:$0xff] %v2592_v40  ;;  %v2618_v33 = vpack.c.bf16 %v2592_v40, %v2591_v31 }
 0x538   : > { %5785 = vrsqrt.f32 %v2562_v48  ;;  %v2546_v18 = vpop.xlane.xlu1 %2545 }
 0x539   : > { %v2563_v42 = vmax.f32 %v2546_v18, 1e-24  ;;  %2626 = vst [vmem:[#allocation5 + $0x28] sm:$0xff] %v2618_v33  ;;  %5026 = vmatmul.mubr.bf16.vlgmr.msra.gmra.mrb[32].mxu1 %v2618_v33 }
 0x53b   : > { %5787 = vrsqrt.f32 %v2563_v42  ;;  %v5784_v6 = vpop.eup %5783 }
 0x53c   : > { %v2548_v35 = vpop.xlane.xlu0 %2547  ;;  %v2593_v2 = vmul.f32 %v5784_v6, %v7667_v63 }
 0x53d   : > { %v2564_v36 = vmax.f32 %v2548_v35, 1e-24 }
 0x53e   : > { %2609 = vst [vmem:[#allocation4 + $0x60] sm:$0xff] %v2593_v2 }
 0x53f   : > { %5789 = vrsqrt.f32 %v2564_v36 }
 0x542   : > { %v5786_v7 = vpop.eup %5785 }
 0x543   : > { %v2594_v14 = vmul.f32 %v5786_v7, %v7671_v47 }
 0x545   : > { %v5788_v37 = vpop.eup %5787  ;;  %2610 = vst [vmem:[#allocation4 + $0x68] sm:$0xff] %v2594_v14  ;;  %v2619_v49 = vpack.c.bf16 %v2594_v14, %v2593_v2 }
 0x546   : > { %v2595_v54 = vmul.f32 %v5788_v37, %v7675_v10 }
 0x547   : > { %2627 = vst [vmem:[#allocation5 + $0x30] sm:$0xff] %v2619_v49  ;;  %5029 = vmatprep.mubr.bf16.mxu1 %v2619_v49 }
 0x548   : > { %2611 = vst [vmem:[#allocation4 + $0x70] sm:$0xff] %v2595_v54 }
 0x549   : > { %v5790_v5 = vpop.eup %5789 }
 0x54a   : > { %v2596_v28 = vmul.f32 %v5790_v5, %v7679_v45 }
 0x54c   : > { %2612 = vst [vmem:[#allocation4 + $0x78] sm:$0xff] %v2596_v28  ;;  %v2620_v60 = vpack.c.bf16 %v2596_v28, %v2595_v54 }
 0x54e   : > { %2628 = vst [vmem:[#allocation5 + $0x38] sm:$0xff] %v2620_v60  ;;  %5030 = vmatmul.mubr.bf16.gmra.mrb[36].mxu1 %v2620_v60  ;;  %v4987_v63 = vpop.f32.mrb[48].mxu0 }
 0x54f   : > { %v2735_v20 = vpop.f32.mrb[49].mxu0 }
 0x550   : > { %v4988_v39 = vpop.f32.mrb[50].mxu0 }
 0x551   : > { %v2799_v22 = vpack.c.bf16 %v4988_v39, %v4987_v63  ;;  %v2738_v47 = vpop.f32.mrb[51].mxu0 }
 0x552   : > { %v2798_v55 = vpack.c.bf16 %v2738_v47, %v2735_v20 }
 0x553   : > { %2807 = vst [vmem:[#allocation6 + $0x8] sm:$0xff] %v2799_v22 }
 0x554   : > { %2806 = vst [vmem:[#allocation6] sm:$0xff] %v2798_v55 }
 0x557   : > { %v4991_v50 = vpop.f32.mrb[52].mxu0 }
 0x558   : > { %v2751_v10 = vpop.f32.mrb[53].mxu0 }
 0x559   : > { %v4992_v0 = vpop.f32.mrb[54].mxu0 }
 0x55a   : > { %v2801_v3 = vpack.c.bf16 %v4992_v0, %v4991_v50  ;;  %v2754_v17 = vpop.f32.mrb[55].mxu0 }
 0x55b   : > { %v2800_v15 = vpack.c.bf16 %v2754_v17, %v2751_v10 }
 0x55c   : > { %2809 = vst [vmem:[#allocation6 + $0x18] sm:$0xff] %v2801_v3 }
 0x55d   : > { %2808 = vst [vmem:[#allocation6 + $0x10] sm:$0xff] %v2800_v15 }
 0x55f   : > { %v4995_v45 = vpop.f32.mrb[56].mxu0 }
 0x560   : > { %v2767_v44 = vpop.f32.mrb[57].mxu0 }
 0x561   : > { %v4996_v58 = vpop.f32.mrb[58].mxu0 }
 0x562   : > { %v2803_v19 = vpack.c.bf16 %v4996_v58, %v4995_v45  ;;  %v2770_v29 = vpop.f32.mrb[59].mxu0 }
 0x563   : > { %v2802_v34 = vpack.c.bf16 %v2770_v29, %v2767_v44 }
 0x564   : > { %2811 = vst [vmem:[#allocation6 + $0x28] sm:$0xff] %v2803_v19 }
 0x565   : > { %2810 = vst [vmem:[#allocation6 + $0x20] sm:$0xff] %v2802_v34 }
 0x567   : > { %v4999_v27 = vpop.f32.mrb[60].mxu0 }
 0x568   : > { %v2783_v62 = vpop.f32.mrb[61].mxu0 }
 0x569   : > { %v5000_v43 = vpop.f32.mrb[62].mxu0 }
 0x56a   : > { %v2805_v61 = vpack.c.bf16 %v5000_v43, %v4999_v27  ;;  %v2786_v52 = vpop.f32.mrb[63].mxu0 }
 0x56b   : > { %v2804_v23 = vpack.c.bf16 %v2786_v52, %v2783_v62 }
 0x56c   : > { %2813 = vst [vmem:[#allocation6 + $0x38] sm:$0xff] %v2805_v61 }
 0x56d   : > { %2812 = vst [vmem:[#allocation6 + $0x30] sm:$0xff] %v2804_v23 }
 0x5ea   : > { %v5019_v21 = vpop.f32.mrb[64].mxu0 }
 0x5eb   : > { %v2920_v30 = vpop.f32.mrb[65].mxu0 }
 0x5ec   : > { %v5020_v25 = vpop.f32.mrb[66].mxu0 }
 0x5ed   : > { %v2984_v59 = vpack.c.bf16 %v5020_v25, %v5019_v21  ;;  %v2923_v56 = vpop.f32.mrb[67].mxu0 }
 0x5ee   : > { %v2983_v8 = vpack.c.bf16 %v2923_v56, %v2920_v30 }
 0x5ef   : > { %2992 = vst [vmem:[#allocation7 + $0x8] sm:$0xff] %v2984_v59 }
 0x5f0   : > { %2991 = vst [vmem:[#allocation7] sm:$0xff] %v2983_v8 }
 0x5f8   : > { %v5023_v57 = vpop.f32.mrb[68].mxu0 }
 0x5f9   : > { %v2936_v16 = vpop.f32.mrb[69].mxu0 }
 0x5fa   : > { %v5024_v11 = vpop.f32.mrb[70].mxu0 }
 0x5fb   : > { %v2986_v32 = vpack.c.bf16 %v5024_v11, %v5023_v57  ;;  %v2939_v13 = vpop.f32.mrb[71].mxu0 }
 0x5fc   : > { %v2985_v1 = vpack.c.bf16 %v2939_v13, %v2936_v16 }
 0x5fd   : > { %2994 = vst [vmem:[#allocation7 + $0x18] sm:$0xff] %v2986_v32 }
 0x5fe   : > { %2993 = vst [vmem:[#allocation7 + $0x10] sm:$0xff] %v2985_v1 }
 0x60c   : > { %v5027_v24 = vpop.f32.mrb[32].mxu1 }
 0x60d   : > { %v2952_v53 = vpop.f32.mrb[33].mxu1 }
 0x60e   : > { %v5028_v4 = vpop.f32.mrb[34].mxu1 }
 0x60f   : > { %v2988_v9 = vpack.c.bf16 %v5028_v4, %v5027_v24  ;;  %v2955_v46 = vpop.f32.mrb[35].mxu1 }
 0x610   : > { %v2987_v38 = vpack.c.bf16 %v2955_v46, %v2952_v53 }
 0x611   : > { %2996 = vst [vmem:[#allocation7 + $0x28] sm:$0xff] %v2988_v9 }
 0x612   : > { %2995 = vst [vmem:[#allocation7 + $0x20] sm:$0xff] %v2987_v38 }
 0x621   : > { %v5031_v41 = vpop.f32.mrb[36].mxu1 }
 0x622   : > { %v2968_v31 = vpop.f32.mrb[37].mxu1 }
 0x623   : > { %v5032_v12 = vpop.f32.mrb[38].mxu1 }
 0x624   : > { %v2990_v51 = vpack.c.bf16 %v5032_v12, %v5031_v41  ;;  %v2971_v26 = vpop.f32.mrb[39].mxu1 }
 0x625   : > { %v2989_v40 = vpack.c.bf16 %v2971_v26, %v2968_v31 }
 0x626   : > { %2998 = vst [vmem:[#allocation7 + $0x38] sm:$0xff] %v2990_v51 }
 0x627   : > { %2997 = vst [vmem:[#allocation7 + $0x30] sm:$0xff] %v2989_v40 }
 0x628 PF: > { %v3023_v48 = vld [vmem:[#allocation7] sm:$0xff]  ;;  %v3024_v33 = vld [vmem:[#allocation7 + $0x8] sm:$0xff]  ;;  %v6396_v18 = vmov 0   ;;  %v3025_v6 = vld [vmem:[#allocation7 + $0x10] sm:$0xff]  ;;  %s8217_s18 = sld [smem:[#allocation57_spill]]  ;;  %s8218_s21 = sld [smem:[#allocation55_spill]] }
 0x629   : > { %5033 = vmatprep.subr.bf16.mxu0 %v3023_v48  ;;  %5791 = vset.pattern.permute.xlu0 %v6396_v18  ;;  %v5793_v42 = vld [vmem:[%s6925_s15] sm:$0xff]   ;;  %v3026_v35 = vld [vmem:[#allocation7 + $0x18] sm:$0xff]  ;;  %v3211_v7 = vld [vmem:[%s6949_s29 + $0x10] sm:$0xff]  ;;  %s6397_s17 = smov [#allocation23]   ;;  %p8219_p2 = scmp.eq.s32.totalorder %s6547_s20, 5 }
 0x62a   : > { %5034 = vmatpush3.bf16.msra.mxu0 %v3023_v48  ;;  %5792 = vset.pattern.permute.xlu1 %v6396_v18  ;;  %v3027_v2 = vld [vmem:[#allocation7 + $0x20] sm:$0xff]  ;;  %v3028_v14 = vld [vmem:[#allocation7 + $0x28] sm:$0xff]  ;;  %v3212_v49 = vld [vmem:[%s6949_s29 + $0x18] sm:$0xff]  ;;  %s4290_s14 = sshll.u32 %s6397_s17, 4  ;;  %s4291_s14 = int_to_ptr.vmem [resolvable:$true] %s4290_s14 }
 0x62b   : > { %5035 = vmatprep.subr.bf16.mxu0 %v3024_v33  ;;  %3560 = vmatprep.mubr.bf16.mxu1 %v6396_v18  ;;  %v3209_v36 = vld [vmem:[%s6949_s29] sm:$0xff]  ;;  %v3210_v37 = vld [vmem:[%s6949_s29 + $0x8] sm:$0xff]  ;;  %v3215_v60 = vld [vmem:[%s6949_s29 + $0x30] sm:$0xff]  ;;  %s6207_s19 = scalar_lea.vmem %s4291_s14, 2048  ;;  %p6214_p12 = scmp.lt.s32.totalorder %s4291_s14, %s4291_s14 }
 0x62c   : > { %5049 = vmatprep.mubr.bf16.mxu0 %v5793_v42  ;;  %3219 = vperm.xlu0 %5791, %v3209_v36   ;;  %v3213_v54 = vld [vmem:[%s6949_s29 + $0x20] sm:$0xff]  ;;  %v3214_v28 = vld [vmem:[%s6949_s29 + $0x28] sm:$0xff]  ;;  %v3216_v20 = vld [vmem:[%s6949_s29 + $0x38] sm:$0xff]  ;;  %s8216_s29 = sld [smem:[#allocation35_spill]]  ;;  %p6208_p10 = scmp.ne.s32.totalorder %s4291_s14, %s6207_s19 }
 0x62d   : > { %3229 = vperm.xlu1 %5792, %v3211_v7   ;;  %v3030_v63 = vld [vmem:[#allocation7 + $0x38] sm:$0xff]  ;;  %v3007_v39 = vld [vmem:[#allocation6] sm:$0xff]  ;;  %v5794_v22 = vld [vmem:[%s6925_s15 + $0x8] sm:$0xff]   ;;  %p6215_p9 = scmp.lt.s32.totalorder %s6207_s19, %s6207_s19 }
 0x62e   : > { %5036 = vmatpush3.bf16.msra.mxu0 %v3024_v33  ;;  %v3029_v5 = vld [vmem:[#allocation7 + $0x30] sm:$0xff]  ;;  %v3008_v55 = vld [vmem:[#allocation6 + $0x8] sm:$0xff]  ;;  %v5796_v10 = vld [vmem:[%s6925_s15 + $0x18] sm:$0xff]   ;;  %p6209_p3 = pnand %p6208_p10, %p8219_p2 }
 0x62f   : > { %5037 = vmatprep.subr.bf16.mxu0 %v3025_v6  ;;  %v5795_v47 = vld [vmem:[%s6925_s15 + $0x10] sm:$0xff]   ;;  %v5797_v0 = vld [vmem:[%s6918_s2] sm:$0xff]   ;;  %v3010_v3 = vld [vmem:[#allocation6 + $0x18] sm:$0xff]  ;;  %p6216_p5 = por %p6215_p9, %p6214_p12 }
 0x630   : > { %3224 = vperm.xlu0 %5791, %v3210_v37   ;;  %v3009_v50 = vld [vmem:[#allocation6 + $0x10] sm:$0xff]  ;;  %v3011_v17 = vld [vmem:[#allocation6 + $0x20] sm:$0xff]  ;;  %v3012_v15 = vld [vmem:[#allocation6 + $0x28] sm:$0xff]  ;;  %p6210_p8 = pneg %p6209_p3 }
 0x631   : > { %3234 = vperm.xlu1 %5792, %v3212_v49   ;;  %v3013_v45 = vld [vmem:[#allocation6 + $0x30] sm:$0xff]  ;;  %v3014_v44 = vld [vmem:[#allocation6 + $0x38] sm:$0xff]  ;;  %v5798_v58 = vld [vmem:[%s6918_s2 + $0x8] sm:$0xff]  }
 0x632   : > { %5038 = vmatpush3.bf16.msra.mxu0 %v3025_v6  ;;  %v5799_v19 = vld [vmem:[%s6918_s2 + $0x10] sm:$0xff]   ;;  %v5800_v29 = vld [vmem:[%s6918_s2 + $0x18] sm:$0xff]   ;;  %v5803_v27 = vld [vmem:[#allocation13] ss:$12 sps:$4 sm:$0xff]   ;;  %s4669_s2 = sshll.u32 %s8216_s29, 6  ;;  %p6217_p1 = pnand %p6216_p5, %p6210_p8 }
 0x633   : > { %5039 = vmatprep.subr.bf16.mxu0 %v3026_v35  ;;  %v5801_v34 = vld [vmem:[#allocation13 + $0x4] ss:$12 sps:$4 sm:$0xff]   ;;  %v5804_v62 = vld [vmem:[#allocation13 + $0x1c] ss:$12 sps:$4 sm:$0xff]   ;;  %v5807_v61 = vld [vmem:[#allocation13 + $0x34] ss:$12 sps:$4 sm:$0xff]  }
 0x634   : > { %3239 = vperm.xlu0 %5791, %v3213_v54   ;;  %3528 = vmatprep.subr.bf16.mxu1 %v5801_v34  ;;  %v5806_v43 = vld [vmem:[#allocation13 + $0x18] ss:$12 sps:$4 sm:$0xff]   ;;  %v5809_v52 = vld [vmem:[#allocation13 + $0x30] ss:$12 sps:$4 sm:$0xff]   ;;  %v5812_v21 = vld [vmem:[#allocation13 + $0x48] ss:$12 sps:$4 sm:$0xff]  }
 0x635   : > { %3244 = vperm.xlu1 %5792, %v3214_v28   ;;  %3529 = vmatpush1.bf16.msra.mxu1 %v5803_v27  ;;  %v5810_v23 = vld [vmem:[#allocation13 + $0x4c] ss:$12 sps:$4 sm:$0xff]   ;;  %v5824_v34 = vld [vmem:[#allocation13 + $0xa8] ss:$12 sps:$4 sm:$0xff]   ;;  %s3666_s15 = sshra.s32 %s4669_s2, 4  ;;  %s7884_s13 = scalar_lea.vmem [#allocation2], %s4669_s2 }
 0x636   : > { %5040 = vmatpush3.bf16.msra.mxu0 %v3026_v35  ;;  %3530 = vmatprep.subr.bf16.mxu1 %v5804_v62  ;;  %v7750_v27 = vld [vmem:[#allocation13 + $0x8] ss:$12 sps:$4 sm:$0xff]   ;;  %s4694_s27 = sshll.u32 %s3666_s15, 3 }
 0x637   : > { %5041 = vmatprep.subr.bf16.mxu0 %v3027_v2  ;;  %v5854_v62 = vld [vmem:[#allocation14 + $0x8] ss:$12 sps:$4 sm:$0xff]   ;;  %s7756_s4 = scalar_lea.vmem [#allocation3], %s4694_s27 }
 0x638   : > { %3249 = vperm.xlu0 %5791, %v3215_v60  }
 0x639   : > { %3254 = vperm.xlu1 %5792, %v3216_v20   ;;  %3531 = vmatpush1.bf16.msra.mxu1 %v5806_v43  ;;  %v5858_v43 = vld [vmem:[#allocation14 + $0x20] ss:$12 sps:$4 sm:$0xff]  }
 0x63a   : > { %5042 = vmatpush3.bf16.msra.mxu0 %v3027_v2  ;;  %3532 = vmatprep.subr.bf16.mxu1 %v5807_v61  ;;  %v7759_v61 = vld [vmem:[%s7756_s4] sm:$0xff] }
 0x63b   : > { %5043 = vmatprep.subr.bf16.mxu0 %v3028_v14 }
 0x63d   : > { %3533 = vmatpush1.bf16.msra.mxu1 %v5809_v52  ;;  %v5859_v52 = vld [vmem:[#allocation14 + $0x38] ss:$12 sps:$4 sm:$0xff]  }
 0x63e   : > { %5044 = vmatpush3.bf16.msra.mxu0 %v3028_v14  ;;  %3534 = vmatprep.subr.bf16.mxu1 %v5810_v23  ;;  %v5860_v23 = vld [vmem:[#allocation14 + $0x50] ss:$12 sps:$4 sm:$0xff]  }
 0x63f   : > { %5045 = vmatprep.subr.bf16.mxu0 %v3029_v5 }
 0x641   : > { %3535 = vmatpush1.bf16.msra.mxu1 %v5812_v21  ;;  %v5861_v21 = vld [vmem:[#allocation14 + $0x68] ss:$12 sps:$4 sm:$0xff]  }
 0x642   : > { %5046 = vmatpush3.bf16.msra.mxu0 %v3029_v5 }
 0x643   : > { %5047 = vmatprep.subr.bf16.mxu0 %v3030_v63 }
 0x646   : > { %5048 = vmatpush3.bf16.msra.mxu0 %v3030_v63 }
 0x647   : > { %5057 = vmatprep.subr.bf16.mxu0 %v3007_v39 }
 0x649   : > { %5050 = vmatmul.mubr.bf16.vlgmr.msra.gmra.mrb[0].mxu0 %v5794_v22 }
 0x64a   : > { %5058 = vmatpush3.bf16.msra.mxu0 %v3007_v39  ;;  %5053 = vmatprep.mubr.bf16.mxu0 %v5795_v47 }
 0x64b   : > { %5059 = vmatprep.subr.bf16.mxu0 %v3008_v55 }
 0x64e   : > { %5060 = vmatpush3.bf16.msra.mxu0 %v3008_v55 }
 0x64f   : > { %5061 = vmatprep.subr.bf16.mxu0 %v3009_v50 }
 0x651   : > { %5054 = vmatmul.mubr.bf16.gmra.mrb[4].mxu0 %v5796_v10 }
 0x652   : > { %5062 = vmatpush3.bf16.msra.mxu0 %v3009_v50  ;;  %5073 = vmatprep.mubr.bf16.mxu0 %v5797_v0 }
 0x653   : > { %5063 = vmatprep.subr.bf16.mxu0 %v3010_v3 }
 0x656   : > { %5064 = vmatpush3.bf16.msra.mxu0 %v3010_v3 }
 0x657   : > { %5065 = vmatprep.subr.bf16.mxu0 %v3011_v17 }
 0x65a   : > { %5066 = vmatpush3.bf16.msra.mxu0 %v3011_v17  ;;  %v5813_v17 = vld [vmem:[#allocation13 + $0x64] ss:$12 sps:$4 sm:$0xff]  }
 0x65b   : > { %5067 = vmatprep.subr.bf16.mxu0 %v3012_v15  ;;  %3536 = vmatprep.subr.bf16.mxu1 %v5813_v17  ;;  %v5831_v17 = vld [vmem:[#allocation13 + $0x98] ss:$12 sps:$4 sm:$0xff]  }
 0x65e   : > { %5068 = vmatpush3.bf16.msra.mxu0 %v3012_v15  ;;  %v5815_v15 = vld [vmem:[#allocation13 + $0x60] ss:$12 sps:$4 sm:$0xff]  }
 0x65f   : > { %5069 = vmatprep.subr.bf16.mxu0 %v3013_v45  ;;  %3537 = vmatpush1.bf16.msra.mxu1 %v5815_v15 }
 0x662   : > { %5070 = vmatpush3.bf16.msra.mxu0 %v3013_v45  ;;  %v5816_v45 = vld [vmem:[#allocation13 + $0x7c] ss:$12 sps:$4 sm:$0xff]  }
 0x663   : > { %5071 = vmatprep.subr.bf16.mxu0 %v3014_v44  ;;  %3538 = vmatprep.subr.bf16.mxu1 %v5816_v45 }
 0x666   : > { %5072 = vmatpush3.bf16.msra.mxu0 %v3014_v44  ;;  %v5818_v44 = vld [vmem:[#allocation13 + $0x78] ss:$12 sps:$4 sm:$0xff]  }
 0x667   : > { %3539 = vmatpush1.bf16.msra.mxu1 %v5818_v44  ;;  %5105 = vmatprep.subr.bf16.mxu0 %v5854_v62  ;;  %v5835_v44 = vld [vmem:[#allocation14 + $0x4] ss:$12 sps:$4 sm:$0xff]  }
 0x669   : > { %5074 = vmatmul.mubr.bf16.vlgmr.msra.gmra.mrb[0].mxu0 %v5798_v58  ;;  %v5819_v58 = vld [vmem:[#allocation13 + $0x94] ss:$12 sps:$4 sm:$0xff]  }
 0x66a   : > { %5077 = vmatprep.mubr.bf16.mxu0 %v5799_v19  ;;  %v5821_v19 = vld [vmem:[#allocation13 + $0x90] ss:$12 sps:$4 sm:$0xff]   ;;  %3540 = vmatprep.subr.bf16.mxu1 %v5819_v58  ;;  %v5833_v58 = vld [vmem:[#allocation14] ss:$12 sps:$4 sm:$0xff]  }
 0x66b   : > { %3541 = vmatpush1.bf16.msra.mxu1 %v5821_v19  ;;  %5106 = vmatpush3.bf16.msra.mxu0 %v5854_v62  ;;  %v5838_v19 = vld [vmem:[#allocation14 + $0x1c] ss:$12 sps:$4 sm:$0xff]   ;;  %v5847_v62 = vld [vmem:[#allocation14 + $0x64] ss:$12 sps:$4 sm:$0xff]  }
 0x66c   : > { %5107 = vmatprep.subr.bf16.mxu0 %v5858_v43 }
 0x66f   : > { %5108 = vmatpush3.bf16.msra.mxu0 %v5858_v43  ;;  %v5845_v43 = vld [vmem:[#allocation14 + $0x60] ss:$12 sps:$4 sm:$0xff]  }
 0x670   : > { %5109 = vmatprep.subr.bf16.mxu0 %v5859_v52 }
 0x671   : > { %5078 = vmatmul.mubr.bf16.gmra.mrb[4].mxu0 %v5800_v29  ;;  %v5822_v29 = vld [vmem:[#allocation13 + $0xac] ss:$12 sps:$4 sm:$0xff]  }
 0x672   : > { %3542 = vmatprep.subr.bf16.mxu1 %v5822_v29  ;;  %5121 = vmatprep.mubr.bf16.mxu0 %v7759_v61  ;;  %v5836_v29 = vld [vmem:[#allocation14 + $0x18] ss:$12 sps:$4 sm:$0xff]  }
 0x673   : > { %3543 = vmatpush1.bf16.msra.mxu1 %v5824_v34  ;;  %5110 = vmatpush3.bf16.msra.mxu0 %v5859_v52  ;;  %v5844_v34 = vld [vmem:[#allocation14 + $0x4c] ss:$12 sps:$4 sm:$0xff]   ;;  %v5850_v52 = vld [vmem:[#allocation14 + $0x7c] ss:$12 sps:$4 sm:$0xff]  }
 0x674   : > { %5081 = vmatprep.subr.bf16.mxu1 %v7750_v27  ;;  %5111 = vmatprep.subr.bf16.mxu0 %v5860_v23 }
 0x677   : > { %5112 = vmatpush3.bf16.msra.mxu0 %v5860_v23  ;;  %v5848_v23 = vld [vmem:[#allocation14 + $0x78] ss:$12 sps:$4 sm:$0xff]  }
 0x678   : > { %5113 = vmatprep.subr.bf16.mxu0 %v5861_v21 }
 0x67b   : > { %5114 = vmatpush3.bf16.msra.mxu0 %v5861_v21  ;;  %v5853_v21 = vld [vmem:[#allocation14 + $0x94] ss:$12 sps:$4 sm:$0xff]  }
 0x6ab   : > { %v3220_v30 = vpop.permute.xlu0 %3219 }
 0x6ac   : > { %v3230_v25 = vpop.permute.xlu1 %3229 }
 0x6af   : > { %v3225_v59 = vpop.permute.xlu0 %3224 }
 0x6b0   : > { %v3235_v56 = vpop.permute.xlu1 %3234 }
 0x6b3   : > { %v3240_v11 = vpop.permute.xlu0 %3239 }
 0x6b4   : > { %v3245_v46 = vpop.permute.xlu1 %3244 }
 0x6b7   : > { %v3250_v51 = vpop.permute.xlu0 %3249 }
 0x6b8   : > { %v3255_v36 = vpop.permute.xlu1 %3254 }
 0x73c   : > { %v5075_v8 = vpop.f32.mrb[0].mxu0 }
 0x73d   : > { %v3259_v57 = vmul.f32 %v5075_v8, %v3230_v25  ;;  %v3178_v16 = vpop.f32.mrb[1].mxu0  ;;  %v5863_v25 = vld [vmem:[#allocation14 + $0x98] ss:$12 sps:$4 sm:$0xff]   ;;  %v7766_v8 = vld [vmem:[%s7756_s4 + $0x10] sm:$0xff] }
 0x73e   : > { %v3257_v32 = vmul.f32 %v3220_v30, %v3178_v16  ;;  %v5076_v13 = vpop.f32.mrb[2].mxu0  ;;  %v5862_v30 = vld [vmem:[#allocation14 + $0x80] ss:$12 sps:$4 sm:$0xff]  }
 0x73f   : > { %v3260_v1 = vmul.f32 %v5076_v13, %v3235_v56  ;;  %v3181_v24 = vpop.f32.mrb[3].mxu0  ;;  %v3275_v53 = vmul.f32 0.22916667, %v3259_v57  ;;  %vm3267_vm1 = vcmp.ge.f32.partialorder %v3259_v57, 0.0  ;;  %5115 = vmatprep.subr.bf16.mxu0 %v5862_v30  ;;  %v7763_v56 = vld [vmem:[%s7756_s4 + $0x8] sm:$0xff] }
 0x740   : > { %v3273_v4 = vmul.f32 0.22916667, %v3257_v32  ;;  %v3258_v9 = vmul.f32 %v3225_v59, %v3181_v24  ;;  %vm3265_vm0 = vcmp.ge.f32.partialorder %v3257_v32, 0.0  ;;  %5116 = vmatpush3.bf16.msra.mxu0 %v5862_v30  ;;  %v5864_v59 = vld [vmem:[#allocation14 + $0xb0] ss:$12 sps:$4 sm:$0xff]  }
 0x741   : > { %v3276_v31 = vmul.f32 0.22916667, %v3260_v1  ;;  %v7724_v48 = vsel %vm3267_vm1, %v3259_v57, %v3275_v53  ;;  %vm3268_vm3 = vcmp.ge.f32.partialorder %v3260_v1, 0.0  ;;  %5117 = vmatprep.subr.bf16.mxu0 %v5863_v25  ;;  %v7771_v57 = vld [vmem:[%s7756_s4 + $0x18] sm:$0xff] }
 0x742   : > { %v3274_v38 = vmul.f32 0.22916667, %v3258_v9  ;;  %v7718_v41 = vsel %vm3265_vm0, %v3257_v32, %v3273_v4  ;;  %vm3266_vm2 = vcmp.ge.f32.partialorder %v3258_v9, 0.0  ;;  %v3291_v37 = vmul.f32 %v7724_v48, %v7724_v48  ;;  %v5851_v30 = vld [vmem:[#allocation14 + $0x90] ss:$12 sps:$4 sm:$0xff]  }
 0x743   : > { %v3289_v12 = vmul.f32 %v7718_v41, %v7718_v41  ;;  %v7730_v49 = vsel %vm3268_vm3, %v3260_v1, %v3276_v31 }
 0x744   : > { %v5079_v26 = vpop.f32.mrb[4].mxu0  ;;  %v7722_v40 = vsel %vm3266_vm2, %v3258_v9, %v3274_v38  ;;  %v3292_v20 = vmul.f32 %v7730_v49, %v7730_v49  ;;  %5118 = vmatpush3.bf16.msra.mxu0 %v5863_v25  ;;  %v5857_v25 = vld [vmem:[#allocation14 + $0xac] ss:$12 sps:$4 sm:$0xff]  }
 0x745   : > { %v3263_v33 = vmul.f32 %v5079_v26, %v3250_v51  ;;  %3297 = vadd.xlane.f32.xlu0 %v3289_v12  ;;  %v3194_v42 = vpop.f32.mrb[5].mxu0  ;;  %v3290_v6 = vmul.f32 %v7722_v40, %v7722_v40  ;;  %5119 = vmatprep.subr.bf16.mxu0 %v5864_v59 }
 0x746   : > { %v3261_v35 = vmul.f32 %v3240_v11, %v3194_v42  ;;  %v5080_v2 = vpop.f32.mrb[6].mxu0 }
 0x747   : > { %v3279_v7 = vmul.f32 0.22916667, %v3263_v33  ;;  %3299 = vadd.xlane.f32.xlu1 %v3290_v6  ;;  %v3197_v14 = vpop.f32.mrb[7].mxu0  ;;  %v3264_v5 = vmul.f32 %v5080_v2, %v3255_v36  ;;  %vm3271_vm5 = vcmp.ge.f32.partialorder %v3263_v33, 0.0 }
 0x748   : > { %v3277_v54 = vmul.f32 0.22916667, %v3261_v35  ;;  %v3262_v28 = vmul.f32 %v3245_v46, %v3197_v14  ;;  %vm3269_vm4 = vcmp.ge.f32.partialorder %v3261_v35, 0.0  ;;  %5120 = vmatpush3.bf16.msra.mxu0 %v5864_v59  ;;  %v5855_v59 = vld [vmem:[#allocation14 + $0xa8] ss:$12 sps:$4 sm:$0xff]  }
 0x749   : > { %3301 = vadd.xlane.f32.xlu0 %v3291_v37  ;;  %v3280_v22 = vmul.f32 0.22916667, %v3264_v5  ;;  %v7738_v47 = vsel %vm3271_vm5, %v3263_v33, %v3279_v7  ;;  %vm3272_vm7 = vcmp.ge.f32.partialorder %v3264_v5, 0.0  ;;  %v5827_v37 = vld [vmem:[#allocation13 + $0x38] ss:$12 sps:$4 sm:$0xff]  }
 0x74a   : > { %v3278_v60 = vmul.f32 0.22916667, %v3262_v28  ;;  %v7732_v63 = vsel %vm3269_vm4, %v3261_v35, %v3277_v54  ;;  %vm3270_vm6 = vcmp.ge.f32.partialorder %v3262_v28, 0.0  ;;  %v3295_v50 = vmul.f32 %v7738_v47, %v7738_v47  ;;  %v5826_v35 = vld [vmem:[#allocation13 + $0x20] ss:$12 sps:$4 sm:$0xff]  }
 0x74b   : > { %v3293_v39 = vmul.f32 %v7732_v63, %v7732_v63  ;;  %v7746_v0 = vsel %vm3272_vm7, %v3264_v5, %v3280_v22  ;;  %5122 = vmatmul.mubr.bf16.vlgmr.msra.gmra.mrb[8].mxu0 %v7763_v56 }
 0x74c   : > { %v7740_v55 = vsel %vm3270_vm6, %v3262_v28, %v3278_v60  ;;  %v3296_v3 = vmul.f32 %v7746_v0, %v7746_v0  ;;  %5125 = vmatprep.mubr.bf16.mxu0 %v7766_v8  ;;  %v5828_v28 = vld [vmem:[#allocation13 + $0x50] ss:$12 sps:$4 sm:$0xff]  }
 0x74d   : > { %3303 = vadd.xlane.f32.xlu0 %v3292_v20  ;;  %3305 = vadd.xlane.f32.xlu1 %v3293_v39  ;;  %v3294_v10 = vmul.f32 %v7740_v55, %v7740_v55  ;;  %v5829_v39 = vld [vmem:[#allocation13 + $0x68] ss:$12 sps:$4 sm:$0xff]  }
 0x751   : > { %3309 = vadd.xlane.f32.xlu1 %v3295_v50  ;;  %3307 = vadd.xlane.f32.xlu0 %v3294_v10  ;;  %v5830_v50 = vld [vmem:[#allocation13 + $0x80] ss:$12 sps:$4 sm:$0xff]  }
 0x753   : > { %5126 = vmatmul.mubr.bf16.gmra.mrb[12].mxu0 %v7771_v57 }
 0x755   : > { %3311 = vadd.xlane.f32.xlu0 %v3296_v3 }
 0x7d2   : > { %v3298_v16 = vpop.xlane.xlu0 %3297 }
 0x7d3   : > { %v3313_v11 = vmax.f32 %v3298_v16, 1e-24 }
 0x7d4   : > { %v3300_v32 = vpop.xlane.xlu1 %3299 }
 0x7d5   : > { %5865 = vrsqrt.f32 %v3313_v11  ;;  %v3314_v13 = vmax.f32 %v3300_v32, 1e-24 }
 0x7d6   : > { %v3302_v1 = vpop.xlane.xlu0 %3301 }
 0x7d7   : > { %5867 = vrsqrt.f32 %v3314_v13  ;;  %v3315_v24 = vmax.f32 %v3302_v1, 1e-24 }
 0x7d9   : > { %5869 = vrsqrt.f32 %v3315_v24 }
 0x7da   : > { %v3304_v53 = vpop.xlane.xlu0 %3303  ;;  %v3306_v9 = vpop.xlane.xlu1 %3305 }
 0x7db   : > { %v3316_v4 = vmax.f32 %v3304_v53, 1e-24  ;;  %v3317_v51 = vmax.f32 %v3306_v9, 1e-24 }
 0x7dd   : > { %5871 = vrsqrt.f32 %v3316_v4 }
 0x7de   : > { %v3308_v46 = vpop.xlane.xlu0 %3307  ;;  %v3310_v36 = vpop.xlane.xlu1 %3309 }
 0x7df   : > { %v5866_v38 = vpop.eup %5865  ;;  %v3318_v31 = vmax.f32 %v3308_v46, 1e-24  ;;  %v3319_v54 = vmax.f32 %v3310_v36, 1e-24 }
 0x7e0   : > { %v3329_v26 = vmul.f32 %v5866_v38, %v7718_v41 }
 0x7e1   : > { %v5868_v12 = vpop.eup %5867  ;;  %5873 = vrsqrt.f32 %v3318_v31  ;;  %v3385_v31 = vlaneseq }
 0x7e2   : > { %v3330_v33 = vmul.f32 %v5868_v12, %v7722_v40  ;;  %v3312_v42 = vpop.xlane.xlu0 %3311  ;;  %5875 = vrsqrt.f32 %v3317_v51 }
 0x7e3   : > { %v5870_v2 = vpop.eup %5869  ;;  %v3320_v14 = vmax.f32 %v3312_v42, 1e-24  ;;  %v7826_v12 = vshrl.u32 %v3385_v31, 7  ;;  %v7836_v42 = vld [vmem:[%s8218_s21] sm:$0x7] }
 0x7e4   : > { %v3347_v6 = vpack.c.bf16 %v3330_v33, %v3329_v26  ;;  %v3331_v40 = vmul.f32 %v5870_v2, %v7724_v48  ;;  %v3706_v26 = vld [vmem:[%s8217_s18] sm:$0x7] }
 0x7e5   : > { %5877 = vrsqrt.f32 %v3320_v14  ;;  %v3387_v51 = vsub.s32 0, %v7826_v12  ;;  %v3391_v33 = vsub.s32 1, %v7826_v12 }
 0x7e6   : > { %3561 = vmatmul.mubr.bf16.vlgmr.msra.gmra.mrb[0].mxu1 %v3347_v6  ;;  %5879 = vrsqrt.f32 %v3319_v54 }
 0x7e7   : > { %v5872_v7 = vpop.eup %5871  ;;  %5082 = vmatpush3.bf16.msra.mxu1 %v7750_v27  ;;  %3570 = vmatprep.mubr.bf16.mxu1 %v6396_v18  ;;  %v5842_v27 = vld [vmem:[#allocation14 + $0x48] ss:$12 sps:$4 sm:$0xff]   ;;  %v3392_v2 = vrot.slane %v7836_v42, %v3391_v33  ;;  %v3715_v36 = vrot.slane %v3706_v26, %v3391_v33 }
 0x7e8   : > { %5083 = vmatprep.subr.bf16.mxu1 %v5826_v35  ;;  %v3332_v41 = vmul.f32 %v5872_v7, %v7730_v49 }
 0x7e9   : > { %v7842_v14 = vadd.f32 %v3715_v36, %v3392_v2 }
 0x7ea   : > { %v3348_v5 = vpack.c.bf16 %v3332_v41, %v3331_v40 }
 0x7eb   : > { %5084 = vmatpush3.bf16.msra.mxu1 %v5826_v35  ;;  %v5874_v60 = vpop.eup %5873  ;;  %v3711_v35 = vrot.slane %v3706_v26, %v3387_v51 }
 0x7ec   : > { %5085 = vmatprep.subr.bf16.mxu1 %v5827_v37  ;;  %v5876_v20 = vpop.eup %5875  ;;  %v3334_v22 = vmul.f32 %v5874_v60, %v7740_v55 }
 0x7ed   : > { %v3333_v49 = vmul.f32 %v5876_v20, %v7732_v63  ;;  %v5832_v63 = vld [vmem:[#allocation13 + $0xb0] ss:$12 sps:$4 sm:$0xff]  }
 0x7ee   : > { %3571 = vmatmul.mubr.bf16.gmra.mrb[4].mxu1 %v3348_v5 }
 0x7ef   : > { %5086 = vmatpush3.bf16.msra.mxu1 %v5827_v37  ;;  %3580 = vmatprep.mubr.bf16.mxu1 %v6396_v18  ;;  %v3349_v48 = vpack.c.bf16 %v3334_v22, %v3333_v49  ;;  %v5878_v10 = vpop.eup %5877 }
 0x7f0   : > { %5087 = vmatprep.subr.bf16.mxu1 %v5828_v28  ;;  %v5880_v3 = vpop.eup %5879  ;;  %v3336_v15 = vmul.f32 %v5878_v10, %v7746_v0  ;;  %v5841_v0 = vld [vmem:[#allocation14 + $0x34] ss:$12 sps:$4 sm:$0xff]  }
 0x7f1   : > { %v3335_v45 = vmul.f32 %v5880_v3, %v7738_v47  ;;  %v5839_v47 = vld [vmem:[#allocation14 + $0x30] ss:$12 sps:$4 sm:$0xff]  }
 0x7f3   : > { %5088 = vmatpush3.bf16.msra.mxu1 %v5828_v28  ;;  %v3350_v55 = vpack.c.bf16 %v3336_v15, %v3335_v45 }
 0x7f4   : > { %5089 = vmatprep.subr.bf16.mxu1 %v5829_v39 }
 0x7f6   : > { %3581 = vmatmul.mubr.bf16.gmra.mrb[8].mxu1 %v3349_v48 }
 0x7f7   : > { %5090 = vmatpush3.bf16.msra.mxu1 %v5829_v39  ;;  %3590 = vmatprep.mubr.bf16.mxu1 %v6396_v18 }
 0x7f8   : > { %5091 = vmatprep.subr.bf16.mxu1 %v5830_v50 }
 0x7fb   : > { %5092 = vmatpush3.bf16.msra.mxu1 %v5830_v50 }
 0x7fc   : > { %5093 = vmatprep.subr.bf16.mxu1 %v5831_v17 }
 0x7fe   : > { %3591 = vmatmul.mubr.bf16.gmra.mrb[12].mxu1 %v3350_v55 }
 0x7ff   : > { %5094 = vmatpush3.bf16.msra.mxu1 %v5831_v17  ;;  %5097 = vmatprep.mubr.bf16.mxu1 %v3347_v6  ;;  %v3388_v6 = vrot.slane %v7836_v42, %v3387_v51 }
 0x800   : > { %5095 = vmatprep.subr.bf16.mxu1 %v5832_v63 }
 0x801   : > { %v7840_v7 = vadd.f32 %v3711_v35, %v3388_v6 }
 0x803   : > { %5096 = vmatpush3.bf16.msra.mxu1 %v5832_v63 }
 0x804   : > { %3851 = vmatprep.subr.bf16.mxu1 %v5835_v44 }
 0x806   : > { %5098 = vmatmul.mubr.bf16.vlgmr.msra.gmra.mrb[16].mxu1 %v3348_v5 }
 0x807   : > { %3852 = vmatpush1.bf16.msra.mxu1 %v5833_v58  ;;  %5101 = vmatprep.mubr.bf16.mxu1 %v3349_v48 }
 0x808   : > { %3853 = vmatprep.subr.bf16.mxu1 %v5838_v19 }
 0x80b   : > { %3854 = vmatpush1.bf16.msra.mxu1 %v5836_v29 }
 0x80c   : > { %3855 = vmatprep.subr.bf16.mxu1 %v5841_v0 }
 0x80e   : > { %5102 = vmatmul.mubr.bf16.gmra.mrb[20].mxu1 %v3350_v55 }
 0x80f   : > { %3856 = vmatpush1.bf16.msra.mxu1 %v5839_v47  ;;  %3883 = vmatprep.mubr.bf16.mxu1 %v6396_v18 }
 0x810   : > { %3857 = vmatprep.subr.bf16.mxu1 %v5844_v34 }
 0x813   : > { %3858 = vmatpush1.bf16.msra.mxu1 %v5842_v27 }
 0x814   : > { %3859 = vmatprep.subr.bf16.mxu1 %v5847_v62 }
 0x817   : > { %3860 = vmatpush1.bf16.msra.mxu1 %v5845_v43 }
 0x818   : > { %3861 = vmatprep.subr.bf16.mxu1 %v5850_v52  ;;  %v3395_v52 = vsub.s32 2, %v7826_v12 }
 0x81a   : > { %v7856_v35 = vrot.slane %v3706_v26, %v3395_v52 }
 0x81b   : > { %3862 = vmatpush1.bf16.msra.mxu1 %v5848_v23 }
 0x81c   : > { %3863 = vmatprep.subr.bf16.mxu1 %v5853_v21 }
 0x81e   : > { %v7794_v16 = vpop.f32.mrb[8].mxu0 }
 0x81f   : > { %3864 = vmatpush1.bf16.msra.mxu1 %v5851_v30  ;;  %v7796_v11 = vpop.f32.mrb[9].mxu0 }
 0x820   : > { %3865 = vmatprep.subr.bf16.mxu1 %v5857_v25  ;;  %v7798_v32 = vpop.f32.mrb[10].mxu0 }
 0x821   : > { %v7800_v13 = vpop.f32.mrb[11].mxu0 }
 0x823   : > { %3866 = vmatpush1.bf16.msra.mxu1 %v5855_v59 }
 0x826   : > { %3884 = vmatmul.mubr.bf16.vlgmr.msra.gmra.mrb[0].mxu1 %v7759_v61  ;;  %v7802_v61 = vpop.f32.mrb[12].mxu0 }
 0x827   : > { %3893 = vmatprep.mubr.bf16.mxu1 %v6396_v18  ;;  %v7804_v1 = vpop.f32.mrb[13].mxu0 }
 0x82e   : > { %3894 = vmatmul.mubr.bf16.gmra.mrb[4].mxu1 %v7763_v56  ;;  %v7806_v56 = vpop.f32.mrb[14].mxu0 }
 0x82f   : > { %3903 = vmatprep.mubr.bf16.mxu1 %v6396_v18  ;;  %v7808_v24 = vpop.f32.mrb[15].mxu0 }
 0x836   : > { %3904 = vmatmul.mubr.bf16.gmra.mrb[8].mxu1 %v7766_v8 }
 0x837   : > { %3913 = vmatprep.mubr.bf16.mxu1 %v6396_v18 }
 0x83e   : > { %3914 = vmatmul.mubr.bf16.gmra.mrb[12].mxu1 %v7771_v57 }
 0x8d9   : > { %v7810_v8 = vpop.f32.mrb[16].mxu1 }
 0x8da   : > { %v7812_v18 = vpop.f32.mrb[17].mxu1 }
 0x8db   : > { %v7814_v57 = vpop.f32.mrb[18].mxu1 }
 0x8dc   : > { %v7816_v53 = vpop.f32.mrb[19].mxu1 }
 0x8e1   : > { %v7818_v4 = vpop.f32.mrb[20].mxu1 }
 0x8e2   : > { %v7820_v9 = vpop.f32.mrb[21].mxu1 }
 0x8e3   : > { %v7822_v46 = vpop.f32.mrb[22].mxu1 }
 0x8e4   : > { %v7824_v38 = vpop.f32.mrb[23].mxu1 }
 0x8f9   : > { %v3885_v37 = vpop.f32.mrb[0].mxu1 }
 0x8fa   : > { %v5242_v41 = vadd.f32 %v7840_v7, %v3885_v37  ;;  %v3887_v54 = vpop.f32.mrb[1].mxu1 }
 0x8fb   : > { %v5244_v40 = vadd.f32 %v7842_v14, %v3887_v54  ;;  %v3889_v5 = vpop.f32.mrb[2].mxu1 }
 0x8fc   : > { %v4719_v28 = vmul.f32 -1.442695, %v5242_v41  ;;  %v5246_v60 = vadd.f32 %v7840_v7, %v3889_v5  ;;  %v3891_v20 = vpop.f32.mrb[3].mxu1  ;;  %v7860_v41 = vrot.slane %v7836_v42, %v3395_v52 }
 0x8fd   : > { %v4727_v39 = vmul.f32 -1.442695, %v5244_v40  ;;  %v5248_v22 = vadd.f32 %v7842_v14, %v3891_v20  ;;  %v3959_v20 = vadd.f32 %v7796_v11, %v7856_v35 }
 0x8fe   : > { %5881 = vpow2.f32 %v4719_v28  ;;  %v4720_v49 = vmul.f32 -1.442695, %v5246_v60  ;;  %v3636_v11 = vadd.f32 %v7812_v18, %v7860_v41  ;;  %v3967_v18 = vadd.f32 %v7794_v16, %v7856_v35 }
 0x8ff   : > { %v4728_v48 = vmul.f32 -1.442695, %v5248_v22 }
 0x900   : > { %5883 = vpow2.f32 %v4720_v49  ;;  %v3962_v49 = vadd.f32 %v7800_v13, %v7856_v35 }
 0x901   : > { %5885 = vpow2.f32 %v4727_v39  ;;  %v3895_v50 = vpop.f32.mrb[4].mxu1 }
 0x902   : > { %v5250_v10 = vadd.f32 %v7840_v7, %v3895_v50  ;;  %v3897_v3 = vpop.f32.mrb[5].mxu1  ;;  %5887 = vpow2.f32 %v4728_v48 }
 0x903   : > { %v5252_v17 = vadd.f32 %v7842_v14, %v3897_v3  ;;  %v3899_v15 = vpop.f32.mrb[6].mxu1 }
 0x904   : > { %v4721_v45 = vmul.f32 -1.442695, %v5250_v10  ;;  %v5254_v55 = vadd.f32 %v7840_v7, %v3899_v15  ;;  %v3901_v63 = vpop.f32.mrb[7].mxu1 }
 0x905   : > { %v4729_v44 = vmul.f32 -1.442695, %v5252_v17  ;;  %v5256_v29 = vadd.f32 %v7842_v14, %v3901_v63 }
 0x906   : > { %5889 = vpow2.f32 %v4721_v45  ;;  %v4722_v58 = vmul.f32 -1.442695, %v5254_v55 }
 0x907   : > { %v4730_v30 = vmul.f32 -1.442695, %v5256_v29 }
 0x908   : > { %v5882_v19 = vpop.eup %5881  ;;  %5891 = vpow2.f32 %v4722_v58  ;;  %v3639_v58 = vadd.f32 %v7816_v53, %v7860_v41  ;;  %v3970_v53 = vadd.f32 %v7798_v32, %v7856_v35 }
 0x909   : > { %v4021_v0 = vadd.f32 1.0, %v5882_v19  ;;  %v3905_v47 = vpop.f32.mrb[8].mxu1  ;;  %5893 = vpow2.f32 %v4729_v44 }
 0x90a   : > { %v5884_v34 = vpop.eup %5883  ;;  %v5258_v27 = vadd.f32 %v7840_v7, %v3905_v47  ;;  %v3907_v62 = vpop.f32.mrb[9].mxu1 }
 0x90b   : > { %v5886_v43 = vpop.eup %5885  ;;  %5895 = vrcp.f32 %v4021_v0  ;;  %v4022_v23 = vadd.f32 1.0, %v5884_v34  ;;  %v3909_v21 = vpop.f32.mrb[10].mxu1  ;;  %v5260_v59 = vadd.f32 %v7842_v14, %v3907_v62 }
 0x90c   : > { %v4723_v25 = vmul.f32 -1.442695, %v5258_v27  ;;  %v5262_v31 = vadd.f32 %v7840_v7, %v3909_v21  ;;  %v3911_v51 = vpop.f32.mrb[11].mxu1  ;;  %v4077_v33 = vadd.f32 1.0, %v5886_v43  ;;  %v5888_v2 = vpop.eup %5887 }
 0x90d   : > { %5897 = vrcp.f32 %v4022_v23  ;;  %v4731_v12 = vmul.f32 -1.442695, %v5260_v59  ;;  %v5264_v37 = vadd.f32 %v7842_v14, %v3911_v51  ;;  %v4078_v28 = vadd.f32 1.0, %v5888_v2 }
 0x90e   : > { %v4724_v6 = vmul.f32 -1.442695, %v5262_v31  ;;  %5899 = vpow2.f32 %v4723_v25  ;;  %v3647_v51 = vadd.f32 %v7814_v57, %v7860_v41 }
 0x90f   : > { %5901 = vpow2.f32 %v4730_v30  ;;  %v4732_v48 = vmul.f32 -1.442695, %v5264_v37  ;;  %v3644_v30 = vadd.f32 %v7810_v8, %v7860_v41  ;;  %v3339_v8 = vld [vmem:[%s7884_s13] sm:$0xff] }
 0x910   : > { %v5890_v36 = vpop.eup %5889  ;;  %5903 = vpow2.f32 %v4724_v6 }
 0x911   : > { %v4023_v54 = vadd.f32 1.0, %v5890_v36  ;;  %v3915_v40 = vpop.f32.mrb[12].mxu1  ;;  %5905 = vrcp.f32 %v4077_v33 }
 0x912   : > { %v5892_v5 = vpop.eup %5891  ;;  %v5266_v60 = vadd.f32 %v7840_v7, %v3915_v40  ;;  %v3917_v26 = vpop.f32.mrb[13].mxu1  ;;  %v3975_v40 = vadd.f32 %v7804_v1, %v7856_v35  ;;  %v3652_v1 = vadd.f32 %v7820_v9, %v7860_v41 }
 0x913   : > { %5907 = vrcp.f32 %v4023_v54  ;;  %v4024_v39 = vadd.f32 1.0, %v5892_v5  ;;  %v3919_v22 = vpop.f32.mrb[14].mxu1  ;;  %v5894_v42 = vpop.eup %5893  ;;  %v5268_v15 = vadd.f32 %v7842_v14, %v3917_v26 }
 0x914   : > { %5909 = vpow2.f32 %v4731_v12  ;;  %v4725_v50 = vmul.f32 -1.442695, %v5266_v60  ;;  %v5270_v10 = vadd.f32 %v7840_v7, %v3919_v22  ;;  %v3921_v3 = vpop.f32.mrb[15].mxu1  ;;  %v4079_v44 = vadd.f32 1.0, %v5894_v42 }
 0x915   : > { %v5896_v17 = vpop.eup %5895  ;;  %5911 = vrcp.f32 %v4024_v39  ;;  %v5272_v13 = vadd.f32 %v7842_v14, %v3921_v3  ;;  %v4733_v0 = vmul.f32 -1.442695, %v5268_v15  ;;  %v3978_v60 = vadd.f32 %v7808_v24, %v7856_v35 }
 0x916   : > { %5913 = vrcp.f32 %v4078_v28  ;;  %v4726_v45 = vmul.f32 -1.442695, %v5270_v10  ;;  %v4101_v55 = vmul.f32 %v5896_v17, %v3959_v20  ;;  %v3340_v10 = vld [vmem:[%s7884_s13 + $0x8] sm:$0xff]  ;;  %v3655_v24 = vadd.f32 %v7824_v38, %v7860_v41 }
 0x917   : > { %v5898_v63 = vpop.eup %5897  ;;  %5915 = vpow2.f32 %v4725_v50  ;;  %v4734_v43 = vmul.f32 -1.442695, %v5272_v13  ;;  %v3983_v38 = vadd.f32 %v7802_v61, %v7856_v35 }
 0x918   : > { %5917 = vpow2.f32 %v4732_v48  ;;  %v4109_v7 = vadd.f32 %v4101_v55, %v3636_v11  ;;  %v4102_v19 = vmul.f32 %v5898_v63, %v3962_v49  ;;  %v5900_v29 = vpop.eup %5899  ;;  %v3341_v63 = vld [vmem:[%s7884_s13 + $0x10] sm:$0xff] }
 0x919   : > { %5919 = vpow2.f32 %v4726_v45  ;;  %v5902_v47 = vpop.eup %5901  ;;  %v4025_v34 = vadd.f32 1.0, %v5900_v29 }
 0x91a   : > { %5921 = vtanh.f32 %v4109_v7  ;;  %v4110_v27 = vadd.f32 %v4102_v19, %v3639_v58  ;;  %v5904_v62 = vpop.eup %5903  ;;  %v4080_v59 = vadd.f32 1.0, %v5902_v47 }
 0x91b   : > { %5923 = vrcp.f32 %v4079_v44  ;;  %v5906_v14 = vpop.eup %5905  ;;  %v4026_v52 = vadd.f32 1.0, %v5904_v62 }
 0x91c   : > { %5925 = vrcp.f32 %v4025_v34  ;;  %v4125_v57 = vsub.f32 1.0, %v5906_v14  ;;  %v4141_v22 = vmul.f32 %v5906_v14, %v3339_v8  ;;  %v3986_v14 = vadd.f32 %v7806_v56, %v7856_v35 }
 0x91d   : > { %v5908_v23 = vpop.eup %5907  ;;  %5927 = vpow2.f32 %v4733_v0 }
 0x91e   : > { %v5910_v21 = vpop.eup %5909  ;;  %5929 = vrcp.f32 %v4026_v52  ;;  %v4103_v16 = vmul.f32 %v5908_v23, %v3967_v18 }
 0x91f   : > { %v5912_v25 = vpop.eup %5911  ;;  %5931 = vpow2.f32 %v4734_v43  ;;  %v4081_v2 = vadd.f32 1.0, %v5910_v21  ;;  %v3660_v43 = vadd.f32 %v7818_v4, %v7860_v41  ;;  %v3342_v21 = vld [vmem:[%s7884_s13 + $0x18] sm:$0xff] }
 0x920   : > { %v5914_v31 = vpop.eup %5913  ;;  %v4111_v33 = vadd.f32 %v4103_v16, %v3644_v30  ;;  %v4104_v6 = vmul.f32 %v5912_v25, %v3970_v53  ;;  %5933 = vtanh.f32 %v4110_v27  ;;  %v3663_v16 = vadd.f32 %v7822_v46, %v7860_v41 }
 0x921   : > { %v5916_v32 = vpop.eup %5915  ;;  %v4126_v17 = vsub.f32 1.0, %v5914_v31  ;;  %v4142_v9 = vmul.f32 %v5914_v31, %v3340_v10 }
 0x922   : > { %v5918_v36 = vpop.eup %5917  ;;  %v4027_v12 = vadd.f32 1.0, %v5916_v32  ;;  %5935 = vtanh.f32 %v4111_v33  ;;  %v4112_v37 = vadd.f32 %v4104_v6, %v3647_v51  ;;  %v3343_v32 = vld [vmem:[%s7884_s13 + $0x20] sm:$0xff] }
 0x923   : > { %v5920_v54 = vpop.eup %5919  ;;  %5937 = vrcp.f32 %v4080_v59  ;;  %v4082_v20 = vadd.f32 1.0, %v5918_v36  ;;  %v3344_v36 = vld [vmem:[%s7884_s13 + $0x28] sm:$0xff] }
 0x924   : > { %v5922_v5 = vpop.eup %5921  ;;  %5939 = vrcp.f32 %v4027_v12  ;;  %v4028_v28 = vadd.f32 1.0, %v5920_v54 }
 0x925   : > { %v5924_v26 = vpop.eup %5923  ;;  %5941 = vrcp.f32 %v4081_v2  ;;  %v4133_v39 = vmul.f32 %v5922_v5, %v4125_v57 }
 0x926   : > { %v5926_v49 = vpop.eup %5925  ;;  %5943 = vrcp.f32 %v4028_v28  ;;  %v4127_v13 = vsub.f32 1.0, %v5924_v26  ;;  %v4143_v0 = vmul.f32 %v5924_v26, %v3341_v63 }
 0x927   : > { %v5928_v42 = vpop.eup %5927  ;;  %5945 = vtanh.f32 %v4112_v37  ;;  %v4105_v48 = vmul.f32 %v5926_v49, %v3975_v40  ;;  %v7893_v50 = vadd.f32 %v4141_v22, %v4133_v39  ;;  %v3345_v22 = vld [vmem:[%s7884_s13 + $0x30] sm:$0xff] }
 0x928   : > { %v5930_v3 = vpop.eup %5929  ;;  %5947 = vrcp.f32 %v4082_v20  ;;  %v4083_v58 = vadd.f32 1.0, %v5928_v42 }
 0x929   : > { %v5932_v15 = vpop.eup %5931  ;;  %v4113_v11 = vadd.f32 %v4105_v48, %v3652_v1  ;;  %v4106_v45 = vmul.f32 %v5930_v3, %v3978_v60  ;;  %v4157_v55 = vmul.f32 %v7893_v50, %v7893_v50  ;;  %v3346_v48 = vld [vmem:[%s7884_s13 + $0x38] sm:$0xff] }
 0x92a   : > { %v5934_v44 = vpop.eup %5933  ;;  %v4084_v34 = vadd.f32 1.0, %v5932_v15 }
 0x92b   : > { %5949 = vtanh.f32 %v4113_v11  ;;  %v4114_v7 = vadd.f32 %v4106_v45, %v3655_v24  ;;  %4165 = vadd.xlane.f32.xlu1 %v4157_v55  ;;  %v4134_v19 = vmul.f32 %v5934_v44, %v4126_v17 }
 0x92c   : > { %v5936_v29 = vpop.eup %5935 }
 0x92d   : > { %v5938_v47 = vpop.eup %5937  ;;  %5951 = vtanh.f32 %v4114_v7  ;;  %v7903_v18 = vadd.f32 %v4142_v9, %v4134_v19  ;;  %v4135_v27 = vmul.f32 %v5936_v29, %v4127_v13  ;;  %v4229_v9 = vld [vmem:[#allocation4] sm:$0xff]  ;;  %v4230_v13 = vld [vmem:[#allocation4 + $0x8] sm:$0xff]  ;;  %v4232_v7 = vld [vmem:[#allocation4 + $0x18] sm:$0xff] }
 0x92e   : > { %v5940_v62 = vpop.eup %5939  ;;  %5953 = vrcp.f32 %v4083_v58  ;;  %v4128_v25 = vsub.f32 1.0, %v5938_v47  ;;  %v4144_v51 = vmul.f32 %v5938_v47, %v3342_v21  ;;  %v4231_v58 = vld [vmem:[#allocation4 + $0x10] sm:$0xff]  ;;  %v4233_v19 = vld [vmem:[#allocation4 + $0x20] sm:$0xff]  ;;  %v4234_v29 = vld [vmem:[#allocation4 + $0x28] sm:$0xff]  ;;  %4245 = vst [vmem:[#allocation23] sm:$0xff] %v4229_v9 }
 0x92f   : > { %v5942_v52 = vpop.eup %5941  ;;  %v4107_v53 = vmul.f32 %v5940_v62, %v3983_v38  ;;  %v4158_v61 = vmul.f32 %v7903_v18, %v7903_v18  ;;  %v7911_v23 = vadd.f32 %v4143_v0, %v4135_v27  ;;  %5955 = vrcp.f32 %v4084_v34  ;;  %4246 = vst [vmem:[#allocation23 + $0x8] sm:$0xff] %v4230_v13  ;;  %4247 = vst [vmem:[#allocation23 + $0x10] sm:$0xff] %v4231_v58  ;;  %v4235_v38 = vld [vmem:[#allocation4 + $0x30] sm:$0xff]  ;;  %v4236_v0 = vld [vmem:[#allocation4 + $0x38] sm:$0xff] }
 0x930   : > { %v5944_v30 = vpop.eup %5943  ;;  %v4129_v46 = vsub.f32 1.0, %v5942_v52  ;;  %v4145_v8 = vmul.f32 %v5942_v52, %v3343_v32  ;;  %v4237_v47 = vld [vmem:[#allocation4 + $0x40] sm:$0xff]  ;;  %4248 = vst [vmem:[#allocation23 + $0x18] sm:$0xff] %v4232_v7  ;;  %4249 = vst [vmem:[#allocation23 + $0x20] sm:$0xff] %v4233_v19  ;;  %v4238_v34 = vld [vmem:[#allocation4 + $0x48] sm:$0xff] }
 0x931   : > { %v5946_v59 = vpop.eup %5945  ;;  %v4115_v4 = vadd.f32 %v4107_v53, %v3660_v43  ;;  %v4108_v56 = vmul.f32 %v5944_v30, %v3986_v14  ;;  %4167 = vadd.xlane.f32.xlu0 %v4158_v61  ;;  %v4159_v35 = vmul.f32 %v7911_v23, %v7911_v23  ;;  %4250 = vst [vmem:[#allocation23 + $0x28] sm:$0xff] %v4234_v29  ;;  %v4239_v27 = vld [vmem:[#allocation4 + $0x50] sm:$0xff]  ;;  %v4240_v62 = vld [vmem:[#allocation4 + $0x58] sm:$0xff]  ;;  %4251 = vst [vmem:[#allocation23 + $0x30] sm:$0xff] %v4235_v38 }
 0x932   : > { %v4136_v31 = vmul.f32 %v5946_v59, %v4128_v25  ;;  %v5948_v33 = vpop.eup %5947  ;;  %4252 = vst [vmem:[#allocation23 + $0x38] sm:$0xff] %v4236_v0  ;;  %4253 = vst [vmem:[#allocation23 + $0x40] sm:$0xff] %v4237_v47  ;;  %v4241_v43 = vld [vmem:[#allocation4 + $0x60] sm:$0xff]  ;;  %v4242_v14 = vld [vmem:[#allocation4 + $0x68] sm:$0xff] }
 0x933   : > { %5957 = vtanh.f32 %v4115_v4  ;;  %v4116_v6 = vadd.f32 %v4108_v56, %v3663_v16  ;;  %4169 = vadd.xlane.f32.xlu1 %v4159_v35  ;;  %v4130_v54 = vsub.f32 1.0, %v5948_v33  ;;  %v4146_v28 = vmul.f32 %v5948_v33, %v3344_v36  ;;  %v4243_v52 = vld [vmem:[#allocation4 + $0x70] sm:$0xff]  ;;  %4254 = vst [vmem:[#allocation23 + $0x48] sm:$0xff] %v4238_v34  ;;  %4255 = vst [vmem:[#allocation23 + $0x50] sm:$0xff] %v4239_v27  ;;  %v4244_v53 = vld [vmem:[#allocation4 + $0x78] sm:$0xff] }
 0x934   : > { %v7919_v2 = vadd.f32 %v4144_v51, %v4136_v31  ;;  %4256 = vst [vmem:[#allocation23 + $0x58] sm:$0xff] %v4240_v62  ;;  %4257 = vst [vmem:[#allocation23 + $0x60] sm:$0xff] %v4241_v43 }
 0x935   : > { %v5950_v41 = vpop.eup %5949  ;;  %5959 = vtanh.f32 %v4116_v6  ;;  %4258 = vst [vmem:[#allocation23 + $0x68] sm:$0xff] %v4242_v14  ;;  %4259 = vst [vmem:[#allocation23 + $0x70] sm:$0xff] %v4243_v52 }
 0x936   : > { %v4160_v12 = vmul.f32 %v7919_v2, %v7919_v2  ;;  %v4137_v37 = vmul.f32 %v5950_v41, %v4129_v46  ;;  %4260 = vst [vmem:[#allocation23 + $0x78] sm:$0xff] %v4244_v53 }
 0x937   : > { %v5952_v40 = vpop.eup %5951 }
 0x938   : > { %4171 = vadd.xlane.f32.xlu0 %v4160_v12  ;;  %v7924_v57 = vadd.f32 %v4145_v8, %v4137_v37  ;;  %v4138_v5 = vmul.f32 %v5952_v40, %v4130_v54  ;;  %v5954_v60 = vpop.eup %5953 }
 0x939   : > { %v5956_v39 = vpop.eup %5955  ;;  %v4131_v42 = vsub.f32 1.0, %v5954_v60  ;;  %v4147_v3 = vmul.f32 %v5954_v60, %v3345_v22 }
 0x93a   : > { %v4161_v26 = vmul.f32 %v7924_v57, %v7924_v57  ;;  %v7928_v20 = vadd.f32 %v4146_v28, %v4138_v5  ;;  %v4132_v24 = vsub.f32 1.0, %v5956_v39  ;;  %v4148_v45 = vmul.f32 %v5956_v39, %v3346_v48 }
 0x93c   : > { %4173 = vadd.xlane.f32.xlu1 %v4161_v26  ;;  %v4162_v49 = vmul.f32 %v7928_v20, %v7928_v20 }
 0x93d   : > { %v5958_v1 = vpop.eup %5957 }
 0x93e   : > { %4175 = vadd.xlane.f32.xlu0 %v4162_v49  ;;  %v4139_v10 = vmul.f32 %v5958_v1, %v4131_v42 }
 0x93f   : > { %v5960_v17 = vpop.eup %5959 }
 0x940   : > { %v7934_v15 = vadd.f32 %v4147_v3, %v4139_v10  ;;  %v4140_v11 = vmul.f32 %v5960_v17, %v4132_v24 }
 0x942   : > { %v4163_v55 = vmul.f32 %v7934_v15, %v7934_v15  ;;  %v7938_v63 = vadd.f32 %v4148_v45, %v4140_v11 }
 0x944   : > { %4177 = vadd.xlane.f32.xlu1 %v4163_v55  ;;  %v4164_v44 = vmul.f32 %v7938_v63, %v7938_v63 }
 0x946   : > { %4179 = vadd.xlane.f32.xlu0 %v4164_v44 }
 0x947   : > { %6220 = shalt.err (!%p6217_p1)
}
 0x948   : > { %s8220_s29 = sld [smem:[#allocation65_spill]]  ;;  %p8222_p13 = pmov %p8219_p2 }
 0x94e   : > { %s8221_s2 = smov %s8220_s29  ;;  %s6221_s15 = scalar_lea.hbm %s8220_s29, 2048 }
 0x94f   : > { %p6222_p4 = scmp.ne.s32.totalorder %s8221_s2, %s6221_s15  ;;  %p6227_p6 = scmp.lt.u32.totalorder %s6221_s15, %s8221_s2 }
 0x951   : > { %p6223_p11 = pnand %p6222_p4, %p8222_p13 }
 0x953   : > { %p6224_p0 = pneg %p6223_p11 }
 0x955   : > { %p6229_p7 = pnand %p6227_p6, %p6224_p0 }
 0x957   : > { %6232 = shalt.err (!%p6229_p7)
}
 0x958   : > { %s6398_s8 = smov 128   ;;  %s6399_s12 = smov 8  }
 0x959   : > { %p8223_p10 = pmov %p8219_p2  ;;  %s4277_s29 = sshll.u32 %s6951_s28, 4  ;;  %s7996_s29 = int_to_ptr.vmem [resolvable:$true] %s4277_s29 }
 0x95a   : > { %s8225_s7 = sld [smem:[#allocation64_spill]]  ;;  %s6233_s18 = scalar_lea.vmem %s7996_s29, 1024 }
 0x95b   : > { %5325 = dma.vmem_to_hbm [thread:$0]  (%p8223_p10), %s4291_s14, 2048, %s8221_s2, [#allocation24], %s6398_s8, %s6398_s8, %s6399_s12  }
 0x95c   : > { %s8224_s14 = sld [smem:[#allocation36_spill]]  ;;  %p6234_p2 = scmp.ne.s32.totalorder %s7996_s29, %s6233_s18 }
 0x95d   : > { %p8226_p3 = scmp.ne.s32.totalorder %s8179_s23, 0  ;;  %s6400_s21 = smov [#allocation22]  }
 0x95e   : > { %s6237_s17 = sshll.u32 %s6400_s21, 4  ;;  %s6238_s17 = int_to_ptr.vmem [resolvable:$false] %s6237_s17 }
 0x95f   : > { %p6235_p8 = pnand %p6234_p2, %p8226_p3  ;;  %p6240_p9 = scmp.lt.s32.totalorder %s7996_s29, %s6238_s17 }
 0x961   : > { %p6236_p12 = pneg %p6235_p8 }
 0x962   : > { %s4737_s19 = sshll.u32 %s8224_s14, 4  ;;  %s6239_s14 = scalar_lea.vmem %s6238_s17, 2048 }
 0x963   : > { %s4274_s3 = sadd.s32 %s4737_s19, %s6934_s0  ;;  %s4262_s0 = scalar_lea.sflag [#allocation10], %s6915_s11 }
 0x964   : > { %s4738_s5 = sshll.u32 %s4274_s3, 7  ;;  %p6241_p5 = scmp.lt.s32.totalorder %s6239_s14, %s6233_s18 }
 0x965   : > { %s7994_s10 = scalar_lea.hbm %s8225_s7, %s4738_s5 }
 0x966   : > { %p6242_p1 = por %p6241_p5, %p6240_p9 }
 0x968   : > { %p6243_p4 = pnand %p6242_p1, %p6236_p12 }
 0x9b8   : > { %v4166_v61 = vpop.xlane.xlu1 %4165 }
 0x9b9   : > { %v4181_v21 = vmax.f32 %v4166_v61, 1e-24 }
 0x9bb   : > { %5961 = vrsqrt.f32 %v4181_v21 }
 0x9be   : > { %v4168_v30 = vpop.xlane.xlu0 %4167 }
 0x9bf   : > { %v4182_v16 = vmax.f32 %v4168_v30, 1e-24 }
 0x9c0   : > { %v4170_v25 = vpop.xlane.xlu1 %4169 }
 0x9c1   : > { %5963 = vrsqrt.f32 %v4182_v16  ;;  %v4183_v59 = vmax.f32 %v4170_v25, 1e-24 }
 0x9c3   : > { %5965 = vrsqrt.f32 %v4183_v59 }
 0x9c5   : > { %v5962_v4 = vpop.eup %5961  ;;  %v4172_v56 = vpop.xlane.xlu0 %4171 }
 0x9c6   : > { %v4197_v35 = vmul.f32 %v5962_v4, %v7893_v50  ;;  %v4184_v31 = vmax.f32 %v4172_v56, 1e-24 }
 0x9c8   : > { %4205 = vst [vmem:[%s7884_s13] sm:$0xff] %v4197_v35  ;;  %4221 = vst [vmem:[%s6951_s28] sm:$0xff] %v4197_v35  ;;  %5967 = vrsqrt.f32 %v4184_v31 }
 0x9c9   : > { %v4174_v51 = vpop.xlane.xlu1 %4173 }
 0x9ca   : > { %v4185_v33 = vmax.f32 %v4174_v51, 1e-24 }
 0x9cb   : > { %v5964_v6 = vpop.eup %5963  ;;  %v4176_v32 = vpop.xlane.xlu0 %4175 }
 0x9cc   : > { %v4198_v46 = vmul.f32 %v5964_v6, %v7903_v18  ;;  %5969 = vrsqrt.f32 %v4185_v33  ;;  %v4186_v41 = vmax.f32 %v4176_v32, 1e-24 }
 0x9cd   : > { %v5966_v36 = vpop.eup %5965 }
 0x9ce   : > { %4206 = vst [vmem:[%s7884_s13 + $0x8] sm:$0xff] %v4198_v46  ;;  %v4213_v12 = vpack.c.bf16 %v4198_v46, %v4197_v35  ;;  %4222 = vst [vmem:[%s6951_s28 + $0x8] sm:$0xff] %v4198_v46  ;;  %v4199_v50 = vmul.f32 %v5966_v36, %v7911_v23  ;;  %5971 = vrsqrt.f32 %v4186_v41 }
 0x9d0   : > { %4217 = vst [vmem:[%s7756_s4] sm:$0xff] %v4213_v12  ;;  %4207 = vst [vmem:[%s7884_s13 + $0x10] sm:$0xff] %v4199_v50 }
 0x9d1   : > { %4223 = vst [vmem:[%s6951_s28 + $0x10] sm:$0xff] %v4199_v50  ;;  %v4178_v37 = vpop.xlane.xlu1 %4177 }
 0x9d2   : > { %v5968_v8 = vpop.eup %5967  ;;  %v4187_v18 = vmax.f32 %v4178_v37, 1e-24 }
 0x9d3   : > { %v4200_v54 = vmul.f32 %v5968_v8, %v7919_v2  ;;  %v4180_v40 = vpop.xlane.xlu0 %4179 }
 0x9d4   : > { %5973 = vrsqrt.f32 %v4187_v18  ;;  %v4188_v5 = vmax.f32 %v4180_v40, 1e-24 }
 0x9d5   : > { %4208 = vst [vmem:[%s7884_s13 + $0x18] sm:$0xff] %v4200_v54  ;;  %v4214_v23 = vpack.c.bf16 %v4200_v54, %v4199_v50  ;;  %4224 = vst [vmem:[%s6951_s28 + $0x18] sm:$0xff] %v4200_v54 }
 0x9d6   : > { %v5970_v28 = vpop.eup %5969  ;;  %5975 = vrsqrt.f32 %v4188_v5 }
 0x9d7   : > { %4218 = vst [vmem:[%s7756_s4 + $0x8] sm:$0xff] %v4214_v23  ;;  %v4201_v60 = vmul.f32 %v5970_v28, %v7924_v57 }
 0x9d8   : > { %v5972_v26 = vpop.eup %5971 }
 0x9d9   : > { %4209 = vst [vmem:[%s7884_s13 + $0x20] sm:$0xff] %v4201_v60  ;;  %4225 = vst [vmem:[%s6951_s28 + $0x20] sm:$0xff] %v4201_v60  ;;  %v4202_v2 = vmul.f32 %v5972_v26, %v7928_v20 }
 0x9db   : > { %4210 = vst [vmem:[%s7884_s13 + $0x28] sm:$0xff] %v4202_v2  ;;  %v4215_v39 = vpack.c.bf16 %v4202_v2, %v4201_v60  ;;  %4226 = vst [vmem:[%s6951_s28 + $0x28] sm:$0xff] %v4202_v2 }
 0x9dd   : > { %4219 = vst [vmem:[%s7756_s4 + $0x10] sm:$0xff] %v4215_v39 }
 0x9de   : > { %v5974_v22 = vpop.eup %5973 }
 0x9df   : > { %v4203_v57 = vmul.f32 %v5974_v22, %v7934_v15 }
 0x9e0   : > { %v5976_v49 = vpop.eup %5975 }
 0x9e1   : > { %4211 = vst [vmem:[%s7884_s13 + $0x30] sm:$0xff] %v4203_v57  ;;  %4227 = vst [vmem:[%s6951_s28 + $0x30] sm:$0xff] %v4203_v57  ;;  %v4204_v42 = vmul.f32 %v5976_v49, %v7938_v63 }
 0x9e3   : > { %4212 = vst [vmem:[%s7884_s13 + $0x38] sm:$0xff] %v4204_v42  ;;  %v4216_v20 = vpack.c.bf16 %v4204_v42, %v4203_v57  ;;  %4228 = vst [vmem:[%s6951_s28 + $0x38] sm:$0xff] %v4204_v42 }
 0x9e4   : > { %6246 = shalt.err (!%p6243_p4)
}
 0x9e5   : > { %s6247_s28 = scalar_lea.hbm %s7994_s10, 1024  ;;  %s6251_s3 = scalar_lea.hbm %s8225_s7, 6144 }
 0x9e6   : > { %p6248_p13 = scmp.ne.s32.totalorder %s7994_s10, %s6247_s28  ;;  %p6252_p6 = scmp.lt.u32.totalorder %s7994_s10, %s8225_s7 }
 0x9e7   : > { %p6253_p7 = scmp.lt.u32.totalorder %s6251_s3, %s6247_s28  ;;  %p6255_p2 = scmp.lt.u32.totalorder %s6247_s28, %s7994_s10 }
 0x9e8   : > { %p6249_p11 = pnand %p6248_p13, %p8226_p3 }
 0x9e9   : > { %p6254_p10 = por %p6253_p7, %p6252_p6 }
 0x9ea   : > { %p6250_p0 = pneg %p6249_p11 }
 0x9eb   : > { %p6256_p8 = por %p6255_p2, %p6254_p10 }
 0x9ed   : > { %p6257_p12 = pnand %p6256_p8, %p6250_p0 }
 0x9ef   : > { %6260 = shalt.err (!%p6257_p12)
}
 0x9f0   : > { %5323 = dma.vmem_to_hbm [thread:$0]  (%p8226_p3), %s7996_s29, 1024, %s7994_s10, %s4262_s0, %s6398_s8, %s6398_s8, %s6399_s12  }
 0x9f1   : > { %4220 = vst [vmem:[%s7756_s4 + $0x18] sm:$0xff] %v4216_v20  ;;  %p8227_p9 = scmp.eq.s32.totalorder %s6547_s20, 5 }
 0x9f3   : > { %6330 = dma.done.wait (%p8227_p9), [#allocation24], 2048   ;;  %p8228_p5 = pmov %p8227_p9 }
 0x9f5   : > { %6332 = vsyncadd (%p8228_p5), [#allocation24], 4294965248 }
 0x9f6 PF: > { %p5372_p1 = scmp.ge.s32.totalorder %s6379_s1, 2  ;;  %s4309_s23 = sand.u32 1, %s6339_s24  }
 0x9f7   : > { %p8229_p4 = scmp.ne.s32.totalorder %s8180_s30, 0  ;;  %s4310_s11 = scalar_lea.sflag [#allocation10], %s4309_s23 }
 0x9f9   : > { %p5356_p13 = pnand %p5372_p1, %p8229_p4 }
 0x9fb   : > { %6334 = dma.done.wait (!%p5356_p13), %s4310_s11, 1024  }
 0x9fc   : > { %6336 = vsyncadd (!%p5356_p13), %s4310_s11, 4294966272  ;;  %s41_s1 = sadd.s32 1, %s6379_s1   ;;  %s8230_s27 = sld [smem:[#allocation33_spill]] }
 0x9fd   : > { %p38_p3 = scmp.ge.s32.totalorder %s41_s1, 8   ;;  %s8231_s28 = sld [smem:[#allocation34_spill]] }
 0x9fe   : > { %s8232_s29 = sld [smem:[#allocation43_spill]]  ;;  %s8233_s0 = sld [smem:[#allocation37_spill]] }
 0x9ff   : > { %s8234_s30 = sld [smem:[#allocation38_spill]]  ;;  %s8235_s18 = sld [smem:[#allocation41_spill]] }
 0xa00   : > { %s8236_s19 = sld [smem:[#allocation42_spill]]  ;;  %s8237_s24 = smov %s6343_s25 }
 0xa01   : > { %s8238_s25 = smov %s6347_s26  ;;  %s8239_s26 = smov %s6797_s16 }
 0xa02   :  { %40 = sbr.rel (!%p38_p3) target bundleno = 34 (0x22), region = 198 }
 0xa09   :  { %4315 = vsyncpa [#allocation9], 1 }
 0xa0a   :  { %4317 = vsyncpa [#allocation9 + $0x1], 1 }
 0xa0b   :  { %4318 = vsyncpa [#allocation12], 1 }
 0xa0c   :  { %4319 = vsyncpa [#allocation15], 1 }
 0xa0d   :  { %4320 = vsyncpa [#allocation18], 1 }
 0xa0e   :  { %4322 = vsyncpa [#allocation18 + $0x1], 1 }
 0xa0f   :  { %4323 = vsyncpa [#allocation21], 1 }
 0xa10   :  { %4325 = vsyncpa [#allocation21 + $0x1], 1 }
 0xa11   :  { %4326 = vsyncpa [#allocation10], 1 }
 0xa12   :  { %4328 = vsyncpa [#allocation10 + $0x1], 1 }
 0xa13   :  { %4329 = vsyncpa [#allocation24], 1 }

</bundles_post_ra>
